<compile_context>
chip_gen: v5e
topology: v5e:2x2
jax: 0.10.0
libtpu: 0.0.40
codegen_flags: <defaults>
</compile_context>

<pallas_src>
import jax
import jax.numpy as jnp
from jax.experimental import pallas as pl
from jax.experimental.pallas import tpu as pltpu

LANE = 128
MXU_DTYPE = jnp.bfloat16  # matmul operand dtype; accumulation stays f32


def _round_up(x, m):
    return ((x + m - 1) // m) * m


def charnn_seq_kernel(xp_ref,                 # VMEM (T, B, 4Hp) f32: embed@W_ih^T + b (precomputed)
                      h0_ref, c0_ref,         # VMEM (B, Hp) f32
                      whh_ref,                # VMEM (Hp, 4Hp) bf16
                      wlin_ref,               # VMEM (Hp, Op) bf16
                      blin_ref,               # VMEM (1, Op) f32, padded cols pre-masked to -1e30
                      out_ref,                # VMEM (T*B, Op) f32
                      h1_ref, c1_ref,         # VMEM (B, Hp) f32
                      hall_sc):               # VMEM scratch (T*B, Hp) f32
    T, B, _ = xp_ref.shape
    Hp = h0_ref.shape[1]

    h = h0_ref[...]
    c = c0_ref[...]

    # Serial recurrence: only h @ W_hh plus gate elementwise math on the critical
    # path.  T is static, so the loop is fully unrolled (all indices static; the
    # LLO scheduler can overlap step t's EUP/VPU tail with step t+1's MXU push).
    for t in range(T):
        gates = xp_ref[t] + jnp.dot(h.astype(MXU_DTYPE), whh_ref[...],
                                    preferred_element_type=jnp.float32)   # (B, 4Hp)
        # PyTorch gate order i, f, g, o; Hp is a multiple of 128 so each gate slice
        # is lane-aligned (no cross-lane shuffles).
        i_g = jax.nn.sigmoid(gates[:, 0 * Hp:1 * Hp])
        f_g = jax.nn.sigmoid(gates[:, 1 * Hp:2 * Hp])
        g_g = jnp.tanh(gates[:, 2 * Hp:3 * Hp])
        o_g = jax.nn.sigmoid(gates[:, 3 * Hp:4 * Hp])
        c = f_g * c + i_g * g_g
        h = o_g * jnp.tanh(c)
        hall_sc[t * B:(t + 1) * B, :] = h

    h1_ref[...] = h
    c1_ref[...] = c

    # One batched output projection + softmax for all T steps (single lane-dense
    # store).  Padded output columns were pre-masked via blin = -1e30, so their
    # exp underflows to exactly 0 and real rows renormalize correctly.
    h_all = hall_sc[...]                                                   # (T*B, Hp)
    logits = (jnp.dot(h_all.astype(MXU_DTYPE), wlin_ref[...],
                      preferred_element_type=jnp.float32) + blin_ref[...])  # (T*B, Op)
    m = jnp.max(logits, axis=-1, keepdims=True)
    e = jnp.exp(logits - m)
    out_ref[...] = e / jnp.sum(e, axis=-1, keepdims=True)


def init_params(key, input_size, hidden_size, output_size):
    """Deterministic synthetic parameters with PyTorch-like shapes (f32, unpadded)."""
    ks = jax.random.split(key, 8)
    s = 1.0 / jnp.sqrt(hidden_size)
    return {
        # nn.Embedding(input_size, hidden_size)
        "embed": jax.random.normal(ks[0], (input_size, hidden_size), jnp.float32),
        # nn.LSTM weights (4H, H) in torch; stored transposed (H, 4H), gate order i,f,g,o
        "w_ih_t": jax.random.uniform(ks[1], (hidden_size, 4 * hidden_size),
                                     jnp.float32, -s, s),
        "w_hh_t": jax.random.uniform(ks[2], (hidden_size, 4 * hidden_size),
                                     jnp.float32, -s, s),
        "b_ih": jax.random.uniform(ks[3], (4 * hidden_size,), jnp.float32, -s, s),
        "b_hh": jax.random.uniform(ks[4], (4 * hidden_size,), jnp.float32, -s, s),
        # nn.Linear(hidden, output) weight (O, H) in torch; stored transposed (H, O)
        "w_lin_t": jax.random.uniform(ks[5], (hidden_size, output_size),
                                      jnp.float32, -s, s),
        "b_lin": jax.random.uniform(ks[6], (output_size,), jnp.float32, -s, s),
    }


def prepare_kernel_params(params):
    """Pad H and O to lane multiples (per-gate 128-wide blocks), fold the embedding
    and input projection into a single (V, 4Hp) lookup table, cast MXU weights to
    bf16, and pre-mask the padded linear-bias columns for the softmax."""
    H = params["w_ih_t"].shape[0]
    O = params["w_lin_t"].shape[1]
    V = params["embed"].shape[0]
    Hp = _round_up(H, LANE)
    Op = _round_up(O, LANE)

    emb_p = jnp.zeros((V, Hp), jnp.float32).at[:, :H].set(params["embed"])

    wih = jnp.zeros((Hp, 4 * Hp), jnp.float32)
    whh = jnp.zeros((Hp, 4 * Hp), jnp.float32)
    b = jnp.zeros((1, 4 * Hp), jnp.float32)
    b_full = params["b_ih"] + params["b_hh"]
    for k in range(4):  # scatter each gate's H columns into its 128-wide padded block
        wih = wih.at[:H, k * Hp:k * Hp + H].set(params["w_ih_t"][:, k * H:(k + 1) * H])
        whh = whh.at[:H, k * Hp:k * Hp + H].set(params["w_hh_t"][:, k * H:(k + 1) * H])
        b = b.at[0, k * Hp:k * Hp + H].set(b_full[k * H:(k + 1) * H])

    # Folded input table: x_table[v] = embed[v] @ W_ih^T + (b_ih + b_hh), padded.
    # The input projection does not depend on the recurrence, so it is removed from
    # the kernel's serial critical path entirely (f32, computed once by XLA).
    x_table = emb_p @ wih + b                                              # (V, 4Hp)

    wlin = jnp.zeros((Hp, Op), jnp.float32).at[:H, :O].set(params["w_lin_t"])
    # Pre-masked bias: padded output columns get -1e30 so the in-kernel softmax
    # needs no iota/where; exp of padded logits is exactly 0.
    blin = jnp.full((1, Op), -1e30, jnp.float32).at[0, :O].set(params["b_lin"])

    return {
        "x_table": x_table,
        "w_hh_t": whh.astype(MXU_DTYPE),
        "w_lin_t": wlin.astype(MXU_DTYPE),
        "b_lin": blin,
        "H": H, "O": O, "Hp": Hp, "Op": Op,
    }


def charnn_forward_seq(kparams, token_seq, hidden):
    """Run Ex3_charNN.forward over a whole token sequence in one pallas_call.

    token_seq: (T, B) int32; hidden: (h0, c0), each (layer_num=1, B, H).
    Returns (softmax outputs (T, B, O), (h1, c1)); step t equals the module's
    forward(token_seq[t], hidden_t).
    """
    h0, c0 = hidden
    T, B = token_seq.shape
    H, O, Hp, Op = kparams["H"], kparams["O"], kparams["Hp"], kparams["Op"]

    # Embedding gather + input projection hoisted out of the kernel (tiny XLA gather).
    xp = kparams["x_table"][token_seq.astype(jnp.int32)]        # (T, B, 4Hp) f32

    h0_p = jnp.zeros((B, Hp), jnp.float32).at[:, :H].set(h0[0])
    c0_p = jnp.zeros((B, Hp), jnp.float32).at[:, :H].set(c0[0])

    out_p, h1_p, c1_p = pl.pallas_call(
        charnn_seq_kernel,
        out_shape=(
            jax.ShapeDtypeStruct((T * B, Op), jnp.float32),   # softmax rows, lane-dense
            jax.ShapeDtypeStruct((B, Hp), jnp.float32),       # final h1
            jax.ShapeDtypeStruct((B, Hp), jnp.float32),       # final c1
        ),
        scratch_shapes=[pltpu.VMEM((T * B, Hp), jnp.float32)],  # per-step hidden states
        # No grid: the whole recurrence (and its inputs, < 1 MB total) is VMEM-resident
        # in a single invocation, so there is no per-step grid overhead or DMA.
    )(xp, h0_p, c0_p, kparams["w_hh_t"], kparams["w_lin_t"], kparams["b_lin"])

    out = out_p.reshape(T, B, Op)[:, :, :O]
    h1 = h1_p[:, :H][None]
    c1 = c1_p[:, :H][None]
    return out, (h1, c1)


def charnn_forward(kparams, token_ids, hidden):
    """Exact single-step equivalent of Ex3_charNN.forward(input, hidden)."""
    out_seq, new_hidden = charnn_forward_seq(kparams, token_ids[None, :], hidden)
    return out_seq[0], new_hidden


def init_hidden(batch_size, hidden_size, layer_num=1):
    return (jnp.zeros((layer_num, batch_size, hidden_size), jnp.float32),
            jnp.zeros((layer_num, batch_size, hidden_size), jnp.float32))


def charnn_ref_step(params, token_ids, h, c):
    """Pure-JAX f32 reference of one Ex3_charNN.forward step."""
    H = h.shape[1]
    x = params["embed"][token_ids]
    gates = (x @ params["w_ih_t"] + h @ params["w_hh_t"]
             + params["b_ih"] + params["b_hh"])
    i_g = jax.nn.sigmoid(gates[:, 0 * H:1 * H])
    f_g = jax.nn.sigmoid(gates[:, 1 * H:2 * H])
    g_g = jnp.tanh(gates[:, 2 * H:3 * H])
    o_g = jax.nn.sigmoid(gates[:, 3 * H:4 * H])
    c1 = f_g * c + i_g * g_g
    h1 = o_g * jnp.tanh(c1)
    logits = h1 @ params["w_lin_t"] + params["b_lin"]
    return jax.nn.softmax(logits, axis=-1), h1, c1


if __name__ == "__main__":
    # Small shapes consistent with the module: vocab=16, hidden=32, output=16, batch=8, T=16.
    input_size = 16
    hidden_size = 32
    output_size = 16
    batch = 8
    seq_len = 16
    layer_num = 1

    key = jax.random.PRNGKey(0)
    k_params, k_ids = jax.random.split(key)

    params = init_params(k_params, input_size, hidden_size, output_size)
    kparams = prepare_kernel_params(params)

    token_seq = jax.random.randint(k_ids, (seq_len, batch), 0, input_size, dtype=jnp.int32)
    hidden = init_hidden(batch, hidden_size, layer_num)

    out_seq, (h1, c1) = charnn_forward_seq(kparams, token_seq, hidden)
    jax.block_until_ready((out_seq, h1, c1))

    # Pure-JAX f32 reference (loop of single steps, i.e. repeated module forwards).
    h_ref, c_ref = hidden[0][0], hidden[1][0]
    ref_outs = []
    for t in range(seq_len):
        o_t, h_ref, c_ref = charnn_ref_step(params, token_seq[t], h_ref, c_ref)
        ref_outs.append(o_t)
    ref_out = jnp.stack(ref_outs, axis=0)

    assert out_seq.shape == (seq_len, batch, output_size)
    assert h1.shape == (layer_num, batch, hidden_size)
    assert c1.shape == (layer_num, batch, hidden_size)
    # Exact-division softmax: rows sum to 1 at f32 precision.
    assert jnp.allclose(jnp.sum(out_seq, axis=-1), 1.0, atol=1e-3)
    # bf16 MXU operands vs f32 reference: loose but meaningful tolerance.
    assert jnp.allclose(out_seq, ref_out, atol=3e-2)
    assert jnp.allclose(h1[0], h_ref, atol=3e-2)
    assert jnp.allclose(c1[0], c_ref, atol=3e-2)

    # Single-step API identical to Ex3_charNN.forward(input, hidden).
    out1, (h1_s, c1_s) = charnn_forward(kparams, token_seq[0], hidden)
    jax.block_until_ready((out1, h1_s, c1_s))
    assert out1.shape == (batch, output_size)
    assert h1_s.shape == (layer_num, batch, hidden_size)
    assert jnp.allclose(jnp.sum(out1, axis=-1), 1.0, atol=1e-3)

    print("KERNEL_OK")
</pallas_src>

<mosaic_0001>
module attributes {stable_mosaic.version = 11 : i64} {
  func.func @charnn_seq_kernel(%arg0: memref<16x8x512xf32, #tpu.memory_space<vmem>>, %arg1: memref<8x128xf32, #tpu.memory_space<vmem>>, %arg2: memref<8x128xf32, #tpu.memory_space<vmem>>, %arg3: memref<128x512xbf16, #tpu.memory_space<vmem>>, %arg4: memref<128x128xbf16, #tpu.memory_space<vmem>>, %arg5: memref<1x128xf32, #tpu.memory_space<vmem>>, %arg6: memref<128x128xf32, #tpu.memory_space<vmem>>, %arg7: memref<8x128xf32, #tpu.memory_space<vmem>>, %arg8: memref<8x128xf32, #tpu.memory_space<vmem>>, %arg9: memref<128x128xf32, #tpu.memory_space<vmem>>) attributes {dimension_semantics = [], scalar_prefetch = 0 : i64, scratch_operands = 1 : i64, tpu.core_type = #tpu.core_type<tc>} {
    %c0 = arith.constant 0 : index
    %c0_0 = arith.constant 0 : index
    %0 = vector.load %arg1[%c0, %c0_0] : memref<8x128xf32, #tpu.memory_space<vmem>>, vector<8x128xf32>
    %c0_1 = arith.constant 0 : index
    %c0_2 = arith.constant 0 : index
    %1 = vector.load %arg2[%c0_1, %c0_2] : memref<8x128xf32, #tpu.memory_space<vmem>>, vector<8x128xf32>
    %c0_3 = arith.constant 0 : index
    %c0_4 = arith.constant 0 : index
    %c0_5 = arith.constant 0 : index
    %2 = vector.load %arg0[%c0_3, %c0_4, %c0_5] : memref<16x8x512xf32, #tpu.memory_space<vmem>>, vector<1x8x512xf32>
    %3 = vector.shape_cast %2 : vector<1x8x512xf32> to vector<8x512xf32>
    %4 = arith.truncf %0 : vector<8x128xf32> to vector<8x128xbf16>
    %c0_6 = arith.constant 0 : index
    %c0_7 = arith.constant 0 : index
    %5 = vector.load %arg3[%c0_6, %c0_7] : memref<128x512xbf16, #tpu.memory_space<vmem>>, vector<128x512xbf16>
    %cst = arith.constant dense<0.000000e+00> : vector<8x512xf32>
    %6 = tpu.matmul %4, %5, %cst {dimension_numbers = #tpu.dot_dimension_numbers<[1], [0], [0], [1], [0, 0, 1, 1], [], []>} : vector<8x128xbf16>, vector<128x512xbf16>, vector<8x512xf32> -> vector<8x512xf32>
    %7 = arith.addf %3, %6 : vector<8x512xf32>
    %8 = vector.extract_strided_slice %7 {offsets = [0, 0], sizes = [8, 128], strides = [1, 1]} : vector<8x512xf32> to vector<8x128xf32>
    %9 = arith.negf %8 : vector<8x128xf32>
    %10 = math.exp %9 : vector<8x128xf32>
    %cst_8 = arith.constant 1.000000e+00 : f32
    %11 = vector.broadcast %cst_8 : f32 to vector<8x128xf32>
    %12 = arith.addf %11, %10 : vector<8x128xf32>
    %13 = arith.divf %11, %12 : vector<8x128xf32>
    %14 = vector.extract_strided_slice %7 {offsets = [0, 128], sizes = [8, 128], strides = [1, 1]} : vector<8x512xf32> to vector<8x128xf32>
    %15 = arith.negf %14 : vector<8x128xf32>
    %16 = math.exp %15 : vector<8x128xf32>
    %cst_9 = arith.constant 1.000000e+00 : f32
    %17 = vector.broadcast %cst_9 : f32 to vector<8x128xf32>
    %18 = arith.addf %17, %16 : vector<8x128xf32>
    %19 = arith.divf %17, %18 : vector<8x128xf32>
    %20 = vector.extract_strided_slice %7 {offsets = [0, 256], sizes = [8, 128], strides = [1, 1]} : vector<8x512xf32> to vector<8x128xf32>
    %21 = math.tanh %20 : vector<8x128xf32>
    %22 = vector.extract_strided_slice %7 {offsets = [0, 384], sizes = [8, 128], strides = [1, 1]} : vector<8x512xf32> to vector<8x128xf32>
    %23 = arith.negf %22 : vector<8x128xf32>
    %24 = math.exp %23 : vector<8x128xf32>
    %cst_10 = arith.constant 1.000000e+00 : f32
    %25 = vector.broadcast %cst_10 : f32 to vector<8x128xf32>
    %26 = arith.addf %25, %24 : vector<8x128xf32>
    %27 = arith.divf %25, %26 : vector<8x128xf32>
    %28 = arith.mulf %19, %1 : vector<8x128xf32>
    %29 = arith.mulf %13, %21 : vector<8x128xf32>
    %30 = arith.addf %28, %29 : vector<8x128xf32>
    %31 = math.tanh %30 : vector<8x128xf32>
    %32 = arith.mulf %27, %31 : vector<8x128xf32>
    %c0_11 = arith.constant 0 : index
    %c0_12 = arith.constant 0 : index
    %33 = vector.load %arg9[%c0_11, %c0_12] : memref<128x128xf32, #tpu.memory_space<vmem>>, vector<8x128xf32>
    tpu.vector_store %arg9[%c0_11, %c0_12], %32 {strides = array<i32>} : memref<128x128xf32, #tpu.memory_space<vmem>>, vector<8x128xf32>,
    %c1 = arith.constant 1 : index
    %c0_13 = arith.constant 0 : index
    %c0_14 = arith.constant 0 : index
    %34 = vector.load %arg0[%c1, %c0_13, %c0_14] : memref<16x8x512xf32, #tpu.memory_space<vmem>>, vector<1x8x512xf32>
    %35 = vector.shape_cast %34 : vector<1x8x512xf32> to vector<8x512xf32>
    %36 = arith.truncf %32 : vector<8x128xf32> to vector<8x128xbf16>
    %c0_15 = arith.constant 0 : index
    %c0_16 = arith.constant 0 : index
    %37 = vector.load %arg3[%c0_15, %c0_16] : memref<128x512xbf16, #tpu.memory_space<vmem>>, vector<128x512xbf16>
    %cst_17 = arith.constant dense<0.000000e+00> : vector<8x512xf32>
    %38 = tpu.matmul %36, %37, %cst_17 {dimension_numbers = #tpu.dot_dimension_numbers<[1], [0], [0], [1], [0, 0, 1, 1], [], []>} : vector<8x128xbf16>, vector<128x512xbf16>, vector<8x512xf32> -> vector<8x512xf32>
    %39 = arith.addf %35, %38 : vector<8x512xf32>
    %40 = vector.extract_strided_slice %39 {offsets = [0, 0], sizes = [8, 128], strides = [1, 1]} : vector<8x512xf32> to vector<8x128xf32>
    %41 = arith.negf %40 : vector<8x128xf32>
    %42 = math.exp %41 : vector<8x128xf32>
    %cst_18 = arith.constant 1.000000e+00 : f32
    %43 = vector.broadcast %cst_18 : f32 to vector<8x128xf32>
    %44 = arith.addf %43, %42 : vector<8x128xf32>
    %45 = arith.divf %43, %44 : vector<8x128xf32>
    %46 = vector.extract_strided_slice %39 {offsets = [0, 128], sizes = [8, 128], strides = [1, 1]} : vector<8x512xf32> to vector<8x128xf32>
    %47 = arith.negf %46 : vector<8x128xf32>
    %48 = math.exp %47 : vector<8x128xf32>
    %cst_19 = arith.constant 1.000000e+00 : f32
    %49 = vector.broadcast %cst_19 : f32 to vector<8x128xf32>
    %50 = arith.addf %49, %48 : vector<8x128xf32>
    %51 = arith.divf %49, %50 : vector<8x128xf32>
    %52 = vector.extract_strided_slice %39 {offsets = [0, 256], sizes = [8, 128], strides = [1, 1]} : vector<8x512xf32> to vector<8x128xf32>
    %53 = math.tanh %52 : vector<8x128xf32>
    %54 = vector.extract_strided_slice %39 {offsets = [0, 384], sizes = [8, 128], strides = [1, 1]} : vector<8x512xf32> to vector<8x128xf32>
    %55 = arith.negf %54 : vector<8x128xf32>
    %56 = math.exp %55 : vector<8x128xf32>
    %cst_20 = arith.constant 1.000000e+00 : f32
    %57 = vector.broadcast %cst_20 : f32 to vector<8x128xf32>
    %58 = arith.addf %57, %56 : vector<8x128xf32>
    %59 = arith.divf %57, %58 : vector<8x128xf32>
    %60 = arith.mulf %51, %30 : vector<8x128xf32>
    %61 = arith.mulf %45, %53 : vector<8x128xf32>
    %62 = arith.addf %60, %61 : vector<8x128xf32>
    %63 = math.tanh %62 : vector<8x128xf32>
    %64 = arith.mulf %59, %63 : vector<8x128xf32>
    %c8 = arith.constant 8 : index
    %c0_21 = arith.constant 0 : index
    %65 = vector.load %arg9[%c8, %c0_21] : memref<128x128xf32, #tpu.memory_space<vmem>>, vector<8x128xf32>
    tpu.vector_store %arg9[%c8, %c0_21], %64 {strides = array<i32>} : memref<128x128xf32, #tpu.memory_space<vmem>>, vector<8x128xf32>,
    %c2 = arith.constant 2 : index
    %c0_22 = arith.constant 0 : index
    %c0_23 = arith.constant 0 : index
    %66 = vector.load %arg0[%c2, %c0_22, %c0_23] : memref<16x8x512xf32, #tpu.memory_space<vmem>>, vector<1x8x512xf32>
    %67 = vector.shape_cast %66 : vector<1x8x512xf32> to vector<8x512xf32>
    %68 = arith.truncf %64 : vector<8x128xf32> to vector<8x128xbf16>
    %c0_24 = arith.constant 0 : index
    %c0_25 = arith.constant 0 : index
    %69 = vector.load %arg3[%c0_24, %c0_25] : memref<128x512xbf16, #tpu.memory_space<vmem>>, vector<128x512xbf16>
    %cst_26 = arith.constant dense<0.000000e+00> : vector<8x512xf32>
    %70 = tpu.matmul %68, %69, %cst_26 {dimension_numbers = #tpu.dot_dimension_numbers<[1], [0], [0], [1], [0, 0, 1, 1], [], []>} : vector<8x128xbf16>, vector<128x512xbf16>, vector<8x512xf32> -> vector<8x512xf32>
    %71 = arith.addf %67, %70 : vector<8x512xf32>
    %72 = vector.extract_strided_slice %71 {offsets = [0, 0], sizes = [8, 128], strides = [1, 1]} : vector<8x512xf32> to vector<8x128xf32>
    %73 = arith.negf %72 : vector<8x128xf32>
    %74 = math.exp %73 : vector<8x128xf32>
    %cst_27 = arith.constant 1.000000e+00 : f32
    %75 = vector.broadcast %cst_27 : f32 to vector<8x128xf32>
    %76 = arith.addf %75, %74 : vector<8x128xf32>
    %77 = arith.divf %75, %76 : vector<8x128xf32>
    %78 = vector.extract_strided_slice %71 {offsets = [0, 128], sizes = [8, 128], strides = [1, 1]} : vector<8x512xf32> to vector<8x128xf32>
    %79 = arith.negf %78 : vector<8x128xf32>
    %80 = math.exp %79 : vector<8x128xf32>
    %cst_28 = arith.constant 1.000000e+00 : f32
    %81 = vector.broadcast %cst_28 : f32 to vector<8x128xf32>
    %82 = arith.addf %81, %80 : vector<8x128xf32>
    %83 = arith.divf %81, %82 : vector<8x128xf32>
    %84 = vector.extract_strided_slice %71 {offsets = [0, 256], sizes = [8, 128], strides = [1, 1]} : vector<8x512xf32> to vector<8x128xf32>
    %85 = math.tanh %84 : vector<8x128xf32>
    %86 = vector.extract_strided_slice %71 {offsets = [0, 384], sizes = [8, 128], strides = [1, 1]} : vector<8x512xf32> to vector<8x128xf32>
    %87 = arith.negf %86 : vector<8x128xf32>
    %88 = math.exp %87 : vector<8x128xf32>
    %cst_29 = arith.constant 1.000000e+00 : f32
    %89 = vector.broadcast %cst_29 : f32 to vector<8x128xf32>
    %90 = arith.addf %89, %88 : vector<8x128xf32>
    %91 = arith.divf %89, %90 : vector<8x128xf32>
    %92 = arith.mulf %83, %62 : vector<8x128xf32>
    %93 = arith.mulf %77, %85 : vector<8x128xf32>
    %94 = arith.addf %92, %93 : vector<8x128xf32>
    %95 = math.tanh %94 : vector<8x128xf32>
    %96 = arith.mulf %91, %95 : vector<8x128xf32>
    %c16 = arith.constant 16 : index
    %c0_30 = arith.constant 0 : index
    %97 = vector.load %arg9[%c16, %c0_30] : memref<128x128xf32, #tpu.memory_space<vmem>>, vector<8x128xf32>
    tpu.vector_store %arg9[%c16, %c0_30], %96 {strides = array<i32>} : memref<128x128xf32, #tpu.memory_space<vmem>>, vector<8x128xf32>,
    %c3 = arith.constant 3 : index
    %c0_31 = arith.constant 0 : index
    %c0_32 = arith.constant 0 : index
    %98 = vector.load %arg0[%c3, %c0_31, %c0_32] : memref<16x8x512xf32, #tpu.memory_space<vmem>>, vector<1x8x512xf32>
    %99 = vector.shape_cast %98 : vector<1x8x512xf32> to vector<8x512xf32>
    %100 = arith.truncf %96 : vector<8x128xf32> to vector<8x128xbf16>
    %c0_33 = arith.constant 0 : index
    %c0_34 = arith.constant 0 : index
    %101 = vector.load %arg3[%c0_33, %c0_34] : memref<128x512xbf16, #tpu.memory_space<vmem>>, vector<128x512xbf16>
    %cst_35 = arith.constant dense<0.000000e+00> : vector<8x512xf32>
    %102 = tpu.matmul %100, %101, %cst_35 {dimension_numbers = #tpu.dot_dimension_numbers<[1], [0], [0], [1], [0, 0, 1, 1], [], []>} : vector<8x128xbf16>, vector<128x512xbf16>, vector<8x512xf32> -> vector<8x512xf32>
    %103 = arith.addf %99, %102 : vector<8x512xf32>
    %104 = vector.extract_strided_slice %103 {offsets = [0, 0], sizes = [8, 128], strides = [1, 1]} : vector<8x512xf32> to vector<8x128xf32>
    %105 = arith.negf %104 : vector<8x128xf32>
    %106 = math.exp %105 : vector<8x128xf32>
    %cst_36 = arith.constant 1.000000e+00 : f32
    %107 = vector.broadcast %cst_36 : f32 to vector<8x128xf32>
    %108 = arith.addf %107, %106 : vector<8x128xf32>
    %109 = arith.divf %107, %108 : vector<8x128xf32>
    %110 = vector.extract_strided_slice %103 {offsets = [0, 128], sizes = [8, 128], strides = [1, 1]} : vector<8x512xf32> to vector<8x128xf32>
    %111 = arith.negf %110 : vector<8x128xf32>
    %112 = math.exp %111 : vector<8x128xf32>
    %cst_37 = arith.constant 1.000000e+00 : f32
    %113 = vector.broadcast %cst_37 : f32 to vector<8x128xf32>
    %114 = arith.addf %113, %112 : vector<8x128xf32>
    %115 = arith.divf %113, %114 : vector<8x128xf32>
    %116 = vector.extract_strided_slice %103 {offsets = [0, 256], sizes = [8, 128], strides = [1, 1]} : vector<8x512xf32> to vector<8x128xf32>
    %117 = math.tanh %116 : vector<8x128xf32>
    %118 = vector.extract_strided_slice %103 {offsets = [0, 384], sizes = [8, 128], strides = [1, 1]} : vector<8x512xf32> to vector<8x128xf32>
    %119 = arith.negf %118 : vector<8x128xf32>
    %120 = math.exp %119 : vector<8x128xf32>
    %cst_38 = arith.constant 1.000000e+00 : f32
    %121 = vector.broadcast %cst_38 : f32 to vector<8x128xf32>
    %122 = arith.addf %121, %120 : vector<8x128xf32>
    %123 = arith.divf %121, %122 : vector<8x128xf32>
    %124 = arith.mulf %115, %94 : vector<8x128xf32>
    %125 = arith.mulf %109, %117 : vector<8x128xf32>
    %126 = arith.addf %124, %125 : vector<8x128xf32>
    %127 = math.tanh %126 : vector<8x128xf32>
    %128 = arith.mulf %123, %127 : vector<8x128xf32>
    %c24 = arith.constant 24 : index
    %c0_39 = arith.constant 0 : index
    %129 = vector.load %arg9[%c24, %c0_39] : memref<128x128xf32, #tpu.memory_space<vmem>>, vector<8x128xf32>
    tpu.vector_store %arg9[%c24, %c0_39], %128 {strides = array<i32>} : memref<128x128xf32, #tpu.memory_space<vmem>>, vector<8x128xf32>,
    %c4 = arith.constant 4 : index
    %c0_40 = arith.constant 0 : index
    %c0_41 = arith.constant 0 : index
    %130 = vector.load %arg0[%c4, %c0_40, %c0_41] : memref<16x8x512xf32, #tpu.memory_space<vmem>>, vector<1x8x512xf32>
    %131 = vector.shape_cast %130 : vector<1x8x512xf32> to vector<8x512xf32>
    %132 = arith.truncf %128 : vector<8x128xf32> to vector<8x128xbf16>
    %c0_42 = arith.constant 0 : index
    %c0_43 = arith.constant 0 : index
    %133 = vector.load %arg3[%c0_42, %c0_43] : memref<128x512xbf16, #tpu.memory_space<vmem>>, vector<128x512xbf16>
    %cst_44 = arith.constant dense<0.000000e+00> : vector<8x512xf32>
    %134 = tpu.matmul %132, %133, %cst_44 {dimension_numbers = #tpu.dot_dimension_numbers<[1], [0], [0], [1], [0, 0, 1, 1], [], []>} : vector<8x128xbf16>, vector<128x512xbf16>, vector<8x512xf32> -> vector<8x512xf32>
    %135 = arith.addf %131, %134 : vector<8x512xf32>
    %136 = vector.extract_strided_slice %135 {offsets = [0, 0], sizes = [8, 128], strides = [1, 1]} : vector<8x512xf32> to vector<8x128xf32>
    %137 = arith.negf %136 : vector<8x128xf32>
    %138 = math.exp %137 : vector<8x128xf32>
    %cst_45 = arith.constant 1.000000e+00 : f32
    %139 = vector.broadcast %cst_45 : f32 to vector<8x128xf32>
    %140 = arith.addf %139, %138 : vector<8x128xf32>
    %141 = arith.divf %139, %140 : vector<8x128xf32>
    %142 = vector.extract_strided_slice %135 {offsets = [0, 128], sizes = [8, 128], strides = [1, 1]} : vector<8x512xf32> to vector<8x128xf32>
    %143 = arith.negf %142 : vector<8x128xf32>
    %144 = math.exp %143 : vector<8x128xf32>
    %cst_46 = arith.constant 1.000000e+00 : f32
    %145 = vector.broadcast %cst_46 : f32 to vector<8x128xf32>
    %146 = arith.addf %145, %144 : vector<8x128xf32>
    %147 = arith.divf %145, %146 : vector<8x128xf32>
    %148 = vector.extract_strided_slice %135 {offsets = [0, 256], sizes = [8, 128], strides = [1, 1]} : vector<8x512xf32> to vector<8x128xf32>
    %149 = math.tanh %148 : vector<8x128xf32>
    %150 = vector.extract_strided_slice %135 {offsets = [0, 384], sizes = [8, 128], strides = [1, 1]} : vector<8x512xf32> to vector<8x128xf32>
    %151 = arith.negf %150 : vector<8x128xf32>
    %152 = math.exp %151 : vector<8x128xf32>
    %cst_47 = arith.constant 1.000000e+00 : f32
    %153 = vector.broadcast %cst_47 : f32 to vector<8x128xf32>
    %154 = arith.addf %153, %152 : vector<8x128xf32>
    %155 = arith.divf %153, %154 : vector<8x128xf32>
    %156 = arith.mulf %147, %126 : vector<8x128xf32>
    %157 = arith.mulf %141, %149 : vector<8x128xf32>
    %158 = arith.addf %156, %157 : vector<8x128xf32>
    %159 = math.tanh %158 : vector<8x128xf32>
    %160 = arith.mulf %155, %159 : vector<8x128xf32>
    %c32 = arith.constant 32 : index
    %c0_48 = arith.constant 0 : index
    %161 = vector.load %arg9[%c32, %c0_48] : memref<128x128xf32, #tpu.memory_space<vmem>>, vector<8x128xf32>
    tpu.vector_store %arg9[%c32, %c0_48], %160 {strides = array<i32>} : memref<128x128xf32, #tpu.memory_space<vmem>>, vector<8x128xf32>,
    %c5 = arith.constant 5 : index
    %c0_49 = arith.constant 0 : index
    %c0_50 = arith.constant 0 : index
    %162 = vector.load %arg0[%c5, %c0_49, %c0_50] : memref<16x8x512xf32, #tpu.memory_space<vmem>>, vector<1x8x512xf32>
    %163 = vector.shape_cast %162 : vector<1x8x512xf32> to vector<8x512xf32>
    %164 = arith.truncf %160 : vector<8x128xf32> to vector<8x128xbf16>
    %c0_51 = arith.constant 0 : index
    %c0_52 = arith.constant 0 : index
    %165 = vector.load %arg3[%c0_51, %c0_52] : memref<128x512xbf16, #tpu.memory_space<vmem>>, vector<128x512xbf16>
    %cst_53 = arith.constant dense<0.000000e+00> : vector<8x512xf32>
    %166 = tpu.matmul %164, %165, %cst_53 {dimension_numbers = #tpu.dot_dimension_numbers<[1], [0], [0], [1], [0, 0, 1, 1], [], []>} : vector<8x128xbf16>, vector<128x512xbf16>, vector<8x512xf32> -> vector<8x512xf32>
    %167 = arith.addf %163, %166 : vector<8x512xf32>
    %168 = vector.extract_strided_slice %167 {offsets = [0, 0], sizes = [8, 128], strides = [1, 1]} : vector<8x512xf32> to vector<8x128xf32>
    %169 = arith.negf %168 : vector<8x128xf32>
    %170 = math.exp %169 : vector<8x128xf32>
    %cst_54 = arith.constant 1.000000e+00 : f32
    %171 = vector.broadcast %cst_54 : f32 to vector<8x128xf32>
    %172 = arith.addf %171, %170 : vector<8x128xf32>
    %173 = arith.divf %171, %172 : vector<8x128xf32>
    %174 = vector.extract_strided_slice %167 {offsets = [0, 128], sizes = [8, 128], strides = [1, 1]} : vector<8x512xf32> to vector<8x128xf32>
    %175 = arith.negf %174 : vector<8x128xf32>
    %176 = math.exp %175 : vector<8x128xf32>
    %cst_55 = arith.constant 1.000000e+00 : f32
    %177 = vector.broadcast %cst_55 : f32 to vector<8x128xf32>
    %178 = arith.addf %177, %176 : vector<8x128xf32>
    %179 = arith.divf %177, %178 : vector<8x128xf32>
    %180 = vector.extract_strided_slice %167 {offsets = [0, 256], sizes = [8, 128], strides = [1, 1]} : vector<8x512xf32> to vector<8x128xf32>
    %181 = math.tanh %180 : vector<8x128xf32>
    %182 = vector.extract_strided_slice %167 {offsets = [0, 384], sizes = [8, 128], strides = [1, 1]} : vector<8x512xf32> to vector<8x128xf32>
    %183 = arith.negf %182 : vector<8x128xf32>
    %184 = math.exp %183 : vector<8x128xf32>
    %cst_56 = arith.constant 1.000000e+00 : f32
    %185 = vector.broadcast %cst_56 : f32 to vector<8x128xf32>
    %186 = arith.addf %185, %184 : vector<8x128xf32>
    %187 = arith.divf %185, %186 : vector<8x128xf32>
    %188 = arith.mulf %179, %158 : vector<8x128xf32>
    %189 = arith.mulf %173, %181 : vector<8x128xf32>
    %190 = arith.addf %188, %189 : vector<8x128xf32>
    %191 = math.tanh %190 : vector<8x128xf32>
    %192 = arith.mulf %187, %191 : vector<8x128xf32>
    %c40 = arith.constant 40 : index
    %c0_57 = arith.constant 0 : index
    %193 = vector.load %arg9[%c40, %c0_57] : memref<128x128xf32, #tpu.memory_space<vmem>>, vector<8x128xf32>
    tpu.vector_store %arg9[%c40, %c0_57], %192 {strides = array<i32>} : memref<128x128xf32, #tpu.memory_space<vmem>>, vector<8x128xf32>,
    %c6 = arith.constant 6 : index
    %c0_58 = arith.constant 0 : index
    %c0_59 = arith.constant 0 : index
    %194 = vector.load %arg0[%c6, %c0_58, %c0_59] : memref<16x8x512xf32, #tpu.memory_space<vmem>>, vector<1x8x512xf32>
    %195 = vector.shape_cast %194 : vector<1x8x512xf32> to vector<8x512xf32>
    %196 = arith.truncf %192 : vector<8x128xf32> to vector<8x128xbf16>
    %c0_60 = arith.constant 0 : index
    %c0_61 = arith.constant 0 : index
    %197 = vector.load %arg3[%c0_60, %c0_61] : memref<128x512xbf16, #tpu.memory_space<vmem>>, vector<128x512xbf16>
    %cst_62 = arith.constant dense<0.000000e+00> : vector<8x512xf32>
    %198 = tpu.matmul %196, %197, %cst_62 {dimension_numbers = #tpu.dot_dimension_numbers<[1], [0], [0], [1], [0, 0, 1, 1], [], []>} : vector<8x128xbf16>, vector<128x512xbf16>, vector<8x512xf32> -> vector<8x512xf32>
    %199 = arith.addf %195, %198 : vector<8x512xf32>
    %200 = vector.extract_strided_slice %199 {offsets = [0, 0], sizes = [8, 128], strides = [1, 1]} : vector<8x512xf32> to vector<8x128xf32>
    %201 = arith.negf %200 : vector<8x128xf32>
    %202 = math.exp %201 : vector<8x128xf32>
    %cst_63 = arith.constant 1.000000e+00 : f32
    %203 = vector.broadcast %cst_63 : f32 to vector<8x128xf32>
    %204 = arith.addf %203, %202 : vector<8x128xf32>
    %205 = arith.divf %203, %204 : vector<8x128xf32>
    %206 = vector.extract_strided_slice %199 {offsets = [0, 128], sizes = [8, 128], strides = [1, 1]} : vector<8x512xf32> to vector<8x128xf32>
    %207 = arith.negf %206 : vector<8x128xf32>
    %208 = math.exp %207 : vector<8x128xf32>
    %cst_64 = arith.constant 1.000000e+00 : f32
    %209 = vector.broadcast %cst_64 : f32 to vector<8x128xf32>
    %210 = arith.addf %209, %208 : vector<8x128xf32>
    %211 = arith.divf %209, %210 : vector<8x128xf32>
    %212 = vector.extract_strided_slice %199 {offsets = [0, 256], sizes = [8, 128], strides = [1, 1]} : vector<8x512xf32> to vector<8x128xf32>
    %213 = math.tanh %212 : vector<8x128xf32>
    %214 = vector.extract_strided_slice %199 {offsets = [0, 384], sizes = [8, 128], strides = [1, 1]} : vector<8x512xf32> to vector<8x128xf32>
    %215 = arith.negf %214 : vector<8x128xf32>
    %216 = math.exp %215 : vector<8x128xf32>
    %cst_65 = arith.constant 1.000000e+00 : f32
    %217 = vector.broadcast %cst_65 : f32 to vector<8x128xf32>
    %218 = arith.addf %217, %216 : vector<8x128xf32>
    %219 = arith.divf %217, %218 : vector<8x128xf32>
    %220 = arith.mulf %211, %190 : vector<8x128xf32>
    %221 = arith.mulf %205, %213 : vector<8x128xf32>
    %222 = arith.addf %220, %221 : vector<8x128xf32>
    %223 = math.tanh %222 : vector<8x128xf32>
    %224 = arith.mulf %219, %223 : vector<8x128xf32>
    %c48 = arith.constant 48 : index
    %c0_66 = arith.constant 0 : index
    %225 = vector.load %arg9[%c48, %c0_66] : memref<128x128xf32, #tpu.memory_space<vmem>>, vector<8x128xf32>
    tpu.vector_store %arg9[%c48, %c0_66], %224 {strides = array<i32>} : memref<128x128xf32, #tpu.memory_space<vmem>>, vector<8x128xf32>,
    %c7 = arith.constant 7 : index
    %c0_67 = arith.constant 0 : index
    %c0_68 = arith.constant 0 : index
    %226 = vector.load %arg0[%c7, %c0_67, %c0_68] : memref<16x8x512xf32, #tpu.memory_space<vmem>>, vector<1x8x512xf32>
    %227 = vector.shape_cast %226 : vector<1x8x512xf32> to vector<8x512xf32>
    %228 = arith.truncf %224 : vector<8x128xf32> to vector<8x128xbf16>
    %c0_69 = arith.constant 0 : index
    %c0_70 = arith.constant 0 : index
    %229 = vector.load %arg3[%c0_69, %c0_70] : memref<128x512xbf16, #tpu.memory_space<vmem>>, vector<128x512xbf16>
    %cst_71 = arith.constant dense<0.000000e+00> : vector<8x512xf32>
    %230 = tpu.matmul %228, %229, %cst_71 {dimension_numbers = #tpu.dot_dimension_numbers<[1], [0], [0], [1], [0, 0, 1, 1], [], []>} : vector<8x128xbf16>, vector<128x512xbf16>, vector<8x512xf32> -> vector<8x512xf32>
    %231 = arith.addf %227, %230 : vector<8x512xf32>
    %232 = vector.extract_strided_slice %231 {offsets = [0, 0], sizes = [8, 128], strides = [1, 1]} : vector<8x512xf32> to vector<8x128xf32>
    %233 = arith.negf %232 : vector<8x128xf32>
    %234 = math.exp %233 : vector<8x128xf32>
    %cst_72 = arith.constant 1.000000e+00 : f32
    %235 = vector.broadcast %cst_72 : f32 to vector<8x128xf32>
    %236 = arith.addf %235, %234 : vector<8x128xf32>
    %237 = arith.divf %235, %236 : vector<8x128xf32>
    %238 = vector.extract_strided_slice %231 {offsets = [0, 128], sizes = [8, 128], strides = [1, 1]} : vector<8x512xf32> to vector<8x128xf32>
    %239 = arith.negf %238 : vector<8x128xf32>
    %240 = math.exp %239 : vector<8x128xf32>
    %cst_73 = arith.constant 1.000000e+00 : f32
    %241 = vector.broadcast %cst_73 : f32 to vector<8x128xf32>
    %242 = arith.addf %241, %240 : vector<8x128xf32>
    %243 = arith.divf %241, %242 : vector<8x128xf32>
    %244 = vector.extract_strided_slice %231 {offsets = [0, 256], sizes = [8, 128], strides = [1, 1]} : vector<8x512xf32> to vector<8x128xf32>
    %245 = math.tanh %244 : vector<8x128xf32>
    %246 = vector.extract_strided_slice %231 {offsets = [0, 384], sizes = [8, 128], strides = [1, 1]} : vector<8x512xf32> to vector<8x128xf32>
    %247 = arith.negf %246 : vector<8x128xf32>
    %248 = math.exp %247 : vector<8x128xf32>
    %cst_74 = arith.constant 1.000000e+00 : f32
    %249 = vector.broadcast %cst_74 : f32 to vector<8x128xf32>
    %250 = arith.addf %249, %248 : vector<8x128xf32>
    %251 = arith.divf %249, %250 : vector<8x128xf32>
    %252 = arith.mulf %243, %222 : vector<8x128xf32>
    %253 = arith.mulf %237, %245 : vector<8x128xf32>
    %254 = arith.addf %252, %253 : vector<8x128xf32>
    %255 = math.tanh %254 : vector<8x128xf32>
    %256 = arith.mulf %251, %255 : vector<8x128xf32>
    %c56 = arith.constant 56 : index
    %c0_75 = arith.constant 0 : index
    %257 = vector.load %arg9[%c56, %c0_75] : memref<128x128xf32, #tpu.memory_space<vmem>>, vector<8x128xf32>
    tpu.vector_store %arg9[%c56, %c0_75], %256 {strides = array<i32>} : memref<128x128xf32, #tpu.memory_space<vmem>>, vector<8x128xf32>,
    %c8_76 = arith.constant 8 : index
    %c0_77 = arith.constant 0 : index
    %c0_78 = arith.constant 0 : index
    %258 = vector.load %arg0[%c8_76, %c0_77, %c0_78] : memref<16x8x512xf32, #tpu.memory_space<vmem>>, vector<1x8x512xf32>
    %259 = vector.shape_cast %258 : vector<1x8x512xf32> to vector<8x512xf32>
    %260 = arith.truncf %256 : vector<8x128xf32> to vector<8x128xbf16>
    %c0_79 = arith.constant 0 : index
    %c0_80 = arith.constant 0 : index
    %261 = vector.load %arg3[%c0_79, %c0_80] : memref<128x512xbf16, #tpu.memory_space<vmem>>, vector<128x512xbf16>
    %cst_81 = arith.constant dense<0.000000e+00> : vector<8x512xf32>
    %262 = tpu.matmul %260, %261, %cst_81 {dimension_numbers = #tpu.dot_dimension_numbers<[1], [0], [0], [1], [0, 0, 1, 1], [], []>} : vector<8x128xbf16>, vector<128x512xbf16>, vector<8x512xf32> -> vector<8x512xf32>
    %263 = arith.addf %259, %262 : vector<8x512xf32>
    %264 = vector.extract_strided_slice %263 {offsets = [0, 0], sizes = [8, 128], strides = [1, 1]} : vector<8x512xf32> to vector<8x128xf32>
    %265 = arith.negf %264 : vector<8x128xf32>
    %266 = math.exp %265 : vector<8x128xf32>
    %cst_82 = arith.constant 1.000000e+00 : f32
    %267 = vector.broadcast %cst_82 : f32 to vector<8x128xf32>
    %268 = arith.addf %267, %266 : vector<8x128xf32>
    %269 = arith.divf %267, %268 : vector<8x128xf32>
    %270 = vector.extract_strided_slice %263 {offsets = [0, 128], sizes = [8, 128], strides = [1, 1]} : vector<8x512xf32> to vector<8x128xf32>
    %271 = arith.negf %270 : vector<8x128xf32>
    %272 = math.exp %271 : vector<8x128xf32>
    %cst_83 = arith.constant 1.000000e+00 : f32
    %273 = vector.broadcast %cst_83 : f32 to vector<8x128xf32>
    %274 = arith.addf %273, %272 : vector<8x128xf32>
    %275 = arith.divf %273, %274 : vector<8x128xf32>
    %276 = vector.extract_strided_slice %263 {offsets = [0, 256], sizes = [8, 128], strides = [1, 1]} : vector<8x512xf32> to vector<8x128xf32>
    %277 = math.tanh %276 : vector<8x128xf32>
    %278 = vector.extract_strided_slice %263 {offsets = [0, 384], sizes = [8, 128], strides = [1, 1]} : vector<8x512xf32> to vector<8x128xf32>
    %279 = arith.negf %278 : vector<8x128xf32>
    %280 = math.exp %279 : vector<8x128xf32>
    %cst_84 = arith.constant 1.000000e+00 : f32
    %281 = vector.broadcast %cst_84 : f32 to vector<8x128xf32>
    %282 = arith.addf %281, %280 : vector<8x128xf32>
    %283 = arith.divf %281, %282 : vector<8x128xf32>
    %284 = arith.mulf %275, %254 : vector<8x128xf32>
    %285 = arith.mulf %269, %277 : vector<8x128xf32>
    %286 = arith.addf %284, %285 : vector<8x128xf32>
    %287 = math.tanh %286 : vector<8x128xf32>
    %288 = arith.mulf %283, %287 : vector<8x128xf32>
    %c64 = arith.constant 64 : index
    %c0_85 = arith.constant 0 : index
    %289 = vector.load %arg9[%c64, %c0_85] : memref<128x128xf32, #tpu.memory_space<vmem>>, vector<8x128xf32>
    tpu.vector_store %arg9[%c64, %c0_85], %288 {strides = array<i32>} : memref<128x128xf32, #tpu.memory_space<vmem>>, vector<8x128xf32>,
    %c9 = arith.constant 9 : index
    %c0_86 = arith.constant 0 : index
    %c0_87 = arith.constant 0 : index
    %290 = vector.load %arg0[%c9, %c0_86, %c0_87] : memref<16x8x512xf32, #tpu.memory_space<vmem>>, vector<1x8x512xf32>
    %291 = vector.shape_cast %290 : vector<1x8x512xf32> to vector<8x512xf32>
    %292 = arith.truncf %288 : vector<8x128xf32> to vector<8x128xbf16>
    %c0_88 = arith.constant 0 : index
    %c0_89 = arith.constant 0 : index
    %293 = vector.load %arg3[%c0_88, %c0_89] : memref<128x512xbf16, #tpu.memory_space<vmem>>, vector<128x512xbf16>
    %cst_90 = arith.constant dense<0.000000e+00> : vector<8x512xf32>
    %294 = tpu.matmul %292, %293, %cst_90 {dimension_numbers = #tpu.dot_dimension_numbers<[1], [0], [0], [1], [0, 0, 1, 1], [], []>} : vector<8x128xbf16>, vector<128x512xbf16>, vector<8x512xf32> -> vector<8x512xf32>
    %295 = arith.addf %291, %294 : vector<8x512xf32>
    %296 = vector.extract_strided_slice %295 {offsets = [0, 0], sizes = [8, 128], strides = [1, 1]} : vector<8x512xf32> to vector<8x128xf32>
    %297 = arith.negf %296 : vector<8x128xf32>
    %298 = math.exp %297 : vector<8x128xf32>
    %cst_91 = arith.constant 1.000000e+00 : f32
    %299 = vector.broadcast %cst_91 : f32 to vector<8x128xf32>
    %300 = arith.addf %299, %298 : vector<8x128xf32>
    %301 = arith.divf %299, %300 : vector<8x128xf32>
    %302 = vector.extract_strided_slice %295 {offsets = [0, 128], sizes = [8, 128], strides = [1, 1]} : vector<8x512xf32> to vector<8x128xf32>
    %303 = arith.negf %302 : vector<8x128xf32>
    %304 = math.exp %303 : vector<8x128xf32>
    %cst_92 = arith.constant 1.000000e+00 : f32
    %305 = vector.broadcast %cst_92 : f32 to vector<8x128xf32>
    %306 = arith.addf %305, %304 : vector<8x128xf32>
    %307 = arith.divf %305, %306 : vector<8x128xf32>
    %308 = vector.extract_strided_slice %295 {offsets = [0, 256], sizes = [8, 128], strides = [1, 1]} : vector<8x512xf32> to vector<8x128xf32>
    %309 = math.tanh %308 : vector<8x128xf32>
    %310 = vector.extract_strided_slice %295 {offsets = [0, 384], sizes = [8, 128], strides = [1, 1]} : vector<8x512xf32> to vector<8x128xf32>
    %311 = arith.negf %310 : vector<8x128xf32>
    %312 = math.exp %311 : vector<8x128xf32>
    %cst_93 = arith.constant 1.000000e+00 : f32
    %313 = vector.broadcast %cst_93 : f32 to vector<8x128xf32>
    %314 = arith.addf %313, %312 : vector<8x128xf32>
    %315 = arith.divf %313, %314 : vector<8x128xf32>
    %316 = arith.mulf %307, %286 : vector<8x128xf32>
    %317 = arith.mulf %301, %309 : vector<8x128xf32>
    %318 = arith.addf %316, %317 : vector<8x128xf32>
    %319 = math.tanh %318 : vector<8x128xf32>
    %320 = arith.mulf %315, %319 : vector<8x128xf32>
    %c72 = arith.constant 72 : index
    %c0_94 = arith.constant 0 : index
    %321 = vector.load %arg9[%c72, %c0_94] : memref<128x128xf32, #tpu.memory_space<vmem>>, vector<8x128xf32>
    tpu.vector_store %arg9[%c72, %c0_94], %320 {strides = array<i32>} : memref<128x128xf32, #tpu.memory_space<vmem>>, vector<8x128xf32>,
    %c10 = arith.constant 10 : index
    %c0_95 = arith.constant 0 : index
    %c0_96 = arith.constant 0 : index
    %322 = vector.load %arg0[%c10, %c0_95, %c0_96] : memref<16x8x512xf32, #tpu.memory_space<vmem>>, vector<1x8x512xf32>
    %323 = vector.shape_cast %322 : vector<1x8x512xf32> to vector<8x512xf32>
    %324 = arith.truncf %320 : vector<8x128xf32> to vector<8x128xbf16>
    %c0_97 = arith.constant 0 : index
    %c0_98 = arith.constant 0 : index
    %325 = vector.load %arg3[%c0_97, %c0_98] : memref<128x512xbf16, #tpu.memory_space<vmem>>, vector<128x512xbf16>
    %cst_99 = arith.constant dense<0.000000e+00> : vector<8x512xf32>
    %326 = tpu.matmul %324, %325, %cst_99 {dimension_numbers = #tpu.dot_dimension_numbers<[1], [0], [0], [1], [0, 0, 1, 1], [], []>} : vector<8x128xbf16>, vector<128x512xbf16>, vector<8x512xf32> -> vector<8x512xf32>
    %327 = arith.addf %323, %326 : vector<8x512xf32>
    %328 = vector.extract_strided_slice %327 {offsets = [0, 0], sizes = [8, 128], strides = [1, 1]} : vector<8x512xf32> to vector<8x128xf32>
    %329 = arith.negf %328 : vector<8x128xf32>
    %330 = math.exp %329 : vector<8x128xf32>
    %cst_100 = arith.constant 1.000000e+00 : f32
    %331 = vector.broadcast %cst_100 : f32 to vector<8x128xf32>
    %332 = arith.addf %331, %330 : vector<8x128xf32>
    %333 = arith.divf %331, %332 : vector<8x128xf32>
    %334 = vector.extract_strided_slice %327 {offsets = [0, 128], sizes = [8, 128], strides = [1, 1]} : vector<8x512xf32> to vector<8x128xf32>
    %335 = arith.negf %334 : vector<8x128xf32>
    %336 = math.exp %335 : vector<8x128xf32>
    %cst_101 = arith.constant 1.000000e+00 : f32
    %337 = vector.broadcast %cst_101 : f32 to vector<8x128xf32>
    %338 = arith.addf %337, %336 : vector<8x128xf32>
    %339 = arith.divf %337, %338 : vector<8x128xf32>
    %340 = vector.extract_strided_slice %327 {offsets = [0, 256], sizes = [8, 128], strides = [1, 1]} : vector<8x512xf32> to vector<8x128xf32>
    %341 = math.tanh %340 : vector<8x128xf32>
    %342 = vector.extract_strided_slice %327 {offsets = [0, 384], sizes = [8, 128], strides = [1, 1]} : vector<8x512xf32> to vector<8x128xf32>
    %343 = arith.negf %342 : vector<8x128xf32>
    %344 = math.exp %343 : vector<8x128xf32>
    %cst_102 = arith.constant 1.000000e+00 : f32
    %345 = vector.broadcast %cst_102 : f32 to vector<8x128xf32>
    %346 = arith.addf %345, %344 : vector<8x128xf32>
    %347 = arith.divf %345, %346 : vector<8x128xf32>
    %348 = arith.mulf %339, %318 : vector<8x128xf32>
    %349 = arith.mulf %333, %341 : vector<8x128xf32>
    %350 = arith.addf %348, %349 : vector<8x128xf32>
    %351 = math.tanh %350 : vector<8x128xf32>
    %352 = arith.mulf %347, %351 : vector<8x128xf32>
    %c80 = arith.constant 80 : index
    %c0_103 = arith.constant 0 : index
    %353 = vector.load %arg9[%c80, %c0_103] : memref<128x128xf32, #tpu.memory_space<vmem>>, vector<8x128xf32>
    tpu.vector_store %arg9[%c80, %c0_103], %352 {strides = array<i32>} : memref<128x128xf32, #tpu.memory_space<vmem>>, vector<8x128xf32>,
    %c11 = arith.constant 11 : index
    %c0_104 = arith.constant 0 : index
    %c0_105 = arith.constant 0 : index
    %354 = vector.load %arg0[%c11, %c0_104, %c0_105] : memref<16x8x512xf32, #tpu.memory_space<vmem>>, vector<1x8x512xf32>
    %355 = vector.shape_cast %354 : vector<1x8x512xf32> to vector<8x512xf32>
    %356 = arith.truncf %352 : vector<8x128xf32> to vector<8x128xbf16>
    %c0_106 = arith.constant 0 : index
    %c0_107 = arith.constant 0 : index
    %357 = vector.load %arg3[%c0_106, %c0_107] : memref<128x512xbf16, #tpu.memory_space<vmem>>, vector<128x512xbf16>
    %cst_108 = arith.constant dense<0.000000e+00> : vector<8x512xf32>
    %358 = tpu.matmul %356, %357, %cst_108 {dimension_numbers = #tpu.dot_dimension_numbers<[1], [0], [0], [1], [0, 0, 1, 1], [], []>} : vector<8x128xbf16>, vector<128x512xbf16>, vector<8x512xf32> -> vector<8x512xf32>
    %359 = arith.addf %355, %358 : vector<8x512xf32>
    %360 = vector.extract_strided_slice %359 {offsets = [0, 0], sizes = [8, 128], strides = [1, 1]} : vector<8x512xf32> to vector<8x128xf32>
    %361 = arith.negf %360 : vector<8x128xf32>
    %362 = math.exp %361 : vector<8x128xf32>
    %cst_109 = arith.constant 1.000000e+00 : f32
    %363 = vector.broadcast %cst_109 : f32 to vector<8x128xf32>
    %364 = arith.addf %363, %362 : vector<8x128xf32>
    %365 = arith.divf %363, %364 : vector<8x128xf32>
    %366 = vector.extract_strided_slice %359 {offsets = [0, 128], sizes = [8, 128], strides = [1, 1]} : vector<8x512xf32> to vector<8x128xf32>
    %367 = arith.negf %366 : vector<8x128xf32>
    %368 = math.exp %367 : vector<8x128xf32>
    %cst_110 = arith.constant 1.000000e+00 : f32
    %369 = vector.broadcast %cst_110 : f32 to vector<8x128xf32>
    %370 = arith.addf %369, %368 : vector<8x128xf32>
    %371 = arith.divf %369, %370 : vector<8x128xf32>
    %372 = vector.extract_strided_slice %359 {offsets = [0, 256], sizes = [8, 128], strides = [1, 1]} : vector<8x512xf32> to vector<8x128xf32>
    %373 = math.tanh %372 : vector<8x128xf32>
    %374 = vector.extract_strided_slice %359 {offsets = [0, 384], sizes = [8, 128], strides = [1, 1]} : vector<8x512xf32> to vector<8x128xf32>
    %375 = arith.negf %374 : vector<8x128xf32>
    %376 = math.exp %375 : vector<8x128xf32>
    %cst_111 = arith.constant 1.000000e+00 : f32
    %377 = vector.broadcast %cst_111 : f32 to vector<8x128xf32>
    %378 = arith.addf %377, %376 : vector<8x128xf32>
    %379 = arith.divf %377, %378 : vector<8x128xf32>
    %380 = arith.mulf %371, %350 : vector<8x128xf32>
    %381 = arith.mulf %365, %373 : vector<8x128xf32>
    %382 = arith.addf %380, %381 : vector<8x128xf32>
    %383 = math.tanh %382 : vector<8x128xf32>
    %384 = arith.mulf %379, %383 : vector<8x128xf32>
    %c88 = arith.constant 88 : index
    %c0_112 = arith.constant 0 : index
    %385 = vector.load %arg9[%c88, %c0_112] : memref<128x128xf32, #tpu.memory_space<vmem>>, vector<8x128xf32>
    tpu.vector_store %arg9[%c88, %c0_112], %384 {strides = array<i32>} : memref<128x128xf32, #tpu.memory_space<vmem>>, vector<8x128xf32>,
    %c12 = arith.constant 12 : index
    %c0_113 = arith.constant 0 : index
    %c0_114 = arith.constant 0 : index
    %386 = vector.load %arg0[%c12, %c0_113, %c0_114] : memref<16x8x512xf32, #tpu.memory_space<vmem>>, vector<1x8x512xf32>
    %387 = vector.shape_cast %386 : vector<1x8x512xf32> to vector<8x512xf32>
    %388 = arith.truncf %384 : vector<8x128xf32> to vector<8x128xbf16>
    %c0_115 = arith.constant 0 : index
    %c0_116 = arith.constant 0 : index
    %389 = vector.load %arg3[%c0_115, %c0_116] : memref<128x512xbf16, #tpu.memory_space<vmem>>, vector<128x512xbf16>
    %cst_117 = arith.constant dense<0.000000e+00> : vector<8x512xf32>
    %390 = tpu.matmul %388, %389, %cst_117 {dimension_numbers = #tpu.dot_dimension_numbers<[1], [0], [0], [1], [0, 0, 1, 1], [], []>} : vector<8x128xbf16>, vector<128x512xbf16>, vector<8x512xf32> -> vector<8x512xf32>
    %391 = arith.addf %387, %390 : vector<8x512xf32>
    %392 = vector.extract_strided_slice %391 {offsets = [0, 0], sizes = [8, 128], strides = [1, 1]} : vector<8x512xf32> to vector<8x128xf32>
    %393 = arith.negf %392 : vector<8x128xf32>
    %394 = math.exp %393 : vector<8x128xf32>
    %cst_118 = arith.constant 1.000000e+00 : f32
    %395 = vector.broadcast %cst_118 : f32 to vector<8x128xf32>
    %396 = arith.addf %395, %394 : vector<8x128xf32>
    %397 = arith.divf %395, %396 : vector<8x128xf32>
    %398 = vector.extract_strided_slice %391 {offsets = [0, 128], sizes = [8, 128], strides = [1, 1]} : vector<8x512xf32> to vector<8x128xf32>
    %399 = arith.negf %398 : vector<8x128xf32>
    %400 = math.exp %399 : vector<8x128xf32>
    %cst_119 = arith.constant 1.000000e+00 : f32
    %401 = vector.broadcast %cst_119 : f32 to vector<8x128xf32>
    %402 = arith.addf %401, %400 : vector<8x128xf32>
    %403 = arith.divf %401, %402 : vector<8x128xf32>
    %404 = vector.extract_strided_slice %391 {offsets = [0, 256], sizes = [8, 128], strides = [1, 1]} : vector<8x512xf32> to vector<8x128xf32>
    %405 = math.tanh %404 : vector<8x128xf32>
    %406 = vector.extract_strided_slice %391 {offsets = [0, 384], sizes = [8, 128], strides = [1, 1]} : vector<8x512xf32> to vector<8x128xf32>
    %407 = arith.negf %406 : vector<8x128xf32>
    %408 = math.exp %407 : vector<8x128xf32>
    %cst_120 = arith.constant 1.000000e+00 : f32
    %409 = vector.broadcast %cst_120 : f32 to vector<8x128xf32>
    %410 = arith.addf %409, %408 : vector<8x128xf32>
    %411 = arith.divf %409, %410 : vector<8x128xf32>
    %412 = arith.mulf %403, %382 : vector<8x128xf32>
    %413 = arith.mulf %397, %405 : vector<8x128xf32>
    %414 = arith.addf %412, %413 : vector<8x128xf32>
    %415 = math.tanh %414 : vector<8x128xf32>
    %416 = arith.mulf %411, %415 : vector<8x128xf32>
    %c96 = arith.constant 96 : index
    %c0_121 = arith.constant 0 : index
    %417 = vector.load %arg9[%c96, %c0_121] : memref<128x128xf32, #tpu.memory_space<vmem>>, vector<8x128xf32>
    tpu.vector_store %arg9[%c96, %c0_121], %416 {strides = array<i32>} : memref<128x128xf32, #tpu.memory_space<vmem>>, vector<8x128xf32>,
    %c13 = arith.constant 13 : index
    %c0_122 = arith.constant 0 : index
    %c0_123 = arith.constant 0 : index
    %418 = vector.load %arg0[%c13, %c0_122, %c0_123] : memref<16x8x512xf32, #tpu.memory_space<vmem>>, vector<1x8x512xf32>
    %419 = vector.shape_cast %418 : vector<1x8x512xf32> to vector<8x512xf32>
    %420 = arith.truncf %416 : vector<8x128xf32> to vector<8x128xbf16>
    %c0_124 = arith.constant 0 : index
    %c0_125 = arith.constant 0 : index
    %421 = vector.load %arg3[%c0_124, %c0_125] : memref<128x512xbf16, #tpu.memory_space<vmem>>, vector<128x512xbf16>
    %cst_126 = arith.constant dense<0.000000e+00> : vector<8x512xf32>
    %422 = tpu.matmul %420, %421, %cst_126 {dimension_numbers = #tpu.dot_dimension_numbers<[1], [0], [0], [1], [0, 0, 1, 1], [], []>} : vector<8x128xbf16>, vector<128x512xbf16>, vector<8x512xf32> -> vector<8x512xf32>
    %423 = arith.addf %419, %422 : vector<8x512xf32>
    %424 = vector.extract_strided_slice %423 {offsets = [0, 0], sizes = [8, 128], strides = [1, 1]} : vector<8x512xf32> to vector<8x128xf32>
    %425 = arith.negf %424 : vector<8x128xf32>
    %426 = math.exp %425 : vector<8x128xf32>
    %cst_127 = arith.constant 1.000000e+00 : f32
    %427 = vector.broadcast %cst_127 : f32 to vector<8x128xf32>
    %428 = arith.addf %427, %426 : vector<8x128xf32>
    %429 = arith.divf %427, %428 : vector<8x128xf32>
    %430 = vector.extract_strided_slice %423 {offsets = [0, 128], sizes = [8, 128], strides = [1, 1]} : vector<8x512xf32> to vector<8x128xf32>
    %431 = arith.negf %430 : vector<8x128xf32>
    %432 = math.exp %431 : vector<8x128xf32>
    %cst_128 = arith.constant 1.000000e+00 : f32
    %433 = vector.broadcast %cst_128 : f32 to vector<8x128xf32>
    %434 = arith.addf %433, %432 : vector<8x128xf32>
    %435 = arith.divf %433, %434 : vector<8x128xf32>
    %436 = vector.extract_strided_slice %423 {offsets = [0, 256], sizes = [8, 128], strides = [1, 1]} : vector<8x512xf32> to vector<8x128xf32>
    %437 = math.tanh %436 : vector<8x128xf32>
    %438 = vector.extract_strided_slice %423 {offsets = [0, 384], sizes = [8, 128], strides = [1, 1]} : vector<8x512xf32> to vector<8x128xf32>
    %439 = arith.negf %438 : vector<8x128xf32>
    %440 = math.exp %439 : vector<8x128xf32>
    %cst_129 = arith.constant 1.000000e+00 : f32
    %441 = vector.broadcast %cst_129 : f32 to vector<8x128xf32>
    %442 = arith.addf %441, %440 : vector<8x128xf32>
    %443 = arith.divf %441, %442 : vector<8x128xf32>
    %444 = arith.mulf %435, %414 : vector<8x128xf32>
    %445 = arith.mulf %429, %437 : vector<8x128xf32>
    %446 = arith.addf %444, %445 : vector<8x128xf32>
    %447 = math.tanh %446 : vector<8x128xf32>
    %448 = arith.mulf %443, %447 : vector<8x128xf32>
    %c104 = arith.constant 104 : index
    %c0_130 = arith.constant 0 : index
    %449 = vector.load %arg9[%c104, %c0_130] : memref<128x128xf32, #tpu.memory_space<vmem>>, vector<8x128xf32>
    tpu.vector_store %arg9[%c104, %c0_130], %448 {strides = array<i32>} : memref<128x128xf32, #tpu.memory_space<vmem>>, vector<8x128xf32>,
    %c14 = arith.constant 14 : index
    %c0_131 = arith.constant 0 : index
    %c0_132 = arith.constant 0 : index
    %450 = vector.load %arg0[%c14, %c0_131, %c0_132] : memref<16x8x512xf32, #tpu.memory_space<vmem>>, vector<1x8x512xf32>
    %451 = vector.shape_cast %450 : vector<1x8x512xf32> to vector<8x512xf32>
    %452 = arith.truncf %448 : vector<8x128xf32> to vector<8x128xbf16>
    %c0_133 = arith.constant 0 : index
    %c0_134 = arith.constant 0 : index
    %453 = vector.load %arg3[%c0_133, %c0_134] : memref<128x512xbf16, #tpu.memory_space<vmem>>, vector<128x512xbf16>
    %cst_135 = arith.constant dense<0.000000e+00> : vector<8x512xf32>
    %454 = tpu.matmul %452, %453, %cst_135 {dimension_numbers = #tpu.dot_dimension_numbers<[1], [0], [0], [1], [0, 0, 1, 1], [], []>} : vector<8x128xbf16>, vector<128x512xbf16>, vector<8x512xf32> -> vector<8x512xf32>
    %455 = arith.addf %451, %454 : vector<8x512xf32>
    %456 = vector.extract_strided_slice %455 {offsets = [0, 0], sizes = [8, 128], strides = [1, 1]} : vector<8x512xf32> to vector<8x128xf32>
    %457 = arith.negf %456 : vector<8x128xf32>
    %458 = math.exp %457 : vector<8x128xf32>
    %cst_136 = arith.constant 1.000000e+00 : f32
    %459 = vector.broadcast %cst_136 : f32 to vector<8x128xf32>
    %460 = arith.addf %459, %458 : vector<8x128xf32>
    %461 = arith.divf %459, %460 : vector<8x128xf32>
    %462 = vector.extract_strided_slice %455 {offsets = [0, 128], sizes = [8, 128], strides = [1, 1]} : vector<8x512xf32> to vector<8x128xf32>
    %463 = arith.negf %462 : vector<8x128xf32>
    %464 = math.exp %463 : vector<8x128xf32>
    %cst_137 = arith.constant 1.000000e+00 : f32
    %465 = vector.broadcast %cst_137 : f32 to vector<8x128xf32>
    %466 = arith.addf %465, %464 : vector<8x128xf32>
    %467 = arith.divf %465, %466 : vector<8x128xf32>
    %468 = vector.extract_strided_slice %455 {offsets = [0, 256], sizes = [8, 128], strides = [1, 1]} : vector<8x512xf32> to vector<8x128xf32>
    %469 = math.tanh %468 : vector<8x128xf32>
    %470 = vector.extract_strided_slice %455 {offsets = [0, 384], sizes = [8, 128], strides = [1, 1]} : vector<8x512xf32> to vector<8x128xf32>
    %471 = arith.negf %470 : vector<8x128xf32>
    %472 = math.exp %471 : vector<8x128xf32>
    %cst_138 = arith.constant 1.000000e+00 : f32
    %473 = vector.broadcast %cst_138 : f32 to vector<8x128xf32>
    %474 = arith.addf %473, %472 : vector<8x128xf32>
    %475 = arith.divf %473, %474 : vector<8x128xf32>
    %476 = arith.mulf %467, %446 : vector<8x128xf32>
    %477 = arith.mulf %461, %469 : vector<8x128xf32>
    %478 = arith.addf %476, %477 : vector<8x128xf32>
    %479 = math.tanh %478 : vector<8x128xf32>
    %480 = arith.mulf %475, %479 : vector<8x128xf32>
    %c112 = arith.constant 112 : index
    %c0_139 = arith.constant 0 : index
    %481 = vector.load %arg9[%c112, %c0_139] : memref<128x128xf32, #tpu.memory_space<vmem>>, vector<8x128xf32>
    tpu.vector_store %arg9[%c112, %c0_139], %480 {strides = array<i32>} : memref<128x128xf32, #tpu.memory_space<vmem>>, vector<8x128xf32>,
    %c15 = arith.constant 15 : index
    %c0_140 = arith.constant 0 : index
    %c0_141 = arith.constant 0 : index
    %482 = vector.load %arg0[%c15, %c0_140, %c0_141] : memref<16x8x512xf32, #tpu.memory_space<vmem>>, vector<1x8x512xf32>
    %483 = vector.shape_cast %482 : vector<1x8x512xf32> to vector<8x512xf32>
    %484 = arith.truncf %480 : vector<8x128xf32> to vector<8x128xbf16>
    %c0_142 = arith.constant 0 : index
    %c0_143 = arith.constant 0 : index
    %485 = vector.load %arg3[%c0_142, %c0_143] : memref<128x512xbf16, #tpu.memory_space<vmem>>, vector<128x512xbf16>
    %cst_144 = arith.constant dense<0.000000e+00> : vector<8x512xf32>
    %486 = tpu.matmul %484, %485, %cst_144 {dimension_numbers = #tpu.dot_dimension_numbers<[1], [0], [0], [1], [0, 0, 1, 1], [], []>} : vector<8x128xbf16>, vector<128x512xbf16>, vector<8x512xf32> -> vector<8x512xf32>
    %487 = arith.addf %483, %486 : vector<8x512xf32>
    %488 = vector.extract_strided_slice %487 {offsets = [0, 0], sizes = [8, 128], strides = [1, 1]} : vector<8x512xf32> to vector<8x128xf32>
    %489 = arith.negf %488 : vector<8x128xf32>
    %490 = math.exp %489 : vector<8x128xf32>
    %cst_145 = arith.constant 1.000000e+00 : f32
    %491 = vector.broadcast %cst_145 : f32 to vector<8x128xf32>
    %492 = arith.addf %491, %490 : vector<8x128xf32>
    %493 = arith.divf %491, %492 : vector<8x128xf32>
    %494 = vector.extract_strided_slice %487 {offsets = [0, 128], sizes = [8, 128], strides = [1, 1]} : vector<8x512xf32> to vector<8x128xf32>
    %495 = arith.negf %494 : vector<8x128xf32>
    %496 = math.exp %495 : vector<8x128xf32>
    %cst_146 = arith.constant 1.000000e+00 : f32
    %497 = vector.broadcast %cst_146 : f32 to vector<8x128xf32>
    %498 = arith.addf %497, %496 : vector<8x128xf32>
    %499 = arith.divf %497, %498 : vector<8x128xf32>
    %500 = vector.extract_strided_slice %487 {offsets = [0, 256], sizes = [8, 128], strides = [1, 1]} : vector<8x512xf32> to vector<8x128xf32>
    %501 = math.tanh %500 : vector<8x128xf32>
    %502 = vector.extract_strided_slice %487 {offsets = [0, 384], sizes = [8, 128], strides = [1, 1]} : vector<8x512xf32> to vector<8x128xf32>
    %503 = arith.negf %502 : vector<8x128xf32>
    %504 = math.exp %503 : vector<8x128xf32>
    %cst_147 = arith.constant 1.000000e+00 : f32
    %505 = vector.broadcast %cst_147 : f32 to vector<8x128xf32>
    %506 = arith.addf %505, %504 : vector<8x128xf32>
    %507 = arith.divf %505, %506 : vector<8x128xf32>
    %508 = arith.mulf %499, %478 : vector<8x128xf32>
    %509 = arith.mulf %493, %501 : vector<8x128xf32>
    %510 = arith.addf %508, %509 : vector<8x128xf32>
    %511 = math.tanh %510 : vector<8x128xf32>
    %512 = arith.mulf %507, %511 : vector<8x128xf32>
    %c120 = arith.constant 120 : index
    %c0_148 = arith.constant 0 : index
    %513 = vector.load %arg9[%c120, %c0_148] : memref<128x128xf32, #tpu.memory_space<vmem>>, vector<8x128xf32>
    tpu.vector_store %arg9[%c120, %c0_148], %512 {strides = array<i32>} : memref<128x128xf32, #tpu.memory_space<vmem>>, vector<8x128xf32>,
    %c0_149 = arith.constant 0 : index
    %c0_150 = arith.constant 0 : index
    %514 = vector.load %arg7[%c0_149, %c0_150] : memref<8x128xf32, #tpu.memory_space<vmem>>, vector<8x128xf32>
    tpu.vector_store %arg7[%c0_149, %c0_150], %512 {strides = array<i32>} : memref<8x128xf32, #tpu.memory_space<vmem>>, vector<8x128xf32>,
    %c0_151 = arith.constant 0 : index
    %c0_152 = arith.constant 0 : index
    %515 = vector.load %arg8[%c0_151, %c0_152] : memref<8x128xf32, #tpu.memory_space<vmem>>, vector<8x128xf32>
    tpu.vector_store %arg8[%c0_151, %c0_152], %510 {strides = array<i32>} : memref<8x128xf32, #tpu.memory_space<vmem>>, vector<8x128xf32>,
    %c0_153 = arith.constant 0 : index
    %c0_154 = arith.constant 0 : index
    %516 = vector.load %arg9[%c0_153, %c0_154] : memref<128x128xf32, #tpu.memory_space<vmem>>, vector<128x128xf32>
    %517 = arith.truncf %516 : vector<128x128xf32> to vector<128x128xbf16>
    %c0_155 = arith.constant 0 : index
    %c0_156 = arith.constant 0 : index
    %518 = vector.load %arg4[%c0_155, %c0_156] : memref<128x128xbf16, #tpu.memory_space<vmem>>, vector<128x128xbf16>
    %cst_157 = arith.constant dense<0.000000e+00> : vector<128x128xf32>
    %519 = tpu.matmul %517, %518, %cst_157 {dimension_numbers = #tpu.dot_dimension_numbers<[1], [0], [0], [1], [0, 0, 1, 1], [], []>} : vector<128x128xbf16>, vector<128x128xbf16>, vector<128x128xf32> -> vector<128x128xf32>
    %c0_158 = arith.constant 0 : index
    %c0_159 = arith.constant 0 : index
    %520 = vector.load %arg5[%c0_158, %c0_159] : memref<1x128xf32, #tpu.memory_space<vmem>>, vector<1x128xf32>
    %521 = vector.broadcast %520 : vector<1x128xf32> to vector<128x128xf32>
    %522 = arith.addf %519, %521 : vector<128x128xf32>
    %cst_160 = arith.constant dense<0xFF800000> : vector<128xf32>
    %523 = vector.multi_reduction <maximumf>, %522, %cst_160 [1] : vector<128x128xf32> to vector<128xf32>
    %524 = vector.shape_cast %523 : vector<128xf32> to vector<128x1xf32>
    %525 = vector.broadcast %524 : vector<128x1xf32> to vector<128x128xf32>
    %526 = arith.subf %522, %525 : vector<128x128xf32>
    %527 = math.exp %526 : vector<128x128xf32>
    %cst_161 = arith.constant dense<0.000000e+00> : vector<128xf32>
    %528 = vector.multi_reduction <add>, %527, %cst_161 [1] : vector<128x128xf32> to vector<128xf32>
    %529 = vector.shape_cast %528 : vector<128xf32> to vector<128x1xf32>
    %530 = vector.broadcast %529 : vector<128x1xf32> to vector<128x128xf32>
    %531 = arith.divf %527, %530 : vector<128x128xf32>
    %c0_162 = arith.constant 0 : index
    %c0_163 = arith.constant 0 : index
    %532 = vector.load %arg6[%c0_162, %c0_163] : memref<128x128xf32, #tpu.memory_space<vmem>>, vector<128x128xf32>
    tpu.vector_store %arg6[%c0_162, %c0_163], %531 {strides = array<i32>} : memref<128x128xf32, #tpu.memory_space<vmem>>, vector<128x128xf32>,
    return
  }
}

</mosaic_0001>

<bundles_post_ra>
// kernel: tpu_custom_call.1
= control target key start
LH: loop header
LB: loop body
LE: loop exit
PB: predicated region body
PF: predicated region fallthrough
CT: control target
= control target key end

     0   :  { %14 = vsyncpa [#allocation4], 0  ;;  %s9424_s0 = inlined_call_operand.hbm [shape: f32[16,8,512], index: 0, kind: input, shape index: {}]   ;;  %s9425_s1 = inlined_call_operand.hbm [shape: f32[8,128], index: 1, kind: input, shape index: {}]   ;;  %s9426_s2 = inlined_call_operand.hbm [shape: f32[8,128], index: 2, kind: input, shape index: {}]   ;;  %s9427_s3 = inlined_call_operand.hbm [shape: bf16[128,512], index: 3, kind: input, shape index: {}]   ;;  %s9428_s4 = inlined_call_operand.hbm [shape: bf16[128,128], index: 4, kind: input, shape index: {}]   ;;  %s9429_s5 = inlined_call_operand.vmem [shape: f32[1,128], index: 5, kind: input, shape index: {}]   ;;  %s9430_s6 = inlined_call_operand.hbm [shape: f32[128,128], index: 6, kind: output, shape index: {0}]   ;;  %s9431_s7 = inlined_call_operand.hbm [shape: f32[8,128], index: 7, kind: output, shape index: {1}]   ;;  %s9432_s8 = inlined_call_operand.hbm [shape: f32[8,128], index: 8, kind: output, shape index: {2}]  }
   0x1   :  { %15 = vsyncpa [#allocation7], 0 }
   0x2   :  { %16 = vsyncpa [#allocation10], 0 }
   0x3   :  { %17 = vsyncpa [#allocation5], 0  ;;  %s37_s29 = sshll.u32 %s9425_s1, 4  ;;  %s38_s29 = int_to_ptr.hbm [resolvable:$true] %s37_s29 }
   0x4   :  { %18 = vsyncpa [#allocation14], 0  ;;  %s8941_s30 = smov [#allocation6]   ;;  %s58_s12 = sshll.u32 %s9427_s3, 4  ;;  %s59_s12 = int_to_ptr.hbm [resolvable:$true] %s58_s12 }
   0x5   :  { %s39_s9 = sshll.u32 %s8941_s30, 4  ;;  %s8942_s13 = smov [#allocation9]   ;;  %s40_s9 = int_to_ptr.vmem [resolvable:$true] %s39_s9 }
   0x6   :  { %42 = dma.hbm_to_vmem [thread:$0]  %s38_s29, 128, %s40_s9, [#allocation7]  }
   0x7   :  { %s60_s14 = sshll.u32 %s8942_s13, 4  ;;  %s8943_s15 = smov 256   ;;  %s61_s14 = int_to_ptr.vmem [resolvable:$true] %s60_s14 }
   0x8   :  { %s8944_s16 = smov 16   ;;  %s23_s1 = sshll.u32 %s9424_s0, 4  ;;  %s24_s1 = int_to_ptr.hbm [resolvable:$true] %s23_s1 }
   0x9   :  { %66 = dma.hbm_to_vmem [thread:$0]  %s59_s12, 4096, %s61_s14, [#allocation10], %s8943_s15, %s8943_s15, %s8944_s16  }
   0xa   :  { %s8945_s19 = smov [#allocation3]   ;;  %s48_s3 = sshll.u32 %s9426_s2, 4  ;;  %s49_s3 = int_to_ptr.hbm [resolvable:$true] %s48_s3 }
   0xb   :  { %s25_s20 = sshll.u32 %s8945_s19, 4  ;;  %s8946_s23 = smov 512   ;;  %s26_s20 = int_to_ptr.vmem [resolvable:$true] %s25_s20 }
   0xc   :  { %s8947_s24 = smov 32   ;;  %s8948_s25 = smov [#allocation8]  }
   0xd   :  { %31 = dma.hbm_to_vmem [thread:$0]  %s24_s1, 8192, %s26_s20, [#allocation4], %s8946_s23, %s8946_s23, %s8947_s24  }
   0xe   :  { %s50_s26 = sshll.u32 %s8948_s25, 4  ;;  %s71_s29 = sshll.u32 %s9428_s4, 4  ;;  %s51_s26 = int_to_ptr.vmem [resolvable:$true] %s50_s26  ;;  %s72_s29 = int_to_ptr.hbm [resolvable:$true] %s71_s29 }
   0xf   :  { %53 = dma.hbm_to_vmem [thread:$0]  %s49_s3, 128, %s51_s26, [#allocation7]  }
  0x10   :  { %s8949_s0 = smov [#allocation11]   ;;  %s8950_s9 = smov 64  }
  0x11   :  { %s73_s30 = sshll.u32 %s8949_s0, 4  ;;  %s8951_s10 = smov 4   ;;  %s74_s30 = int_to_ptr.vmem [resolvable:$true] %s73_s30 }
  0x12   :  { %79 = dma.hbm_to_vmem [thread:$0]  %s72_s29, 1024, %s74_s30, [#allocation10], %s8950_s9, %s8950_s9, %s8951_s10  }
  0x13   :  { %8931 = dma.done.wait [#allocation4], 8192  }
  0x14   :  { %8932 = vsyncadd [#allocation4], 4294959104 }
  0x15   :  { %8933 = dma.done.wait [#allocation7], 256  }
  0x16   :  { %8934 = vsyncadd [#allocation7], 4294967040 }
  0x17   :  { %8935 = dma.done.wait [#allocation10], 5120  }
  0x18   :  { %8936 = vsyncadd [#allocation10], 4294962176  ;;  %v5868_v0 = vld [vmem:[#allocation9 + $0xe0] sm:$0xf]  ;;  %v7912_v1 = vld [vmem:[#allocation9 + $0xec] sm:$0xf0] }
  0x19   :  { %v5852_v2 = vld [vmem:[#allocation9 + $0xc0] sm:$0xf]  ;;  %v5869_v3 = vor.u32 %v7912_v1, %v5868_v0  ;;  %v7908_v4 = vld [vmem:[#allocation9 + $0xcc] sm:$0xf0]  ;;  %v5876_v5 = vld [vmem:[#allocation9 + $0xe8] sm:$0xf] }
  0x1a   :  { %v5853_v6 = vor.u32 %v7908_v4, %v5852_v2  ;;  %v5836_v7 = vld [vmem:[#allocation9 + $0xa0] sm:$0xf]  ;;  %v7913_v8 = vld [vmem:[#allocation9 + $0xf4] sm:$0xf0]  ;;  %v7904_v9 = vld [vmem:[#allocation9 + $0xac] sm:$0xf0] }
  0x1b   :  { %301 = vmatpush.bf16.msra.mxu1 %v5869_v3  ;;  %v5877_v10 = vor.u32 %v7913_v8, %v5876_v5  ;;  %v5860_v11 = vld [vmem:[#allocation9 + $0xc8] sm:$0xf]  ;;  %v7909_v12 = vld [vmem:[#allocation9 + $0xd4] sm:$0xf0]  ;;  %v7911_v13 = vld [vmem:[#allocation9 + $0xec] sm:$0xf]  ;;  %v5837_v18 = vor.u32 %v7904_v9, %v5836_v7 }
  0x1c   :  { %v5878_v14 = vld [vmem:[#allocation9 + $0xf8] sm:$0xf0]  ;;  %v5861_v15 = vor.u32 %v7909_v12, %v5860_v11  ;;  %v5844_v17 = vld [vmem:[#allocation9 + $0xa8] sm:$0xf]  ;;  %v7905_v19 = vld [vmem:[#allocation9 + $0xb4] sm:$0xf0] }
  0x1d   :  { %327 = vmatpush.bf16.msra.mxu2 %v5877_v10  ;;  %v5881_v16 = vor.u32 %v7911_v13, %v5878_v14  ;;  %v7907_v20 = vld [vmem:[#allocation9 + $0xcc] sm:$0xf]  ;;  %v5862_v21 = vld [vmem:[#allocation9 + $0xd8] sm:$0xf0]  ;;  %v5820_v22 = vld [vmem:[#allocation9 + $0x80] sm:$0xf]  ;;  %v5845_v25 = vor.u32 %v7905_v19, %v5844_v17 }
  0x1e   :  { %v7900_v23 = vld [vmem:[#allocation9 + $0x8c] sm:$0xf0]  ;;  %v5865_v24 = vor.u32 %v7907_v20, %v5862_v21  ;;  %v7903_v26 = vld [vmem:[#allocation9 + $0xac] sm:$0xf]  ;;  %v5846_v27 = vld [vmem:[#allocation9 + $0xb8] sm:$0xf0] }
  0x1f   :  { %302 = vmatpush.bf16.msra.mxu1 %v5853_v6  ;;  %340 = vmatpush.bf16.msra.mxu3 %v5881_v16  ;;  %v5821_v28 = vor.u32 %v7900_v23, %v5820_v22  ;;  %v5828_v29 = vld [vmem:[#allocation9 + $0x88] sm:$0xf]  ;;  %v7901_v30 = vld [vmem:[#allocation9 + $0x94] sm:$0xf0]  ;;  %v5804_v31 = vld [vmem:[#allocation9 + $0x60] sm:$0xf]  ;;  %v5849_v33 = vor.u32 %v7903_v26, %v5846_v27 }
  0x20   :  { %v7896_v32 = vld [vmem:[#allocation9 + $0x6c] sm:$0xf0]  ;;  %v7899_v34 = vld [vmem:[#allocation9 + $0x8c] sm:$0xf]  ;;  %v5830_v35 = vld [vmem:[#allocation9 + $0x98] sm:$0xf0]  ;;  %v5829_v36 = vor.u32 %v7901_v30, %v5828_v29 }
  0x21   :  { %328 = vmatpush.bf16.msra.mxu2 %v5861_v15  ;;  %v5805_v37 = vor.u32 %v7896_v32, %v5804_v31  ;;  %v5812_v38 = vld [vmem:[#allocation9 + $0x68] sm:$0xf]  ;;  %v7897_v39 = vld [vmem:[#allocation9 + $0x74] sm:$0xf0]  ;;  %v5788_v40 = vld [vmem:[#allocation9 + $0x40] sm:$0xf]  ;;  %v5833_v42 = vor.u32 %v7899_v34, %v5830_v35 }
  0x22   :  { %v7892_v41 = vld [vmem:[#allocation9 + $0x4c] sm:$0xf0]  ;;  %v7895_v43 = vld [vmem:[#allocation9 + $0x6c] sm:$0xf]  ;;  %v5814_v44 = vld [vmem:[#allocation9 + $0x78] sm:$0xf0]  ;;  %v5813_v45 = vor.u32 %v7897_v39, %v5812_v38 }
  0x23   :  { %303 = vmatpush.bf16.msra.mxu1 %v5837_v18  ;;  %341 = vmatpush.bf16.msra.mxu3 %v5865_v24  ;;  %v5789_v46 = vor.u32 %v7892_v41, %v5788_v40  ;;  %v5796_v47 = vld [vmem:[#allocation9 + $0x48] sm:$0xf]  ;;  %v7893_v48 = vld [vmem:[#allocation9 + $0x54] sm:$0xf0]  ;;  %v5772_v49 = vld [vmem:[#allocation9 + $0x20] sm:$0xf]  ;;  %v5817_v51 = vor.u32 %v7895_v43, %v5814_v44 }
  0x24   :  { %v7888_v50 = vld [vmem:[#allocation9 + $0x2c] sm:$0xf0]  ;;  %v7891_v52 = vld [vmem:[#allocation9 + $0x4c] sm:$0xf]  ;;  %v5798_v53 = vld [vmem:[#allocation9 + $0x58] sm:$0xf0]  ;;  %v5797_v54 = vor.u32 %v7893_v48, %v5796_v47 }
  0x25   :  { %329 = vmatpush.bf16.msra.mxu2 %v5845_v25  ;;  %v5773_v55 = vor.u32 %v7888_v50, %v5772_v49  ;;  %v5780_v56 = vld [vmem:[#allocation9 + $0x28] sm:$0xf]  ;;  %v7889_v57 = vld [vmem:[#allocation9 + $0x34] sm:$0xf0]  ;;  %v5756_v58 = vld [vmem:[#allocation9] sm:$0xf]  ;;  %v5801_v61 = vor.u32 %v7891_v52, %v5798_v53 }
  0x26   :  { %v7884_v59 = vld [vmem:[#allocation9 + $0xc] sm:$0xf0]  ;;  %v7910_v60 = vld [vmem:[#allocation9 + $0xe4] sm:$0xf]  ;;  %v5870_v62 = vld [vmem:[#allocation9 + $0xf0] sm:$0xf0]  ;;  %v5781_v1 = vor.u32 %v7889_v57, %v5780_v56 }
  0x27   :  { %304 = vmatpush.bf16.msra.mxu1 %v5821_v28  ;;  %342 = vmatpush.bf16.msra.mxu3 %v5849_v33  ;;  %v7887_v63 = vld [vmem:[#allocation9 + $0x2c] sm:$0xf]  ;;  %v5782_v0 = vld [vmem:[#allocation9 + $0x38] sm:$0xf0]  ;;  %v5757_v2 = vor.u32 %v7884_v59, %v5756_v58  ;;  %v102_v3 = vld [vmem:[#allocation6] sm:$0xff]  ;;  %v5873_v6 = vor.u32 %v7910_v60, %v5870_v62  ;;  %s5722_s14 = sshll.u32 %s9431_s7, 4  ;;  %s5723_s14 = int_to_ptr.hbm [resolvable:$true] %s5722_s14 }
  0x28   :  { %v5764_v4 = vld [vmem:[#allocation9 + $0x8] sm:$0xf]  ;;  %v7885_v5 = vld [vmem:[#allocation9 + $0x14] sm:$0xf0]  ;;  %v7906_v7 = vld [vmem:[#allocation9 + $0xc4] sm:$0xf]  ;;  %v5785_v8 = vor.u32 %v7887_v63, %v5782_v0  ;;  %v108_v12 = vpack.c.bf16 %v102_v3, %v102_v3 }
  0x29   :  { %330 = vmatpush.bf16.msra.mxu2 %v5829_v36  ;;  %v5854_v9 = vld [vmem:[#allocation9 + $0xd0] sm:$0xf0]  ;;  %v7883_v10 = vld [vmem:[#allocation9 + $0xc] sm:$0xf]  ;;  %v5766_v11 = vld [vmem:[#allocation9 + $0x18] sm:$0xf0]  ;;  %v5765_v13 = vor.u32 %v7885_v5, %v5764_v4 }
  0x2a   :  { %v5857_v14 = vor.u32 %v7906_v7, %v5854_v9  ;;  %v5769_v15 = vor.u32 %v7883_v10, %v5766_v11  ;;  %v7902_v16 = vld [vmem:[#allocation9 + $0xa4] sm:$0xf]  ;;  %v5838_v17 = vld [vmem:[#allocation9 + $0xb0] sm:$0xf0]  ;;  %v5999_v34 = vld [vmem:[#allocation9 + $0xe0] sm:$0xf] }
  0x2b   :  { %305 = vmatpush.bf16.msra.mxu1 %v5805_v37  ;;  %343 = vmatpush.bf16.msra.mxu3 %v5833_v42  ;;  %v5841_v18 = vor.u32 %v7902_v16, %v5838_v17  ;;  %v7898_v19 = vld [vmem:[#allocation9 + $0x84] sm:$0xf]  ;;  %v5822_v20 = vld [vmem:[#allocation9 + $0x90] sm:$0xf0]  ;;  %v7944_v35 = vld [vmem:[#allocation9 + $0xec] sm:$0xf0] }
  0x2c   :  { %v5825_v21 = vor.u32 %v7898_v19, %v5822_v20  ;;  %v7894_v22 = vld [vmem:[#allocation9 + $0x64] sm:$0xf]  ;;  %v5806_v23 = vld [vmem:[#allocation9 + $0x70] sm:$0xf0]  ;;  %v6000_v36 = vor.u32 %v7944_v35, %v5999_v34  ;;  %v5983_v38 = vld [vmem:[#allocation9 + $0xc0] sm:$0xf] }
  0x2d   :  { %331 = vmatpush.bf16.msra.mxu2 %v5813_v45  ;;  %v5809_v24 = vor.u32 %v7894_v22, %v5806_v23  ;;  %v7890_v25 = vld [vmem:[#allocation9 + $0x44] sm:$0xf]  ;;  %v5790_v26 = vld [vmem:[#allocation9 + $0x50] sm:$0xf0]  ;;  %v7940_v39 = vld [vmem:[#allocation9 + $0xcc] sm:$0xf0] }
  0x2e   :  { %v5793_v27 = vor.u32 %v7890_v25, %v5790_v26  ;;  %v7886_v28 = vld [vmem:[#allocation9 + $0x24] sm:$0xf]  ;;  %v5774_v29 = vld [vmem:[#allocation9 + $0x30] sm:$0xf0]  ;;  %v5984_v40 = vor.u32 %v7940_v39, %v5983_v38  ;;  %v5967_v42 = vld [vmem:[#allocation9 + $0xa0] sm:$0xf] }
  0x2f   :  { %306 = vmatpush.bf16.msra.mxu1 %v5789_v46  ;;  %344 = vmatpush.bf16.msra.mxu3 %v5817_v51  ;;  %v5777_v30 = vor.u32 %v7886_v28, %v5774_v29  ;;  %v7882_v31 = vld [vmem:[#allocation9 + $0x4] sm:$0xf]  ;;  %v5758_v32 = vld [vmem:[#allocation9 + $0x10] sm:$0xf0]  ;;  %v7936_v43 = vld [vmem:[#allocation9 + $0xac] sm:$0xf0] }
  0x30   :  { %v5761_v33 = vor.u32 %v7882_v31, %v5758_v32  ;;  %v104_v41 = vld [vmem:[#allocation3] sm:$0xff]  ;;  %v5968_v44 = vor.u32 %v7936_v43, %v5967_v42  ;;  %v5951_v47 = vld [vmem:[#allocation9 + $0x80] sm:$0xf]  ;;  %v7942_v51 = vld [vmem:[#allocation9 + $0xe4] sm:$0xf]  ;;  %s8953_s7 = smov [#allocation15]  }
  0x31   :  { %332 = vmatpush.bf16.msra.mxu2 %v5797_v54  ;;  %v7932_v48 = vld [vmem:[#allocation9 + $0x8c] sm:$0xf0]  ;;  %v6001_v52 = vld [vmem:[#allocation9 + $0xf0] sm:$0xf0]  ;;  %v7943_v53 = vld [vmem:[#allocation9 + $0xec] sm:$0xf] }
  0x32   :  { %v5952_v50 = vor.u32 %v7932_v48, %v5951_v47  ;;  %v6009_v56 = vld [vmem:[#allocation9 + $0xf8] sm:$0xf0]  ;;  %v5935_v59 = vld [vmem:[#allocation9 + $0x60] sm:$0xf]  ;;  %v7928_v60 = vld [vmem:[#allocation9 + $0x6c] sm:$0xf0] }
  0x33   :  { %307 = vmatpush.bf16.msra.mxu1 %v5773_v55  ;;  %345 = vmatpush.bf16.msra.mxu3 %v5801_v61  ;;  %v6004_v55 = vor.u32 %v7942_v51, %v6001_v52  ;;  %v6012_v58 = vor.u32 %v7943_v53, %v6009_v56  ;;  %v5936_v61 = vor.u32 %v7928_v60, %v5935_v59  ;;  %v7938_v62 = vld [vmem:[#allocation9 + $0xc4] sm:$0xf]  ;;  %v5985_v63 = vld [vmem:[#allocation9 + $0xd0] sm:$0xf0]  ;;  %v7939_v0 = vld [vmem:[#allocation9 + $0xcc] sm:$0xf] }
  0x34   :  { %v107_v4 = vld [vmem:[#allocation3 + $0x18] sm:$0xff]  ;;  %v5919_v5 = vld [vmem:[#allocation9 + $0x40] sm:$0xf]  ;;  %v7934_v9 = vld [vmem:[#allocation9 + $0xa4] sm:$0xf]  ;;  %s5731_s15 = sshll.u32 %s8953_s7, 4  ;;  %s5732_s15 = int_to_ptr.vmem [resolvable:$true] %s5731_s15 }
  0x35   :  { %333 = vmatpush.bf16.msra.mxu2 %v5781_v1  ;;  %v5993_v1 = vld [vmem:[#allocation9 + $0xd8] sm:$0xf0]  ;;  %v5969_v10 = vld [vmem:[#allocation9 + $0xb0] sm:$0xf0]  ;;  %v7935_v11 = vld [vmem:[#allocation9 + $0xac] sm:$0xf] }
  0x36   :  { %v5996_v3 = vor.u32 %v7939_v0, %v5993_v1  ;;  %v7920_v19 = vld [vmem:[#allocation9 + $0x2c] sm:$0xf0]  ;;  %v5953_v22 = vld [vmem:[#allocation9 + $0x90] sm:$0xf0]  ;;  %v7931_v23 = vld [vmem:[#allocation9 + $0x8c] sm:$0xf] }
  0x37   :  { %308 = vmatpush.bf16.msra.mxu1 %v5757_v2  ;;  %346 = vmatpush.bf16.msra.mxu3 %v5785_v8  ;;  %v5988_v2 = vor.u32 %v7938_v62, %v5985_v63  ;;  %v5961_v25 = vld [vmem:[#allocation9 + $0x98] sm:$0xf0]  ;;  %v5887_v29 = vld [vmem:[#allocation9] sm:$0xf]  ;;  %v7926_v32 = vld [vmem:[#allocation9 + $0x64] sm:$0xf] }
  0x38   :  { %v6007_v34 = vld [vmem:[#allocation9 + $0xe8] sm:$0xf]  ;;  %v5945_v38 = vld [vmem:[#allocation9 + $0x78] sm:$0xf0]  ;;  %v7922_v42 = vld [vmem:[#allocation9 + $0x44] sm:$0xf] }
  0x39   :  { %334 = vmatpush.bf16.msra.mxu2 %v5765_v13  ;;  %v5977_v13 = vld [vmem:[#allocation9 + $0xb8] sm:$0xf0]  ;;  %v5921_v43 = vld [vmem:[#allocation9 + $0x50] sm:$0xf0]  ;;  %v7941_v47 = vld [vmem:[#allocation9 + $0xd4] sm:$0xf0] }
  0x3a   :  { %309 = vmatmul.bf16.vlgmr.msra.gmra.mxu1 %v108_v12  ;;  %v105_v39 = vld [vmem:[#allocation3 + $0x8] sm:$0xff]  ;;  %v7923_v48 = vld [vmem:[#allocation9 + $0x4c] sm:$0xf]  ;;  %v5975_v56 = vld [vmem:[#allocation9 + $0xa8] sm:$0xf]  ;;  %s5733_s18 = sshll.u32 %s9432_s8, 4  ;;  %s5734_s18 = int_to_ptr.hbm [resolvable:$true] %s5733_s18 }
  0x3b   :  { %314 = vmatpush.bf16.msrb.mxu1 %v5873_v6  ;;  %347 = vmatpush.bf16.msra.mxu3 %v5769_v15  ;;  %v7924_v6 = vld [vmem:[#allocation9 + $0x4c] sm:$0xf0]  ;;  %v5980_v15 = vor.u32 %v7935_v11, %v5977_v13  ;;  %v5913_v59 = vld [vmem:[#allocation9 + $0x38] sm:$0xf0]  ;;  %v7914_v63 = vld [vmem:[#allocation9 + $0x4] sm:$0xf] }
  0x3c   :  { %335 = vmatmul.bf16.vlgmr.msra.gmra.mxu2 %v108_v12  ;;  %v5920_v8 = vor.u32 %v7924_v6, %v5919_v5  ;;  %v7915_v6 = vld [vmem:[#allocation9 + $0xc] sm:$0xf]  ;;  %s8954_s8 = smov [#allocation12]   ;;  %s5708_s21 = sshll.u32 %s9430_s6, 4  ;;  %s5709_s21 = int_to_ptr.hbm [resolvable:$true] %s5708_s21 }
  0x3d   :  { %619 = vmatpush.bf16.msrb.mxu2 %v6000_v36  ;;  %v7945_v36 = vld [vmem:[#allocation9 + $0xf4] sm:$0xf0]  ;;  %s5706_s1 = sshll.u32 %s8954_s8, 4  ;;  %s8955_s22 = smov 128   ;;  %s5707_s1 = int_to_ptr.vmem [resolvable:$true] %s5706_s1 }
  0x3e   :  { %348 = vmatmul.bf16.vlgmr.msra.gmra.mxu3 %v108_v12  ;;  %s8956_s3 = smov 8  }
  0x3f   :  { %315 = vmatpush.bf16.msrb.mxu1 %v5857_v14  ;;  %658 = vmatpush.bf16.msrb.mxu3 %v6012_v58  ;;  %v7919_v58 = vld [vmem:[#allocation9 + $0x2c] sm:$0xf] }
  0x40   :  { %v5916_v1 = vor.u32 %v7919_v58, %v5913_v59 }
  0x41   :  { %620 = vmatpush.bf16.msrb.mxu2 %v5984_v40  ;;  %v6008_v40 = vor.u32 %v7945_v36, %v6007_v34  ;;  %v7966_v34 = vld [vmem:[#allocation9 + $0xa4] sm:$0xf] }
  0x43   :  { %316 = vmatpush.bf16.msrb.mxu1 %v5841_v18  ;;  %659 = vmatpush.bf16.msrb.mxu3 %v5996_v3  ;;  %v5903_v18 = vld [vmem:[#allocation9 + $0x20] sm:$0xf]  ;;  %v5959_v3 = vld [vmem:[#allocation9 + $0x88] sm:$0xf] }
  0x44   :  { %v5904_v20 = vor.u32 %v7920_v19, %v5903_v18  ;;  %v7929_v18 = vld [vmem:[#allocation9 + $0x74] sm:$0xf0]  ;;  %v106_v19 = vld [vmem:[#allocation3 + $0x10] sm:$0xff] }
  0x45   :  { %621 = vmatpush.bf16.msrb.mxu2 %v5968_v44  ;;  %v5991_v44 = vld [vmem:[#allocation9 + $0xc8] sm:$0xf] }
  0x46   :  { %v5992_v52 = vor.u32 %v7941_v47, %v5991_v44 }
  0x47   :  { %317 = vmatpush.bf16.msrb.mxu1 %v5825_v21  ;;  %660 = vmatpush.bf16.msrb.mxu3 %v5980_v15  ;;  %v7930_v21 = vld [vmem:[#allocation9 + $0x84] sm:$0xf] }
  0x49   :  { %622 = vmatpush.bf16.msrb.mxu2 %v5952_v50  ;;  %v5929_v50 = vld [vmem:[#allocation9 + $0x58] sm:$0xf0] }
  0x4a   :  { %v5932_v53 = vor.u32 %v7923_v48, %v5929_v50  ;;  %v103_v50 = vld [vmem:[#allocation8] sm:$0xff] }
  0x4b   :  { %318 = vmatpush.bf16.msrb.mxu1 %v5809_v24  ;;  %v5956_v24 = vor.u32 %v7930_v21, %v5953_v22  ;;  %v5927_v21 = vld [vmem:[#allocation9 + $0x48] sm:$0xf]  ;;  %v7925_v22 = vld [vmem:[#allocation9 + $0x54] sm:$0xf0] }
  0x4d   :  { %623 = vmatpush.bf16.msrb.mxu2 %v5936_v61 }
  0x4f   :  { %319 = vmatpush.bf16.msrb.mxu1 %v5793_v27  ;;  %v5964_v27 = vor.u32 %v7931_v23, %v5961_v25 }
  0x51   :  { %624 = vmatpush.bf16.msrb.mxu2 %v5920_v8  ;;  %661 = vmatpush.bf16.msrb.mxu3 %v5964_v27  ;;  %v5911_v27 = vld [vmem:[#allocation9 + $0x28] sm:$0xf] }
  0x53   :  { %320 = vmatpush.bf16.msrb.mxu1 %v5777_v30  ;;  %v7916_v30 = vld [vmem:[#allocation9 + $0xc] sm:$0xf0] }
  0x54   :  { %v5888_v31 = vor.u32 %v7916_v30, %v5887_v29 }
  0x55   :  { %625 = vmatpush.bf16.msrb.mxu2 %v5904_v20 }
  0x57   :  { %321 = vmatpush.bf16.msrb.mxu1 %v5761_v33  ;;  %v5937_v33 = vld [vmem:[#allocation9 + $0x70] sm:$0xf0] }
  0x58   :  { %v5940_v35 = vor.u32 %v7926_v32, %v5937_v33 }
  0x59   :  { %626 = vmatpush.bf16.msrb.mxu2 %v5888_v31 }
  0x5a   :  { %322 = vmatmul.bf16.vlgmr.msrb.gmra.mxu1 %v108_v12  ;;  %v5972_v12 = vor.u32 %v7934_v9, %v5969_v10 }
  0x5b   :  { %632 = vmatpush.bf16.msra.mxu1 %v6004_v55  ;;  %v5905_v55 = vld [vmem:[#allocation9 + $0x30] sm:$0xf0] }
  0x5d   :  { %645 = vmatpush.bf16.msra.mxu2 %v6008_v40 }
  0x5f   :  { %633 = vmatpush.bf16.msra.mxu1 %v5988_v2  ;;  %v5889_v2 = vld [vmem:[#allocation9 + $0x10] sm:$0xf0] }
  0x60   :  { %v5892_v10 = vor.u32 %v7914_v63, %v5889_v2 }
  0x61   :  { %646 = vmatpush.bf16.msra.mxu2 %v5992_v52 }
  0x63   :  { %634 = vmatpush.bf16.msra.mxu1 %v5972_v12 }
  0x67   :  { %635 = vmatpush.bf16.msra.mxu1 %v5956_v24  ;;  %v5928_v24 = vor.u32 %v7925_v22, %v5927_v21  ;;  %v6066_v21 = vld [vmem:[#allocation9 + $0x60] sm:$0xf]  ;;  %v7960_v22 = vld [vmem:[#allocation9 + $0x6c] sm:$0xf0] }
  0x6b   :  { %636 = vmatpush.bf16.msra.mxu1 %v5940_v35 }
  0xb7   :  { %v310_v37 = vpop.f32.mrf.mxu1 }
  0xb8   :  { %v353_v45 = vadd.f32 %v310_v37, %v104_v41  ;;  %v7927_v37 = vld [vmem:[#allocation9 + $0x6c] sm:$0xf] }
  0xb9   :  { %v5948_v41 = vor.u32 %v7927_v37, %v5945_v38  ;;  %v5895_v37 = vld [vmem:[#allocation9 + $0x8] sm:$0xf]  ;;  %v7917_v38 = vld [vmem:[#allocation9 + $0x14] sm:$0xf0] }
  0xba   :  { %v5882_v54 = vmul.f32 -1.442695, %v353_v45  ;;  %v5896_v44 = vor.u32 %v7917_v38, %v5895_v37  ;;  %v7969_v37 = vld [vmem:[#allocation9 + $0xb4] sm:$0xf0] }
  0xbb   :  { %662 = vmatpush.bf16.msrb.mxu3 %v5948_v41 }
  0xbc   :  { %8419 = vpow2.f32 %v5882_v54  ;;  %v7918_v54 = vld [vmem:[#allocation9 + $0x24] sm:$0xf] }
  0xbd   :  { %v5908_v61 = vor.u32 %v7918_v54, %v5905_v55 }
  0xbf   :  { %v312_v46 = vpop.f32.mrf.mxu1  ;;  %v9017_v49 = vpop.f32.mrf.mxu2  ;;  %663 = vmatpush.bf16.msrb.mxu3 %v5932_v53 }
  0xc0   :  { %v5924_v46 = vor.u32 %v7922_v42, %v5921_v43  ;;  %v355_v25 = vadd.f32 %v9017_v49, %v106_v19  ;;  %v7977_v19 = vld [vmem:[#allocation9 + $0xf4] sm:$0xf0] }
  0xc1   :  { %v349_v57 = vpop.f32.mrf.mxu3 }
  0xc2   :  { %v8420_v16 = vpop.eup %8419  ;;  %v356_v17 = vadd.f32 %v349_v57, %v107_v4  ;;  %v7937_v57 = vld [vmem:[#allocation9 + $0xb4] sm:$0xf0]  ;;  %637 = vmatpush.bf16.msra.mxu1 %v5924_v46 }
  0xc3   :  { %v9019_v26 = vadd.f32 1.0, %v8420_v16  ;;  %v5976_v62 = vor.u32 %v7937_v57, %v5975_v56  ;;  %v7933_v4 = vld [vmem:[#allocation9 + $0x94] sm:$0xf0]  ;;  %664 = vmatpush.bf16.msrb.mxu3 %v5916_v1 }
  0xc4   :  { %v5884_v28 = vmul.f32 -1.442695, %v356_v17  ;;  %v5960_v11 = vor.u32 %v7933_v4, %v5959_v3  ;;  %v5943_v17 = vld [vmem:[#allocation9 + $0x68] sm:$0xf]  ;;  %v6130_v3 = vld [vmem:[#allocation9 + $0xe0] sm:$0xf] }
  0xc5   :  { %8421 = vrcp.f32 %v9019_v26  ;;  %647 = vmatpush.bf16.msra.mxu2 %v5976_v62  ;;  %v5944_v20 = vor.u32 %v7929_v18, %v5943_v17  ;;  %vm366_vm0 = vweird.f32 %v9019_v26  ;;  %v370_v32 = vand.u32 2147483647, %v9019_v26  ;;  %v7976_v4 = vld [vmem:[#allocation9 + $0xec] sm:$0xf0]  ;;  %v6138_v17 = vld [vmem:[#allocation9 + $0xe8] sm:$0xf] }
  0xc6   :  { %8423 = vpow2.f32 %v5884_v28  ;;  %638 = vmatpush.bf16.msra.mxu1 %v5908_v61  ;;  %v7921_v28 = vld [vmem:[#allocation9 + $0x34] sm:$0xf0]  ;;  %v372_v33 = vand.u32 2147483648, %v9019_v26 }
  0xc7   :  { %v338_v7 = vpop.f32.mrf.mxu2  ;;  %v5912_v49 = vor.u32 %v7921_v28, %v5911_v27  ;;  %vm371_vm3 = vcmp.eq.f32.partialorder %v370_v32, 8.507059e+37  ;;  %v6122_v28 = vld [vmem:[#allocation9 + $0xc8] sm:$0xf]  ;;  %v7956_v32 = vld [vmem:[#allocation9 + $0x4c] sm:$0xf0] }
  0xc8   :  { %v5897_v7 = vld [vmem:[#allocation9 + $0x18] sm:$0xf0]  ;;  %v373_v41 = vor.u32 1.1754944e-38, %v372_v33 }
  0xc9   :  { %v351_v14 = vpop.f32.mrf.mxu3  ;;  %v5900_v13 = vor.u32 %v7915_v6, %v5897_v7  ;;  %648 = vmatpush.bf16.msra.mxu2 %v5960_v11  ;;  %v6114_v6 = vld [vmem:[#allocation9 + $0xc0] sm:$0xf]  ;;  %v7972_v7 = vld [vmem:[#allocation9 + $0xcc] sm:$0xf0] }
  0xca   :  { %639 = vmatpush.bf16.msra.mxu1 %v5892_v10  ;;  %v7968_v10 = vld [vmem:[#allocation9 + $0xac] sm:$0xf0] }
  0xcb   :  { %v9022_v0 = vpop.eup %8421  ;;  %665 = vmatpush.bf16.msrb.mxu3 %v5900_v13  ;;  %v7964_v13 = vld [vmem:[#allocation9 + $0x8c] sm:$0xf0] }
  0xcc   :  { %v8424_v5 = vpop.eup %8423  ;;  %v362_v8 = vmul.f32 %v9022_v0, %v9019_v26  ;;  %vm367_vm1 = vweird.f32 %v9022_v0 }
  0xcd   :  { %v9026_v12 = vadd.f32 1.0, %v8424_v5  ;;  %649 = vmatpush.bf16.msra.mxu2 %v5944_v20  ;;  %vm9036_vm2 = vmor %vm366_vm0, %vm367_vm1  ;;  %v6131_v5 = vor.u32 %v7976_v4, %v6130_v3  ;;  %v6139_v20 = vor.u32 %v7977_v19, %v6138_v17  ;;  %v7950_v19 = vld [vmem:[#allocation9 + $0x24] sm:$0xf] }
  0xce   :  { %v363_v15 = vsub.f32 1.0, %v362_v8  ;;  %v6115_v8 = vor.u32 %v7972_v7, %v6114_v6  ;;  %v7954_v7 = vld [vmem:[#allocation9 + $0x44] sm:$0xf] }
  0xcf   :  { %vm405_vm8 = vweird.f32 %v9026_v12  ;;  %v411_v57 = vand.u32 2147483648, %v9026_v12  ;;  %937 = vmatpush.bf16.msra.mxu3 %v6131_v5 }
  0xd0   :  { %v364_v23 = vmul.f32 %v9022_v0, %v363_v15  ;;  %v7974_v15 = vld [vmem:[#allocation9 + $0xe4] sm:$0xf] }
  0xd1   :  { %650 = vmatpush.bf16.msra.mxu2 %v5928_v24  ;;  %v412_v61 = vor.u32 1.1754944e-38, %v411_v57  ;;  %v7970_v24 = vld [vmem:[#allocation9 + $0xc4] sm:$0xf]  ;;  %v6068_v57 = vld [vmem:[#allocation9 + $0x70] sm:$0xf0] }
  0xd2   :  { %v365_v31 = vadd.f32 %v9022_v0, %v364_v23  ;;  %v6067_v23 = vor.u32 %v7960_v22, %v6066_v21 }
  0xd3   :  { %938 = vmatpush.bf16.msra.mxu3 %v6115_v8  ;;  %v6052_v8 = vld [vmem:[#allocation9 + $0x50] sm:$0xf0] }
  0xd4   :  { %v369_v40 = vsel %vm9036_vm2, %v9022_v0, %v365_v31  ;;  %v6050_v31 = vld [vmem:[#allocation9 + $0x40] sm:$0xf] }
  0xd5   :  { %651 = vmatpush.bf16.msra.mxu2 %v5912_v49  ;;  %v374_v48 = vsel %vm371_vm3, %v373_v41, %v369_v40  ;;  %v6051_v33 = vor.u32 %v7956_v32, %v6050_v31  ;;  %v6106_v49 = vld [vmem:[#allocation9 + $0xa8] sm:$0xf]  ;;  %v6034_v40 = vld [vmem:[#allocation9 + $0x20] sm:$0xf]  ;;  %v7952_v41 = vld [vmem:[#allocation9 + $0x2c] sm:$0xf0] }
  0xd6   :  { %v6107_v38 = vor.u32 %v7969_v37, %v6106_v49  ;;  %v7963_v49 = vld [vmem:[#allocation9 + $0x8c] sm:$0xf] }
  0xd7   :  { %v323_v45 = vpop.f32.mrf.mxu1 }
  0xd8   :  { %v354_v51 = vadd.f32 %v323_v45, %v105_v39 }
  0xd9   :  { %652 = vmatpush.bf16.msra.mxu2 %v5896_v44  ;;  %v6090_v44 = vld [vmem:[#allocation9 + $0x88] sm:$0xf] }
  0xda   :  { %v5883_v60 = vmul.f32 -1.442695, %v354_v51 }
  0xdc   :  { %8425 = vpow2.f32 %v5883_v60  ;;  %v409_v60 = vand.u32 2147483647, %v9026_v12 }
  0xdd   :  { %8427 = vrcp.f32 %v9026_v12 }
  0xde   :  { %vm410_vm11 = vcmp.eq.f32.partialorder %v409_v60, 8.507059e+37  ;;  %v6074_v60 = vld [vmem:[#allocation9 + $0x68] sm:$0xf] }
  0xdf   :  { %v325_v9 = vpop.f32.mrf.mxu1 }
  0xe0   :  { %v6098_v9 = vld [vmem:[#allocation9 + $0xa0] sm:$0xf] }
  0xe1   :  { %v6099_v11 = vor.u32 %v7968_v10, %v6098_v9  ;;  %v6058_v9 = vld [vmem:[#allocation9 + $0x48] sm:$0xf] }
  0xe2   :  { %v8426_v14 = vpop.eup %8425 }
  0xe3   :  { %v379_v16 = vadd.f32 1.0, %v8426_v14  ;;  %v8428_v29 = vpop.eup %8427  ;;  %939 = vmatpush.bf16.msra.mxu3 %v6099_v11 }
  0xe4   :  { %v401_v36 = vmul.f32 %v8428_v29, %v9026_v12  ;;  %vm406_vm9 = vweird.f32 %v8428_v29  ;;  %v6082_v12 = vld [vmem:[#allocation9 + $0x80] sm:$0xf] }
  0xe5   :  { %8429 = vrcp.f32 %v379_v16  ;;  %v391_v26 = vand.u32 2147483648, %v379_v16  ;;  %v389_v43 = vand.u32 2147483647, %v379_v16  ;;  %vm385_vm5 = vweird.f32 %v379_v16  ;;  %vm407_vm10 = vmor %vm405_vm8, %vm406_vm9 }
  0xe6   :  { %8431 = vtanh.f32 %v355_v25  ;;  %v402_v45 = vsub.f32 1.0, %v401_v36  ;;  %v6083_v14 = vor.u32 %v7964_v13, %v6082_v12  ;;  %v6116_v25 = vld [vmem:[#allocation9 + $0xd0] sm:$0xf0]  ;;  %v6055_v12 = vor.u32 %v7954_v7, %v6052_v8  ;;  %v7957_v13 = vld [vmem:[#allocation9 + $0x54] sm:$0xf0] }
  0xe7   :  { %v392_v51 = vor.u32 1.1754944e-38, %v391_v26  ;;  %vm390_vm7 = vcmp.eq.f32.partialorder %v389_v43, 8.507059e+37  ;;  %v6119_v27 = vor.u32 %v7970_v24, %v6116_v25  ;;  %v6035_v26 = vor.u32 %v7952_v41, %v6034_v40  ;;  %v6084_v43 = vld [vmem:[#allocation9 + $0x90] sm:$0xf0]  ;;  %v7953_v24 = vld [vmem:[#allocation9 + $0x34] sm:$0xf0] }
  0xe8   :  { %v403_v53 = vmul.f32 %v8428_v29, %v402_v45  ;;  %940 = vmatpush.bf16.msra.mxu3 %v6083_v14  ;;  %v7971_v14 = vld [vmem:[#allocation9 + $0xcc] sm:$0xf]  ;;  %v6059_v17 = vor.u32 %v7957_v13, %v6058_v9  ;;  %v8001_v8 = vld [vmem:[#allocation9 + $0xb4] sm:$0xf0] }
  0xea   :  { %v404_v59 = vadd.f32 %v8428_v29, %v403_v53  ;;  %v7948_v53 = vld [vmem:[#allocation9 + $0xc] sm:$0xf0] }
  0xeb   :  { %v8430_v30 = vpop.eup %8429 }
  0xec   :  { %v381_v35 = vmul.f32 %v8430_v30, %v379_v16  ;;  %vm386_vm4 = vweird.f32 %v8430_v30  ;;  %v8432_v47 = vpop.eup %8431  ;;  %v408_v62 = vsel %vm407_vm10, %v8428_v29, %v404_v59  ;;  %v6132_v16 = vld [vmem:[#allocation9 + $0xf0] sm:$0xf0]  ;;  %v7973_v29 = vld [vmem:[#allocation9 + $0xd4] sm:$0xf0]  ;;  %941 = vmatpush.bf16.msra.mxu3 %v6067_v23  ;;  %v6042_v23 = vld [vmem:[#allocation9 + $0x28] sm:$0xf] }
  0xed   :  { %vm387_vm6 = vmor %vm385_vm5, %vm386_vm4  ;;  %v416_v55 = vmul.f32 %v8432_v47, %v374_v48  ;;  %v413_v0 = vsel %vm410_vm11, %v412_v61, %v408_v62  ;;  %v6135_v18 = vor.u32 %v7974_v15, %v6132_v16  ;;  %v7965_v47 = vld [vmem:[#allocation9 + $0x94] sm:$0xf0]  ;;  %v7975_v62 = vld [vmem:[#allocation9 + $0xec] sm:$0xf] }
  0xee   :  { %v382_v39 = vsub.f32 1.0, %v381_v35  ;;  %v6100_v35 = vld [vmem:[#allocation9 + $0xb0] sm:$0xf0]  ;;  %v7961_v61 = vld [vmem:[#allocation9 + $0x74] sm:$0xf0] }
  0xef   :  { %950 = vmatpush.bf16.msrb.mxu1 %v6135_v18  ;;  %v6103_v36 = vor.u32 %v7966_v34, %v6100_v35  ;;  %v6124_v15 = vld [vmem:[#allocation9 + $0xd8] sm:$0xf0]  ;;  %v6026_v34 = vld [vmem:[#allocation9 + $0x8] sm:$0xf]  ;;  %v7949_v35 = vld [vmem:[#allocation9 + $0x14] sm:$0xf0] }
  0xf0   :  { %v383_v42 = vmul.f32 %v8430_v30, %v382_v39  ;;  %942 = vmatpush.bf16.msra.mxu3 %v6051_v33  ;;  %v423_v39 = vld [vmem:[#allocation3 + $0x28] sm:$0xff]  ;;  %v6127_v18 = vor.u32 %v7971_v14, %v6124_v15  ;;  %v6020_v33 = vld [vmem:[#allocation9 + $0x10] sm:$0xf0]  ;;  %v6027_v40 = vor.u32 %v7949_v35, %v6026_v34 }
  0xf2   :  { %v384_v46 = vadd.f32 %v8430_v30, %v383_v42  ;;  %v7962_v42 = vld [vmem:[#allocation9 + $0x84] sm:$0xf] }
  0xf3   :  { %951 = vmatpush.bf16.msrb.mxu1 %v6119_v27  ;;  %v6043_v27 = vor.u32 %v7953_v24, %v6042_v23 }
  0xf4   :  { %v388_v52 = vsel %vm387_vm6, %v8430_v30, %v384_v46  ;;  %v6123_v30 = vor.u32 %v7973_v29, %v6122_v28  ;;  %v6087_v46 = vor.u32 %v7962_v42, %v6084_v43  ;;  %943 = vmatpush.bf16.msra.mxu3 %v6035_v26  ;;  %v7967_v28 = vld [vmem:[#allocation9 + $0xac] sm:$0xf]  ;;  %v6108_v29 = vld [vmem:[#allocation9 + $0xb8] sm:$0xf0] }
  0xf5   :  { %v393_v54 = vsel %vm390_vm7, %v392_v51, %v388_v52  ;;  %v422_v51 = vld [vmem:[#allocation3 + $0x20] sm:$0xff]  ;;  %v6018_v52 = vld [vmem:[#allocation9] sm:$0xf]  ;;  %v6111_v32 = vor.u32 %v7967_v28, %v6108_v29 }
  0xf6   :  { %v415_v56 = vmul.f32 %v393_v54, %v103_v50  ;;  %v6091_v50 = vor.u32 %v7965_v47, %v6090_v44 }
  0xf7   :  { %952 = vmatpush.bf16.msrb.mxu1 %v6103_v36  ;;  %v6092_v36 = vld [vmem:[#allocation9 + $0x98] sm:$0xf0] }
  0xf8   :  { %v9046_v58 = vadd.f32 %v416_v55, %v415_v56  ;;  %v6019_v55 = vor.u32 %v7948_v53, %v6018_v52  ;;  %v7958_v56 = vld [vmem:[#allocation9 + $0x64] sm:$0xf]  ;;  %v6095_v41 = vor.u32 %v7963_v49, %v6092_v36  ;;  %v6060_v52 = vld [vmem:[#allocation9 + $0x58] sm:$0xf0] }
  0xf9   :  { %v6071_v59 = vor.u32 %v7958_v56, %v6068_v57 }
  0xfa   :  { %8433 = vtanh.f32 %v9046_v58  ;;  %944 = vmatpush.bf16.msra.mxu3 %v6019_v55 }
  0xfb   :  { %953 = vmatpush.bf16.msrb.mxu1 %v6087_v46  ;;  %v7959_v46 = vld [vmem:[#allocation9 + $0x6c] sm:$0xf] }
  0xff   :  { %954 = vmatpush.bf16.msrb.mxu1 %v6071_v59 }
 0x100   :  { %v8434_v63 = vpop.eup %8433 }
 0x101   :  { %v9050_v1 = vmul.f32 %v8434_v63, %v413_v0  ;;  %v425_v63 = vld [vmem:[#allocation3 + $0x38] sm:$0xff]  ;;  %v6075_v0 = vor.u32 %v7961_v61, %v6074_v60 }
 0x102   :  { %v7951_v61 = vld [vmem:[#allocation9 + $0x2c] sm:$0xf] }
 0x103   :  { %v426_v2 = vpack.c.bf16 %v9050_v1, %v9050_v1  ;;  %955 = vmatpush.bf16.msrb.mxu1 %v6055_v12  ;;  %v6028_v12 = vld [vmem:[#allocation9 + $0x18] sm:$0xf0] }
 0x105   :  { %627 = vmatmul.bf16.vlgmr.msrb.gmra.mxu2 %v426_v2  ;;  %640 = vmatmul.bf16.vlgmr.msra.gmra.mxu1 %v426_v2 }
 0x106   :  { %666 = vmatmul.bf16.vlgmr.msrb.gmra.mxu3 %v426_v2  ;;  %963 = vmatpush.bf16.msrb.mxu2 %v6139_v20  ;;  %v6036_v20 = vld [vmem:[#allocation9 + $0x30] sm:$0xf0] }
 0x107   :  { %v6039_v22 = vor.u32 %v7950_v19, %v6036_v20 }
 0x109   :  { %956 = vmatpush.bf16.msrb.mxu1 %v6039_v22 }
 0x10a   :  { %964 = vmatpush.bf16.msrb.mxu2 %v6123_v30  ;;  %v7946_v30 = vld [vmem:[#allocation9 + $0x4] sm:$0xf] }
 0x10e   :  { %965 = vmatpush.bf16.msrb.mxu2 %v6107_v38  ;;  %v6023_v38 = vor.u32 %v7946_v30, %v6020_v33 }
 0x110   :  { %957 = vmatpush.bf16.msrb.mxu1 %v6023_v38  ;;  %v8008_v38 = vld [vmem:[#allocation9 + $0xec] sm:$0xf0] }
 0x112   :  { %966 = vmatpush.bf16.msrb.mxu2 %v6091_v50 }
 0x115   :  { %653 = vmatmul.bf16.vlgmr.msra.gmra.mxu2 %v426_v2  ;;  %v6140_v2 = vld [vmem:[#allocation9 + $0xf8] sm:$0xf0] }
 0x116   :  { %v6143_v4 = vor.u32 %v7975_v62, %v6140_v2  ;;  %967 = vmatpush.bf16.msrb.mxu2 %v6075_v0  ;;  %v6044_v62 = vld [vmem:[#allocation9 + $0x38] sm:$0xf0] }
 0x117   :  { %v6047_v7 = vor.u32 %v7951_v61, %v6044_v62  ;;  %v6255_v61 = vld [vmem:[#allocation9 + $0xd8] sm:$0xf0] }
 0x118   :  { %976 = vmatpush.bf16.msrb.mxu3 %v6143_v4 }
 0x11a   :  { %968 = vmatpush.bf16.msrb.mxu2 %v6059_v17 }
 0x11c   :  { %977 = vmatpush.bf16.msrb.mxu3 %v6127_v18 }
 0x11e   :  { %969 = vmatpush.bf16.msrb.mxu2 %v6043_v27 }
 0x120   :  { %978 = vmatpush.bf16.msrb.mxu3 %v6111_v32 }
 0x122   :  { %970 = vmatpush.bf16.msrb.mxu2 %v6027_v40 }
 0x124   :  { %979 = vmatpush.bf16.msrb.mxu3 %v6095_v41  ;;  %v6263_v41 = vld [vmem:[#allocation9 + $0xf0] sm:$0xf0] }
 0x182   :  { %v641_v45 = vpop.f32.mrf.mxu1 }
 0x183   :  { %v672_v48 = vadd.f32 %v641_v45, %v423_v39 }
 0x185   :  { %v6014_v54 = vmul.f32 -1.442695, %v672_v48  ;;  %v6076_v48 = vld [vmem:[#allocation9 + $0x78] sm:$0xf0] }
 0x186   :  { %v6079_v55 = vor.u32 %v7959_v46, %v6076_v48  ;;  %v6271_v46 = vld [vmem:[#allocation9 + $0xf8] sm:$0xf0] }
 0x187   :  { %8435 = vpow2.f32 %v6014_v54  ;;  %v424_v54 = vld [vmem:[#allocation3 + $0x30] sm:$0xff] }
 0x188   :  { %v628_v3 = vpop.f32.mrf.mxu2  ;;  %980 = vmatpush.bf16.msrb.mxu3 %v6079_v55  ;;  %v6253_v55 = vld [vmem:[#allocation9 + $0xc8] sm:$0xf] }
 0x189   :  { %v671_v5 = vadd.f32 %v628_v3, %v422_v51  ;;  %v667_v6 = vpop.f32.mrf.mxu3  ;;  %v7955_v51 = vld [vmem:[#allocation9 + $0x4c] sm:$0xf] }
 0x18a   :  { %v674_v10 = vadd.f32 %v667_v6, %v425_v63  ;;  %v643_v11 = vpop.f32.mrf.mxu1  ;;  %v6063_v57 = vor.u32 %v7955_v51, %v6060_v52  ;;  %v8004_v51 = vld [vmem:[#allocation9 + $0xcc] sm:$0xf0]  ;;  %v8002_v52 = vld [vmem:[#allocation9 + $0xc4] sm:$0xf] }
 0x18b   :  { %v6013_v16 = vmul.f32 -1.442695, %v671_v5  ;;  %v7947_v11 = vld [vmem:[#allocation9 + $0xc] sm:$0xf] }
 0x18c   :  { %v6015_v21 = vmul.f32 -1.442695, %v674_v10  ;;  %981 = vmatpush.bf16.msrb.mxu3 %v6063_v57  ;;  %v6031_v19 = vor.u32 %v7947_v11, %v6028_v12  ;;  %v7999_v12 = vld [vmem:[#allocation9 + $0xac] sm:$0xf] }
 0x18d   :  { %v8436_v25 = vpop.eup %8435  ;;  %8437 = vpow2.f32 %v6013_v16 }
 0x18e   :  { %v9054_v31 = vadd.f32 1.0, %v8436_v25  ;;  %8439 = vpow2.f32 %v6015_v21 }
 0x190   :  { %8441 = vrcp.f32 %v9054_v31  ;;  %v630_v37 = vpop.f32.mrf.mxu2  ;;  %v709_v3 = vand.u32 2147483648, %v9054_v31  ;;  %vm703_vm13 = vweird.f32 %v9054_v31  ;;  %v707_v6 = vand.u32 2147483647, %v9054_v31  ;;  %982 = vmatpush.bf16.msrb.mxu3 %v6047_v7  ;;  %v6237_v7 = vld [vmem:[#allocation9 + $0xa8] sm:$0xf] }
 0x191   :  { %v669_v39 = vpop.f32.mrf.mxu3  ;;  %v6261_v37 = vld [vmem:[#allocation9 + $0xe0] sm:$0xf]  ;;  %v6238_v11 = vor.u32 %v8001_v8, %v6237_v7  ;;  %v6173_v8 = vld [vmem:[#allocation9 + $0x28] sm:$0xf] }
 0x192   :  { %v710_v16 = vor.u32 1.1754944e-38, %v709_v3  ;;  %vm708_vm1 = vcmp.eq.f32.partialorder %v707_v6, 8.507059e+37  ;;  %v8006_v39 = vld [vmem:[#allocation9 + $0xe4] sm:$0xf]  ;;  %v6262_v40 = vor.u32 %v8008_v38, %v6261_v37  ;;  %v8000_v3 = vld [vmem:[#allocation9 + $0xac] sm:$0xf0] }
 0x193   :  { %v8438_v26 = vpop.eup %8437  ;;  %v6231_v6 = vld [vmem:[#allocation9 + $0xb0] sm:$0xf0]  ;;  %v7990_v37 = vld [vmem:[#allocation9 + $0x64] sm:$0xf] }
 0x194   :  { %v8440_v42 = vpop.eup %8439  ;;  %v678_v43 = vadd.f32 1.0, %v8438_v26  ;;  %983 = vmatpush.bf16.msrb.mxu3 %v6031_v19  ;;  %v6269_v26 = vld [vmem:[#allocation9 + $0xe8] sm:$0xf]  ;;  %1255 = vmatpush.bf16.msra.mxu0 %v6262_v40  ;;  %v6199_v38 = vld [vmem:[#allocation9 + $0x70] sm:$0xf0] }
 0x195   :  { %v9057_v44 = vadd.f32 1.0, %v8440_v42  ;;  %v8009_v42 = vld [vmem:[#allocation9 + $0xf4] sm:$0xf0] }
 0x196   :  { %v8442_v45 = vpop.eup %8441  ;;  %8443 = vrcp.f32 %v678_v43  ;;  %v690_v9 = vand.u32 2147483648, %v678_v43  ;;  %v688_v14 = vand.u32 2147483647, %v678_v43  ;;  %vm684_vm0 = vweird.f32 %v678_v43 }
 0x197   :  { %v699_v47 = vmul.f32 %v8442_v45, %v9054_v31  ;;  %8445 = vrcp.f32 %v9057_v44  ;;  %vm704_vm12 = vweird.f32 %v8442_v45  ;;  %v729_v31 = vand.u32 2147483648, %v9057_v44 }
 0x198   :  { %v654_v50 = vpop.f32.mrf.mxu2  ;;  %vm9065_vm14 = vmor %vm703_vm13, %vm704_vm12  ;;  %v691_v20 = vor.u32 1.1754944e-38, %v690_v9  ;;  %vm689_vm3 = vcmp.eq.f32.partialorder %v688_v14, 8.507059e+37  ;;  %vm723_vm5 = vweird.f32 %v9057_v44  ;;  %v727_v32 = vand.u32 2147483647, %v9057_v44  ;;  %v740_v14 = vld [vmem:[#allocation3 + $0x40] sm:$0xff] }
 0x199   :  { %v700_v53 = vsub.f32 1.0, %v699_v47  ;;  %v673_v60 = vadd.f32 %v654_v50, %v424_v54  ;;  %v730_v34 = vor.u32 1.1754944e-38, %v729_v31  ;;  %v741_v47 = vld [vmem:[#allocation3 + $0x48] sm:$0xff]  ;;  %v6245_v50 = vld [vmem:[#allocation9 + $0xc0] sm:$0xf] }
 0x19a   :  { %vm728_vm7 = vcmp.eq.f32.partialorder %v727_v32, 8.507059e+37  ;;  %v6247_v54 = vld [vmem:[#allocation9 + $0xd0] sm:$0xf0]  ;;  %v6223_v31 = vld [vmem:[#allocation9 + $0x98] sm:$0xf0] }
 0x19b   :  { %v701_v56 = vmul.f32 %v8442_v45, %v700_v53  ;;  %8447 = vtanh.f32 %v673_v60  ;;  %v6246_v53 = vor.u32 %v8004_v51, %v6245_v50  ;;  %v6250_v57 = vor.u32 %v8002_v52, %v6247_v54  ;;  %v8003_v60 = vld [vmem:[#allocation9 + $0xcc] sm:$0xf]  ;;  %v7986_v50 = vld [vmem:[#allocation9 + $0x44] sm:$0xf]  ;;  %v6183_v52 = vld [vmem:[#allocation9 + $0x50] sm:$0xf0] }
 0x19c   :  { %v8444_v59 = vpop.eup %8443 }
 0x19d   :  { %v8446_v63 = vpop.eup %8445  ;;  %v680_v0 = vmul.f32 %v8444_v59, %v678_v43  ;;  %v702_v2 = vadd.f32 %v8442_v45, %v701_v56  ;;  %vm685_vm15 = vweird.f32 %v8444_v59  ;;  %v6266_v43 = vor.u32 %v8006_v39, %v6263_v41  ;;  %v8005_v56 = vld [vmem:[#allocation9 + $0xd4] sm:$0xf0]  ;;  %1256 = vmatpush.bf16.msra.mxu0 %v6246_v53  ;;  %v6205_v39 = vld [vmem:[#allocation9 + $0x68] sm:$0xf] }
 0x19e   :  { %v719_v4 = vmul.f32 %v8446_v63, %v9057_v44  ;;  %vm686_vm2 = vmor %vm684_vm0, %vm685_vm15  ;;  %vm724_vm4 = vweird.f32 %v8446_v63  ;;  %v6270_v44 = vor.u32 %v8009_v42, %v6269_v26  ;;  %v6202_v41 = vor.u32 %v7990_v37, %v6199_v38  ;;  %v7993_v26 = vld [vmem:[#allocation9 + $0x74] sm:$0xf0]  ;;  %v7991_v42 = vld [vmem:[#allocation9 + $0x6c] sm:$0xf] }
 0x19f   :  { %v681_v5 = vsub.f32 1.0, %v680_v0  ;;  %v706_v15 = vsel %vm9065_vm14, %v8442_v45, %v702_v2  ;;  %vm725_vm6 = vmor %vm723_vm5, %vm724_vm4  ;;  %v8007_v45 = vld [vmem:[#allocation9 + $0xec] sm:$0xf]  ;;  %1268 = vmatpush.bf16.msra.mxu1 %v6266_v43  ;;  %v6229_v2 = vld [vmem:[#allocation9 + $0xa0] sm:$0xf] }
 0x1a0   :  { %v656_v10 = vpop.f32.mrf.mxu2  ;;  %v720_v17 = vsub.f32 1.0, %v719_v4  ;;  %v711_v21 = vsel %vm708_vm1, %v710_v16, %v706_v15  ;;  %v6274_v48 = vor.u32 %v8007_v45, %v6271_v46  ;;  %1281 = vmatpush.bf16.msra.mxu2 %v6270_v44  ;;  %v7998_v4 = vld [vmem:[#allocation9 + $0xa4] sm:$0xf]  ;;  %v6213_v16 = vld [vmem:[#allocation9 + $0x80] sm:$0xf]  ;;  %v6206_v45 = vor.u32 %v7993_v26, %v6205_v39 }
 0x1a1   :  { %v682_v13 = vmul.f32 %v8444_v59, %v681_v5  ;;  %v8448_v23 = vpop.eup %8447  ;;  %v733_v27 = vmul.f32 %v711_v21, %v9046_v58  ;;  %v6230_v5 = vor.u32 %v8000_v3, %v6229_v2  ;;  %v6234_v10 = vor.u32 %v7998_v4, %v6231_v6  ;;  %v6215_v21 = vld [vmem:[#allocation9 + $0x90] sm:$0xf0]  ;;  %v6207_v43 = vld [vmem:[#allocation9 + $0x78] sm:$0xf0]  ;;  %v7984_v2 = vld [vmem:[#allocation9 + $0x2c] sm:$0xf0] }
 0x1a2   :  { %v721_v24 = vmul.f32 %v8446_v63, %v720_v17  ;;  %v7996_v17 = vld [vmem:[#allocation9 + $0x8c] sm:$0xf0]  ;;  %v6210_v46 = vor.u32 %v7991_v42, %v6207_v43  ;;  %v7982_v3 = vld [vmem:[#allocation9 + $0x24] sm:$0xf]  ;;  %v6167_v4 = vld [vmem:[#allocation9 + $0x30] sm:$0xf0] }
 0x1a3   :  { %v683_v18 = vadd.f32 %v8444_v59, %v682_v13  ;;  %1269 = vmatpush.bf16.msra.mxu1 %v6250_v57  ;;  %v6239_v13 = vld [vmem:[#allocation9 + $0xb8] sm:$0xf0]  ;;  %1257 = vmatpush.bf16.msra.mxu0 %v6230_v5  ;;  %v7989_v57 = vld [vmem:[#allocation9 + $0x54] sm:$0xf0]  ;;  %v6170_v7 = vor.u32 %v7982_v3, %v6167_v4 }
 0x1a4   :  { %v722_v30 = vadd.f32 %v8446_v63, %v721_v24  ;;  %v6242_v15 = vor.u32 %v7999_v12, %v6239_v13  ;;  %v6175_v12 = vld [vmem:[#allocation9 + $0x38] sm:$0xf0]  ;;  %v6149_v13 = vld [vmem:[#allocation9] sm:$0xf] }
 0x1a5   :  { %v687_v22 = vsel %vm686_vm2, %v8444_v59, %v683_v18  ;;  %v6254_v59 = vor.u32 %v8005_v56, %v6253_v55  ;;  %v7994_v18 = vld [vmem:[#allocation9 + $0x84] sm:$0xf]  ;;  %v6186_v55 = vor.u32 %v7986_v50, %v6183_v52  ;;  %v6189_v56 = vld [vmem:[#allocation9 + $0x48] sm:$0xf] }
 0x1a6   :  { %v692_v25 = vsel %vm689_vm3, %v691_v20, %v687_v22  ;;  %v726_v33 = vsel %vm725_vm6, %v8446_v63, %v722_v30  ;;  %v6258_v63 = vor.u32 %v8003_v60, %v6255_v61  ;;  %v6214_v20 = vor.u32 %v7996_v17, %v6213_v16  ;;  %v6221_v22 = vld [vmem:[#allocation9 + $0x88] sm:$0xf]  ;;  %v7995_v30 = vld [vmem:[#allocation9 + $0x8c] sm:$0xf]  ;;  %v6191_v61 = vld [vmem:[#allocation9 + $0x58] sm:$0xf0] }
 0x1a7   :  { %v734_v28 = vmul.f32 %v8448_v23, %v692_v25  ;;  %v731_v58 = vsel %vm728_vm7, %v730_v34, %v726_v33  ;;  %1282 = vmatpush.bf16.msra.mxu2 %v6254_v59  ;;  %1270 = vmatpush.bf16.msra.mxu1 %v6234_v10  ;;  %v7997_v23 = vld [vmem:[#allocation9 + $0x94] sm:$0xf0]  ;;  %v6226_v33 = vor.u32 %v7995_v30, %v6223_v31  ;;  %v7987_v59 = vld [vmem:[#allocation9 + $0x4c] sm:$0xf]  ;;  %v7980_v16 = vld [vmem:[#allocation9 + $0xc] sm:$0xf0] }
 0x1a8   :  { %1258 = vmatpush.bf16.msra.mxu0 %v6214_v20  ;;  %v6190_v60 = vor.u32 %v7989_v57, %v6189_v56  ;;  %v7978_v20 = vld [vmem:[#allocation9 + $0x4] sm:$0xf] }
 0x1a9   :  { %v9072_v29 = vadd.f32 %v734_v28, %v733_v27  ;;  %v6218_v27 = vor.u32 %v7994_v18, %v6215_v21  ;;  %v6222_v28 = vor.u32 %v7997_v23, %v6221_v22  ;;  %v6151_v21 = vld [vmem:[#allocation9 + $0x10] sm:$0xf0]  ;;  %v6157_v22 = vld [vmem:[#allocation9 + $0x8] sm:$0xf]  ;;  %v742_v31 = vld [vmem:[#allocation3 + $0x50] sm:$0xff] }
 0x1ab   :  { %8449 = vtanh.f32 %v9072_v29  ;;  %1283 = vmatpush.bf16.msra.mxu2 %v6238_v11  ;;  %1271 = vmatpush.bf16.msra.mxu1 %v6218_v27  ;;  %v7983_v11 = vld [vmem:[#allocation9 + $0x2c] sm:$0xf]  ;;  %v7981_v27 = vld [vmem:[#allocation9 + $0x14] sm:$0xf0] }
 0x1ac   :  { %v6178_v18 = vor.u32 %v7983_v11, %v6175_v12  ;;  %v8040_v11 = vld [vmem:[#allocation9 + $0xec] sm:$0xf0]  ;;  %v8038_v12 = vld [vmem:[#allocation9 + $0xe4] sm:$0xf] }
 0x1af   :  { %1284 = vmatpush.bf16.msra.mxu2 %v6222_v28  ;;  %1272 = vmatpush.bf16.msra.mxu1 %v6202_v41  ;;  %v7979_v28 = vld [vmem:[#allocation9 + $0xc] sm:$0xf] }
 0x1b1   :  { %v8450_v35 = vpop.eup %8449 }
 0x1b2   :  { %v9078_v49 = vmul.f32 %v8450_v35, %v731_v58  ;;  %v6197_v35 = vld [vmem:[#allocation9 + $0x60] sm:$0xf]  ;;  %v7992_v58 = vld [vmem:[#allocation9 + $0x6c] sm:$0xf0] }
 0x1b3   :  { %1285 = vmatpush.bf16.msra.mxu2 %v6206_v45  ;;  %1273 = vmatpush.bf16.msra.mxu1 %v6186_v55 }
 0x1b4   :  { %v744_v36 = vpack.c.bf16 %v9078_v49, %v9078_v49 }
 0x1b6   :  { %945 = vmatmul.bf16.vlgmr.msra.gmra.mxu3 %v744_v36  ;;  %958 = vmatmul.bf16.vlgmr.msrb.gmra.mxu1 %v744_v36 }
 0x1b7   :  { %971 = vmatmul.bf16.vlgmr.msrb.gmra.mxu2 %v744_v36  ;;  %1294 = vmatpush.bf16.msra.mxu3 %v6274_v48  ;;  %v7988_v48 = vld [vmem:[#allocation9 + $0x4c] sm:$0xf0] }
 0x1b8   :  { %1286 = vmatpush.bf16.msra.mxu2 %v6190_v60  ;;  %1274 = vmatpush.bf16.msra.mxu1 %v6170_v7 }
 0x1bb   :  { %1295 = vmatpush.bf16.msra.mxu3 %v6258_v63 }
 0x1bf   :  { %1296 = vmatpush.bf16.msra.mxu3 %v6242_v15  ;;  %v743_v15 = vld [vmem:[#allocation3 + $0x58] sm:$0xff] }
 0x1c3   :  { %1297 = vmatpush.bf16.msra.mxu3 %v6226_v33  ;;  %v6158_v33 = vor.u32 %v7981_v27, %v6157_v22  ;;  %v6376_v22 = vld [vmem:[#allocation9 + $0xc0] sm:$0xf] }
 0x1c6   :  { %984 = vmatmul.bf16.vlgmr.msrb.gmra.mxu3 %v744_v36  ;;  %v6198_v36 = vor.u32 %v7992_v58, %v6197_v35 }
 0x1c7   :  { %1298 = vmatpush.bf16.msra.mxu3 %v6210_v46 }
 0x1c8   :  { %1259 = vmatpush.bf16.msra.mxu0 %v6198_v36 }
 0x233   :  { %v959_v62 = vpop.f32.mrf.mxu1 }
 0x234   :  { %v990_v0 = vadd.f32 %v959_v62, %v741_v47  ;;  %v6181_v47 = vld [vmem:[#allocation9 + $0x40] sm:$0xf] }
 0x235   :  { %v6182_v54 = vor.u32 %v7988_v48, %v6181_v47  ;;  %v6165_v62 = vld [vmem:[#allocation9 + $0x20] sm:$0xf] }
 0x236   :  { %v6145_v9 = vmul.f32 -1.442695, %v990_v0  ;;  %v6194_v0 = vor.u32 %v7987_v59, %v6191_v61  ;;  %v6166_v6 = vor.u32 %v7984_v2, %v6165_v62 }
 0x237   :  { %1260 = vmatpush.bf16.msra.mxu0 %v6182_v54 }
 0x238   :  { %8451 = vpow2.f32 %v6145_v9  ;;  %v7985_v9 = vld [vmem:[#allocation9 + $0x34] sm:$0xf0]  ;;  %1299 = vmatpush.bf16.msra.mxu3 %v6194_v0 }
 0x239   :  { %v946_v19 = vpop.f32.mrf.mxu3  ;;  %v6174_v10 = vor.u32 %v7985_v9, %v6173_v8 }
 0x23a   :  { %v989_v24 = vadd.f32 %v946_v19, %v740_v14  ;;  %v9082_v25 = vpop.f32.mrf.mxu2  ;;  %v6150_v19 = vor.u32 %v7980_v16, %v6149_v13  ;;  %v8041_v16 = vld [vmem:[#allocation9 + $0xf4] sm:$0xf0] }
 0x23b   :  { %v961_v32 = vpop.f32.mrf.mxu1  ;;  %1261 = vmatpush.bf16.msra.mxu0 %v6166_v6  ;;  %1287 = vmatpush.bf16.msra.mxu2 %v6174_v10  ;;  %v991_v38 = vadd.f32 %v9082_v25, %v742_v31  ;;  %v6392_v10 = vld [vmem:[#allocation9 + $0xe0] sm:$0xf]  ;;  %v8037_v31 = vld [vmem:[#allocation9 + $0xd4] sm:$0xf0] }
 0x23c   :  { %v6144_v34 = vmul.f32 -1.442695, %v989_v24  ;;  %v6154_v24 = vor.u32 %v7978_v20, %v6151_v21  ;;  %1300 = vmatpush.bf16.msra.mxu3 %v6178_v18  ;;  %v6393_v13 = vor.u32 %v8040_v11, %v6392_v10  ;;  %v6402_v20 = vld [vmem:[#allocation9 + $0xf8] sm:$0xf0]  ;;  %v8023_v11 = vld [vmem:[#allocation9 + $0x6c] sm:$0xf] }
 0x23e   :  { %v8452_v40 = vpop.eup %8451  ;;  %8453 = vpow2.f32 %v6144_v34  ;;  %v6159_v34 = vld [vmem:[#allocation9 + $0x18] sm:$0xf0]  ;;  %1275 = vmatpush.bf16.msra.mxu1 %v6154_v24  ;;  %v8034_v24 = vld [vmem:[#allocation9 + $0xc4] sm:$0xf] }
 0x23f   :  { %v9084_v44 = vadd.f32 1.0, %v8452_v40  ;;  %v6162_v35 = vor.u32 %v7979_v28, %v6159_v34  ;;  %1262 = vmatpush.bf16.msra.mxu0 %v6150_v19  ;;  %1288 = vmatpush.bf16.msra.mxu2 %v6158_v33  ;;  %v8039_v19 = vld [vmem:[#allocation9 + $0xec] sm:$0xf]  ;;  %v6378_v28 = vld [vmem:[#allocation9 + $0xd0] sm:$0xf0] }
 0x240   :  { %v6405_v21 = vor.u32 %v8039_v19, %v6402_v20  ;;  %v8035_v34 = vld [vmem:[#allocation9 + $0xcc] sm:$0xf] }
 0x241   :  { %8455 = vrcp.f32 %v9084_v44  ;;  %v948_v51 = vpop.f32.mrf.mxu3  ;;  %1301 = vmatpush.bf16.msra.mxu3 %v6162_v35  ;;  %v1027_v43 = vand.u32 2147483648, %v9084_v44  ;;  %vm1021_vm10 = vweird.f32 %v9084_v44  ;;  %v1025_v46 = vand.u32 2147483647, %v9084_v44  ;;  %v6386_v35 = vld [vmem:[#allocation9 + $0xd8] sm:$0xf0] }
 0x242   :  { %v974_v53 = vpop.f32.mrf.mxu2 }
 0x243   :  { %v1028_v53 = vor.u32 1.1754944e-38, %v1027_v43  ;;  %vm1026_vm15 = vcmp.eq.f32.partialorder %v1025_v46, 8.507059e+37  ;;  %1573 = vmatpush.bf16.msrb.mxu0 %v6393_v13 }
 0x244   :  { %v8454_v63 = vpop.eup %8453 }
 0x245   :  { %v9087_v5 = vadd.f32 1.0, %v8454_v63  ;;  %1612 = vmatpush.bf16.msrb.mxu3 %v6405_v21  ;;  %v1061_v21 = vld [vmem:[#allocation3 + $0x78] sm:$0xff] }
 0x247   :  { %v9089_v14 = vpop.eup %8455  ;;  %8457 = vrcp.f32 %v9087_v5  ;;  %v1008_v41 = vand.u32 2147483648, %v9087_v5  ;;  %v1006_v25 = vand.u32 2147483647, %v9087_v5  ;;  %vm1002_vm12 = vweird.f32 %v9087_v5 }
 0x248   :  { %v1017_v17 = vmul.f32 %v9089_v14, %v9084_v44  ;;  %vm1022_vm8 = vweird.f32 %v9089_v14 }
 0x249   :  { %v985_v23 = vpop.f32.mrf.mxu3  ;;  %vm1023_vm11 = vmor %vm1021_vm10, %vm1022_vm8  ;;  %v1009_v50 = vor.u32 1.1754944e-38, %v1008_v41  ;;  %vm1007_vm14 = vcmp.eq.f32.partialorder %v1006_v25, 8.507059e+37  ;;  %v6368_v41 = vld [vmem:[#allocation9 + $0xa8] sm:$0xf]  ;;  %v6370_v25 = vld [vmem:[#allocation9 + $0xb8] sm:$0xf0] }
 0x24a   :  { %v1018_v30 = vsub.f32 1.0, %v1017_v17  ;;  %v992_v32 = vadd.f32 %v985_v23, %v743_v15  ;;  %v6400_v15 = vld [vmem:[#allocation9 + $0xe8] sm:$0xf]  ;;  %v8036_v23 = vld [vmem:[#allocation9 + $0xcc] sm:$0xf0] }
 0x24b   :  { %v6401_v18 = vor.u32 %v8041_v16, %v6400_v15  ;;  %v6377_v27 = vor.u32 %v8036_v23, %v6376_v22  ;;  %v6312_v16 = vld [vmem:[#allocation9 + $0x40] sm:$0xf]  ;;  %v6314_v23 = vld [vmem:[#allocation9 + $0x50] sm:$0xf0] }
 0x24c   :  { %v6146_v58 = vmul.f32 -1.442695, %v992_v32  ;;  %v1019_v37 = vmul.f32 %v9089_v14, %v1018_v30  ;;  %v6384_v30 = vld [vmem:[#allocation9 + $0xc8] sm:$0xf]  ;;  %v6381_v32 = vor.u32 %v8034_v24, %v6378_v28  ;;  %v8021_v28 = vld [vmem:[#allocation9 + $0x54] sm:$0xf0] }
 0x24d   :  { %v8458_v36 = vpop.eup %8457  ;;  %1599 = vmatpush.bf16.msrb.mxu2 %v6401_v18  ;;  %v6385_v33 = vor.u32 %v8037_v31, %v6384_v30  ;;  %1574 = vmatpush.bf16.msrb.mxu0 %v6377_v27  ;;  %v8018_v18 = vld [vmem:[#allocation9 + $0x44] sm:$0xf]  ;;  %v6320_v27 = vld [vmem:[#allocation9 + $0x48] sm:$0xf]  ;;  %v8019_v30 = vld [vmem:[#allocation9 + $0x4c] sm:$0xf] }
 0x24e   :  { %v998_v39 = vmul.f32 %v8458_v36, %v9087_v5  ;;  %8459 = vpow2.f32 %v6146_v58  ;;  %v1020_v26 = vadd.f32 %v9089_v14, %v1019_v37  ;;  %vm1003_vm9 = vweird.f32 %v8458_v36  ;;  %v8032_v37 = vld [vmem:[#allocation9 + $0xac] sm:$0xf0] }
 0x24f   :  { %8461 = vtanh.f32 %v991_v38  ;;  %vm1004_vm13 = vmor %vm1002_vm12, %vm1003_vm9  ;;  %v6389_v58 = vor.u32 %v8035_v34, %v6386_v35  ;;  %v8030_v38 = vld [vmem:[#allocation9 + $0xa4] sm:$0xf]  ;;  %v6317_v24 = vor.u32 %v8018_v18, %v6314_v23  ;;  %v6321_v31 = vor.u32 %v8021_v28, %v6320_v27  ;;  %v8016_v34 = vld [vmem:[#allocation9 + $0x2c] sm:$0xf0] }
 0x250   :  { %v999_v40 = vsub.f32 1.0, %v998_v39  ;;  %v1024_v51 = vsel %vm1023_vm11, %v9089_v14, %v1020_v26  ;;  %v6394_v14 = vld [vmem:[#allocation9 + $0xf0] sm:$0xf0]  ;;  %v8033_v26 = vld [vmem:[#allocation9 + $0xb4] sm:$0xf0] }
 0x251   :  { %v987_v42 = vpop.f32.mrf.mxu3  ;;  %v1029_v57 = vsel %vm1026_vm15, %v1028_v53, %v1024_v51  ;;  %v6397_v17 = vor.u32 %v8038_v12, %v6394_v14  ;;  %1600 = vmatpush.bf16.msrb.mxu2 %v6385_v33  ;;  %1613 = vmatpush.bf16.msrb.mxu3 %v6389_v58  ;;  %v6369_v43 = vor.u32 %v8033_v26, %v6368_v41  ;;  %v6352_v53 = vld [vmem:[#allocation9 + $0x88] sm:$0xf]  ;;  %v6338_v12 = vld [vmem:[#allocation9 + $0x78] sm:$0xf0]  ;;  %v6296_v33 = vld [vmem:[#allocation9 + $0x20] sm:$0xf] }
 0x252   :  { %v1000_v45 = vmul.f32 %v8458_v36, %v999_v40  ;;  %v1051_v44 = vmul.f32 %v1029_v57, %v9072_v29  ;;  %v6362_v40 = vld [vmem:[#allocation9 + $0xb0] sm:$0xf0]  ;;  %v8027_v57 = vld [vmem:[#allocation9 + $0x8c] sm:$0xf]  ;;  %v6341_v15 = vor.u32 %v8023_v11, %v6338_v12  ;;  %v6297_v58 = vor.u32 %v8016_v34, %v6296_v33  ;;  %v8017_v26 = vld [vmem:[#allocation9 + $0x34] sm:$0xf0] }
 0x253   :  { %1586 = vmatpush.bf16.msrb.mxu1 %v6397_v17  ;;  %v6365_v42 = vor.u32 %v8030_v38, %v6362_v40  ;;  %v8020_v17 = vld [vmem:[#allocation9 + $0x4c] sm:$0xf0]  ;;  %v6304_v38 = vld [vmem:[#allocation9 + $0x28] sm:$0xf] }
 0x254   :  { %v8460_v47 = vpop.eup %8459  ;;  %v1001_v48 = vadd.f32 %v8458_v36, %v1000_v45  ;;  %v8031_v45 = vld [vmem:[#allocation9 + $0xac] sm:$0xf]  ;;  %v6313_v22 = vor.u32 %v8020_v17, %v6312_v16 }
 0x255   :  { %v1035_v52 = vadd.f32 1.0, %v8460_v47  ;;  %v8462_v55 = vpop.eup %8461  ;;  %v6373_v46 = vor.u32 %v8031_v45, %v6370_v25  ;;  %1601 = vmatpush.bf16.msrb.mxu2 %v6369_v43  ;;  %v6344_v47 = vld [vmem:[#allocation9 + $0x80] sm:$0xf]  ;;  %v6306_v43 = vld [vmem:[#allocation9 + $0x38] sm:$0xf0] }
 0x256   :  { %v1005_v54 = vsel %vm1004_vm13, %v8458_v36, %v1001_v48  ;;  %v6360_v36 = vld [vmem:[#allocation9 + $0xa0] sm:$0xf]  ;;  %v8028_v48 = vld [vmem:[#allocation9 + $0x8c] sm:$0xf0] }
 0x257   :  { %v1010_v56 = vsel %vm1007_vm14, %v1009_v50, %v1005_v54  ;;  %8463 = vrcp.f32 %v1035_v52  ;;  %v1047_v0 = vand.u32 2147483648, %v1035_v52  ;;  %v1045_v3 = vand.u32 2147483647, %v1035_v52  ;;  %1587 = vmatpush.bf16.msrb.mxu1 %v6381_v32  ;;  %v8026_v50 = vld [vmem:[#allocation9 + $0x84] sm:$0xf]  ;;  %1614 = vmatpush.bf16.msrb.mxu3 %v6373_v46 }
 0x258   :  { %v1052_v59 = vmul.f32 %v8462_v55, %v1010_v56  ;;  %vm1041_vm1 = vweird.f32 %v1035_v52  ;;  %v6361_v39 = vor.u32 %v8032_v37, %v6360_v36  ;;  %v6345_v51 = vor.u32 %v8028_v48, %v6344_v47  ;;  %v8029_v54 = vld [vmem:[#allocation9 + $0x94] sm:$0xf0]  ;;  %v6322_v32 = vld [vmem:[#allocation9 + $0x58] sm:$0xf0]  ;;  %v8014_v36 = vld [vmem:[#allocation9 + $0x24] sm:$0xf] }
 0x259   :  { %v1048_v5 = vor.u32 1.1754944e-38, %v1047_v0  ;;  %vm1046_vm3 = vcmp.eq.f32.partialorder %v1045_v3, 8.507059e+37  ;;  %v6353_v56 = vor.u32 %v8029_v54, %v6352_v53  ;;  %v8024_v0 = vld [vmem:[#allocation9 + $0x6c] sm:$0xf0]  ;;  %v6325_v35 = vor.u32 %v8019_v30, %v6322_v32  ;;  %v6298_v37 = vld [vmem:[#allocation9 + $0x30] sm:$0xf0] }
 0x25a   :  { %v9107_v61 = vadd.f32 %v1052_v59, %v1051_v44  ;;  %1575 = vmatpush.bf16.msrb.mxu0 %v6361_v39  ;;  %v6354_v59 = vld [vmem:[#allocation9 + $0x98] sm:$0xf0]  ;;  %v1058_v44 = vld [vmem:[#allocation3 + $0x60] sm:$0xff]  ;;  %v6301_v41 = vor.u32 %v8014_v36, %v6298_v37  ;;  %v6305_v47 = vor.u32 %v8017_v26, %v6304_v38 }
 0x25b   :  { %1588 = vmatpush.bf16.msrb.mxu1 %v6365_v42  ;;  %1602 = vmatpush.bf16.msrb.mxu2 %v6353_v56  ;;  %v8015_v42 = vld [vmem:[#allocation9 + $0x2c] sm:$0xf]  ;;  %v6282_v54 = vld [vmem:[#allocation9 + $0x10] sm:$0xf0]  ;;  %v8013_v56 = vld [vmem:[#allocation9 + $0x14] sm:$0xf0] }
 0x25c   :  { %8465 = vtanh.f32 %v9107_v61  ;;  %v6309_v48 = vor.u32 %v8015_v42, %v6306_v43 }
 0x25d   :  { %v8464_v60 = vpop.eup %8463 }
 0x25e   :  { %v1037_v62 = vmul.f32 %v8464_v60, %v1035_v52  ;;  %vm1042_vm0 = vweird.f32 %v8464_v60  ;;  %v6346_v52 = vld [vmem:[#allocation9 + $0x90] sm:$0xf0]  ;;  %1576 = vmatpush.bf16.msrb.mxu0 %v6345_v51  ;;  %v8012_v51 = vld [vmem:[#allocation9 + $0xc] sm:$0xf0] }
 0x25f   :  { %vm1043_vm2 = vmor %vm1041_vm1, %vm1042_vm0  ;;  %v6349_v55 = vor.u32 %v8026_v50, %v6346_v52  ;;  %v6280_v50 = vld [vmem:[#allocation9] sm:$0xf]  ;;  %v8010_v52 = vld [vmem:[#allocation9 + $0x4] sm:$0xf] }
 0x260   :  { %v1038_v63 = vsub.f32 1.0, %v1037_v62  ;;  %v6357_v62 = vor.u32 %v8027_v57, %v6354_v59  ;;  %v6281_v53 = vor.u32 %v8012_v51, %v6280_v50  ;;  %v6285_v59 = vor.u32 %v8010_v52, %v6282_v54  ;;  %v8072_v50 = vld [vmem:[#allocation9 + $0xec] sm:$0xf0]  ;;  %v8070_v51 = vld [vmem:[#allocation9 + $0xe4] sm:$0xf] }
 0x261   :  { %1589 = vmatpush.bf16.msrb.mxu1 %v6349_v55  ;;  %v6288_v55 = vld [vmem:[#allocation9 + $0x8] sm:$0xf] }
 0x262   :  { %v1039_v2 = vmul.f32 %v8464_v60, %v1038_v63  ;;  %v8466_v7 = vpop.eup %8465  ;;  %v6328_v63 = vld [vmem:[#allocation9 + $0x60] sm:$0xf]  ;;  %1615 = vmatpush.bf16.msrb.mxu3 %v6357_v62  ;;  %v6531_v54 = vld [vmem:[#allocation9 + $0xe8] sm:$0xf] }
 0x263   :  { %v6329_v3 = vor.u32 %v8024_v0, %v6328_v63  ;;  %v6289_v63 = vor.u32 %v8013_v56, %v6288_v55  ;;  %v8073_v55 = vld [vmem:[#allocation9 + $0xf4] sm:$0xf0] }
 0x264   :  { %v1040_v4 = vadd.f32 %v8464_v60, %v1039_v2  ;;  %v8022_v2 = vld [vmem:[#allocation9 + $0x64] sm:$0xf] }
 0x265   :  { %1577 = vmatpush.bf16.msrb.mxu0 %v6329_v3 }
 0x266   :  { %v1044_v6 = vsel %vm1043_vm2, %v8464_v60, %v1040_v4  ;;  %v1059_v60 = vld [vmem:[#allocation3 + $0x68] sm:$0xff]  ;;  %v6330_v4 = vld [vmem:[#allocation9 + $0x70] sm:$0xf0]  ;;  %1616 = vmatpush.bf16.msrb.mxu3 %v6341_v15 }
 0x267   :  { %v1049_v8 = vsel %vm1046_vm3, %v1048_v5, %v1044_v6  ;;  %v6336_v5 = vld [vmem:[#allocation9 + $0x68] sm:$0xf]  ;;  %v8025_v6 = vld [vmem:[#allocation9 + $0x74] sm:$0xf0] }
 0x268   :  { %v9110_v29 = vmul.f32 %v8466_v7, %v1049_v8  ;;  %v6337_v10 = vor.u32 %v8025_v6, %v6336_v5 }
 0x269   :  { %1578 = vmatpush.bf16.msrb.mxu0 %v6313_v22 }
 0x26a   :  { %v1062_v9 = vpack.c.bf16 %v9110_v29, %v9110_v29  ;;  %1603 = vmatpush.bf16.msrb.mxu2 %v6337_v10  ;;  %1617 = vmatpush.bf16.msrb.mxu3 %v6325_v35 }
 0x26c   :  { %1263 = vmatmul.bf16.vlgmr.msra.gmra.mxu0 %v1062_v9  ;;  %1276 = vmatmul.bf16.vlgmr.msra.gmra.mxu1 %v1062_v9 }
 0x26d   :  { %1289 = vmatmul.bf16.vlgmr.msra.gmra.mxu2 %v1062_v9  ;;  %1302 = vmatmul.bf16.vlgmr.msra.gmra.mxu3 %v1062_v9  ;;  %v6333_v9 = vor.u32 %v8022_v2, %v6330_v4 }
 0x26e   :  { %1604 = vmatpush.bf16.msrb.mxu2 %v6321_v31  ;;  %1579 = vmatpush.bf16.msrb.mxu0 %v6297_v58 }
 0x26f   :  { %1590 = vmatpush.bf16.msrb.mxu1 %v6333_v9  ;;  %1618 = vmatpush.bf16.msrb.mxu3 %v6309_v48  ;;  %v6523_v48 = vld [vmem:[#allocation9 + $0xe0] sm:$0xf] }
 0x270   :  { %v6524_v52 = vor.u32 %v8072_v50, %v6523_v48  ;;  %v8055_v48 = vld [vmem:[#allocation9 + $0x6c] sm:$0xf]  ;;  %v6469_v50 = vld [vmem:[#allocation9 + $0x78] sm:$0xf0] }
 0x272   :  { %1605 = vmatpush.bf16.msrb.mxu2 %v6305_v47  ;;  %1580 = vmatpush.bf16.msrb.mxu0 %v6281_v53  ;;  %v6525_v53 = vld [vmem:[#allocation9 + $0xf0] sm:$0xf0] }
 0x273   :  { %1591 = vmatpush.bf16.msrb.mxu1 %v6317_v24  ;;  %v6528_v56 = vor.u32 %v8070_v51, %v6525_v53  ;;  %v6472_v53 = vor.u32 %v8055_v48, %v6469_v50 }
 0x276   :  { %1606 = vmatpush.bf16.msrb.mxu2 %v6289_v63  ;;  %1891 = vmatpush.bf16.msra.mxu0 %v6524_v52  ;;  %v8068_v63 = vld [vmem:[#allocation9 + $0xcc] sm:$0xf0] }
 0x277   :  { %1592 = vmatpush.bf16.msrb.mxu1 %v6301_v41 }
 0x27b   :  { %1593 = vmatpush.bf16.msrb.mxu1 %v6285_v59  ;;  %v8071_v59 = vld [vmem:[#allocation9 + $0xec] sm:$0xf] }
 0x27f   :  { %1904 = vmatpush.bf16.msra.mxu1 %v6528_v56  ;;  %v6443_v56 = vld [vmem:[#allocation9 + $0x40] sm:$0xf] }
 0x2e9   :  { %v1264_v7 = vpop.f32.mrf.mxu0  ;;  %v1277_v8 = vpop.f32.mrf.mxu1 }
 0x2ea   :  { %v1307_v13 = vadd.f32 %v1264_v7, %v1058_v44  ;;  %v1308_v14 = vadd.f32 %v1277_v8, %v1059_v60  ;;  %v8011_v44 = vld [vmem:[#allocation9 + $0xc] sm:$0xf]  ;;  %v6290_v60 = vld [vmem:[#allocation9 + $0x18] sm:$0xf0]  ;;  %v1060_v7 = vld [vmem:[#allocation3 + $0x70] sm:$0xff] }
 0x2eb   :  { %v6293_v3 = vor.u32 %v8011_v44, %v6290_v60  ;;  %v6533_v44 = vld [vmem:[#allocation9 + $0xf8] sm:$0xf0] }
 0x2ec   :  { %v6275_v19 = vmul.f32 -1.442695, %v1307_v13  ;;  %v6276_v20 = vmul.f32 -1.442695, %v1308_v14  ;;  %v6536_v60 = vor.u32 %v8071_v59, %v6533_v44  ;;  %v8050_v59 = vld [vmem:[#allocation9 + $0x44] sm:$0xf] }
 0x2ed   :  { %1619 = vmatpush.bf16.msrb.mxu3 %v6293_v3  ;;  %v6509_v3 = vld [vmem:[#allocation9 + $0xd0] sm:$0xf0] }
 0x2ee   :  { %8467 = vpow2.f32 %v6275_v19 }
 0x2ef   :  { %8469 = vpow2.f32 %v6276_v20 }
 0x2f0   :  { %v1290_v39 = vpop.f32.mrf.mxu2  ;;  %v1303_v40 = vpop.f32.mrf.mxu3 }
 0x2f1   :  { %v1310_v45 = vadd.f32 %v1303_v40, %v1061_v21  ;;  %v1266_v25 = vpop.f32.mrf.mxu0  ;;  %v1279_v46 = vpop.f32.mrf.mxu1  ;;  %v1309_v11 = vadd.f32 %v1290_v39, %v1060_v7  ;;  %1930 = vmatpush.bf16.msra.mxu3 %v6536_v60  ;;  %v6445_v60 = vld [vmem:[#allocation9 + $0x50] sm:$0xf0] }
 0x2f3   :  { %v6277_v57 = vmul.f32 -1.442695, %v1310_v45 }
 0x2f4   :  { %v8468_v62 = vpop.eup %8467 }
 0x2f5   :  { %v8470_v0 = vpop.eup %8469  ;;  %v1314_v2 = vadd.f32 1.0, %v8468_v62  ;;  %8471 = vpow2.f32 %v6277_v57  ;;  %v6532_v57 = vor.u32 %v8073_v55, %v6531_v54  ;;  %v6507_v62 = vld [vmem:[#allocation9 + $0xc0] sm:$0xf] }
 0x2f6   :  { %v1333_v4 = vadd.f32 1.0, %v8470_v0  ;;  %v8066_v0 = vld [vmem:[#allocation9 + $0xc4] sm:$0xf] }
 0x2f7   :  { %8473 = vrcp.f32 %v1314_v2  ;;  %v1326_v17 = vand.u32 2147483648, %v1314_v2  ;;  %v1324_v20 = vand.u32 2147483647, %v1314_v2  ;;  %vm1320_vm6 = vweird.f32 %v1314_v2  ;;  %1917 = vmatpush.bf16.msra.mxu2 %v6532_v57  ;;  %v8052_v57 = vld [vmem:[#allocation9 + $0x4c] sm:$0xf0] }
 0x2f8   :  { %8475 = vrcp.f32 %v1333_v4  ;;  %v1292_v5 = vpop.f32.mrf.mxu2  ;;  %v1305_v6 = vpop.f32.mrf.mxu3  ;;  %v1345_v18 = vand.u32 2147483648, %v1333_v4  ;;  %v1343_v22 = vand.u32 2147483647, %v1333_v4  ;;  %vm1339_vm7 = vweird.f32 %v1333_v4 }
 0x2f9   :  { %v1327_v27 = vor.u32 1.1754944e-38, %v1326_v17  ;;  %vm1325_vm10 = vcmp.eq.f32.partialorder %v1324_v20, 8.507059e+37  ;;  %v8069_v5 = vld [vmem:[#allocation9 + $0xd4] sm:$0xf0]  ;;  %v6512_v6 = vor.u32 %v8066_v0, %v6509_v3  ;;  %v8063_v20 = vld [vmem:[#allocation9 + $0xac] sm:$0xf]  ;;  %v6444_v44 = vor.u32 %v8052_v57, %v6443_v56 }
 0x2fa   :  { %v1346_v31 = vor.u32 1.1754944e-38, %v1345_v18  ;;  %vm1344_vm11 = vcmp.eq.f32.partialorder %v1343_v22, 8.507059e+37  ;;  %v8065_v17 = vld [vmem:[#allocation9 + $0xb4] sm:$0xf0]  ;;  %v1379_v3 = vld [vmem:[#allocation3 + $0x98] sm:$0xff] }
 0x2fb   :  { %v8472_v8 = vpop.eup %8471  ;;  %1905 = vmatpush.bf16.msra.mxu1 %v6512_v6  ;;  %v8051_v6 = vld [vmem:[#allocation9 + $0x4c] sm:$0xf] }
 0x2fc   :  { %v1353_v9 = vadd.f32 1.0, %v8472_v8  ;;  %v8067_v8 = vld [vmem:[#allocation9 + $0xcc] sm:$0xf] }
 0x2fd   :  { %v8474_v10 = vpop.eup %8473 }
 0x2fe   :  { %v8476_v12 = vpop.eup %8475  ;;  %v1316_v13 = vmul.f32 %v8474_v10, %v1314_v2  ;;  %8477 = vrcp.f32 %v1353_v9  ;;  %vm1321_vm4 = vweird.f32 %v8474_v10  ;;  %v1365_v26 = vand.u32 2147483648, %v1353_v9 }
 0x2ff   :  { %v1335_v14 = vmul.f32 %v8476_v12, %v1333_v4  ;;  %8479 = vtanh.f32 %v1309_v11  ;;  %vm1340_vm5 = vweird.f32 %v8476_v12  ;;  %vm1322_vm8 = vmor %vm1320_vm6, %vm1321_vm4  ;;  %vm1359_vm13 = vweird.f32 %v1353_v9  ;;  %v6515_v4 = vld [vmem:[#allocation9 + $0xc8] sm:$0xf]  ;;  %v6491_v11 = vld [vmem:[#allocation9 + $0xa0] sm:$0xf] }
 0x300   :  { %v1317_v15 = vsub.f32 1.0, %v1316_v13  ;;  %vm1341_vm9 = vmor %vm1339_vm7, %vm1340_vm5  ;;  %v1363_v42 = vand.u32 2147483647, %v1353_v9  ;;  %v1366_v45 = vor.u32 1.1754944e-38, %v1365_v26  ;;  %v6508_v2 = vor.u32 %v8068_v63, %v6507_v62  ;;  %v8062_v13 = vld [vmem:[#allocation9 + $0xa4] sm:$0xf] }
 0x301   :  { %v1336_v16 = vsub.f32 1.0, %v1335_v14  ;;  %v6516_v7 = vor.u32 %v8069_v5, %v6515_v4  ;;  %v8054_v26 = vld [vmem:[#allocation9 + $0x64] sm:$0xf]  ;;  %v6451_v62 = vld [vmem:[#allocation9 + $0x48] sm:$0xf]  ;;  %v6448_v4 = vor.u32 %v8050_v59, %v6445_v60 }
 0x302   :  { %v1318_v19 = vmul.f32 %v8474_v10, %v1317_v15  ;;  %vm1364_vm15 = vcmp.eq.f32.partialorder %v1363_v42, 8.507059e+37  ;;  %1892 = vmatpush.bf16.msra.mxu0 %v6508_v2  ;;  %v6493_v15 = vld [vmem:[#allocation9 + $0xb0] sm:$0xf0]  ;;  %v8053_v63 = vld [vmem:[#allocation9 + $0x54] sm:$0xf0] }
 0x303   :  { %v1337_v21 = vmul.f32 %v8476_v12, %v1336_v16  ;;  %1918 = vmatpush.bf16.msra.mxu2 %v6516_v7  ;;  %v6499_v16 = vld [vmem:[#allocation9 + $0xa8] sm:$0xf]  ;;  %v6496_v18 = vor.u32 %v8062_v13, %v6493_v15  ;;  %v6452_v5 = vor.u32 %v8053_v63, %v6451_v62  ;;  %v6453_v7 = vld [vmem:[#allocation9 + $0x58] sm:$0xf0]  ;;  %v6429_v13 = vld [vmem:[#allocation9 + $0x30] sm:$0xf0] }
 0x304   :  { %v8478_v23 = vpop.eup %8477  ;;  %v1319_v24 = vadd.f32 %v8474_v10, %v1318_v19  ;;  %v6500_v19 = vor.u32 %v8065_v17, %v6499_v16  ;;  %v8049_v16 = vld [vmem:[#allocation9 + $0x34] sm:$0xf0]  ;;  %v8047_v17 = vld [vmem:[#allocation9 + $0x2c] sm:$0xf] }
 0x305   :  { %v1338_v28 = vadd.f32 %v8476_v12, %v1337_v21  ;;  %v1355_v30 = vmul.f32 %v8478_v23, %v1353_v9  ;;  %v8480_v33 = vpop.eup %8479  ;;  %vm1360_vm12 = vweird.f32 %v8478_v23  ;;  %v6517_v9 = vld [vmem:[#allocation9 + $0xd8] sm:$0xf0]  ;;  %1906 = vmatpush.bf16.msra.mxu1 %v6496_v18 }
 0x306   :  { %v1323_v32 = vsel %vm1322_vm8, %v8474_v10, %v1319_v24  ;;  %vm1361_vm14 = vmor %vm1359_vm13, %vm1360_vm12  ;;  %v6520_v10 = vor.u32 %v8067_v8, %v6517_v9  ;;  %v6501_v21 = vld [vmem:[#allocation9 + $0xb8] sm:$0xf0]  ;;  %v8060_v24 = vld [vmem:[#allocation9 + $0x8c] sm:$0xf0] }
 0x307   :  { %v1328_v34 = vsel %vm1325_vm10, %v1327_v27, %v1323_v32  ;;  %v1342_v35 = vsel %vm1341_vm9, %v8476_v12, %v1338_v28  ;;  %v1356_v58 = vsub.f32 1.0, %v1355_v30  ;;  %v8064_v12 = vld [vmem:[#allocation9 + $0xac] sm:$0xf0]  ;;  %v6504_v22 = vor.u32 %v8063_v20, %v6501_v21  ;;  %1919 = vmatpush.bf16.msra.mxu2 %v6500_v19  ;;  %v8058_v27 = vld [vmem:[#allocation9 + $0x84] sm:$0xf] }
 0x308   :  { %v1347_v36 = vsel %vm1344_vm11, %v1346_v31, %v1342_v35  ;;  %v1370_v37 = vmul.f32 %v8480_v33, %v1328_v34  ;;  %1931 = vmatpush.bf16.msra.mxu3 %v6520_v10  ;;  %v6492_v14 = vor.u32 %v8064_v12, %v6491_v11  ;;  %v6477_v30 = vld [vmem:[#allocation9 + $0x90] sm:$0xf0]  ;;  %v6483_v31 = vld [vmem:[#allocation9 + $0x88] sm:$0xf]  ;;  %v8061_v32 = vld [vmem:[#allocation9 + $0x94] sm:$0xf0]  ;;  %v6456_v10 = vor.u32 %v8051_v6, %v6453_v7 }
 0x309   :  { %v1369_v38 = vmul.f32 %v1347_v36, %v9107_v61  ;;  %v1357_v39 = vmul.f32 %v8478_v23, %v1356_v58  ;;  %v6480_v33 = vor.u32 %v8058_v27, %v6477_v30  ;;  %v6484_v34 = vor.u32 %v8061_v32, %v6483_v31  ;;  %v8059_v35 = vld [vmem:[#allocation9 + $0x8c] sm:$0xf]  ;;  %v6485_v58 = vld [vmem:[#allocation9 + $0x98] sm:$0xf0]  ;;  %v1376_v36 = vld [vmem:[#allocation3 + $0x80] sm:$0xff] }
 0x30a   :  { %1893 = vmatpush.bf16.msra.mxu0 %v6492_v14  ;;  %v6427_v8 = vld [vmem:[#allocation9 + $0x20] sm:$0xf]  ;;  %v8048_v9 = vld [vmem:[#allocation9 + $0x2c] sm:$0xf0]  ;;  %v8046_v12 = vld [vmem:[#allocation9 + $0x24] sm:$0xf] }
 0x30b   :  { %v9115_v40 = vadd.f32 %v1370_v37, %v1369_v38  ;;  %v1358_v41 = vadd.f32 %v8478_v23, %v1357_v39  ;;  %v1377_v37 = vld [vmem:[#allocation3 + $0x88] sm:$0xff]  ;;  %v6488_v38 = vor.u32 %v8059_v35, %v6485_v58  ;;  %1907 = vmatpush.bf16.msra.mxu1 %v6480_v33  ;;  %1920 = vmatpush.bf16.msra.mxu2 %v6484_v34  ;;  %v6459_v39 = vld [vmem:[#allocation9 + $0x60] sm:$0xf]  ;;  %v6435_v14 = vld [vmem:[#allocation9 + $0x28] sm:$0xf] }
 0x30c   :  { %1932 = vmatpush.bf16.msra.mxu3 %v6504_v22  ;;  %v6428_v11 = vor.u32 %v8048_v9, %v6427_v8  ;;  %v6432_v15 = vor.u32 %v8046_v12, %v6429_v13  ;;  %v6437_v18 = vld [vmem:[#allocation9 + $0x38] sm:$0xf0]  ;;  %v6436_v21 = vor.u32 %v8049_v16, %v6435_v14  ;;  %v8042_v27 = vld [vmem:[#allocation9 + $0x4] sm:$0xf]  ;;  %v6413_v33 = vld [vmem:[#allocation9 + $0x10] sm:$0xf0] }
 0x30d   :  { %8481 = vtanh.f32 %v9115_v40  ;;  %v1362_v43 = vsel %vm1361_vm14, %v8478_v23, %v1358_v41  ;;  %v6475_v23 = vld [vmem:[#allocation9 + $0x80] sm:$0xf]  ;;  %v8056_v41 = vld [vmem:[#allocation9 + $0x6c] sm:$0xf0]  ;;  %v6440_v22 = vor.u32 %v8047_v17, %v6437_v18  ;;  %v6419_v34 = vld [vmem:[#allocation9 + $0x8] sm:$0xf]  ;;  %v6416_v58 = vor.u32 %v8042_v27, %v6413_v33 }
 0x30e   :  { %v1367_v46 = vsel %vm1364_vm15, %v1366_v45, %v1362_v43  ;;  %v6476_v28 = vor.u32 %v8060_v24, %v6475_v23  ;;  %v6460_v42 = vor.u32 %v8056_v41, %v6459_v39  ;;  %v6461_v43 = vld [vmem:[#allocation9 + $0x70] sm:$0xf0]  ;;  %v6467_v45 = vld [vmem:[#allocation9 + $0x68] sm:$0xf]  ;;  %v6411_v23 = vld [vmem:[#allocation9] sm:$0xf] }
 0x30f   :  { %v8044_v24 = vld [vmem:[#allocation9 + $0xc] sm:$0xf0]  ;;  %v8045_v35 = vld [vmem:[#allocation9 + $0x14] sm:$0xf0]  ;;  %v6656_v33 = vld [vmem:[#allocation9 + $0xf0] sm:$0xf0] }
 0x310   :  { %1894 = vmatpush.bf16.msra.mxu0 %v6476_v28  ;;  %1933 = vmatpush.bf16.msra.mxu3 %v6488_v38  ;;  %v6412_v32 = vor.u32 %v8044_v24, %v6411_v23  ;;  %v6421_v38 = vld [vmem:[#allocation9 + $0x18] sm:$0xf0] }
 0x313   :  { %v8482_v25 = vpop.eup %8481 }
 0x314   :  { %v9118_v47 = vmul.f32 %v8482_v25, %v1367_v46  ;;  %v8057_v25 = vld [vmem:[#allocation9 + $0x74] sm:$0xf0]  ;;  %v6464_v46 = vor.u32 %v8054_v26, %v6461_v43  ;;  %1895 = vmatpush.bf16.msra.mxu0 %v6460_v42  ;;  %1934 = vmatpush.bf16.msra.mxu3 %v6472_v53 }
 0x316   :  { %v1380_v61 = vpack.c.bf16 %v9118_v47, %v9118_v47  ;;  %1908 = vmatpush.bf16.msra.mxu1 %v6464_v46 }
 0x318   :  { %1581 = vmatmul.bf16.vlgmr.msrb.gmra.mxu0 %v1380_v61  ;;  %1594 = vmatmul.bf16.vlgmr.msrb.gmra.mxu1 %v1380_v61 }
 0x319   :  { %1607 = vmatmul.bf16.vlgmr.msrb.gmra.mxu2 %v1380_v61  ;;  %1620 = vmatmul.bf16.vlgmr.msrb.gmra.mxu3 %v1380_v61  ;;  %v6468_v61 = vor.u32 %v8057_v25, %v6467_v45 }
 0x31a   :  { %1896 = vmatpush.bf16.msra.mxu0 %v6444_v44  ;;  %1909 = vmatpush.bf16.msra.mxu1 %v6448_v4 }
 0x31b   :  { %1921 = vmatpush.bf16.msra.mxu2 %v6468_v61  ;;  %1935 = vmatpush.bf16.msra.mxu3 %v6456_v10  ;;  %v1378_v61 = vld [vmem:[#allocation3 + $0x90] sm:$0xff] }
 0x31e   :  { %1897 = vmatpush.bf16.msra.mxu0 %v6428_v11  ;;  %1910 = vmatpush.bf16.msra.mxu1 %v6432_v15 }
 0x31f   :  { %1922 = vmatpush.bf16.msra.mxu2 %v6452_v5  ;;  %1936 = vmatpush.bf16.msra.mxu3 %v6440_v22 }
 0x322   :  { %1898 = vmatpush.bf16.msra.mxu0 %v6412_v32  ;;  %1911 = vmatpush.bf16.msra.mxu1 %v6416_v58 }
 0x323   :  { %1923 = vmatpush.bf16.msra.mxu2 %v6436_v21 }
 0x395   :  { %v1582_v51 = vpop.f32.mrf.mxu0  ;;  %v1595_v52 = vpop.f32.mrf.mxu1 }
 0x396   :  { %v1625_v54 = vadd.f32 %v1582_v51, %v1376_v36  ;;  %v1626_v55 = vadd.f32 %v1595_v52, %v1377_v37  ;;  %v6420_v36 = vor.u32 %v8045_v35, %v6419_v34  ;;  %v8043_v37 = vld [vmem:[#allocation9 + $0xc] sm:$0xf]  ;;  %v6662_v34 = vld [vmem:[#allocation9 + $0xe8] sm:$0xf]  ;;  %v8105_v35 = vld [vmem:[#allocation9 + $0xf4] sm:$0xf0] }
 0x397   :  { %v6424_v26 = vor.u32 %v8043_v37, %v6421_v38  ;;  %v8103_v37 = vld [vmem:[#allocation9 + $0xec] sm:$0xf]  ;;  %v6664_v38 = vld [vmem:[#allocation9 + $0xf8] sm:$0xf0] }
 0x398   :  { %v6406_v0 = vmul.f32 -1.442695, %v1625_v54  ;;  %v6407_v2 = vmul.f32 -1.442695, %v1626_v55  ;;  %1924 = vmatpush.bf16.msra.mxu2 %v6420_v36  ;;  %v6663_v36 = vor.u32 %v8105_v35, %v6662_v34 }
 0x399   :  { %1937 = vmatpush.bf16.msra.mxu3 %v6424_v26  ;;  %v8100_v26 = vld [vmem:[#allocation9 + $0xcc] sm:$0xf0] }
 0x39a   :  { %8483 = vpow2.f32 %v6406_v0 }
 0x39b   :  { %8485 = vpow2.f32 %v6407_v2 }
 0x39c   :  { %v1608_v19 = vpop.f32.mrf.mxu2  ;;  %v1621_v20 = vpop.f32.mrf.mxu3  ;;  %2235 = vmatpush.bf16.msrb.mxu2 %v6663_v36  ;;  %v6574_v36 = vld [vmem:[#allocation9 + $0x40] sm:$0xf] }
 0x39d   :  { %v1628_v28 = vadd.f32 %v1621_v20, %v1379_v3  ;;  %v1584_v30 = vpop.f32.mrf.mxu0  ;;  %v1597_v31 = vpop.f32.mrf.mxu1  ;;  %v1627_v52 = vadd.f32 %v1608_v19, %v1378_v61 }
 0x39e   :  { %v8104_v30 = vld [vmem:[#allocation9 + $0xec] sm:$0xf0]  ;;  %v8102_v31 = vld [vmem:[#allocation9 + $0xe4] sm:$0xf] }
 0x39f   :  { %v6408_v39 = vmul.f32 -1.442695, %v1628_v28  ;;  %v6654_v28 = vld [vmem:[#allocation9 + $0xe0] sm:$0xf]  ;;  %v6659_v58 = vor.u32 %v8102_v31, %v6656_v33  ;;  %v6600_v31 = vld [vmem:[#allocation9 + $0x78] sm:$0xf0] }
 0x3a0   :  { %v8484_v41 = vpop.eup %8483  ;;  %v6655_v32 = vor.u32 %v8104_v30, %v6654_v28  ;;  %v8087_v30 = vld [vmem:[#allocation9 + $0x6c] sm:$0xf] }
 0x3a1   :  { %v8486_v42 = vpop.eup %8485  ;;  %v1632_v43 = vadd.f32 1.0, %v8484_v41  ;;  %8487 = vpow2.f32 %v6408_v39  ;;  %v6667_v39 = vor.u32 %v8103_v37, %v6664_v38  ;;  %2222 = vmatpush.bf16.msrb.mxu1 %v6659_v58  ;;  %v6638_v41 = vld [vmem:[#allocation9 + $0xc0] sm:$0xf]  ;;  %v6603_v34 = vor.u32 %v8087_v30, %v6600_v31  ;;  %v8084_v37 = vld [vmem:[#allocation9 + $0x4c] sm:$0xf0] }
 0x3a2   :  { %v1651_v45 = vadd.f32 1.0, %v8486_v42  ;;  %2209 = vmatpush.bf16.msrb.mxu0 %v6655_v32  ;;  %v8098_v42 = vld [vmem:[#allocation9 + $0xc4] sm:$0xf] }
 0x3a3   :  { %8489 = vrcp.f32 %v1632_v43  ;;  %v1644_v59 = vand.u32 2147483648, %v1632_v43  ;;  %v1642_v62 = vand.u32 2147483647, %v1632_v43  ;;  %vm1638_vm2 = vweird.f32 %v1632_v43  ;;  %2248 = vmatpush.bf16.msrb.mxu3 %v6667_v39  ;;  %v8082_v38 = vld [vmem:[#allocation9 + $0x44] sm:$0xf] }
 0x3a4   :  { %8491 = vrcp.f32 %v1651_v45  ;;  %v1610_v25 = vpop.f32.mrf.mxu2  ;;  %v1623_v46 = vpop.f32.mrf.mxu3  ;;  %v1663_v44 = vand.u32 2147483648, %v1651_v45  ;;  %v1661_v0 = vand.u32 2147483647, %v1651_v45  ;;  %vm1657_vm3 = vweird.f32 %v1651_v45  ;;  %v1696_v30 = vld [vmem:[#allocation3 + $0xb0] sm:$0xff] }
 0x3a5   :  { %v1645_v4 = vor.u32 1.1754944e-38, %v1644_v59  ;;  %vm1643_vm6 = vcmp.eq.f32.partialorder %v1642_v62, 8.507059e+37  ;;  %v6646_v25 = vld [vmem:[#allocation9 + $0xc8] sm:$0xf]  ;;  %v8101_v46 = vld [vmem:[#allocation9 + $0xd4] sm:$0xf0]  ;;  %v6575_v39 = vor.u32 %v8084_v37, %v6574_v36 }
 0x3a6   :  { %v1664_v7 = vor.u32 1.1754944e-38, %v1663_v44  ;;  %vm1662_vm7 = vcmp.eq.f32.partialorder %v1661_v0, 8.507059e+37  ;;  %v6630_v59 = vld [vmem:[#allocation9 + $0xa8] sm:$0xf]  ;;  %v8097_v44 = vld [vmem:[#allocation9 + $0xb4] sm:$0xf0] }
 0x3a7   :  { %v8488_v48 = vpop.eup %8487  ;;  %v6631_v62 = vor.u32 %v8097_v44, %v6630_v59  ;;  %v6632_v0 = vld [vmem:[#allocation9 + $0xb8] sm:$0xf0]  ;;  %v8081_v44 = vld [vmem:[#allocation9 + $0x34] sm:$0xf0] }
 0x3a8   :  { %v1671_v50 = vadd.f32 1.0, %v8488_v48  ;;  %v6647_v48 = vor.u32 %v8101_v46, %v6646_v25  ;;  %v1697_v25 = vld [vmem:[#allocation3 + $0xb8] sm:$0xff] }
 0x3a9   :  { %v8490_v51 = vpop.eup %8489 }
 0x3aa   :  { %v8492_v53 = vpop.eup %8491  ;;  %v1634_v54 = vmul.f32 %v8490_v51, %v1632_v43  ;;  %8493 = vrcp.f32 %v1671_v50  ;;  %vm1639_vm0 = vweird.f32 %v8490_v51  ;;  %v1683_v19 = vand.u32 2147483648, %v1671_v50  ;;  %2236 = vmatpush.bf16.msrb.mxu2 %v6647_v48  ;;  %v8083_v48 = vld [vmem:[#allocation9 + $0x4c] sm:$0xf] }
 0x3ab   :  { %v1653_v55 = vmul.f32 %v8492_v53, %v1651_v45  ;;  %8495 = vtanh.f32 %v1627_v52  ;;  %vm1658_vm1 = vweird.f32 %v8492_v53  ;;  %vm1640_vm4 = vmor %vm1638_vm2, %vm1639_vm0  ;;  %vm1677_vm9 = vweird.f32 %v1671_v50  ;;  %v6640_v45 = vld [vmem:[#allocation9 + $0xd0] sm:$0xf0] }
 0x3ac   :  { %v1635_v56 = vsub.f32 1.0, %v1634_v54  ;;  %vm1659_vm5 = vmor %vm1657_vm3, %vm1658_vm1  ;;  %v1681_v20 = vand.u32 2147483647, %v1671_v50  ;;  %v1684_v22 = vor.u32 1.1754944e-38, %v1683_v19  ;;  %v6639_v43 = vor.u32 %v8100_v26, %v6638_v41  ;;  %v8096_v54 = vld [vmem:[#allocation9 + $0xac] sm:$0xf0] }
 0x3ad   :  { %v1654_v57 = vsub.f32 1.0, %v1653_v55  ;;  %v6643_v61 = vor.u32 %v8098_v42, %v6640_v45  ;;  %v8094_v55 = vld [vmem:[#allocation9 + $0xa4] sm:$0xf]  ;;  %v8088_v19 = vld [vmem:[#allocation9 + $0x6c] sm:$0xf0] }
 0x3ae   :  { %v1636_v60 = vmul.f32 %v8490_v51, %v1635_v56  ;;  %vm1682_vm11 = vcmp.eq.f32.partialorder %v1681_v20, 8.507059e+37  ;;  %2210 = vmatpush.bf16.msrb.mxu0 %v6639_v43  ;;  %2237 = vmatpush.bf16.msrb.mxu2 %v6631_v62  ;;  %v8086_v20 = vld [vmem:[#allocation9 + $0x64] sm:$0xf]  ;;  %v6576_v41 = vld [vmem:[#allocation9 + $0x50] sm:$0xf0] }
 0x3af   :  { %v1655_v63 = vmul.f32 %v8492_v53, %v1654_v57  ;;  %2223 = vmatpush.bf16.msrb.mxu1 %v6643_v61  ;;  %v6624_v57 = vld [vmem:[#allocation9 + $0xb0] sm:$0xf0]  ;;  %v6582_v26 = vld [vmem:[#allocation9 + $0x48] sm:$0xf]  ;;  %v8085_v42 = vld [vmem:[#allocation9 + $0x54] sm:$0xf0]  ;;  %v6579_v46 = vor.u32 %v8082_v38, %v6576_v41 }
 0x3b0   :  { %v8494_v2 = vpop.eup %8493  ;;  %v1637_v3 = vadd.f32 %v8490_v51, %v1636_v60  ;;  %v6627_v60 = vor.u32 %v8094_v55, %v6624_v57  ;;  %v6583_v61 = vor.u32 %v8085_v42, %v6582_v26  ;;  %v8078_v55 = vld [vmem:[#allocation9 + $0x24] sm:$0xf]  ;;  %v6566_v57 = vld [vmem:[#allocation9 + $0x28] sm:$0xf]  ;;  %v6568_v62 = vld [vmem:[#allocation9 + $0x38] sm:$0xf0] }
 0x3b1   :  { %v1656_v5 = vadd.f32 %v8492_v53, %v1655_v63  ;;  %v1673_v6 = vmul.f32 %v8494_v2, %v1671_v50  ;;  %v8496_v9 = vpop.eup %8495  ;;  %vm1678_vm8 = vweird.f32 %v8494_v2  ;;  %v8099_v50 = vld [vmem:[#allocation9 + $0xcc] sm:$0xf] }
 0x3b2   :  { %v1641_v8 = vsel %vm1640_vm4, %v8490_v51, %v1637_v3  ;;  %vm1679_vm10 = vmor %vm1677_vm9, %vm1678_vm8  ;;  %v6648_v51 = vld [vmem:[#allocation9 + $0xd8] sm:$0xf0]  ;;  %v8095_v63 = vld [vmem:[#allocation9 + $0xac] sm:$0xf] }
 0x3b3   :  { %v1646_v10 = vsel %vm1643_vm6, %v1645_v4, %v1641_v8  ;;  %v1660_v11 = vsel %vm1659_vm5, %v8492_v53, %v1656_v5  ;;  %v1674_v12 = vsub.f32 1.0, %v1673_v6  ;;  %v6651_v52 = vor.u32 %v8099_v50, %v6648_v51  ;;  %v6622_v53 = vld [vmem:[#allocation9 + $0xa0] sm:$0xf]  ;;  %2224 = vmatpush.bf16.msrb.mxu1 %v6627_v60  ;;  %v8092_v4 = vld [vmem:[#allocation9 + $0x8c] sm:$0xf0] }
 0x3b4   :  { %v1665_v13 = vsel %vm1662_vm7, %v1664_v7, %v1660_v11  ;;  %v1688_v14 = vmul.f32 %v8496_v9, %v1646_v10  ;;  %v6623_v56 = vor.u32 %v8096_v54, %v6622_v53  ;;  %v6606_v3 = vld [vmem:[#allocation9 + $0x80] sm:$0xf]  ;;  %v8090_v5 = vld [vmem:[#allocation9 + $0x84] sm:$0xf]  ;;  %v6608_v7 = vld [vmem:[#allocation9 + $0x90] sm:$0xf0] }
 0x3b5   :  { %v1687_v15 = vmul.f32 %v1665_v13, %v9115_v40  ;;  %v1675_v16 = vmul.f32 %v8494_v2, %v1674_v12  ;;  %2249 = vmatpush.bf16.msrb.mxu3 %v6651_v52  ;;  %v6607_v6 = vor.u32 %v8092_v4, %v6606_v3  ;;  %v6614_v8 = vld [vmem:[#allocation9 + $0x88] sm:$0xf]  ;;  %v8093_v9 = vld [vmem:[#allocation9 + $0x94] sm:$0xf0]  ;;  %v6611_v10 = vor.u32 %v8090_v5, %v6608_v7  ;;  %v8091_v12 = vld [vmem:[#allocation9 + $0x8c] sm:$0xf] }
 0x3b6   :  { %2211 = vmatpush.bf16.msrb.mxu0 %v6623_v56  ;;  %v6615_v11 = vor.u32 %v8093_v9, %v6614_v8  ;;  %v6616_v13 = vld [vmem:[#allocation9 + $0x98] sm:$0xf0]  ;;  %v6558_v51 = vld [vmem:[#allocation9 + $0x20] sm:$0xf]  ;;  %v8080_v52 = vld [vmem:[#allocation9 + $0x2c] sm:$0xf0] }
 0x3b7   :  { %v9123_v17 = vadd.f32 %v1688_v14, %v1687_v15  ;;  %v1676_v18 = vadd.f32 %v8494_v2, %v1675_v16  ;;  %v1694_v14 = vld [vmem:[#allocation3 + $0xa0] sm:$0xff]  ;;  %v1695_v15 = vld [vmem:[#allocation3 + $0xa8] sm:$0xff]  ;;  %v6619_v16 = vor.u32 %v8091_v12, %v6616_v13  ;;  %2225 = vmatpush.bf16.msrb.mxu1 %v6611_v10  ;;  %v6559_v54 = vor.u32 %v8080_v52, %v6558_v51  ;;  %v8079_v60 = vld [vmem:[#allocation9 + $0x2c] sm:$0xf] }
 0x3b8   :  { %2238 = vmatpush.bf16.msrb.mxu2 %v6615_v11  ;;  %v6584_v50 = vld [vmem:[#allocation9 + $0x58] sm:$0xf0]  ;;  %v6560_v56 = vld [vmem:[#allocation9 + $0x30] sm:$0xf0]  ;;  %v6571_v3 = vor.u32 %v8079_v60, %v6568_v62  ;;  %v6542_v4 = vld [vmem:[#allocation9] sm:$0xf] }
 0x3b9   :  { %8497 = vtanh.f32 %v9123_v17  ;;  %v1680_v21 = vsel %vm1679_vm10, %v8494_v2, %v1676_v18  ;;  %v6635_v2 = vor.u32 %v8095_v63, %v6632_v0  ;;  %v6590_v18 = vld [vmem:[#allocation9 + $0x60] sm:$0xf]  ;;  %v6587_v53 = vor.u32 %v8083_v48, %v6584_v50  ;;  %v8076_v5 = vld [vmem:[#allocation9 + $0xc] sm:$0xf0]  ;;  %v6544_v11 = vld [vmem:[#allocation9 + $0x10] sm:$0xf0] }
 0x3ba   :  { %v1685_v24 = vsel %vm1682_vm11, %v1684_v22, %v1680_v21  ;;  %2212 = vmatpush.bf16.msrb.mxu0 %v6607_v6  ;;  %v6591_v21 = vor.u32 %v8088_v19, %v6590_v18  ;;  %v6592_v22 = vld [vmem:[#allocation9 + $0x70] sm:$0xf0]  ;;  %v6563_v59 = vor.u32 %v8078_v55, %v6560_v56  ;;  %v8074_v6 = vld [vmem:[#allocation9 + $0x4] sm:$0xf]  ;;  %v6543_v10 = vor.u32 %v8076_v5, %v6542_v4  ;;  %v6550_v12 = vld [vmem:[#allocation9 + $0x8] sm:$0xf] }
 0x3bb   :  { %2250 = vmatpush.bf16.msrb.mxu3 %v6635_v2  ;;  %v6567_v2 = vor.u32 %v8081_v44, %v6566_v57  ;;  %v8077_v13 = vld [vmem:[#allocation9 + $0x14] sm:$0xf0]  ;;  %v6552_v18 = vld [vmem:[#allocation9 + $0x18] sm:$0xf0] }
 0x3be   :  { %2213 = vmatpush.bf16.msrb.mxu0 %v6591_v21 }
 0x3bf   :  { %v8498_v23 = vpop.eup %8497  ;;  %2251 = vmatpush.bf16.msrb.mxu3 %v6619_v16  ;;  %v8075_v16 = vld [vmem:[#allocation9 + $0xc] sm:$0xf] }
 0x3c0   :  { %v9126_v27 = vmul.f32 %v8498_v23, %v1685_v24  ;;  %v6598_v23 = vld [vmem:[#allocation9 + $0x68] sm:$0xf]  ;;  %v8089_v24 = vld [vmem:[#allocation9 + $0x74] sm:$0xf0]  ;;  %v6555_v21 = vor.u32 %v8075_v16, %v6552_v18  ;;  %v8135_v18 = vld [vmem:[#allocation9 + $0xec] sm:$0xf] }
 0x3c1   :  { %v6599_v28 = vor.u32 %v8089_v24, %v6598_v23 }
 0x3c2   :  { %v1698_v40 = vpack.c.bf16 %v9126_v27, %v9126_v27  ;;  %2214 = vmatpush.bf16.msrb.mxu0 %v6575_v39 }
 0x3c3   :  { %2239 = vmatpush.bf16.msrb.mxu2 %v6599_v28  ;;  %2252 = vmatpush.bf16.msrb.mxu3 %v6603_v34 }
 0x3c4   :  { %1899 = vmatmul.bf16.vlgmr.msra.gmra.mxu0 %v1698_v40  ;;  %1912 = vmatmul.bf16.vlgmr.msra.gmra.mxu1 %v1698_v40 }
 0x3c5   :  { %1925 = vmatmul.bf16.vlgmr.msra.gmra.mxu2 %v1698_v40  ;;  %1938 = vmatmul.bf16.vlgmr.msra.gmra.mxu3 %v1698_v40  ;;  %v6595_v40 = vor.u32 %v8086_v20, %v6592_v22 }
 0x3c6   :  { %2215 = vmatpush.bf16.msrb.mxu0 %v6559_v54 }
 0x3c7   :  { %2226 = vmatpush.bf16.msrb.mxu1 %v6595_v40  ;;  %2240 = vmatpush.bf16.msrb.mxu2 %v6583_v61 }
 0x3c8   :  { %2253 = vmatpush.bf16.msrb.mxu3 %v6587_v53 }
 0x3ca   :  { %2216 = vmatpush.bf16.msrb.mxu0 %v6543_v10  ;;  %v8134_v10 = vld [vmem:[#allocation9 + $0xe4] sm:$0xf] }
 0x3cb   :  { %2227 = vmatpush.bf16.msrb.mxu1 %v6579_v46  ;;  %2241 = vmatpush.bf16.msrb.mxu2 %v6567_v2 }
 0x3cc   :  { %2254 = vmatpush.bf16.msrb.mxu3 %v6571_v3 }
 0x3cf   :  { %2228 = vmatpush.bf16.msrb.mxu1 %v6563_v59 }
 0x3d0   :  { %2255 = vmatpush.bf16.msrb.mxu3 %v6555_v21  ;;  %v6769_v21 = vld [vmem:[#allocation9 + $0xc0] sm:$0xf] }
 0x441   :  { %v1900_v32 = vpop.f32.mrf.mxu0  ;;  %v1913_v33 = vpop.f32.mrf.mxu1 }
 0x442   :  { %v1943_v35 = vadd.f32 %v1900_v32, %v1694_v14  ;;  %v1944_v58 = vadd.f32 %v1913_v33, %v1695_v15  ;;  %v6547_v14 = vor.u32 %v8074_v6, %v6544_v11  ;;  %v6551_v15 = vor.u32 %v8077_v13, %v6550_v12  ;;  %v6787_v12 = vld [vmem:[#allocation9 + $0xf0] sm:$0xf0]  ;;  %v6793_v13 = vld [vmem:[#allocation9 + $0xe8] sm:$0xf] }
 0x444   :  { %v6537_v43 = vmul.f32 -1.442695, %v1943_v35  ;;  %v6538_v45 = vmul.f32 -1.442695, %v1944_v58  ;;  %2229 = vmatpush.bf16.msrb.mxu1 %v6547_v14  ;;  %2242 = vmatpush.bf16.msrb.mxu2 %v6551_v15  ;;  %v8137_v14 = vld [vmem:[#allocation9 + $0xf4] sm:$0xf0]  ;;  %v6790_v15 = vor.u32 %v8134_v10, %v6787_v12 }
 0x445   :  { %v6794_v16 = vor.u32 %v8137_v14, %v6793_v13  ;;  %v8119_v10 = vld [vmem:[#allocation9 + $0x6c] sm:$0xf] }
 0x446   :  { %8499 = vpow2.f32 %v6537_v43 }
 0x447   :  { %8501 = vpow2.f32 %v6538_v45 }
 0x448   :  { %v1926_v63 = vpop.f32.mrf.mxu2  ;;  %v1939_v0 = vpop.f32.mrf.mxu3  ;;  %2540 = vmatpush.bf16.msra.mxu1 %v6790_v15  ;;  %2553 = vmatpush.bf16.msra.mxu2 %v6794_v16 }
 0x449   :  { %v1946_v7 = vadd.f32 %v1939_v0, %v1697_v25  ;;  %v1902_v8 = vpop.f32.mrf.mxu0  ;;  %v1915_v9 = vpop.f32.mrf.mxu1  ;;  %v1945_v34 = vadd.f32 %v1926_v63, %v1696_v30  ;;  %v8133_v30 = vld [vmem:[#allocation9 + $0xd4] sm:$0xf0] }
 0x44a   :  { %v6785_v8 = vld [vmem:[#allocation9 + $0xe0] sm:$0xf]  ;;  %v8136_v9 = vld [vmem:[#allocation9 + $0xec] sm:$0xf0] }
 0x44b   :  { %v6539_v19 = vmul.f32 -1.442695, %v1946_v7  ;;  %v6786_v11 = vor.u32 %v8136_v9, %v6785_v8 }
 0x44c   :  { %v8500_v20 = vpop.eup %8499 }
 0x44d   :  { %v8502_v22 = vpop.eup %8501  ;;  %v1950_v23 = vadd.f32 1.0, %v8500_v20  ;;  %8503 = vpow2.f32 %v6539_v19  ;;  %v6795_v19 = vld [vmem:[#allocation9 + $0xf8] sm:$0xf0]  ;;  %2527 = vmatpush.bf16.msra.mxu0 %v6786_v11 }
 0x44e   :  { %v1969_v24 = vadd.f32 1.0, %v8502_v22  ;;  %v6798_v20 = vor.u32 %v8135_v18, %v6795_v19  ;;  %v8132_v22 = vld [vmem:[#allocation9 + $0xcc] sm:$0xf0]  ;;  %v6731_v11 = vld [vmem:[#allocation9 + $0x78] sm:$0xf0] }
 0x44f   :  { %8505 = vrcp.f32 %v1950_v23  ;;  %v1962_v39 = vand.u32 2147483648, %v1950_v23  ;;  %v1960_v42 = vand.u32 2147483647, %v1950_v23  ;;  %vm1956_vm14 = vweird.f32 %v1950_v23  ;;  %v6705_v18 = vld [vmem:[#allocation9 + $0x40] sm:$0xf] }
 0x450   :  { %8507 = vrcp.f32 %v1969_v24  ;;  %v1928_v40 = vpop.f32.mrf.mxu2  ;;  %v1941_v28 = vpop.f32.mrf.mxu3  ;;  %v1981_v41 = vand.u32 2147483648, %v1969_v24  ;;  %v1979_v45 = vand.u32 2147483647, %v1969_v24  ;;  %vm1975_vm15 = vweird.f32 %v1969_v24  ;;  %2566 = vmatpush.bf16.msra.mxu3 %v6798_v20  ;;  %v8116_v19 = vld [vmem:[#allocation9 + $0x4c] sm:$0xf0] }
 0x451   :  { %v1963_v61 = vor.u32 1.1754944e-38, %v1962_v39  ;;  %vm1961_vm2 = vcmp.eq.f32.partialorder %v1960_v42, 8.507059e+37  ;;  %v6771_v40 = vld [vmem:[#allocation9 + $0xd0] sm:$0xf0]  ;;  %v6777_v28 = vld [vmem:[#allocation9 + $0xc8] sm:$0xf]  ;;  %v6734_v14 = vor.u32 %v8119_v10, %v6731_v11 }
 0x452   :  { %v1982_v51 = vor.u32 1.1754944e-38, %v1981_v41  ;;  %vm1980_vm3 = vcmp.eq.f32.partialorder %v1979_v45, 8.507059e+37  ;;  %v6755_v39 = vld [vmem:[#allocation9 + $0xb0] sm:$0xf0]  ;;  %v6761_v41 = vld [vmem:[#allocation9 + $0xa8] sm:$0xf] }
 0x453   :  { %v8504_v31 = vpop.eup %8503  ;;  %v8127_v45 = vld [vmem:[#allocation9 + $0xac] sm:$0xf]  ;;  %v8114_v20 = vld [vmem:[#allocation9 + $0x44] sm:$0xf] }
 0x454   :  { %v1989_v32 = vadd.f32 1.0, %v8504_v31  ;;  %v2014_v11 = vld [vmem:[#allocation3 + $0xd0] sm:$0xff] }
 0x455   :  { %v8506_v33 = vpop.eup %8505 }
 0x456   :  { %v8508_v35 = vpop.eup %8507  ;;  %v1952_v58 = vmul.f32 %v8506_v33, %v1950_v23  ;;  %8509 = vrcp.f32 %v1989_v32  ;;  %vm1957_vm12 = vweird.f32 %v8506_v33  ;;  %v2001_v0 = vand.u32 2147483648, %v1989_v32  ;;  %v8130_v23 = vld [vmem:[#allocation9 + $0xc4] sm:$0xf] }
 0x457   :  { %v1971_v36 = vmul.f32 %v8508_v35, %v1969_v24  ;;  %8511 = vtanh.f32 %v1945_v34  ;;  %vm1976_vm13 = vweird.f32 %v8508_v35  ;;  %vm1958_vm0 = vmor %vm1956_vm14, %vm1957_vm12  ;;  %vm1995_vm5 = vweird.f32 %v1989_v32  ;;  %v6779_v34 = vld [vmem:[#allocation9 + $0xd8] sm:$0xf0] }
 0x458   :  { %v1953_v37 = vsub.f32 1.0, %v1952_v58  ;;  %vm1977_vm1 = vmor %vm1975_vm15, %vm1976_vm13  ;;  %v1999_v2 = vand.u32 2147483647, %v1989_v32  ;;  %v2002_v4 = vor.u32 1.1754944e-38, %v2001_v0  ;;  %v6770_v24 = vor.u32 %v8132_v22, %v6769_v21  ;;  %v6753_v58 = vld [vmem:[#allocation9 + $0xa0] sm:$0xf] }
 0x459   :  { %v1972_v38 = vsub.f32 1.0, %v1971_v36  ;;  %v6774_v31 = vor.u32 %v8130_v23, %v6771_v40  ;;  %v8128_v36 = vld [vmem:[#allocation9 + $0xac] sm:$0xf0]  ;;  %v6721_v0 = vld [vmem:[#allocation9 + $0x60] sm:$0xf]  ;;  %v6706_v21 = vor.u32 %v8116_v19, %v6705_v18 }
 0x45a   :  { %v1954_v26 = vmul.f32 %v8506_v33, %v1953_v37  ;;  %vm2000_vm7 = vcmp.eq.f32.partialorder %v1999_v2, 8.507059e+37  ;;  %2528 = vmatpush.bf16.msra.mxu0 %v6770_v24  ;;  %v8126_v37 = vld [vmem:[#allocation9 + $0xa4] sm:$0xf]  ;;  %v8120_v2 = vld [vmem:[#allocation9 + $0x6c] sm:$0xf0] }
 0x45b   :  { %v1973_v43 = vmul.f32 %v8508_v35, %v1972_v38  ;;  %2541 = vmatpush.bf16.msra.mxu1 %v6774_v31  ;;  %v6754_v38 = vor.u32 %v8128_v36, %v6753_v58  ;;  %v6758_v42 = vor.u32 %v8126_v37, %v6755_v39  ;;  %v6707_v22 = vld [vmem:[#allocation9 + $0x50] sm:$0xf0]  ;;  %v6713_v23 = vld [vmem:[#allocation9 + $0x48] sm:$0xf]  ;;  %v8117_v24 = vld [vmem:[#allocation9 + $0x54] sm:$0xf0] }
 0x45c   :  { %v8510_v25 = vpop.eup %8509  ;;  %v1955_v46 = vadd.f32 %v8506_v33, %v1954_v26  ;;  %v8129_v26 = vld [vmem:[#allocation9 + $0xb4] sm:$0xf0]  ;;  %v6710_v31 = vor.u32 %v8114_v20, %v6707_v22  ;;  %v8112_v58 = vld [vmem:[#allocation9 + $0x2c] sm:$0xf0]  ;;  %v6691_v39 = vld [vmem:[#allocation9 + $0x30] sm:$0xf0] }
 0x45d   :  { %v1974_v48 = vadd.f32 %v8508_v35, %v1973_v43  ;;  %v1991_v50 = vmul.f32 %v8510_v25, %v1989_v32  ;;  %v8512_v53 = vpop.eup %8511  ;;  %vm1996_vm4 = vweird.f32 %v8510_v25  ;;  %v6778_v32 = vor.u32 %v8133_v30, %v6777_v28  ;;  %v2015_v30 = vld [vmem:[#allocation3 + $0xd8] sm:$0xff] }
 0x45e   :  { %v1959_v52 = vsel %vm1958_vm0, %v8506_v33, %v1955_v46  ;;  %vm1997_vm6 = vmor %vm1995_vm5, %vm1996_vm4  ;;  %v8131_v33 = vld [vmem:[#allocation9 + $0xcc] sm:$0xf]  ;;  %v6762_v43 = vor.u32 %v8129_v26, %v6761_v41  ;;  %2529 = vmatpush.bf16.msra.mxu0 %v6754_v38  ;;  %v8110_v38 = vld [vmem:[#allocation9 + $0x24] sm:$0xf] }
 0x45f   :  { %v1964_v54 = vsel %vm1961_vm2, %v1963_v61, %v1959_v52  ;;  %v1978_v55 = vsel %vm1977_vm1, %v8508_v35, %v1974_v48  ;;  %v1992_v56 = vsub.f32 1.0, %v1991_v50  ;;  %v6782_v35 = vor.u32 %v8131_v33, %v6779_v34  ;;  %2554 = vmatpush.bf16.msra.mxu2 %v6778_v32  ;;  %2542 = vmatpush.bf16.msra.mxu1 %v6758_v42  ;;  %v6737_v61 = vld [vmem:[#allocation9 + $0x80] sm:$0xf]  ;;  %v8124_v48 = vld [vmem:[#allocation9 + $0x8c] sm:$0xf0] }
 0x460   :  { %v1983_v57 = vsel %vm1980_vm3, %v1982_v51, %v1978_v55  ;;  %v2006_v59 = vmul.f32 %v8512_v53, %v1964_v54  ;;  %v8122_v50 = vld [vmem:[#allocation9 + $0x84] sm:$0xf]  ;;  %v6738_v51 = vor.u32 %v8124_v48, %v6737_v61  ;;  %v6739_v52 = vld [vmem:[#allocation9 + $0x90] sm:$0xf0]  ;;  %v6745_v53 = vld [vmem:[#allocation9 + $0x88] sm:$0xf]  ;;  %v6714_v32 = vor.u32 %v8117_v24, %v6713_v23 }
 0x461   :  { %v2005_v44 = vmul.f32 %v1983_v57, %v9123_v17  ;;  %v1993_v60 = vmul.f32 %v8510_v25, %v1992_v56  ;;  %2567 = vmatpush.bf16.msra.mxu3 %v6782_v35  ;;  %v8125_v54 = vld [vmem:[#allocation9 + $0x94] sm:$0xf0]  ;;  %v6742_v55 = vor.u32 %v8122_v50, %v6739_v52  ;;  %v8123_v57 = vld [vmem:[#allocation9 + $0x8c] sm:$0xf]  ;;  %v6715_v34 = vld [vmem:[#allocation9 + $0x58] sm:$0xf0]  ;;  %v6694_v26 = vor.u32 %v8110_v38, %v6691_v39 }
 0x462   :  { %v6746_v56 = vor.u32 %v8125_v54, %v6745_v53  ;;  %2530 = vmatpush.bf16.msra.mxu0 %v6738_v51  ;;  %v8115_v33 = vld [vmem:[#allocation9 + $0x4c] sm:$0xf]  ;;  %v6689_v35 = vld [vmem:[#allocation9 + $0x20] sm:$0xf]  ;;  %v6697_v41 = vld [vmem:[#allocation9 + $0x28] sm:$0xf] }
 0x463   :  { %v9131_v62 = vadd.f32 %v2006_v59, %v2005_v44  ;;  %v1994_v63 = vadd.f32 %v8510_v25, %v1993_v60  ;;  %2555 = vmatpush.bf16.msra.mxu2 %v6762_v43  ;;  %v6747_v59 = vld [vmem:[#allocation9 + $0x98] sm:$0xf0]  ;;  %v2012_v44 = vld [vmem:[#allocation3 + $0xc0] sm:$0xff]  ;;  %2543 = vmatpush.bf16.msra.mxu1 %v6742_v55  ;;  %v6718_v36 = vor.u32 %v8115_v33, %v6715_v34  ;;  %v8113_v42 = vld [vmem:[#allocation9 + $0x34] sm:$0xf0] }
 0x464   :  { %v2013_v60 = vld [vmem:[#allocation3 + $0xc8] sm:$0xff]  ;;  %v6690_v37 = vor.u32 %v8112_v58, %v6689_v35  ;;  %v8111_v43 = vld [vmem:[#allocation9 + $0x2c] sm:$0xf]  ;;  %v6698_v61 = vor.u32 %v8113_v42, %v6697_v41  ;;  %v6673_v50 = vld [vmem:[#allocation9] sm:$0xf] }
 0x465   :  { %8513 = vtanh.f32 %v9131_v62  ;;  %v1998_v3 = vsel %vm1997_vm6, %v8510_v25, %v1994_v63  ;;  %v6763_v25 = vld [vmem:[#allocation9 + $0xb8] sm:$0xf0]  ;;  %v6750_v63 = vor.u32 %v8123_v57, %v6747_v59  ;;  %v8108_v51 = vld [vmem:[#allocation9 + $0xc] sm:$0xf0]  ;;  %v8106_v52 = vld [vmem:[#allocation9 + $0x4] sm:$0xf] }
 0x466   :  { %v2003_v6 = vsel %vm2000_vm7, %v2002_v4, %v1998_v3  ;;  %v6766_v46 = vor.u32 %v8127_v45, %v6763_v25  ;;  %v8118_v3 = vld [vmem:[#allocation9 + $0x64] sm:$0xf]  ;;  %v6722_v4 = vor.u32 %v8120_v2, %v6721_v0  ;;  %v6699_v45 = vld [vmem:[#allocation9 + $0x38] sm:$0xf0]  ;;  %v6675_v57 = vld [vmem:[#allocation9 + $0x10] sm:$0xf0] }
 0x467   :  { %2556 = vmatpush.bf16.msra.mxu2 %v6746_v56  ;;  %v6702_v48 = vor.u32 %v8111_v43, %v6699_v45  ;;  %v6674_v56 = vor.u32 %v8108_v51, %v6673_v50  ;;  %v6681_v59 = vld [vmem:[#allocation9 + $0x8] sm:$0xf]  ;;  %v8107_v0 = vld [vmem:[#allocation9 + $0xc] sm:$0xf]  ;;  %v6683_v2 = vld [vmem:[#allocation9 + $0x18] sm:$0xf0] }
 0x468   :  { %2568 = vmatpush.bf16.msra.mxu3 %v6766_v46  ;;  %2531 = vmatpush.bf16.msra.mxu0 %v6722_v4 }
 0x46b   :  { %v8514_v5 = vpop.eup %8513 }
 0x46c   :  { %v9134_v7 = vmul.f32 %v8514_v5, %v2003_v6  ;;  %2569 = vmatpush.bf16.msra.mxu3 %v6750_v63  ;;  %v6723_v5 = vld [vmem:[#allocation9 + $0x70] sm:$0xf0]  ;;  %v6729_v6 = vld [vmem:[#allocation9 + $0x68] sm:$0xf]  ;;  %2532 = vmatpush.bf16.msra.mxu0 %v6706_v21 }
 0x46d   :  { %v6726_v8 = vor.u32 %v8118_v3, %v6723_v5  ;;  %v6686_v5 = vor.u32 %v8107_v0, %v6683_v2 }
 0x46e   :  { %v2016_v17 = vpack.c.bf16 %v9134_v7, %v9134_v7 }
 0x46f   :  { %2544 = vmatpush.bf16.msra.mxu1 %v6726_v8 }
 0x470   :  { %2217 = vmatmul.bf16.vlgmr.msrb.gmra.mxu0 %v2016_v17  ;;  %2230 = vmatmul.bf16.vlgmr.msrb.gmra.mxu1 %v2016_v17 }
 0x471   :  { %2243 = vmatmul.bf16.vlgmr.msrb.gmra.mxu2 %v2016_v17  ;;  %2256 = vmatmul.bf16.vlgmr.msrb.gmra.mxu3 %v2016_v17  ;;  %v8121_v17 = vld [vmem:[#allocation9 + $0x74] sm:$0xf0] }
 0x472   :  { %v6730_v9 = vor.u32 %v8121_v17, %v6729_v6  ;;  %2570 = vmatpush.bf16.msra.mxu3 %v6734_v14  ;;  %2533 = vmatpush.bf16.msra.mxu0 %v6690_v37 }
 0x473   :  { %2545 = vmatpush.bf16.msra.mxu1 %v6710_v31 }
 0x474   :  { %2557 = vmatpush.bf16.msra.mxu2 %v6730_v9 }
 0x476   :  { %2571 = vmatpush.bf16.msra.mxu3 %v6718_v36  ;;  %2534 = vmatpush.bf16.msra.mxu0 %v6674_v56  ;;  %v8168_v56 = vld [vmem:[#allocation9 + $0xec] sm:$0xf0] }
 0x477   :  { %2546 = vmatpush.bf16.msra.mxu1 %v6694_v26 }
 0x478   :  { %2558 = vmatpush.bf16.msra.mxu2 %v6714_v32 }
 0x47a   :  { %2572 = vmatpush.bf16.msra.mxu3 %v6702_v48 }
 0x47c   :  { %2559 = vmatpush.bf16.msra.mxu2 %v6698_v61 }
 0x47e   :  { %2573 = vmatpush.bf16.msra.mxu3 %v6686_v5 }
 0x4ed   :  { %v2218_v12 = vpop.f32.mrf.mxu0  ;;  %v2231_v13 = vpop.f32.mrf.mxu1 }
 0x4ee   :  { %v2261_v15 = vadd.f32 %v2218_v12, %v2012_v44  ;;  %v2262_v16 = vadd.f32 %v2231_v13, %v2013_v60  ;;  %v8109_v44 = vld [vmem:[#allocation9 + $0x14] sm:$0xf0]  ;;  %v6678_v60 = vor.u32 %v8106_v52, %v6675_v57  ;;  %v8166_v57 = vld [vmem:[#allocation9 + $0xe4] sm:$0xf] }
 0x4ef   :  { %v6682_v63 = vor.u32 %v8109_v44, %v6681_v59  ;;  %v6918_v44 = vld [vmem:[#allocation9 + $0xf0] sm:$0xf0] }
 0x4f0   :  { %v6668_v40 = vmul.f32 -1.442695, %v2261_v15  ;;  %v6669_v28 = vmul.f32 -1.442695, %v2262_v16  ;;  %2547 = vmatpush.bf16.msra.mxu1 %v6678_v60  ;;  %v6924_v60 = vld [vmem:[#allocation9 + $0xe8] sm:$0xf]  ;;  %v6921_v0 = vor.u32 %v8166_v57, %v6918_v44 }
 0x4f1   :  { %2560 = vmatpush.bf16.msra.mxu2 %v6682_v63  ;;  %v8169_v63 = vld [vmem:[#allocation9 + $0xf4] sm:$0xf0]  ;;  %v6862_v44 = vld [vmem:[#allocation9 + $0x78] sm:$0xf0] }
 0x4f2   :  { %8515 = vpow2.f32 %v6668_v40  ;;  %v6925_v2 = vor.u32 %v8169_v63, %v6924_v60 }
 0x4f3   :  { %8517 = vpow2.f32 %v6669_v28 }
 0x4f4   :  { %v2244_v25 = vpop.f32.mrf.mxu2  ;;  %v2257_v46 = vpop.f32.mrf.mxu3  ;;  %2858 = vmatpush.bf16.msrb.mxu1 %v6921_v0 }
 0x4f5   :  { %v2264_v53 = vadd.f32 %v2257_v46, %v2015_v30  ;;  %v2220_v54 = vpop.f32.mrf.mxu0  ;;  %v2233_v55 = vpop.f32.mrf.mxu1  ;;  %v2263_v15 = vadd.f32 %v2244_v25, %v2014_v11  ;;  %2871 = vmatpush.bf16.msrb.mxu2 %v6925_v2  ;;  %v6908_v11 = vld [vmem:[#allocation9 + $0xc8] sm:$0xf] }
 0x4f6   :  { %v6916_v55 = vld [vmem:[#allocation9 + $0xe0] sm:$0xf] }
 0x4f7   :  { %v6670_v3 = vmul.f32 -1.442695, %v2264_v53  ;;  %v6917_v59 = vor.u32 %v8168_v56, %v6916_v55  ;;  %v8153_v55 = vld [vmem:[#allocation9 + $0x74] sm:$0xf0] }
 0x4f8   :  { %v8516_v4 = vpop.eup %8515 }
 0x4f9   :  { %v8518_v6 = vpop.eup %8517  ;;  %v2268_v17 = vadd.f32 1.0, %v8516_v4  ;;  %8519 = vpow2.f32 %v6670_v3  ;;  %v8167_v3 = vld [vmem:[#allocation9 + $0xec] sm:$0xf]  ;;  %v6926_v4 = vld [vmem:[#allocation9 + $0xf8] sm:$0xf0]  ;;  %2845 = vmatpush.bf16.msrb.mxu0 %v6917_v59 }
 0x4fa   :  { %v2287_v8 = vadd.f32 1.0, %v8518_v6  ;;  %v6929_v5 = vor.u32 %v8167_v3, %v6926_v4  ;;  %v6900_v6 = vld [vmem:[#allocation9 + $0xc0] sm:$0xf]  ;;  %v8151_v59 = vld [vmem:[#allocation9 + $0x6c] sm:$0xf] }
 0x4fb   :  { %8521 = vrcp.f32 %v2268_v17  ;;  %v2280_v22 = vand.u32 2147483648, %v2268_v17  ;;  %v2278_v40 = vand.u32 2147483647, %v2268_v17  ;;  %vm2274_vm10 = vweird.f32 %v2268_v17  ;;  %v6836_v4 = vld [vmem:[#allocation9 + $0x40] sm:$0xf] }
 0x4fc   :  { %8523 = vrcp.f32 %v2287_v8  ;;  %v2246_v9 = vpop.f32.mrf.mxu2  ;;  %v2259_v10 = vpop.f32.mrf.mxu3  ;;  %v2299_v23 = vand.u32 2147483648, %v2287_v8  ;;  %v2297_v30 = vand.u32 2147483647, %v2287_v8  ;;  %vm2293_vm11 = vweird.f32 %v2287_v8  ;;  %2884 = vmatpush.bf16.msrb.mxu3 %v6929_v5  ;;  %v8148_v5 = vld [vmem:[#allocation9 + $0x4c] sm:$0xf0] }
 0x4fd   :  { %v2281_v33 = vor.u32 1.1754944e-38, %v2280_v22  ;;  %vm2279_vm14 = vcmp.eq.f32.partialorder %v2278_v40, 8.507059e+37  ;;  %v6902_v10 = vld [vmem:[#allocation9 + $0xd0] sm:$0xf0]  ;;  %v8161_v40 = vld [vmem:[#allocation9 + $0xb4] sm:$0xf0]  ;;  %v6865_v0 = vor.u32 %v8151_v59, %v6862_v44 }
 0x4fe   :  { %v2300_v58 = vor.u32 1.1754944e-38, %v2299_v23  ;;  %vm2298_vm15 = vcmp.eq.f32.partialorder %v2297_v30, 8.507059e+37  ;;  %v6886_v23 = vld [vmem:[#allocation9 + $0xb0] sm:$0xf0] }
 0x4ff   :  { %v8520_v12 = vpop.eup %8519 }
 0x500   :  { %v2307_v13 = vadd.f32 1.0, %v8520_v12  ;;  %v8165_v12 = vld [vmem:[#allocation9 + $0xd4] sm:$0xf0] }
 0x501   :  { %v8522_v14 = vpop.eup %8521 }
 0x502   :  { %v8524_v16 = vpop.eup %8523  ;;  %v2270_v18 = vmul.f32 %v8522_v14, %v2268_v17  ;;  %8525 = vrcp.f32 %v2307_v13  ;;  %vm2275_vm8 = vweird.f32 %v8522_v14  ;;  %v2319_v61 = vand.u32 2147483648, %v2307_v13  ;;  %v8164_v17 = vld [vmem:[#allocation9 + $0xcc] sm:$0xf0] }
 0x503   :  { %v2289_v19 = vmul.f32 %v8524_v16, %v2287_v8  ;;  %8527 = vtanh.f32 %v2263_v15  ;;  %vm2294_vm9 = vweird.f32 %v8524_v16  ;;  %vm2276_vm12 = vmor %vm2274_vm10, %vm2275_vm8  ;;  %vm2313_vm1 = vweird.f32 %v2307_v13  ;;  %v8162_v8 = vld [vmem:[#allocation9 + $0xc4] sm:$0xf]  ;;  %v8163_v15 = vld [vmem:[#allocation9 + $0xcc] sm:$0xf] }
 0x504   :  { %v2271_v20 = vsub.f32 1.0, %v2270_v18  ;;  %vm2295_vm13 = vmor %vm2293_vm11, %vm2294_vm9  ;;  %v2317_v48 = vand.u32 2147483647, %v2307_v13  ;;  %v2320_v51 = vor.u32 1.1754944e-38, %v2319_v61  ;;  %v6901_v9 = vor.u32 %v8164_v17, %v6900_v6  ;;  %v8146_v6 = vld [vmem:[#allocation9 + $0x44] sm:$0xf] }
 0x505   :  { %v2290_v21 = vsub.f32 1.0, %v2289_v19  ;;  %v6884_v19 = vld [vmem:[#allocation9 + $0xa0] sm:$0xf]  ;;  %v6837_v17 = vor.u32 %v8148_v5, %v6836_v4 }
 0x506   :  { %v2272_v24 = vmul.f32 %v8522_v14, %v2271_v20  ;;  %vm2318_vm3 = vcmp.eq.f32.partialorder %v2317_v48, 8.507059e+37  ;;  %2846 = vmatpush.bf16.msrb.mxu0 %v6901_v9  ;;  %v8160_v20 = vld [vmem:[#allocation9 + $0xac] sm:$0xf0]  ;;  %v6852_v48 = vld [vmem:[#allocation9 + $0x60] sm:$0xf] }
 0x507   :  { %v2291_v28 = vmul.f32 %v8524_v16, %v2290_v21  ;;  %v8158_v21 = vld [vmem:[#allocation9 + $0xa4] sm:$0xf]  ;;  %v6885_v22 = vor.u32 %v8160_v20, %v6884_v19  ;;  %v6844_v9 = vld [vmem:[#allocation9 + $0x48] sm:$0xf]  ;;  %v6820_v19 = vld [vmem:[#allocation9 + $0x20] sm:$0xf] }
 0x508   :  { %v8526_v31 = vpop.eup %8525  ;;  %v2273_v32 = vadd.f32 %v8522_v14, %v2272_v24  ;;  %v6892_v24 = vld [vmem:[#allocation9 + $0xa8] sm:$0xf]  ;;  %v8144_v20 = vld [vmem:[#allocation9 + $0x2c] sm:$0xf0] }
 0x509   :  { %v2292_v34 = vadd.f32 %v8524_v16, %v2291_v28  ;;  %v2309_v35 = vmul.f32 %v8526_v31, %v2307_v13  ;;  %v8528_v37 = vpop.eup %8527  ;;  %vm2314_vm0 = vweird.f32 %v8526_v31  ;;  %v6905_v13 = vor.u32 %v8162_v8, %v6902_v10  ;;  %v6838_v8 = vld [vmem:[#allocation9 + $0x50] sm:$0xf0]  ;;  %v8149_v10 = vld [vmem:[#allocation9 + $0x54] sm:$0xf0] }
 0x50a   :  { %v2277_v36 = vsel %vm2276_vm12, %v8522_v14, %v2273_v32  ;;  %vm2315_vm2 = vmor %vm2313_vm1, %vm2314_vm0  ;;  %v6909_v14 = vor.u32 %v8165_v12, %v6908_v11  ;;  %v6889_v28 = vor.u32 %v8158_v21, %v6886_v23  ;;  %v6893_v30 = vor.u32 %v8161_v40, %v6892_v24  ;;  %v6894_v32 = vld [vmem:[#allocation9 + $0xb8] sm:$0xf0]  ;;  %2847 = vmatpush.bf16.msrb.mxu0 %v6885_v22  ;;  %v8142_v23 = vld [vmem:[#allocation9 + $0x24] sm:$0xf] }
 0x50b   :  { %v2282_v38 = vsel %vm2279_vm14, %v2281_v33, %v2277_v36  ;;  %v2296_v39 = vsel %vm2295_vm13, %v8524_v16, %v2292_v34  ;;  %v2310_v41 = vsub.f32 1.0, %v2309_v35  ;;  %v6910_v16 = vld [vmem:[#allocation9 + $0xd8] sm:$0xf0]  ;;  %2859 = vmatpush.bf16.msrb.mxu1 %v6905_v13  ;;  %v6868_v34 = vld [vmem:[#allocation9 + $0x80] sm:$0xf]  ;;  %v2333_v13 = vld [vmem:[#allocation3 + $0xf8] sm:$0xff]  ;;  %v6821_v22 = vor.u32 %v8144_v20, %v6820_v19 }
 0x50c   :  { %v2301_v26 = vsel %vm2298_vm15, %v2300_v58, %v2296_v39  ;;  %v2324_v42 = vmul.f32 %v8528_v37, %v2282_v38  ;;  %v6913_v18 = vor.u32 %v8163_v15, %v6910_v16  ;;  %2872 = vmatpush.bf16.msrb.mxu2 %v6909_v14  ;;  %v8156_v35 = vld [vmem:[#allocation9 + $0x8c] sm:$0xf0]  ;;  %v8154_v58 = vld [vmem:[#allocation9 + $0x84] sm:$0xf]  ;;  %v6870_v37 = vld [vmem:[#allocation9 + $0x90] sm:$0xf0]  ;;  %v6841_v14 = vor.u32 %v8146_v6, %v6838_v8 }
 0x50d   :  { %v2323_v43 = vmul.f32 %v2301_v26, %v9131_v62  ;;  %v2311_v45 = vmul.f32 %v8526_v31, %v2310_v41  ;;  %v6869_v36 = vor.u32 %v8156_v35, %v6868_v34  ;;  %v6876_v38 = vld [vmem:[#allocation9 + $0x88] sm:$0xf]  ;;  %v8157_v39 = vld [vmem:[#allocation9 + $0x94] sm:$0xf0]  ;;  %v6873_v41 = vor.u32 %v8154_v58, %v6870_v37  ;;  %v8147_v16 = vld [vmem:[#allocation9 + $0x4c] sm:$0xf] }
 0x50e   :  { %2885 = vmatpush.bf16.msrb.mxu3 %v6913_v18  ;;  %v6877_v26 = vor.u32 %v8157_v39, %v6876_v38  ;;  %v6845_v15 = vor.u32 %v8149_v10, %v6844_v9  ;;  %v6846_v18 = vld [vmem:[#allocation9 + $0x58] sm:$0xf0]  ;;  %v6822_v24 = vld [vmem:[#allocation9 + $0x30] sm:$0xf0]  ;;  %v6828_v40 = vld [vmem:[#allocation9 + $0x28] sm:$0xf] }
 0x50f   :  { %v9139_v25 = vadd.f32 %v2324_v42, %v2323_v43  ;;  %v2312_v46 = vadd.f32 %v8526_v31, %v2311_v45  ;;  %2860 = vmatpush.bf16.msrb.mxu1 %v6889_v28  ;;  %v8155_v42 = vld [vmem:[#allocation9 + $0x8c] sm:$0xf]  ;;  %v6878_v43 = vld [vmem:[#allocation9 + $0x98] sm:$0xf0]  ;;  %v2330_v45 = vld [vmem:[#allocation3 + $0xe0] sm:$0xff]  ;;  %2848 = vmatpush.bf16.msrb.mxu0 %v6869_v36  ;;  %v6849_v21 = vor.u32 %v8147_v16, %v6846_v18 }
 0x510   :  { %2873 = vmatpush.bf16.msrb.mxu2 %v6893_v30  ;;  %v6881_v61 = vor.u32 %v8155_v42, %v6878_v43  ;;  %v6825_v28 = vor.u32 %v8142_v23, %v6822_v24  ;;  %v8145_v30 = vld [vmem:[#allocation9 + $0x34] sm:$0xf0]  ;;  %v6804_v36 = vld [vmem:[#allocation9] sm:$0xf]  ;;  %v8140_v37 = vld [vmem:[#allocation9 + $0xc] sm:$0xf0] }
 0x511   :  { %8529 = vtanh.f32 %v9139_v25  ;;  %v2316_v50 = vsel %vm2315_vm2, %v8526_v31, %v2312_v46  ;;  %v8159_v31 = vld [vmem:[#allocation9 + $0xac] sm:$0xf]  ;;  %v2331_v46 = vld [vmem:[#allocation3 + $0xe8] sm:$0xff]  ;;  %v6829_v35 = vor.u32 %v8145_v30, %v6828_v40  ;;  %v8138_v38 = vld [vmem:[#allocation9 + $0x4] sm:$0xf]  ;;  %v6805_v42 = vor.u32 %v8140_v37, %v6804_v36 }
 0x512   :  { %v2321_v53 = vsel %vm2318_vm3, %v2320_v51, %v2316_v50  ;;  %v6897_v33 = vor.u32 %v8159_v31, %v6894_v32  ;;  %v8152_v50 = vld [vmem:[#allocation9 + $0x6c] sm:$0xf0]  ;;  %v8150_v51 = vld [vmem:[#allocation9 + $0x64] sm:$0xf]  ;;  %v8143_v31 = vld [vmem:[#allocation9 + $0x2c] sm:$0xf] }
 0x513   :  { %2861 = vmatpush.bf16.msrb.mxu1 %v6873_v41  ;;  %v6830_v32 = vld [vmem:[#allocation9 + $0x38] sm:$0xf0]  ;;  %v6806_v43 = vld [vmem:[#allocation9 + $0x10] sm:$0xf0] }
 0x514   :  { %2886 = vmatpush.bf16.msrb.mxu3 %v6897_v33  ;;  %2874 = vmatpush.bf16.msrb.mxu2 %v6877_v26  ;;  %v6833_v58 = vor.u32 %v8143_v31, %v6830_v32 }
 0x517   :  { %v8530_v52 = vpop.eup %8529 }
 0x518   :  { %v9142_v54 = vmul.f32 %v8530_v52, %v2321_v53  ;;  %2887 = vmatpush.bf16.msrb.mxu3 %v6881_v61  ;;  %v6853_v52 = vor.u32 %v8152_v50, %v6852_v48  ;;  %v6854_v53 = vld [vmem:[#allocation9 + $0x70] sm:$0xf0]  ;;  %v6809_v61 = vor.u32 %v8138_v38, %v6806_v43  ;;  %v8139_v50 = vld [vmem:[#allocation9 + $0xc] sm:$0xf]  ;;  %v8200_v43 = vld [vmem:[#allocation9 + $0xec] sm:$0xf0] }
 0x519   :  { %v6857_v56 = vor.u32 %v8150_v51, %v6854_v53  ;;  %v6814_v51 = vld [vmem:[#allocation9 + $0x18] sm:$0xf0] }
 0x51a   :  { %v2334_v62 = vpack.c.bf16 %v9142_v54, %v9142_v54  ;;  %2849 = vmatpush.bf16.msrb.mxu0 %v6853_v52 }
 0x51b   :  { %2862 = vmatpush.bf16.msrb.mxu1 %v6857_v56 }
 0x51c   :  { %2535 = vmatmul.bf16.vlgmr.msra.gmra.mxu0 %v2334_v62  ;;  %2548 = vmatmul.bf16.vlgmr.msra.gmra.mxu1 %v2334_v62 }
 0x51d   :  { %2561 = vmatmul.bf16.vlgmr.msra.gmra.mxu2 %v2334_v62  ;;  %2574 = vmatmul.bf16.vlgmr.msra.gmra.mxu3 %v2334_v62  ;;  %v6860_v62 = vld [vmem:[#allocation9 + $0x68] sm:$0xf] }
 0x51e   :  { %v6861_v57 = vor.u32 %v8153_v55, %v6860_v62  ;;  %2888 = vmatpush.bf16.msrb.mxu3 %v6865_v0  ;;  %2850 = vmatpush.bf16.msrb.mxu0 %v6837_v17  ;;  %v6817_v62 = vor.u32 %v8139_v50, %v6814_v51  ;;  %v8201_v50 = vld [vmem:[#allocation9 + $0xf4] sm:$0xf0] }
 0x51f   :  { %2863 = vmatpush.bf16.msrb.mxu1 %v6841_v14 }
 0x520   :  { %2875 = vmatpush.bf16.msrb.mxu2 %v6861_v57 }
 0x522   :  { %2889 = vmatpush.bf16.msrb.mxu3 %v6849_v21  ;;  %2851 = vmatpush.bf16.msrb.mxu0 %v6821_v22 }
 0x523   :  { %2864 = vmatpush.bf16.msrb.mxu1 %v6825_v28 }
 0x524   :  { %2876 = vmatpush.bf16.msrb.mxu2 %v6845_v15 }
 0x526   :  { %2890 = vmatpush.bf16.msrb.mxu3 %v6833_v58  ;;  %2852 = vmatpush.bf16.msrb.mxu0 %v6805_v42  ;;  %v7047_v42 = vld [vmem:[#allocation9 + $0xe0] sm:$0xf] }
 0x527   :  { %2865 = vmatpush.bf16.msrb.mxu1 %v6809_v61  ;;  %v7049_v61 = vld [vmem:[#allocation9 + $0xf0] sm:$0xf0] }
 0x528   :  { %2877 = vmatpush.bf16.msrb.mxu2 %v6829_v35 }
 0x52a   :  { %2891 = vmatpush.bf16.msrb.mxu3 %v6817_v62  ;;  %v7057_v62 = vld [vmem:[#allocation9 + $0xf8] sm:$0xf0] }
 0x599   :  { %v2536_v60 = vpop.f32.mrf.mxu0  ;;  %v2549_v63 = vpop.f32.mrf.mxu1 }
 0x59a   :  { %v2579_v2 = vadd.f32 %v2536_v60, %v2330_v45  ;;  %v2580_v3 = vadd.f32 %v2549_v63, %v2331_v46  ;;  %v6812_v45 = vld [vmem:[#allocation9 + $0x8] sm:$0xf]  ;;  %v8141_v46 = vld [vmem:[#allocation9 + $0x14] sm:$0xf0]  ;;  %v2332_v60 = vld [vmem:[#allocation3 + $0xf0] sm:$0xff] }
 0x59b   :  { %v6813_v48 = vor.u32 %v8141_v46, %v6812_v45  ;;  %v8198_v45 = vld [vmem:[#allocation9 + $0xe4] sm:$0xf]  ;;  %v7048_v46 = vor.u32 %v8200_v43, %v7047_v42  ;;  %v6991_v42 = vld [vmem:[#allocation9 + $0x68] sm:$0xf]  ;;  %v8185_v43 = vld [vmem:[#allocation9 + $0x74] sm:$0xf0] }
 0x59c   :  { %v6799_v11 = vmul.f32 -1.442695, %v2579_v2  ;;  %v6800_v12 = vmul.f32 -1.442695, %v2580_v3  ;;  %v7052_v51 = vor.u32 %v8198_v45, %v7049_v61  ;;  %v8183_v61 = vld [vmem:[#allocation9 + $0x6c] sm:$0xf] }
 0x59d   :  { %2878 = vmatpush.bf16.msrb.mxu2 %v6813_v48  ;;  %v7055_v48 = vld [vmem:[#allocation9 + $0xe8] sm:$0xf]  ;;  %3163 = vmatpush.bf16.msra.mxu0 %v7048_v46  ;;  %v6992_v46 = vor.u32 %v8185_v43, %v6991_v42 }
 0x59e   :  { %8531 = vpow2.f32 %v6799_v11  ;;  %3176 = vmatpush.bf16.msra.mxu1 %v7052_v51 }
 0x59f   :  { %8533 = vpow2.f32 %v6800_v12 }
 0x5a0   :  { %v2562_v33 = vpop.f32.mrf.mxu2  ;;  %v2575_v34 = vpop.f32.mrf.mxu3 }
 0x5a1   :  { %v2582_v39 = vadd.f32 %v2575_v34, %v2333_v13  ;;  %v2538_v41 = vpop.f32.mrf.mxu0  ;;  %v2551_v26 = vpop.f32.mrf.mxu1  ;;  %v2581_v3 = vadd.f32 %v2562_v33, %v2332_v60  ;;  %v7033_v60 = vld [vmem:[#allocation9 + $0xd0] sm:$0xf0] }
 0x5a3   :  { %v6801_v52 = vmul.f32 -1.442695, %v2582_v39 }
 0x5a4   :  { %v8532_v53 = vpop.eup %8531 }
 0x5a5   :  { %v8534_v55 = vpop.eup %8533  ;;  %v2586_v56 = vadd.f32 1.0, %v8532_v53  ;;  %8535 = vpow2.f32 %v6801_v52  ;;  %v7056_v52 = vor.u32 %v8201_v50, %v7055_v48  ;;  %v8199_v53 = vld [vmem:[#allocation9 + $0xec] sm:$0xf]  ;;  %v6993_v48 = vld [vmem:[#allocation9 + $0x78] sm:$0xf0] }
 0x5a6   :  { %v2605_v57 = vadd.f32 1.0, %v8534_v55  ;;  %v7060_v55 = vor.u32 %v8199_v53, %v7057_v62 }
 0x5a7   :  { %8537 = vrcp.f32 %v2586_v56  ;;  %v2598_v9 = vand.u32 2147483648, %v2586_v56  ;;  %v2596_v12 = vand.u32 2147483647, %v2586_v56  ;;  %vm2592_vm6 = vweird.f32 %v2586_v56  ;;  %3189 = vmatpush.bf16.msra.mxu2 %v7056_v52 }
 0x5a8   :  { %8539 = vrcp.f32 %v2605_v57  ;;  %v2564_v59 = vpop.f32.mrf.mxu2  ;;  %v2577_v44 = vpop.f32.mrf.mxu3  ;;  %v2617_v10 = vand.u32 2147483648, %v2605_v57  ;;  %v2615_v14 = vand.u32 2147483647, %v2605_v57  ;;  %vm2611_vm7 = vweird.f32 %v2605_v57  ;;  %3202 = vmatpush.bf16.msra.mxu3 %v7060_v55  ;;  %v6967_v55 = vld [vmem:[#allocation9 + $0x40] sm:$0xf] }
 0x5a9   :  { %v2599_v18 = vor.u32 1.1754944e-38, %v2598_v9  ;;  %vm2597_vm10 = vcmp.eq.f32.partialorder %v2596_v12, 8.507059e+37  ;;  %v8194_v59 = vld [vmem:[#allocation9 + $0xc4] sm:$0xf]  ;;  %v7023_v12 = vld [vmem:[#allocation9 + $0xa8] sm:$0xf]  ;;  %v6996_v52 = vor.u32 %v8183_v61, %v6993_v48 }
 0x5aa   :  { %v2618_v21 = vor.u32 1.1754944e-38, %v2617_v10  ;;  %vm2616_vm11 = vcmp.eq.f32.partialorder %v2615_v14, 8.507059e+37  ;;  %v8190_v9 = vld [vmem:[#allocation9 + $0xa4] sm:$0xf] }
 0x5ab   :  { %v8536_v63 = vpop.eup %8535 }
 0x5ac   :  { %v2625_v0 = vadd.f32 1.0, %v8536_v63  ;;  %v7039_v63 = vld [vmem:[#allocation9 + $0xc8] sm:$0xf] }
 0x5ad   :  { %v8538_v2 = vpop.eup %8537 }
 0x5ae   :  { %v8540_v4 = vpop.eup %8539  ;;  %v2588_v5 = vmul.f32 %v8538_v2, %v2586_v56  ;;  %8541 = vrcp.f32 %v2625_v0  ;;  %vm2593_vm4 = vweird.f32 %v8538_v2  ;;  %v2637_v58 = vand.u32 2147483648, %v2625_v0  ;;  %v7031_v56 = vld [vmem:[#allocation9 + $0xc0] sm:$0xf] }
 0x5af   :  { %v2607_v6 = vmul.f32 %v8540_v4, %v2605_v57  ;;  %8543 = vtanh.f32 %v2581_v3  ;;  %vm2612_vm5 = vweird.f32 %v8540_v4  ;;  %vm2594_vm8 = vmor %vm2592_vm6, %vm2593_vm4  ;;  %vm2631_vm13 = vweird.f32 %v2625_v0  ;;  %v8196_v57 = vld [vmem:[#allocation9 + $0xcc] sm:$0xf0] }
 0x5b0   :  { %v2589_v17 = vsub.f32 1.0, %v2588_v5  ;;  %vm2613_vm9 = vmor %vm2611_vm7, %vm2612_vm5  ;;  %v2635_v36 = vand.u32 2147483647, %v2625_v0  ;;  %v2638_v38 = vor.u32 1.1754944e-38, %v2637_v58  ;;  %v7032_v44 = vor.u32 %v8196_v57, %v7031_v56  ;;  %v7041_v5 = vld [vmem:[#allocation9 + $0xd8] sm:$0xf0] }
 0x5b1   :  { %v2608_v8 = vsub.f32 1.0, %v2607_v6  ;;  %v2649_v58 = vld [vmem:[#allocation3 + $0x108] sm:$0xff]  ;;  %v8180_v56 = vld [vmem:[#allocation9 + $0x4c] sm:$0xf0]  ;;  %v8178_v57 = vld [vmem:[#allocation9 + $0x44] sm:$0xf] }
 0x5b2   :  { %v2590_v11 = vmul.f32 %v8538_v2, %v2589_v17  ;;  %vm2636_vm15 = vcmp.eq.f32.partialorder %v2635_v36, 8.507059e+37  ;;  %3164 = vmatpush.bf16.msra.mxu0 %v7032_v44  ;;  %v7015_v17 = vld [vmem:[#allocation9 + $0xa0] sm:$0xf]  ;;  %v6969_v44 = vld [vmem:[#allocation9 + $0x50] sm:$0xf0] }
 0x5b3   :  { %v2609_v13 = vmul.f32 %v8540_v4, %v2608_v8  ;;  %v8192_v8 = vld [vmem:[#allocation9 + $0xac] sm:$0xf0] }
 0x5b4   :  { %v8542_v15 = vpop.eup %8541  ;;  %v2591_v16 = vadd.f32 %v8538_v2, %v2590_v11  ;;  %v7016_v10 = vor.u32 %v8192_v8, %v7015_v17  ;;  %v7017_v11 = vld [vmem:[#allocation9 + $0xb0] sm:$0xf0]  ;;  %v6977_v17 = vld [vmem:[#allocation9 + $0x58] sm:$0xf0]  ;;  %v6951_v8 = vld [vmem:[#allocation9 + $0x20] sm:$0xf] }
 0x5b5   :  { %v2610_v19 = vadd.f32 %v8540_v4, %v2609_v13  ;;  %v2627_v20 = vmul.f32 %v8542_v15, %v2625_v0  ;;  %v8544_v23 = vpop.eup %8543  ;;  %vm2632_vm12 = vweird.f32 %v8542_v15  ;;  %v8197_v0 = vld [vmem:[#allocation9 + $0xd4] sm:$0xf0]  ;;  %v7020_v14 = vor.u32 %v8190_v9, %v7017_v11  ;;  %v8176_v9 = vld [vmem:[#allocation9 + $0x2c] sm:$0xf0] }
 0x5b6   :  { %v2595_v22 = vsel %vm2594_vm8, %v8538_v2, %v2591_v16  ;;  %vm2633_vm14 = vmor %vm2631_vm13, %vm2632_vm12  ;;  %v7036_v2 = vor.u32 %v8194_v59, %v7033_v60  ;;  %v7040_v3 = vor.u32 %v8197_v0, %v7039_v63  ;;  %v8193_v13 = vld [vmem:[#allocation9 + $0xb4] sm:$0xf0]  ;;  %v8191_v16 = vld [vmem:[#allocation9 + $0xac] sm:$0xf]  ;;  %3165 = vmatpush.bf16.msra.mxu0 %v7016_v10  ;;  %v6968_v59 = vor.u32 %v8180_v56, %v6967_v55 }
 0x5b7   :  { %v2600_v24 = vsel %vm2597_vm10, %v2599_v18, %v2595_v22  ;;  %v2614_v40 = vsel %vm2613_vm9, %v8540_v4, %v2610_v19  ;;  %v2628_v28 = vsub.f32 1.0, %v2627_v20  ;;  %v8195_v4 = vld [vmem:[#allocation9 + $0xcc] sm:$0xf]  ;;  %v7025_v18 = vld [vmem:[#allocation9 + $0xb8] sm:$0xf0]  ;;  %v6952_v11 = vor.u32 %v8176_v9, %v6951_v8 }
 0x5b8   :  { %v2619_v30 = vsel %vm2616_vm11, %v2618_v21, %v2614_v40  ;;  %v2642_v31 = vmul.f32 %v8544_v23, %v2600_v24  ;;  %v7044_v6 = vor.u32 %v8195_v4, %v7041_v5  ;;  %3177 = vmatpush.bf16.msra.mxu1 %v7036_v2  ;;  %3190 = vmatpush.bf16.msra.mxu2 %v7040_v3  ;;  %v6999_v20 = vld [vmem:[#allocation9 + $0x80] sm:$0xf]  ;;  %v8188_v21 = vld [vmem:[#allocation9 + $0x8c] sm:$0xf0]  ;;  %v8186_v22 = vld [vmem:[#allocation9 + $0x84] sm:$0xf] }
 0x5b9   :  { %v2641_v32 = vmul.f32 %v2619_v30, %v9139_v25  ;;  %v2629_v33 = vmul.f32 %v8542_v15, %v2628_v28  ;;  %v7028_v19 = vor.u32 %v8191_v16, %v7025_v18  ;;  %v7000_v23 = vor.u32 %v8188_v21, %v6999_v20  ;;  %v7001_v24 = vld [vmem:[#allocation9 + $0x90] sm:$0xf0]  ;;  %v7007_v40 = vld [vmem:[#allocation9 + $0x88] sm:$0xf]  ;;  %v8189_v28 = vld [vmem:[#allocation9 + $0x94] sm:$0xf0] }
 0x5ba   :  { %3203 = vmatpush.bf16.msra.mxu3 %v7044_v6  ;;  %v7004_v30 = vor.u32 %v8186_v22, %v7001_v24  ;;  %v6975_v60 = vld [vmem:[#allocation9 + $0x48] sm:$0xf]  ;;  %v8181_v63 = vld [vmem:[#allocation9 + $0x54] sm:$0xf0]  ;;  %v6972_v4 = vor.u32 %v8178_v57, %v6969_v44  ;;  %v8179_v6 = vld [vmem:[#allocation9 + $0x4c] sm:$0xf] }
 0x5bb   :  { %v9147_v34 = vadd.f32 %v2642_v31, %v2641_v32  ;;  %v2630_v35 = vadd.f32 %v8542_v15, %v2629_v33  ;;  %v7008_v31 = vor.u32 %v8189_v28, %v7007_v40  ;;  %v8187_v32 = vld [vmem:[#allocation9 + $0x8c] sm:$0xf]  ;;  %v7009_v33 = vld [vmem:[#allocation9 + $0x98] sm:$0xf0]  ;;  %3166 = vmatpush.bf16.msra.mxu0 %v7000_v23  ;;  %v6976_v5 = vor.u32 %v8181_v63, %v6975_v60  ;;  %v8177_v16 = vld [vmem:[#allocation9 + $0x34] sm:$0xf0] }
 0x5bc   :  { %3178 = vmatpush.bf16.msra.mxu1 %v7020_v14  ;;  %v7012_v36 = vor.u32 %v8187_v32, %v7009_v33  ;;  %v2651_v3 = vld [vmem:[#allocation3 + $0x118] sm:$0xff]  ;;  %v6980_v10 = vor.u32 %v8179_v6, %v6977_v17  ;;  %v6935_v24 = vld [vmem:[#allocation9] sm:$0xf]  ;;  %v8172_v40 = vld [vmem:[#allocation9 + $0xc] sm:$0xf0] }
 0x5bd   :  { %8545 = vtanh.f32 %v9147_v34  ;;  %v2634_v37 = vsel %vm2633_vm14, %v8542_v15, %v2630_v35  ;;  %v7024_v15 = vor.u32 %v8193_v13, %v7023_v12  ;;  %v2648_v35 = vld [vmem:[#allocation3 + $0x100] sm:$0xff]  ;;  %v8174_v12 = vld [vmem:[#allocation9 + $0x24] sm:$0xf]  ;;  %v6959_v14 = vld [vmem:[#allocation9 + $0x28] sm:$0xf]  ;;  %v6936_v33 = vor.u32 %v8172_v40, %v6935_v24 }
 0x5be   :  { %v2639_v41 = vsel %vm2636_vm15, %v2638_v38, %v2634_v37  ;;  %3204 = vmatpush.bf16.msra.mxu3 %v7028_v19  ;;  %v6983_v37 = vld [vmem:[#allocation9 + $0x60] sm:$0xf]  ;;  %v8184_v38 = vld [vmem:[#allocation9 + $0x6c] sm:$0xf0]  ;;  %v6953_v13 = vld [vmem:[#allocation9 + $0x30] sm:$0xf0]  ;;  %v6960_v22 = vor.u32 %v8177_v16, %v6959_v14 }
 0x5bf   :  { %3191 = vmatpush.bf16.msra.mxu2 %v7024_v15  ;;  %v6956_v15 = vor.u32 %v8174_v12, %v6953_v13  ;;  %v8175_v18 = vld [vmem:[#allocation9 + $0x2c] sm:$0xf]  ;;  %v6961_v19 = vld [vmem:[#allocation9 + $0x38] sm:$0xf0]  ;;  %v8170_v28 = vld [vmem:[#allocation9 + $0x4] sm:$0xf] }
 0x5c0   :  { %3179 = vmatpush.bf16.msra.mxu1 %v7004_v30  ;;  %v6964_v23 = vor.u32 %v8175_v18, %v6961_v19 }
 0x5c2   :  { %3205 = vmatpush.bf16.msra.mxu3 %v7012_v36  ;;  %v8173_v36 = vld [vmem:[#allocation9 + $0x14] sm:$0xf0] }
 0x5c3   :  { %v8546_v39 = vpop.eup %8545  ;;  %3192 = vmatpush.bf16.msra.mxu2 %v7008_v31 }
 0x5c4   :  { %v9150_v26 = vmul.f32 %v8546_v39, %v2639_v41  ;;  %v8182_v39 = vld [vmem:[#allocation9 + $0x64] sm:$0xf]  ;;  %v6984_v41 = vor.u32 %v8184_v38, %v6983_v37 }
 0x5c6   :  { %v2652_v25 = vpack.c.bf16 %v9150_v26, %v9150_v26  ;;  %3167 = vmatpush.bf16.msra.mxu0 %v6984_v41  ;;  %3206 = vmatpush.bf16.msra.mxu3 %v6996_v52  ;;  %v6945_v41 = vld [vmem:[#allocation9 + $0x18] sm:$0xf0] }
 0x5c7   :  { %3193 = vmatpush.bf16.msra.mxu2 %v6992_v46 }
 0x5c8   :  { %2853 = vmatmul.bf16.vlgmr.msrb.gmra.mxu0 %v2652_v25  ;;  %2866 = vmatmul.bf16.vlgmr.msrb.gmra.mxu1 %v2652_v25 }
 0x5c9   :  { %2879 = vmatmul.bf16.vlgmr.msrb.gmra.mxu2 %v2652_v25  ;;  %2892 = vmatmul.bf16.vlgmr.msrb.gmra.mxu3 %v2652_v25  ;;  %v6985_v25 = vld [vmem:[#allocation9 + $0x70] sm:$0xf0] }
 0x5ca   :  { %v6988_v45 = vor.u32 %v8182_v39, %v6985_v25  ;;  %3168 = vmatpush.bf16.msra.mxu0 %v6968_v59  ;;  %3207 = vmatpush.bf16.msra.mxu3 %v6980_v10  ;;  %v8171_v39 = vld [vmem:[#allocation9 + $0xc] sm:$0xf] }
 0x5cb   :  { %3194 = vmatpush.bf16.msra.mxu2 %v6976_v5  ;;  %v6948_v43 = vor.u32 %v8171_v39, %v6945_v41  ;;  %v7186_v39 = vld [vmem:[#allocation9 + $0xe8] sm:$0xf]  ;;  %v8233_v41 = vld [vmem:[#allocation9 + $0xf4] sm:$0xf0] }
 0x5cc   :  { %3180 = vmatpush.bf16.msra.mxu1 %v6988_v45 }
 0x5ce   :  { %3169 = vmatpush.bf16.msra.mxu0 %v6952_v11  ;;  %3208 = vmatpush.bf16.msra.mxu3 %v6964_v23 }
 0x5cf   :  { %3195 = vmatpush.bf16.msra.mxu2 %v6960_v22 }
 0x5d0   :  { %3181 = vmatpush.bf16.msra.mxu1 %v6972_v4 }
 0x5d2   :  { %3170 = vmatpush.bf16.msra.mxu0 %v6936_v33  ;;  %3209 = vmatpush.bf16.msra.mxu3 %v6948_v43  ;;  %v8231_v43 = vld [vmem:[#allocation9 + $0xec] sm:$0xf] }
 0x5d4   :  { %3182 = vmatpush.bf16.msra.mxu1 %v6956_v15 }
 0x645   :  { %v2854_v50 = vpop.f32.mrf.mxu0  ;;  %v2867_v51 = vpop.f32.mrf.mxu1 }
 0x646   :  { %v2897_v53 = vadd.f32 %v2854_v50, %v2648_v35  ;;  %v2898_v62 = vadd.f32 %v2867_v51, %v2649_v58  ;;  %v6937_v35 = vld [vmem:[#allocation9 + $0x10] sm:$0xf0]  ;;  %v6943_v58 = vld [vmem:[#allocation9 + $0x8] sm:$0xf]  ;;  %v2650_v51 = vld [vmem:[#allocation3 + $0x110] sm:$0xff] }
 0x647   :  { %v6940_v37 = vor.u32 %v8170_v28, %v6937_v35  ;;  %v6944_v38 = vor.u32 %v8173_v36, %v6943_v58  ;;  %v7178_v35 = vld [vmem:[#allocation9 + $0xe0] sm:$0xf]  ;;  %v8232_v58 = vld [vmem:[#allocation9 + $0xec] sm:$0xf0]  ;;  %v8230_v36 = vld [vmem:[#allocation9 + $0xe4] sm:$0xf] }
 0x648   :  { %v6930_v0 = vmul.f32 -1.442695, %v2897_v53  ;;  %v6931_v2 = vmul.f32 -1.442695, %v2898_v62 }
 0x649   :  { %3183 = vmatpush.bf16.msra.mxu1 %v6940_v37  ;;  %3196 = vmatpush.bf16.msra.mxu2 %v6944_v38  ;;  %v7179_v37 = vor.u32 %v8232_v58, %v7178_v35  ;;  %v7180_v38 = vld [vmem:[#allocation9 + $0xf0] sm:$0xf0]  ;;  %v7122_v58 = vld [vmem:[#allocation9 + $0x68] sm:$0xf] }
 0x64a   :  { %8547 = vpow2.f32 %v6930_v0  ;;  %v7116_v35 = vld [vmem:[#allocation9 + $0x70] sm:$0xf0] }
 0x64b   :  { %8549 = vpow2.f32 %v6931_v2  ;;  %3481 = vmatpush.bf16.msrb.mxu0 %v7179_v37 }
 0x64c   :  { %v2880_v20 = vpop.f32.mrf.mxu2  ;;  %v2893_v21 = vpop.f32.mrf.mxu3 }
 0x64d   :  { %v2900_v30 = vadd.f32 %v2893_v21, %v2651_v3  ;;  %v2856_v31 = vpop.f32.mrf.mxu0  ;;  %v2869_v32 = vpop.f32.mrf.mxu1  ;;  %v2899_v55 = vadd.f32 %v2880_v20, %v2650_v51 }
 0x64f   :  { %v6932_v25 = vmul.f32 -1.442695, %v2900_v30 }
 0x650   :  { %v8548_v42 = vpop.eup %8547 }
 0x651   :  { %v8550_v45 = vpop.eup %8549  ;;  %v2904_v46 = vadd.f32 1.0, %v8548_v42  ;;  %8551 = vpow2.f32 %v6932_v25  ;;  %v7183_v25 = vor.u32 %v8230_v36, %v7180_v38  ;;  %v7187_v42 = vor.u32 %v8233_v41, %v7186_v39  ;;  %v8217_v36 = vld [vmem:[#allocation9 + $0x74] sm:$0xf0]  ;;  %v8215_v39 = vld [vmem:[#allocation9 + $0x6c] sm:$0xf] }
 0x652   :  { %v2923_v61 = vadd.f32 1.0, %v8550_v45  ;;  %v7188_v45 = vld [vmem:[#allocation9 + $0xf8] sm:$0xf0]  ;;  %v7123_v38 = vor.u32 %v8217_v36, %v7122_v58 }
 0x653   :  { %8553 = vrcp.f32 %v2904_v46  ;;  %v2916_v63 = vand.u32 2147483648, %v2904_v46  ;;  %v2914_v3 = vand.u32 2147483647, %v2904_v46  ;;  %vm2910_vm2 = vweird.f32 %v2904_v46  ;;  %3494 = vmatpush.bf16.msrb.mxu1 %v7183_v25  ;;  %3507 = vmatpush.bf16.msrb.mxu2 %v7187_v42  ;;  %v7124_v41 = vld [vmem:[#allocation9 + $0x78] sm:$0xf0] }
 0x654   :  { %8555 = vrcp.f32 %v2923_v61  ;;  %v2882_v48 = vpop.f32.mrf.mxu2  ;;  %v2895_v50 = vpop.f32.mrf.mxu3  ;;  %v2935_v0 = vand.u32 2147483648, %v2923_v61  ;;  %v2933_v5 = vand.u32 2147483647, %v2923_v61  ;;  %vm2929_vm3 = vweird.f32 %v2923_v61 }
 0x655   :  { %v2917_v8 = vor.u32 1.1754944e-38, %v2916_v63  ;;  %vm2915_vm6 = vcmp.eq.f32.partialorder %v2914_v3, 8.507059e+37  ;;  %v8228_v48 = vld [vmem:[#allocation9 + $0xcc] sm:$0xf0]  ;;  %v8226_v50 = vld [vmem:[#allocation9 + $0xc4] sm:$0xf] }
 0x656   :  { %v2936_v11 = vor.u32 1.1754944e-38, %v2935_v0  ;;  %vm2934_vm7 = vcmp.eq.f32.partialorder %v2933_v5, 8.507059e+37  ;;  %v8224_v63 = vld [vmem:[#allocation9 + $0xac] sm:$0xf0]  ;;  %v8222_v0 = vld [vmem:[#allocation9 + $0xa4] sm:$0xf] }
 0x657   :  { %v8552_v52 = vpop.eup %8551  ;;  %v7148_v3 = vld [vmem:[#allocation9 + $0xb0] sm:$0xf0]  ;;  %v8225_v5 = vld [vmem:[#allocation9 + $0xb4] sm:$0xf0] }
 0x658   :  { %v2943_v53 = vadd.f32 1.0, %v8552_v52  ;;  %v7164_v52 = vld [vmem:[#allocation9 + $0xd0] sm:$0xf0] }
 0x659   :  { %v8554_v62 = vpop.eup %8553 }
 0x65a   :  { %v8556_v56 = vpop.eup %8555  ;;  %v2906_v57 = vmul.f32 %v8554_v62, %v2904_v46  ;;  %8557 = vrcp.f32 %v2943_v53  ;;  %vm2911_vm0 = vweird.f32 %v8554_v62  ;;  %v2955_v24 = vand.u32 2147483648, %v2943_v53 }
 0x65b   :  { %v2925_v59 = vmul.f32 %v8556_v56, %v2923_v61  ;;  %8559 = vtanh.f32 %v2899_v55  ;;  %vm2930_vm1 = vweird.f32 %v8556_v56  ;;  %vm2912_vm4 = vmor %vm2910_vm2, %vm2911_vm0  ;;  %vm2949_vm9 = vweird.f32 %v2943_v53  ;;  %v7162_v61 = vld [vmem:[#allocation9 + $0xc0] sm:$0xf] }
 0x65c   :  { %v2907_v44 = vsub.f32 1.0, %v2906_v57  ;;  %vm2931_vm5 = vmor %vm2929_vm3, %vm2930_vm1  ;;  %v2953_v40 = vand.u32 2147483647, %v2943_v53  ;;  %v2956_v30 = vor.u32 1.1754944e-38, %v2955_v24  ;;  %v7191_v46 = vor.u32 %v8231_v43, %v7188_v45  ;;  %v8227_v57 = vld [vmem:[#allocation9 + $0xcc] sm:$0xf] }
 0x65d   :  { %v2926_v60 = vsub.f32 1.0, %v2925_v59  ;;  %v7163_v51 = vor.u32 %v8228_v48, %v7162_v61  ;;  %v7167_v55 = vor.u32 %v8226_v50, %v7164_v52  ;;  %v7172_v59 = vld [vmem:[#allocation9 + $0xd8] sm:$0xf0]  ;;  %v2966_v24 = vld [vmem:[#allocation3 + $0x120] sm:$0xff]  ;;  %v7127_v43 = vor.u32 %v8215_v39, %v7124_v41  ;;  %v7098_v61 = vld [vmem:[#allocation9 + $0x40] sm:$0xf] }
 0x65e   :  { %v2908_v2 = vmul.f32 %v8554_v62, %v2907_v44  ;;  %vm2954_vm11 = vcmp.eq.f32.partialorder %v2953_v40, 8.507059e+37  ;;  %3520 = vmatpush.bf16.msrb.mxu3 %v7191_v46  ;;  %v7175_v44 = vor.u32 %v8227_v57, %v7172_v59  ;;  %v2967_v40 = vld [vmem:[#allocation3 + $0x128] sm:$0xff]  ;;  %v8212_v48 = vld [vmem:[#allocation9 + $0x4c] sm:$0xf0]  ;;  %v8210_v50 = vld [vmem:[#allocation9 + $0x44] sm:$0xf] }
 0x65f   :  { %v2927_v4 = vmul.f32 %v8556_v56, %v2926_v60  ;;  %3482 = vmatpush.bf16.msrb.mxu0 %v7163_v51  ;;  %3495 = vmatpush.bf16.msrb.mxu1 %v7167_v55  ;;  %v7146_v60 = vld [vmem:[#allocation9 + $0xa0] sm:$0xf]  ;;  %v7099_v51 = vor.u32 %v8212_v48, %v7098_v61  ;;  %v7100_v52 = vld [vmem:[#allocation9 + $0x50] sm:$0xf0]  ;;  %v2969_v57 = vld [vmem:[#allocation3 + $0x138] sm:$0xff] }
 0x660   :  { %v8558_v6 = vpop.eup %8557  ;;  %v2909_v17 = vadd.f32 %v8554_v62, %v2908_v2  ;;  %v7147_v2 = vor.u32 %v8224_v63, %v7146_v60  ;;  %v7103_v59 = vor.u32 %v8210_v50, %v7100_v52  ;;  %v8211_v60 = vld [vmem:[#allocation9 + $0x4c] sm:$0xf]  ;;  %v7108_v63 = vld [vmem:[#allocation9 + $0x58] sm:$0xf0] }
 0x661   :  { %v2928_v9 = vadd.f32 %v8556_v56, %v2927_v4  ;;  %v2945_v10 = vmul.f32 %v8558_v6, %v2943_v53  ;;  %v8560_v13 = vpop.eup %8559  ;;  %vm2950_vm8 = vweird.f32 %v8558_v6  ;;  %v7170_v53 = vld [vmem:[#allocation9 + $0xc8] sm:$0xf] }
 0x662   :  { %v2913_v12 = vsel %vm2912_vm4, %v8554_v62, %v2909_v17  ;;  %vm2951_vm10 = vmor %vm2949_vm9, %vm2950_vm8  ;;  %v8229_v62 = vld [vmem:[#allocation9 + $0xd4] sm:$0xf0]  ;;  %3521 = vmatpush.bf16.msrb.mxu3 %v7175_v44  ;;  %v7154_v4 = vld [vmem:[#allocation9 + $0xa8] sm:$0xf] }
 0x663   :  { %v2918_v14 = vsel %vm2915_vm6, %v2917_v8, %v2913_v12  ;;  %v2932_v15 = vsel %vm2931_vm5, %v8556_v56, %v2928_v9  ;;  %v2946_v16 = vsub.f32 1.0, %v2945_v10  ;;  %v7171_v56 = vor.u32 %v8229_v62, %v7170_v53  ;;  %v8223_v8 = vld [vmem:[#allocation9 + $0xac] sm:$0xf]  ;;  %v7156_v9 = vld [vmem:[#allocation9 + $0xb8] sm:$0xf0]  ;;  %3483 = vmatpush.bf16.msrb.mxu0 %v7147_v2 }
 0x664   :  { %v2937_v18 = vsel %vm2934_vm7, %v2936_v11, %v2932_v15  ;;  %v2960_v19 = vmul.f32 %v8560_v13, %v2918_v14  ;;  %v7155_v17 = vor.u32 %v8225_v5, %v7154_v4  ;;  %v7159_v10 = vor.u32 %v8223_v8, %v7156_v9  ;;  %v7130_v11 = vld [vmem:[#allocation9 + $0x80] sm:$0xf]  ;;  %v8220_v12 = vld [vmem:[#allocation9 + $0x8c] sm:$0xf0]  ;;  %v8218_v13 = vld [vmem:[#allocation9 + $0x84] sm:$0xf] }
 0x665   :  { %v2959_v20 = vmul.f32 %v2937_v18, %v9147_v34  ;;  %v2947_v21 = vmul.f32 %v8558_v6, %v2946_v16  ;;  %3508 = vmatpush.bf16.msrb.mxu2 %v7171_v56  ;;  %v7131_v14 = vor.u32 %v8220_v12, %v7130_v11  ;;  %v7132_v15 = vld [vmem:[#allocation9 + $0x90] sm:$0xf0]  ;;  %v7138_v16 = vld [vmem:[#allocation9 + $0x88] sm:$0xf]  ;;  %v8221_v18 = vld [vmem:[#allocation9 + $0x94] sm:$0xf0] }
 0x666   :  { %3522 = vmatpush.bf16.msrb.mxu3 %v7159_v10  ;;  %v7106_v53 = vld [vmem:[#allocation9 + $0x48] sm:$0xf]  ;;  %v8213_v62 = vld [vmem:[#allocation9 + $0x54] sm:$0xf0]  ;;  %v8208_v2 = vld [vmem:[#allocation9 + $0x2c] sm:$0xf0] }
 0x667   :  { %v9155_v22 = vadd.f32 %v2960_v19, %v2959_v20  ;;  %v2948_v23 = vadd.f32 %v8558_v6, %v2947_v21  ;;  %v7135_v19 = vor.u32 %v8218_v13, %v7132_v15  ;;  %v7139_v20 = vor.u32 %v8221_v18, %v7138_v16  ;;  %v8219_v21 = vld [vmem:[#allocation9 + $0x8c] sm:$0xf]  ;;  %3484 = vmatpush.bf16.msrb.mxu0 %v7131_v14  ;;  %v8206_v5 = vld [vmem:[#allocation9 + $0x24] sm:$0xf]  ;;  %v8209_v9 = vld [vmem:[#allocation9 + $0x34] sm:$0xf0] }
 0x668   :  { %v7107_v44 = vor.u32 %v8213_v62, %v7106_v53  ;;  %v8207_v10 = vld [vmem:[#allocation9 + $0x2c] sm:$0xf]  ;;  %v7092_v11 = vld [vmem:[#allocation9 + $0x38] sm:$0xf0]  ;;  %v7066_v16 = vld [vmem:[#allocation9] sm:$0xf] }
 0x669   :  { %8561 = vtanh.f32 %v9155_v22  ;;  %v2952_v28 = vsel %vm2951_vm10, %v8558_v6, %v2948_v23  ;;  %v7151_v6 = vor.u32 %v8222_v0, %v7148_v3  ;;  %3509 = vmatpush.bf16.msrb.mxu2 %v7155_v17  ;;  %v7140_v23 = vld [vmem:[#allocation9 + $0x98] sm:$0xf0]  ;;  %v7082_v0 = vld [vmem:[#allocation9 + $0x20] sm:$0xf]  ;;  %v7111_v3 = vor.u32 %v8211_v60, %v7108_v63  ;;  %v7090_v17 = vld [vmem:[#allocation9 + $0x28] sm:$0xf] }
 0x66a   :  { %v2957_v32 = vsel %vm2954_vm11, %v2956_v30, %v2952_v28  ;;  %v7143_v28 = vor.u32 %v8219_v21, %v7140_v23  ;;  %v7114_v30 = vld [vmem:[#allocation9 + $0x60] sm:$0xf]  ;;  %v7083_v4 = vor.u32 %v8208_v2, %v7082_v0  ;;  %v7091_v14 = vor.u32 %v8209_v9, %v7090_v17  ;;  %v8204_v18 = vld [vmem:[#allocation9 + $0xc] sm:$0xf0] }
 0x66b   :  { %3496 = vmatpush.bf16.msrb.mxu1 %v7151_v6  ;;  %v7084_v6 = vld [vmem:[#allocation9 + $0x30] sm:$0xf0]  ;;  %v7095_v15 = vor.u32 %v8207_v10, %v7092_v11 }
 0x66c   :  { %3523 = vmatpush.bf16.msrb.mxu3 %v7143_v28  ;;  %v7087_v8 = vor.u32 %v8206_v5, %v7084_v6  ;;  %v7074_v28 = vld [vmem:[#allocation9 + $0x8] sm:$0xf] }
 0x66d   :  { %3510 = vmatpush.bf16.msrb.mxu2 %v7139_v20 }
 0x66f   :  { %v8562_v31 = vpop.eup %8561  ;;  %3497 = vmatpush.bf16.msrb.mxu1 %v7135_v19  ;;  %v8202_v19 = vld [vmem:[#allocation9 + $0x4] sm:$0xf] }
 0x670   :  { %v9158_v33 = vmul.f32 %v8562_v31, %v2957_v32  ;;  %v8216_v31 = vld [vmem:[#allocation9 + $0x6c] sm:$0xf0]  ;;  %v8214_v32 = vld [vmem:[#allocation9 + $0x64] sm:$0xf]  ;;  %3524 = vmatpush.bf16.msrb.mxu3 %v7127_v43 }
 0x671   :  { %v7119_v37 = vor.u32 %v8214_v32, %v7116_v35  ;;  %3511 = vmatpush.bf16.msrb.mxu2 %v7123_v38  ;;  %v7076_v35 = vld [vmem:[#allocation9 + $0x18] sm:$0xf0]  ;;  %v2968_v43 = vld [vmem:[#allocation3 + $0x130] sm:$0xff] }
 0x672   :  { %v2970_v34 = vpack.c.bf16 %v9158_v33, %v9158_v33 }
 0x673   :  { %3498 = vmatpush.bf16.msrb.mxu1 %v7119_v37 }
 0x674   :  { %3171 = vmatmul.bf16.vlgmr.msra.gmra.mxu0 %v2970_v34  ;;  %3184 = vmatmul.bf16.vlgmr.msra.gmra.mxu1 %v2970_v34 }
 0x675   :  { %3197 = vmatmul.bf16.vlgmr.msra.gmra.mxu2 %v2970_v34  ;;  %3210 = vmatmul.bf16.vlgmr.msra.gmra.mxu3 %v2970_v34  ;;  %v7115_v34 = vor.u32 %v8216_v31, %v7114_v30  ;;  %v8205_v30 = vld [vmem:[#allocation9 + $0x14] sm:$0xf0] }
 0x676   :  { %3512 = vmatpush.bf16.msrb.mxu2 %v7107_v44  ;;  %3525 = vmatpush.bf16.msrb.mxu3 %v7111_v3  ;;  %v7075_v32 = vor.u32 %v8205_v30, %v7074_v28  ;;  %v7309_v28 = vld [vmem:[#allocation9 + $0xe0] sm:$0xf]  ;;  %v8264_v30 = vld [vmem:[#allocation9 + $0xec] sm:$0xf0] }
 0x677   :  { %3485 = vmatpush.bf16.msrb.mxu0 %v7115_v34  ;;  %3499 = vmatpush.bf16.msrb.mxu1 %v7103_v59  ;;  %v8203_v34 = vld [vmem:[#allocation9 + $0xc] sm:$0xf] }
 0x678   :  { %v7079_v37 = vor.u32 %v8203_v34, %v7076_v35  ;;  %v7311_v34 = vld [vmem:[#allocation9 + $0xf0] sm:$0xf0]  ;;  %v7317_v35 = vld [vmem:[#allocation9 + $0xe8] sm:$0xf] }
 0x67a   :  { %3513 = vmatpush.bf16.msrb.mxu2 %v7091_v14  ;;  %3526 = vmatpush.bf16.msrb.mxu3 %v7095_v15 }
 0x67b   :  { %3486 = vmatpush.bf16.msrb.mxu0 %v7099_v51  ;;  %3500 = vmatpush.bf16.msrb.mxu1 %v7087_v8 }
 0x67e   :  { %3514 = vmatpush.bf16.msrb.mxu2 %v7075_v32  ;;  %3527 = vmatpush.bf16.msrb.mxu3 %v7079_v37  ;;  %v7310_v32 = vor.u32 %v8264_v30, %v7309_v28  ;;  %v7247_v30 = vld [vmem:[#allocation9 + $0x70] sm:$0xf0] }
 0x67f   :  { %3487 = vmatpush.bf16.msrb.mxu0 %v7083_v4 }
 0x6f1   :  { %v3172_v25 = vpop.f32.mrf.mxu0  ;;  %v3185_v42 = vpop.f32.mrf.mxu1 }
 0x6f2   :  { %v3215_v45 = vadd.f32 %v3172_v25, %v2966_v24  ;;  %v3216_v46 = vadd.f32 %v3185_v42, %v2967_v40  ;;  %v7067_v24 = vor.u32 %v8204_v18, %v7066_v16  ;;  %v7068_v40 = vld [vmem:[#allocation9 + $0x10] sm:$0xf0] }
 0x6f3   :  { %v7071_v31 = vor.u32 %v8202_v19, %v7068_v40 }
 0x6f4   :  { %v7061_v55 = vmul.f32 -1.442695, %v3215_v45  ;;  %v7062_v56 = vmul.f32 -1.442695, %v3216_v46  ;;  %3488 = vmatpush.bf16.msrb.mxu0 %v7067_v24 }
 0x6f5   :  { %3501 = vmatpush.bf16.msrb.mxu1 %v7071_v31  ;;  %v8262_v31 = vld [vmem:[#allocation9 + $0xe4] sm:$0xf] }
 0x6f6   :  { %8563 = vpow2.f32 %v7061_v55 }
 0x6f7   :  { %8565 = vpow2.f32 %v7062_v56 }
 0x6f8   :  { %v3198_v12 = vpop.f32.mrf.mxu2  ;;  %v3211_v13 = vpop.f32.mrf.mxu3  ;;  %3799 = vmatpush.bf16.msra.mxu0 %v7310_v32  ;;  %v8249_v32 = vld [vmem:[#allocation9 + $0x74] sm:$0xf0] }
 0x6f9   :  { %v3218_v20 = vadd.f32 %v3211_v13, %v2969_v57  ;;  %v3174_v21 = vpop.f32.mrf.mxu0  ;;  %v3187_v23 = vpop.f32.mrf.mxu1  ;;  %v3217_v48 = vadd.f32 %v3198_v12, %v2968_v43  ;;  %v8258_v43 = vld [vmem:[#allocation9 + $0xc4] sm:$0xf] }
 0x6fb   :  { %v7063_v58 = vmul.f32 -1.442695, %v3218_v20 }
 0x6fc   :  { %v8564_v36 = vpop.eup %8563 }
 0x6fd   :  { %v8566_v38 = vpop.eup %8565  ;;  %v3222_v39 = vadd.f32 1.0, %v8564_v36  ;;  %8567 = vpow2.f32 %v7063_v58  ;;  %v8265_v58 = vld [vmem:[#allocation9 + $0xf4] sm:$0xf0]  ;;  %v7314_v36 = vor.u32 %v8262_v31, %v7311_v34  ;;  %v7253_v31 = vld [vmem:[#allocation9 + $0x68] sm:$0xf] }
 0x6fe   :  { %v3241_v41 = vadd.f32 1.0, %v8566_v38  ;;  %v7318_v37 = vor.u32 %v8265_v58, %v7317_v35  ;;  %v8263_v38 = vld [vmem:[#allocation9 + $0xec] sm:$0xf]  ;;  %v7254_v35 = vor.u32 %v8249_v32, %v7253_v31  ;;  %v7207_v31 = vld [vmem:[#allocation9 + $0x18] sm:$0xf0] }
 0x6ff   :  { %8569 = vrcp.f32 %v3222_v39  ;;  %v3234_v55 = vand.u32 2147483648, %v3222_v39  ;;  %v3232_v59 = vand.u32 2147483647, %v3222_v39  ;;  %vm3228_vm14 = vweird.f32 %v3222_v39  ;;  %3812 = vmatpush.bf16.msra.mxu1 %v7314_v36  ;;  %v8247_v58 = vld [vmem:[#allocation9 + $0x6c] sm:$0xf] }
 0x700   :  { %8571 = vrcp.f32 %v3241_v41  ;;  %v3200_v25 = vpop.f32.mrf.mxu2  ;;  %v3213_v42 = vpop.f32.mrf.mxu3  ;;  %v3253_v56 = vand.u32 2147483648, %v3241_v41  ;;  %v3251_v60 = vand.u32 2147483647, %v3241_v41  ;;  %vm3247_vm15 = vweird.f32 %v3241_v41  ;;  %3825 = vmatpush.bf16.msra.mxu2 %v7318_v37  ;;  %v7255_v36 = vld [vmem:[#allocation9 + $0x78] sm:$0xf0] }
 0x701   :  { %v3235_v2 = vor.u32 1.1754944e-38, %v3234_v55  ;;  %vm3233_vm2 = vcmp.eq.f32.partialorder %v3232_v59, 8.507059e+37  ;;  %v7293_v25 = vld [vmem:[#allocation9 + $0xc0] sm:$0xf]  ;;  %v8260_v42 = vld [vmem:[#allocation9 + $0xcc] sm:$0xf0] }
 0x702   :  { %v3254_v5 = vor.u32 1.1754944e-38, %v3253_v56  ;;  %vm3252_vm3 = vcmp.eq.f32.partialorder %v3251_v60, 8.507059e+37  ;;  %v7277_v55 = vld [vmem:[#allocation9 + $0xa0] sm:$0xf]  ;;  %v8256_v56 = vld [vmem:[#allocation9 + $0xac] sm:$0xf0] }
 0x703   :  { %v8568_v45 = vpop.eup %8567  ;;  %v7278_v59 = vor.u32 %v8256_v56, %v7277_v55  ;;  %v7285_v60 = vld [vmem:[#allocation9 + $0xa8] sm:$0xf]  ;;  %v8243_v56 = vld [vmem:[#allocation9 + $0x4c] sm:$0xf] }
 0x704   :  { %v3261_v46 = vadd.f32 1.0, %v8568_v45  ;;  %v7294_v45 = vor.u32 %v8260_v42, %v7293_v25  ;;  %v7229_v42 = vld [vmem:[#allocation9 + $0x40] sm:$0xf] }
 0x705   :  { %v8570_v61 = vpop.eup %8569 }
 0x706   :  { %v8572_v50 = vpop.eup %8571  ;;  %v3224_v51 = vmul.f32 %v8570_v61, %v3222_v39  ;;  %8573 = vrcp.f32 %v3261_v46  ;;  %vm3229_vm12 = vweird.f32 %v8570_v61  ;;  %v3273_v18 = vand.u32 2147483648, %v3261_v46  ;;  %v7319_v39 = vld [vmem:[#allocation9 + $0xf8] sm:$0xf0]  ;;  %3800 = vmatpush.bf16.msra.mxu0 %v7294_v45  ;;  %v8242_v45 = vld [vmem:[#allocation9 + $0x44] sm:$0xf] }
 0x707   :  { %v3243_v52 = vmul.f32 %v8572_v50, %v3241_v41  ;;  %8575 = vtanh.f32 %v3217_v48  ;;  %vm3248_vm13 = vweird.f32 %v8572_v50  ;;  %vm3230_vm0 = vmor %vm3228_vm14, %vm3229_vm12  ;;  %vm3267_vm5 = vweird.f32 %v3261_v46  ;;  %v8261_v48 = vld [vmem:[#allocation9 + $0xd4] sm:$0xf0] }
 0x708   :  { %v3225_v53 = vsub.f32 1.0, %v3224_v51  ;;  %vm3249_vm1 = vmor %vm3247_vm15, %vm3248_vm13  ;;  %v3271_v19 = vand.u32 2147483647, %v3261_v46  ;;  %v3274_v21 = vor.u32 1.1754944e-38, %v3273_v18  ;;  %v7322_v41 = vor.u32 %v8263_v38, %v7319_v39  ;;  %v7271_v18 = vld [vmem:[#allocation9 + $0x98] sm:$0xf0] }
 0x709   :  { %v3244_v62 = vsub.f32 1.0, %v3243_v52  ;;  %v8259_v52 = vld [vmem:[#allocation9 + $0xcc] sm:$0xf]  ;;  %v7258_v39 = vor.u32 %v8247_v58, %v7255_v36 }
 0x70a   :  { %v3226_v57 = vmul.f32 %v8570_v61, %v3225_v53  ;;  %vm3272_vm7 = vcmp.eq.f32.partialorder %v3271_v19, 8.507059e+37  ;;  %3838 = vmatpush.bf16.msra.mxu3 %v7322_v41  ;;  %v7303_v53 = vld [vmem:[#allocation9 + $0xd8] sm:$0xf0]  ;;  %3801 = vmatpush.bf16.msra.mxu0 %v7278_v59  ;;  %v3284_v19 = vld [vmem:[#allocation3 + $0x140] sm:$0xff]  ;;  %v7213_v59 = vld [vmem:[#allocation9 + $0x20] sm:$0xf] }
 0x70b   :  { %v3245_v44 = vmul.f32 %v8572_v50, %v3244_v62  ;;  %v7306_v62 = vor.u32 %v8259_v52, %v7303_v53  ;;  %v3287_v53 = vld [vmem:[#allocation3 + $0x158] sm:$0xff] }
 0x70c   :  { %v8574_v63 = vpop.eup %8573  ;;  %v3227_v0 = vadd.f32 %v8570_v61, %v3226_v57  ;;  %v8254_v57 = vld [vmem:[#allocation9 + $0xa4] sm:$0xf] }
 0x70d   :  { %v3246_v3 = vadd.f32 %v8572_v50, %v3245_v44  ;;  %v3263_v4 = vmul.f32 %v8574_v63, %v3261_v46  ;;  %v8576_v17 = vpop.eup %8575  ;;  %vm3268_vm4 = vweird.f32 %v8574_v63  ;;  %v7295_v46 = vld [vmem:[#allocation9 + $0xd0] sm:$0xf0] }
 0x70e   :  { %v3231_v6 = vsel %vm3230_vm0, %v8570_v61, %v3227_v0  ;;  %vm3269_vm6 = vmor %vm3267_vm5, %vm3268_vm4  ;;  %v7301_v61 = vld [vmem:[#allocation9 + $0xc8] sm:$0xf]  ;;  %3839 = vmatpush.bf16.msra.mxu3 %v7306_v62  ;;  %v7279_v44 = vld [vmem:[#allocation9 + $0xb0] sm:$0xf0] }
 0x70f   :  { %v3236_v8 = vsel %vm3233_vm2, %v3235_v2, %v3231_v6  ;;  %v3250_v9 = vsel %vm3249_vm1, %v8572_v50, %v3246_v3  ;;  %v3264_v10 = vsub.f32 1.0, %v3263_v4  ;;  %v7298_v50 = vor.u32 %v8258_v43, %v7295_v46  ;;  %v8255_v3 = vld [vmem:[#allocation9 + $0xac] sm:$0xf]  ;;  %v7287_v4 = vld [vmem:[#allocation9 + $0xb8] sm:$0xf0] }
 0x710   :  { %v3255_v11 = vsel %vm3252_vm3, %v3254_v5, %v3250_v9  ;;  %v3278_v12 = vmul.f32 %v8576_v17, %v3236_v8  ;;  %v7302_v51 = vor.u32 %v8261_v48, %v7301_v61  ;;  %v7282_v0 = vor.u32 %v8254_v57, %v7279_v44  ;;  %v7261_v6 = vld [vmem:[#allocation9 + $0x80] sm:$0xf]  ;;  %v8252_v17 = vld [vmem:[#allocation9 + $0x8c] sm:$0xf0]  ;;  %v8250_v8 = vld [vmem:[#allocation9 + $0x84] sm:$0xf] }
 0x711   :  { %v3277_v13 = vmul.f32 %v3255_v11, %v9155_v22  ;;  %v3265_v14 = vmul.f32 %v8574_v63, %v3264_v10  ;;  %3813 = vmatpush.bf16.msra.mxu1 %v7298_v50  ;;  %v7290_v5 = vor.u32 %v8255_v3, %v7287_v4  ;;  %v7262_v9 = vor.u32 %v8252_v17, %v7261_v6  ;;  %v7263_v10 = vld [vmem:[#allocation9 + $0x90] sm:$0xf0]  ;;  %v7269_v11 = vld [vmem:[#allocation9 + $0x88] sm:$0xf]  ;;  %v8244_v43 = vld [vmem:[#allocation9 + $0x4c] sm:$0xf0] }
 0x712   :  { %3826 = vmatpush.bf16.msra.mxu2 %v7302_v51  ;;  %v7230_v46 = vor.u32 %v8244_v43, %v7229_v42  ;;  %v7231_v61 = vld [vmem:[#allocation9 + $0x50] sm:$0xf0]  ;;  %v7237_v48 = vld [vmem:[#allocation9 + $0x48] sm:$0xf]  ;;  %v8245_v50 = vld [vmem:[#allocation9 + $0x54] sm:$0xf0] }
 0x713   :  { %v9163_v15 = vadd.f32 %v3278_v12, %v3277_v13  ;;  %v3266_v16 = vadd.f32 %v8574_v63, %v3265_v14  ;;  %3840 = vmatpush.bf16.msra.mxu3 %v7290_v5  ;;  %v8253_v12 = vld [vmem:[#allocation9 + $0x94] sm:$0xf0]  ;;  %v7266_v13 = vor.u32 %v8250_v8, %v7263_v10  ;;  %3802 = vmatpush.bf16.msra.mxu0 %v7262_v9  ;;  %v7239_v57 = vld [vmem:[#allocation9 + $0x58] sm:$0xf0]  ;;  %v8240_v44 = vld [vmem:[#allocation9 + $0x2c] sm:$0xf0] }
 0x714   :  { %v7270_v14 = vor.u32 %v8253_v12, %v7269_v11  ;;  %v7234_v62 = vor.u32 %v8242_v45, %v7231_v61  ;;  %v7238_v55 = vor.u32 %v8245_v50, %v7237_v48  ;;  %v7221_v3 = vld [vmem:[#allocation9 + $0x28] sm:$0xf]  ;;  %v8241_v5 = vld [vmem:[#allocation9 + $0x34] sm:$0xf0]  ;;  %v8239_v6 = vld [vmem:[#allocation9 + $0x2c] sm:$0xf] }
 0x715   :  { %8577 = vtanh.f32 %v9163_v15  ;;  %v3270_v20 = vsel %vm3269_vm6, %v8574_v63, %v3266_v16  ;;  %v8257_v63 = vld [vmem:[#allocation9 + $0xb4] sm:$0xf0]  ;;  %3814 = vmatpush.bf16.msra.mxu1 %v7282_v0  ;;  %v8251_v16 = vld [vmem:[#allocation9 + $0x8c] sm:$0xf]  ;;  %v8238_v0 = vld [vmem:[#allocation9 + $0x24] sm:$0xf]  ;;  %v7222_v10 = vor.u32 %v8241_v5, %v7221_v3 }
 0x716   :  { %v3275_v24 = vsel %vm3272_vm7, %v3274_v21, %v3270_v20  ;;  %v7286_v2 = vor.u32 %v8257_v63, %v7285_v60  ;;  %v3285_v20 = vld [vmem:[#allocation3 + $0x148] sm:$0xff]  ;;  %v7274_v21 = vor.u32 %v8251_v16, %v7271_v18  ;;  %v7242_v60 = vor.u32 %v8243_v56, %v7239_v57  ;;  %v7197_v12 = vld [vmem:[#allocation9] sm:$0xf] }
 0x717   :  { %v7214_v63 = vor.u32 %v8240_v44, %v7213_v59  ;;  %v7223_v17 = vld [vmem:[#allocation9 + $0x38] sm:$0xf0] }
 0x718   :  { %3827 = vmatpush.bf16.msra.mxu2 %v7286_v2  ;;  %3841 = vmatpush.bf16.msra.mxu3 %v7274_v21  ;;  %v7215_v2 = vld [vmem:[#allocation9 + $0x30] sm:$0xf0]  ;;  %v7226_v11 = vor.u32 %v8239_v6, %v7223_v17 }
 0x719   :  { %3815 = vmatpush.bf16.msra.mxu1 %v7266_v13  ;;  %v7218_v4 = vor.u32 %v8238_v0, %v7215_v2  ;;  %v8236_v13 = vld [vmem:[#allocation9 + $0xc] sm:$0xf0]  ;;  %v7199_v21 = vld [vmem:[#allocation9 + $0x10] sm:$0xf0] }
 0x71b   :  { %v8578_v23 = vpop.eup %8577 }
 0x71c   :  { %v9166_v40 = vmul.f32 %v8578_v23, %v3275_v24  ;;  %3828 = vmatpush.bf16.msra.mxu2 %v7270_v14  ;;  %v7245_v23 = vld [vmem:[#allocation9 + $0x60] sm:$0xf]  ;;  %v8248_v24 = vld [vmem:[#allocation9 + $0x6c] sm:$0xf0]  ;;  %3842 = vmatpush.bf16.msra.mxu3 %v7258_v39  ;;  %v8234_v14 = vld [vmem:[#allocation9 + $0x4] sm:$0xf] }
 0x71d   :  { %v7246_v28 = vor.u32 %v8248_v24, %v7245_v23  ;;  %v7205_v23 = vld [vmem:[#allocation9 + $0x8] sm:$0xf]  ;;  %v8237_v24 = vld [vmem:[#allocation9 + $0x14] sm:$0xf0] }
 0x71e   :  { %v3288_v22 = vpack.c.bf16 %v9166_v40, %v9166_v40 }
 0x71f   :  { %3803 = vmatpush.bf16.msra.mxu0 %v7246_v28  ;;  %v7206_v28 = vor.u32 %v8237_v24, %v7205_v23  ;;  %v7440_v24 = vld [vmem:[#allocation9 + $0xe0] sm:$0xf] }
 0x720   :  { %3489 = vmatmul.bf16.vlgmr.msrb.gmra.mxu0 %v3288_v22  ;;  %3502 = vmatmul.bf16.vlgmr.msrb.gmra.mxu1 %v3288_v22 }
 0x721   :  { %3515 = vmatmul.bf16.vlgmr.msrb.gmra.mxu2 %v3288_v22  ;;  %3528 = vmatmul.bf16.vlgmr.msrb.gmra.mxu3 %v3288_v22  ;;  %v8246_v22 = vld [vmem:[#allocation9 + $0x64] sm:$0xf] }
 0x722   :  { %v7250_v34 = vor.u32 %v8246_v22, %v7247_v30  ;;  %3829 = vmatpush.bf16.msra.mxu2 %v7254_v35  ;;  %3843 = vmatpush.bf16.msra.mxu3 %v7242_v60  ;;  %v7202_v22 = vor.u32 %v8234_v14, %v7199_v21  ;;  %v8235_v30 = vld [vmem:[#allocation9 + $0xc] sm:$0xf] }
 0x723   :  { %3804 = vmatpush.bf16.msra.mxu0 %v7230_v46  ;;  %v7210_v35 = vor.u32 %v8235_v30, %v7207_v31  ;;  %v7442_v31 = vld [vmem:[#allocation9 + $0xf0] sm:$0xf0] }
 0x724   :  { %3816 = vmatpush.bf16.msra.mxu1 %v7250_v34 }
 0x726   :  { %3830 = vmatpush.bf16.msra.mxu2 %v7238_v55  ;;  %3844 = vmatpush.bf16.msra.mxu3 %v7226_v11 }
 0x727   :  { %3805 = vmatpush.bf16.msra.mxu0 %v7214_v63 }
 0x728   :  { %3817 = vmatpush.bf16.msra.mxu1 %v7234_v62 }
 0x72a   :  { %3831 = vmatpush.bf16.msra.mxu2 %v7222_v10  ;;  %3845 = vmatpush.bf16.msra.mxu3 %v7210_v35 }
 0x72c   :  { %3818 = vmatpush.bf16.msra.mxu1 %v7218_v4 }
 0x72e   :  { %3832 = vmatpush.bf16.msra.mxu2 %v7206_v28  ;;  %v8294_v28 = vld [vmem:[#allocation9 + $0xe4] sm:$0xf] }
 0x72f   :  { %v7445_v35 = vor.u32 %v8294_v28, %v7442_v31  ;;  %v7378_v28 = vld [vmem:[#allocation9 + $0x70] sm:$0xf0]  ;;  %v8281_v31 = vld [vmem:[#allocation9 + $0x74] sm:$0xf0] }
 0x730   :  { %3819 = vmatpush.bf16.msra.mxu1 %v7202_v22  ;;  %v8296_v22 = vld [vmem:[#allocation9 + $0xec] sm:$0xf0] }
 0x731   :  { %v7441_v30 = vor.u32 %v8296_v22, %v7440_v24  ;;  %v8278_v24 = vld [vmem:[#allocation9 + $0x64] sm:$0xf] }
 0x734   :  { %4130 = vmatpush.bf16.msrb.mxu1 %v7445_v35  ;;  %v8279_v35 = vld [vmem:[#allocation9 + $0x6c] sm:$0xf] }
 0x79d   :  { %v3490_v37 = vpop.f32.mrf.mxu0  ;;  %v3503_v38 = vpop.f32.mrf.mxu1 }
 0x79e   :  { %v3533_v41 = vadd.f32 %v3490_v37, %v3284_v19  ;;  %v3534_v25 = vadd.f32 %v3503_v38, %v3285_v20  ;;  %v7198_v20 = vor.u32 %v8236_v13, %v7197_v12 }
 0x7a0   :  { %v7192_v51 = vmul.f32 -1.442695, %v3533_v41  ;;  %v7193_v52 = vmul.f32 -1.442695, %v3534_v25  ;;  %3806 = vmatpush.bf16.msra.mxu0 %v7198_v20  ;;  %v3286_v41 = vld [vmem:[#allocation3 + $0x150] sm:$0xff] }
 0x7a2   :  { %8579 = vpow2.f32 %v7192_v51 }
 0x7a3   :  { %8581 = vpow2.f32 %v7193_v52 }
 0x7a4   :  { %v3516_v8 = vpop.f32.mrf.mxu2  ;;  %v3529_v9 = vpop.f32.mrf.mxu3  ;;  %4117 = vmatpush.bf16.msrb.mxu0 %v7441_v30  ;;  %v7384_v30 = vld [vmem:[#allocation9 + $0x68] sm:$0xf] }
 0x7a5   :  { %v3536_v16 = vadd.f32 %v3529_v9, %v3287_v53  ;;  %v3492_v18 = vpop.f32.mrf.mxu0  ;;  %v3505_v19 = vpop.f32.mrf.mxu1  ;;  %v3535_v45 = vadd.f32 %v3516_v8, %v3286_v41  ;;  %v8292_v41 = vld [vmem:[#allocation9 + $0xcc] sm:$0xf0] }
 0x7a7   :  { %v7194_v32 = vmul.f32 -1.442695, %v3536_v16 }
 0x7a8   :  { %v8580_v34 = vpop.eup %8579 }
 0x7a9   :  { %v8582_v58 = vpop.eup %8581  ;;  %v3540_v36 = vadd.f32 1.0, %v8580_v34  ;;  %8583 = vpow2.f32 %v7194_v32  ;;  %v7448_v32 = vld [vmem:[#allocation9 + $0xe8] sm:$0xf]  ;;  %v8297_v34 = vld [vmem:[#allocation9 + $0xf4] sm:$0xf0] }
 0x7aa   :  { %v3559_v37 = vadd.f32 1.0, %v8582_v58  ;;  %v7449_v58 = vor.u32 %v8297_v34, %v7448_v32  ;;  %v7381_v32 = vor.u32 %v8278_v24, %v7378_v28  ;;  %v7385_v34 = vor.u32 %v8281_v31, %v7384_v30  ;;  %v8269_v24 = vld [vmem:[#allocation9 + $0x14] sm:$0xf0]  ;;  %v8267_v30 = vld [vmem:[#allocation9 + $0xc] sm:$0xf] }
 0x7ab   :  { %8585 = vrcp.f32 %v3540_v36  ;;  %v3552_v52 = vand.u32 2147483648, %v3540_v36  ;;  %v3550_v55 = vand.u32 2147483647, %v3540_v36  ;;  %vm3546_vm10 = vweird.f32 %v3540_v36  ;;  %v7338_v31 = vld [vmem:[#allocation9 + $0x18] sm:$0xf0] }
 0x7ac   :  { %8587 = vrcp.f32 %v3559_v37  ;;  %v3518_v38 = vpop.f32.mrf.mxu2  ;;  %v3531_v39 = vpop.f32.mrf.mxu3  ;;  %v3571_v53 = vand.u32 2147483648, %v3559_v37  ;;  %v3569_v57 = vand.u32 2147483647, %v3559_v37  ;;  %vm3565_vm11 = vweird.f32 %v3559_v37  ;;  %4143 = vmatpush.bf16.msrb.mxu2 %v7449_v58  ;;  %v7386_v58 = vld [vmem:[#allocation9 + $0x78] sm:$0xf0] }
 0x7ad   :  { %v3553_v60 = vor.u32 1.1754944e-38, %v3552_v52  ;;  %vm3551_vm14 = vcmp.eq.f32.partialorder %v3550_v55, 8.507059e+37  ;;  %v7424_v39 = vld [vmem:[#allocation9 + $0xc0] sm:$0xf]  ;;  %v8286_v55 = vld [vmem:[#allocation9 + $0xa4] sm:$0xf] }
 0x7ae   :  { %v3572_v2 = vor.u32 1.1754944e-38, %v3571_v53  ;;  %vm3570_vm15 = vcmp.eq.f32.partialorder %v3569_v57, 8.507059e+37  ;;  %v7408_v53 = vld [vmem:[#allocation9 + $0xa0] sm:$0xf]  ;;  %v7410_v57 = vld [vmem:[#allocation9 + $0xb0] sm:$0xf0] }
 0x7af   :  { %v8584_v25 = vpop.eup %8583 }
 0x7b0   :  { %v3579_v42 = vadd.f32 1.0, %v8584_v25  ;;  %v8290_v25 = vld [vmem:[#allocation9 + $0xc4] sm:$0xf] }
 0x7b1   :  { %v8586_v43 = vpop.eup %8585 }
 0x7b2   :  { %v8588_v46 = vpop.eup %8587  ;;  %v3542_v61 = vmul.f32 %v8586_v43, %v3540_v36  ;;  %8589 = vrcp.f32 %v3579_v42  ;;  %vm3547_vm8 = vweird.f32 %v8586_v43  ;;  %v3591_v14 = vand.u32 2147483648, %v3579_v42  ;;  %v8295_v36 = vld [vmem:[#allocation9 + $0xec] sm:$0xf] }
 0x7b3   :  { %v3561_v48 = vmul.f32 %v8588_v46, %v3559_v37  ;;  %8591 = vtanh.f32 %v3535_v45  ;;  %vm3566_vm9 = vweird.f32 %v8588_v46  ;;  %vm3548_vm12 = vmor %vm3546_vm10, %vm3547_vm8  ;;  %vm3585_vm1 = vweird.f32 %v3579_v42  ;;  %v7450_v37 = vld [vmem:[#allocation9 + $0xf8] sm:$0xf0]  ;;  %v7432_v45 = vld [vmem:[#allocation9 + $0xc8] sm:$0xf] }
 0x7b4   :  { %v3543_v50 = vsub.f32 1.0, %v3542_v61  ;;  %vm3567_vm13 = vmor %vm3565_vm11, %vm3566_vm9  ;;  %v3589_v16 = vand.u32 2147483647, %v3579_v42  ;;  %v3592_v19 = vor.u32 1.1754944e-38, %v3591_v14  ;;  %v7453_v38 = vor.u32 %v8295_v36, %v7450_v37  ;;  %v8283_v14 = vld [vmem:[#allocation9 + $0x8c] sm:$0xf] }
 0x7b5   :  { %v3562_v51 = vsub.f32 1.0, %v3561_v48 }
 0x7b6   :  { %v3544_v62 = vmul.f32 %v8586_v43, %v3543_v50  ;;  %vm3590_vm3 = vcmp.eq.f32.partialorder %v3589_v16, 8.507059e+37  ;;  %4156 = vmatpush.bf16.msrb.mxu3 %v7453_v38  ;;  %v8291_v50 = vld [vmem:[#allocation9 + $0xcc] sm:$0xf]  ;;  %v7402_v16 = vld [vmem:[#allocation9 + $0x98] sm:$0xf0]  ;;  %v7389_v38 = vor.u32 %v8279_v35, %v7386_v58  ;;  %v7341_v35 = vor.u32 %v8267_v30, %v7338_v31 }
 0x7b7   :  { %v3563_v56 = vmul.f32 %v8588_v46, %v3562_v51  ;;  %v7434_v51 = vld [vmem:[#allocation9 + $0xd8] sm:$0xf0]  ;;  %v8326_v30 = vld [vmem:[#allocation9 + $0xe4] sm:$0xf] }
 0x7b8   :  { %v8590_v59 = vpop.eup %8589  ;;  %v3545_v44 = vadd.f32 %v8586_v43, %v3544_v62  ;;  %v7437_v52 = vor.u32 %v8291_v50, %v7434_v51  ;;  %v8288_v62 = vld [vmem:[#allocation9 + $0xac] sm:$0xf0] }
 0x7b9   :  { %v3564_v63 = vadd.f32 %v8588_v46, %v3563_v56  ;;  %v3581_v0 = vmul.f32 %v8590_v59, %v3579_v42  ;;  %v8592_v4 = vpop.eup %8591  ;;  %vm3586_vm0 = vweird.f32 %v8590_v59  ;;  %v7425_v42 = vor.u32 %v8292_v41, %v7424_v39 }
 0x7ba   :  { %v3549_v3 = vsel %vm3548_vm12, %v8586_v43, %v3545_v44  ;;  %vm3587_vm2 = vmor %vm3585_vm1, %vm3586_vm0  ;;  %v7426_v43 = vld [vmem:[#allocation9 + $0xd0] sm:$0xf0]  ;;  %4157 = vmatpush.bf16.msrb.mxu3 %v7437_v52  ;;  %v7409_v56 = vor.u32 %v8288_v62, %v7408_v53  ;;  %v8289_v44 = vld [vmem:[#allocation9 + $0xb4] sm:$0xf0] }
 0x7bb   :  { %v3554_v5 = vsel %vm3551_vm14, %v3553_v60, %v3549_v3  ;;  %v3568_v6 = vsel %vm3567_vm13, %v8588_v46, %v3564_v63  ;;  %v3582_v17 = vsub.f32 1.0, %v3581_v0  ;;  %v8293_v46 = vld [vmem:[#allocation9 + $0xd4] sm:$0xf0]  ;;  %v7429_v61 = vor.u32 %v8290_v25, %v7426_v43  ;;  %4118 = vmatpush.bf16.msrb.mxu0 %v7425_v42  ;;  %v8287_v0 = vld [vmem:[#allocation9 + $0xac] sm:$0xf] }
 0x7bc   :  { %v3573_v8 = vsel %vm3570_vm15, %v3572_v2, %v3568_v6  ;;  %v3596_v9 = vmul.f32 %v8592_v4, %v3554_v5  ;;  %v7433_v48 = vor.u32 %v8293_v46, %v7432_v45  ;;  %v7413_v60 = vor.u32 %v8286_v55, %v7410_v57  ;;  %v7418_v2 = vld [vmem:[#allocation9 + $0xb8] sm:$0xf0]  ;;  %v7392_v4 = vld [vmem:[#allocation9 + $0x80] sm:$0xf]  ;;  %v8284_v5 = vld [vmem:[#allocation9 + $0x8c] sm:$0xf0] }
 0x7bd   :  { %v3595_v10 = vmul.f32 %v3573_v8, %v9163_v15  ;;  %v3583_v11 = vmul.f32 %v8590_v59, %v3582_v17  ;;  %4131 = vmatpush.bf16.msrb.mxu1 %v7429_v61  ;;  %v7421_v3 = vor.u32 %v8287_v0, %v7418_v2  ;;  %v8282_v6 = vld [vmem:[#allocation9 + $0x84] sm:$0xf]  ;;  %v7393_v17 = vor.u32 %v8284_v5, %v7392_v4  ;;  %v7394_v8 = vld [vmem:[#allocation9 + $0x90] sm:$0xf0]  ;;  %v7360_v25 = vld [vmem:[#allocation9 + $0x40] sm:$0xf] }
 0x7be   :  { %4144 = vmatpush.bf16.msrb.mxu2 %v7433_v48  ;;  %v8276_v42 = vld [vmem:[#allocation9 + $0x4c] sm:$0xf0]  ;;  %v8274_v43 = vld [vmem:[#allocation9 + $0x44] sm:$0xf]  ;;  %v7362_v46 = vld [vmem:[#allocation9 + $0x50] sm:$0xf0] }
 0x7bf   :  { %v9171_v12 = vadd.f32 %v3596_v9, %v3595_v10  ;;  %v3584_v13 = vadd.f32 %v8590_v59, %v3583_v11  ;;  %4119 = vmatpush.bf16.msrb.mxu0 %v7409_v56  ;;  %4158 = vmatpush.bf16.msrb.mxu3 %v7421_v3  ;;  %v7400_v9 = vld [vmem:[#allocation9 + $0x88] sm:$0xf]  ;;  %v8285_v10 = vld [vmem:[#allocation9 + $0x94] sm:$0xf0]  ;;  %v7397_v11 = vor.u32 %v8282_v6, %v7394_v8  ;;  %v8275_v55 = vld [vmem:[#allocation9 + $0x4c] sm:$0xf] }
 0x7c0   :  { %v7361_v45 = vor.u32 %v8276_v42, %v7360_v25  ;;  %v7368_v61 = vld [vmem:[#allocation9 + $0x48] sm:$0xf]  ;;  %v8277_v48 = vld [vmem:[#allocation9 + $0x54] sm:$0xf0]  ;;  %v7365_v53 = vor.u32 %v8274_v43, %v7362_v46  ;;  %v7370_v56 = vld [vmem:[#allocation9 + $0x58] sm:$0xf0] }
 0x7c1   :  { %8593 = vtanh.f32 %v9171_v12  ;;  %v3588_v18 = vsel %vm3587_vm2, %v8590_v59, %v3584_v13  ;;  %v7416_v59 = vld [vmem:[#allocation9 + $0xa8] sm:$0xf]  ;;  %4132 = vmatpush.bf16.msrb.mxu1 %v7413_v60  ;;  %v7401_v13 = vor.u32 %v8285_v10, %v7400_v9  ;;  %v7369_v62 = vor.u32 %v8277_v48, %v7368_v61  ;;  %v7344_v57 = vld [vmem:[#allocation9 + $0x20] sm:$0xf]  ;;  %v7346_v0 = vld [vmem:[#allocation9 + $0x30] sm:$0xf0] }
 0x7c2   :  { %v3593_v21 = vsel %vm3590_vm3, %v3592_v19, %v3588_v18  ;;  %v7417_v63 = vor.u32 %v8289_v44, %v7416_v59  ;;  %v3602_v18 = vld [vmem:[#allocation3 + $0x160] sm:$0xff]  ;;  %v3603_v19 = vld [vmem:[#allocation3 + $0x168] sm:$0xff]  ;;  %v3605_v52 = vld [vmem:[#allocation3 + $0x178] sm:$0xff]  ;;  %v7373_v44 = vor.u32 %v8275_v55, %v7370_v56 }
 0x7c3   :  { %4120 = vmatpush.bf16.msrb.mxu0 %v7393_v17  ;;  %v8272_v59 = vld [vmem:[#allocation9 + $0x2c] sm:$0xf0]  ;;  %v7352_v2 = vld [vmem:[#allocation9 + $0x28] sm:$0xf]  ;;  %v8273_v4 = vld [vmem:[#allocation9 + $0x34] sm:$0xf0] }
 0x7c4   :  { %4145 = vmatpush.bf16.msrb.mxu2 %v7417_v63  ;;  %v7345_v60 = vor.u32 %v8272_v59, %v7344_v57  ;;  %v8270_v63 = vld [vmem:[#allocation9 + $0x24] sm:$0xf]  ;;  %v8271_v5 = vld [vmem:[#allocation9 + $0x2c] sm:$0xf]  ;;  %v7354_v6 = vld [vmem:[#allocation9 + $0x38] sm:$0xf0]  ;;  %v7353_v9 = vor.u32 %v8273_v4, %v7352_v2 }
 0x7c5   :  { %4133 = vmatpush.bf16.msrb.mxu1 %v7397_v11  ;;  %v7349_v3 = vor.u32 %v8270_v63, %v7346_v0  ;;  %v7357_v10 = vor.u32 %v8271_v5, %v7354_v6  ;;  %v7328_v11 = vld [vmem:[#allocation9] sm:$0xf] }
 0x7c7   :  { %v8594_v20 = vpop.eup %8593 }
 0x7c8   :  { %v9174_v23 = vmul.f32 %v8594_v20, %v3593_v21  ;;  %v7405_v20 = vor.u32 %v8283_v14, %v7402_v16  ;;  %4146 = vmatpush.bf16.msrb.mxu2 %v7401_v13  ;;  %v7376_v21 = vld [vmem:[#allocation9 + $0x60] sm:$0xf]  ;;  %v8268_v13 = vld [vmem:[#allocation9 + $0xc] sm:$0xf0]  ;;  %v8266_v14 = vld [vmem:[#allocation9 + $0x4] sm:$0xf] }
 0x7c9   :  { %4134 = vmatpush.bf16.msrb.mxu1 %v7381_v32 }
 0x7ca   :  { %v3606_v15 = vpack.c.bf16 %v9174_v23, %v9174_v23  ;;  %4159 = vmatpush.bf16.msrb.mxu3 %v7405_v20  ;;  %v7329_v20 = vor.u32 %v8268_v13, %v7328_v11 }
 0x7cc   :  { %3807 = vmatmul.bf16.vlgmr.msra.gmra.mxu0 %v3606_v15  ;;  %3820 = vmatmul.bf16.vlgmr.msra.gmra.mxu1 %v3606_v15 }
 0x7cd   :  { %3833 = vmatmul.bf16.vlgmr.msra.gmra.mxu2 %v3606_v15  ;;  %3846 = vmatmul.bf16.vlgmr.msra.gmra.mxu3 %v3606_v15  ;;  %v8280_v15 = vld [vmem:[#allocation9 + $0x6c] sm:$0xf0] }
 0x7ce   :  { %v7377_v22 = vor.u32 %v8280_v15, %v7376_v21  ;;  %4147 = vmatpush.bf16.msrb.mxu2 %v7385_v34  ;;  %4160 = vmatpush.bf16.msrb.mxu3 %v7389_v38  ;;  %v7330_v21 = vld [vmem:[#allocation9 + $0x10] sm:$0xf0]  ;;  %v7336_v15 = vld [vmem:[#allocation9 + $0x8] sm:$0xf] }
 0x7cf   :  { %4135 = vmatpush.bf16.msrb.mxu1 %v7365_v53  ;;  %v7337_v28 = vor.u32 %v8269_v24, %v7336_v15 }
 0x7d0   :  { %4121 = vmatpush.bf16.msrb.mxu0 %v7377_v22  ;;  %v7333_v22 = vor.u32 %v8266_v14, %v7330_v21 }
 0x7d2   :  { %4148 = vmatpush.bf16.msrb.mxu2 %v7369_v62  ;;  %4161 = vmatpush.bf16.msrb.mxu3 %v7373_v44 }
 0x7d3   :  { %4136 = vmatpush.bf16.msrb.mxu1 %v7349_v3 }
 0x7d4   :  { %4122 = vmatpush.bf16.msrb.mxu0 %v7361_v45 }
 0x7d6   :  { %4149 = vmatpush.bf16.msrb.mxu2 %v7353_v9  ;;  %4162 = vmatpush.bf16.msrb.mxu3 %v7357_v10 }
 0x7d7   :  { %4137 = vmatpush.bf16.msrb.mxu1 %v7333_v22  ;;  %v7571_v22 = vld [vmem:[#allocation9 + $0xe0] sm:$0xf] }
 0x7d8   :  { %4123 = vmatpush.bf16.msrb.mxu0 %v7345_v60 }
 0x7da   :  { %4150 = vmatpush.bf16.msrb.mxu2 %v7337_v28  ;;  %4163 = vmatpush.bf16.msrb.mxu3 %v7341_v35  ;;  %v8328_v28 = vld [vmem:[#allocation9 + $0xec] sm:$0xf0]  ;;  %v8329_v35 = vld [vmem:[#allocation9 + $0xf4] sm:$0xf0] }
 0x7db   :  { %v7572_v31 = vor.u32 %v8328_v28, %v7571_v22  ;;  %v8312_v22 = vld [vmem:[#allocation9 + $0x6c] sm:$0xf0]  ;;  %v8310_v28 = vld [vmem:[#allocation9 + $0x64] sm:$0xf] }
 0x7dc   :  { %4124 = vmatpush.bf16.msrb.mxu0 %v7329_v20 }
 0x7e0   :  { %4435 = vmatpush.bf16.msra.mxu0 %v7572_v31  ;;  %v7509_v31 = vld [vmem:[#allocation9 + $0x70] sm:$0xf0] }
 0x849   :  { %v3808_v36 = vpop.f32.mrf.mxu0  ;;  %v3821_v37 = vpop.f32.mrf.mxu1 }
 0x84a   :  { %v3851_v39 = vadd.f32 %v3808_v36, %v3602_v18  ;;  %v3852_v41 = vadd.f32 %v3821_v37, %v3603_v19 }
 0x84c   :  { %v7323_v50 = vmul.f32 -1.442695, %v3851_v39  ;;  %v7324_v51 = vmul.f32 -1.442695, %v3852_v41  ;;  %v3604_v41 = vld [vmem:[#allocation3 + $0x170] sm:$0xff] }
 0x84e   :  { %8595 = vpow2.f32 %v7323_v50 }
 0x84f   :  { %8597 = vpow2.f32 %v7324_v51 }
 0x850   :  { %v3834_v17 = vpop.f32.mrf.mxu2  ;;  %v3847_v8 = vpop.f32.mrf.mxu3 }
 0x851   :  { %v3854_v16 = vadd.f32 %v3847_v8, %v3605_v52  ;;  %v3810_v18 = vpop.f32.mrf.mxu0  ;;  %v3823_v19 = vpop.f32.mrf.mxu1  ;;  %v3853_v45 = vadd.f32 %v3834_v17, %v3604_v41  ;;  %v7555_v41 = vld [vmem:[#allocation9 + $0xc0] sm:$0xf] }
 0x853   :  { %v7325_v32 = vmul.f32 -1.442695, %v3854_v16 }
 0x854   :  { %v8596_v34 = vpop.eup %8595 }
 0x855   :  { %v8598_v58 = vpop.eup %8597  ;;  %v3858_v36 = vadd.f32 1.0, %v8596_v34  ;;  %8599 = vpow2.f32 %v7325_v32  ;;  %v7573_v32 = vld [vmem:[#allocation9 + $0xf0] sm:$0xf0]  ;;  %v7579_v34 = vld [vmem:[#allocation9 + $0xe8] sm:$0xf] }
 0x856   :  { %v3877_v37 = vadd.f32 1.0, %v8598_v58  ;;  %v7576_v58 = vor.u32 %v8326_v30, %v7573_v32  ;;  %v7515_v32 = vld [vmem:[#allocation9 + $0x68] sm:$0xf] }
 0x857   :  { %8601 = vrcp.f32 %v3858_v36  ;;  %v3870_v52 = vand.u32 2147483648, %v3858_v36  ;;  %v3868_v55 = vand.u32 2147483647, %v3858_v36  ;;  %vm3864_vm6 = vweird.f32 %v3858_v36 }
 0x858   :  { %8603 = vrcp.f32 %v3877_v37  ;;  %v3836_v38 = vpop.f32.mrf.mxu2  ;;  %v3849_v39 = vpop.f32.mrf.mxu3  ;;  %v3889_v53 = vand.u32 2147483648, %v3877_v37  ;;  %v3887_v57 = vand.u32 2147483647, %v3877_v37  ;;  %vm3883_vm7 = vweird.f32 %v3877_v37  ;;  %4448 = vmatpush.bf16.msra.mxu1 %v7576_v58 }
 0x859   :  { %v3871_v60 = vor.u32 1.1754944e-38, %v3870_v52  ;;  %vm3869_vm10 = vcmp.eq.f32.partialorder %v3868_v55, 8.507059e+37  ;;  %v7581_v38 = vld [vmem:[#allocation9 + $0xf8] sm:$0xf0]  ;;  %v8320_v55 = vld [vmem:[#allocation9 + $0xac] sm:$0xf0] }
 0x85a   :  { %v3890_v2 = vor.u32 1.1754944e-38, %v3889_v53  ;;  %vm3888_vm11 = vcmp.eq.f32.partialorder %v3887_v57, 8.507059e+37  ;;  %v7565_v52 = vld [vmem:[#allocation9 + $0xd8] sm:$0xf0] }
 0x85b   :  { %v8600_v25 = vpop.eup %8599 }
 0x85c   :  { %v3897_v42 = vadd.f32 1.0, %v8600_v25  ;;  %v8324_v25 = vld [vmem:[#allocation9 + $0xcc] sm:$0xf0] }
 0x85d   :  { %v8602_v43 = vpop.eup %8601 }
 0x85e   :  { %v8604_v46 = vpop.eup %8603  ;;  %v3860_v61 = vmul.f32 %v8602_v43, %v3858_v36  ;;  %8605 = vrcp.f32 %v3897_v42  ;;  %vm3865_vm4 = vweird.f32 %v8602_v43  ;;  %v3909_v16 = vand.u32 2147483648, %v3897_v42 }
 0x85f   :  { %v3879_v48 = vmul.f32 %v8604_v46, %v3877_v37  ;;  %8607 = vtanh.f32 %v3853_v45  ;;  %vm3884_vm5 = vweird.f32 %v8604_v46  ;;  %vm3866_vm8 = vmor %vm3864_vm6, %vm3865_vm4  ;;  %vm3903_vm13 = vweird.f32 %v3897_v42  ;;  %v8327_v37 = vld [vmem:[#allocation9 + $0xec] sm:$0xf]  ;;  %v7557_v45 = vld [vmem:[#allocation9 + $0xd0] sm:$0xf0] }
 0x860   :  { %v3861_v50 = vsub.f32 1.0, %v3860_v61  ;;  %vm3885_vm9 = vmor %vm3883_vm7, %vm3884_vm5  ;;  %v3907_v18 = vand.u32 2147483647, %v3897_v42  ;;  %v3910_v20 = vor.u32 1.1754944e-38, %v3909_v16  ;;  %v7580_v36 = vor.u32 %v8329_v35, %v7579_v34  ;;  %v8325_v61 = vld [vmem:[#allocation9 + $0xd4] sm:$0xf0] }
 0x861   :  { %v3880_v51 = vsub.f32 1.0, %v3879_v48  ;;  %v7584_v39 = vor.u32 %v8327_v37, %v7581_v38  ;;  %v8313_v34 = vld [vmem:[#allocation9 + $0x74] sm:$0xf0]  ;;  %v7512_v35 = vor.u32 %v8310_v28, %v7509_v31  ;;  %v7517_v37 = vld [vmem:[#allocation9 + $0x78] sm:$0xf0] }
 0x862   :  { %v3862_v62 = vmul.f32 %v8602_v43, %v3861_v50  ;;  %vm3908_vm15 = vcmp.eq.f32.partialorder %v3907_v18, 8.507059e+37  ;;  %4461 = vmatpush.bf16.msra.mxu2 %v7580_v36  ;;  %v8315_v18 = vld [vmem:[#allocation9 + $0x8c] sm:$0xf]  ;;  %v7516_v58 = vor.u32 %v8313_v34, %v7515_v32  ;;  %v7467_v28 = vld [vmem:[#allocation9 + $0x8] sm:$0xf] }
 0x863   :  { %v3881_v56 = vmul.f32 %v8604_v46, %v3880_v51  ;;  %4474 = vmatpush.bf16.msra.mxu3 %v7584_v39  ;;  %v8323_v51 = vld [vmem:[#allocation9 + $0xcc] sm:$0xf] }
 0x864   :  { %v8606_v59 = vpop.eup %8605  ;;  %v3863_v44 = vadd.f32 %v8602_v43, %v3862_v62  ;;  %v7568_v53 = vor.u32 %v8323_v51, %v7565_v52  ;;  %v7539_v62 = vld [vmem:[#allocation9 + $0xa0] sm:$0xf]  ;;  %v8311_v36 = vld [vmem:[#allocation9 + $0x6c] sm:$0xf]  ;;  %v8309_v51 = vld [vmem:[#allocation9 + $0x54] sm:$0xf0] }
 0x865   :  { %v3882_v63 = vadd.f32 %v8604_v46, %v3881_v56  ;;  %v3899_v0 = vmul.f32 %v8606_v59, %v3897_v42  ;;  %v8608_v4 = vpop.eup %8607  ;;  %vm3904_vm12 = vweird.f32 %v8606_v59  ;;  %v8322_v42 = vld [vmem:[#allocation9 + $0xc4] sm:$0xf]  ;;  %v7540_v57 = vor.u32 %v8320_v55, %v7539_v62  ;;  %v3923_v62 = vld [vmem:[#allocation3 + $0x198] sm:$0xff] }
 0x866   :  { %v3867_v3 = vsel %vm3866_vm8, %v8602_v43, %v3863_v44  ;;  %vm3905_vm14 = vmor %vm3903_vm13, %vm3904_vm12  ;;  %v7556_v43 = vor.u32 %v8324_v25, %v7555_v41  ;;  %v7560_v48 = vor.u32 %v8322_v42, %v7557_v45  ;;  %v8318_v56 = vld [vmem:[#allocation9 + $0xa4] sm:$0xf]  ;;  %v7547_v44 = vld [vmem:[#allocation9 + $0xa8] sm:$0xf]  ;;  %v7520_v41 = vor.u32 %v8311_v36, %v7517_v37 }
 0x867   :  { %v3872_v5 = vsel %vm3869_vm10, %v3871_v60, %v3867_v3  ;;  %v3886_v6 = vsel %vm3885_vm9, %v8604_v46, %v3882_v63  ;;  %v3900_v17 = vsub.f32 1.0, %v3899_v0  ;;  %v7563_v46 = vld [vmem:[#allocation9 + $0xc8] sm:$0xf]  ;;  %4475 = vmatpush.bf16.msra.mxu3 %v7568_v53  ;;  %v8321_v60 = vld [vmem:[#allocation9 + $0xb4] sm:$0xf0] }
 0x868   :  { %v3891_v8 = vsel %vm3888_vm11, %v3890_v2, %v3886_v6  ;;  %v3914_v9 = vmul.f32 %v8608_v4, %v3872_v5  ;;  %v7564_v50 = vor.u32 %v8325_v61, %v7563_v46  ;;  %4436 = vmatpush.bf16.msra.mxu0 %v7556_v43  ;;  %4449 = vmatpush.bf16.msra.mxu1 %v7560_v48  ;;  %v8319_v2 = vld [vmem:[#allocation9 + $0xac] sm:$0xf]  ;;  %v7549_v3 = vld [vmem:[#allocation9 + $0xb8] sm:$0xf0]  ;;  %v7523_v5 = vld [vmem:[#allocation9 + $0x80] sm:$0xf] }
 0x869   :  { %v3913_v10 = vmul.f32 %v3891_v8, %v9171_v12  ;;  %v3901_v11 = vmul.f32 %v8606_v59, %v3900_v17  ;;  %v7548_v0 = vor.u32 %v8321_v60, %v7547_v44  ;;  %v7552_v4 = vor.u32 %v8319_v2, %v7549_v3  ;;  %v8316_v6 = vld [vmem:[#allocation9 + $0x8c] sm:$0xf0]  ;;  %v8314_v17 = vld [vmem:[#allocation9 + $0x84] sm:$0xf]  ;;  %v7491_v43 = vld [vmem:[#allocation9 + $0x40] sm:$0xf] }
 0x86a   :  { %4462 = vmatpush.bf16.msra.mxu2 %v7564_v50  ;;  %v7524_v8 = vor.u32 %v8316_v6, %v7523_v5  ;;  %v8308_v45 = vld [vmem:[#allocation9 + $0x4c] sm:$0xf0]  ;;  %v8306_v46 = vld [vmem:[#allocation9 + $0x44] sm:$0xf]  ;;  %v7493_v48 = vld [vmem:[#allocation9 + $0x50] sm:$0xf0] }
 0x86b   :  { %v9179_v13 = vadd.f32 %v3914_v9, %v3913_v10  ;;  %v3902_v14 = vadd.f32 %v8606_v59, %v3901_v11  ;;  %4476 = vmatpush.bf16.msra.mxu3 %v7552_v4  ;;  %v7525_v9 = vld [vmem:[#allocation9 + $0x90] sm:$0xf0]  ;;  %v7531_v10 = vld [vmem:[#allocation9 + $0x88] sm:$0xf]  ;;  %v8317_v11 = vld [vmem:[#allocation9 + $0x94] sm:$0xf0]  ;;  %v7492_v61 = vor.u32 %v8308_v45, %v7491_v43  ;;  %v7496_v55 = vor.u32 %v8306_v46, %v7493_v48 }
 0x86c   :  { %4437 = vmatpush.bf16.msra.mxu0 %v7540_v57  ;;  %v7532_v16 = vor.u32 %v8317_v11, %v7531_v10  ;;  %v7499_v50 = vld [vmem:[#allocation9 + $0x48] sm:$0xf]  ;;  %v8307_v57 = vld [vmem:[#allocation9 + $0x4c] sm:$0xf]  ;;  %v7475_v44 = vld [vmem:[#allocation9 + $0x20] sm:$0xf] }
 0x86d   :  { %8609 = vtanh.f32 %v9179_v13  ;;  %v3906_v19 = vsel %vm3905_vm14, %v8606_v59, %v3902_v14  ;;  %v7541_v59 = vld [vmem:[#allocation9 + $0xb0] sm:$0xf0]  ;;  %v7528_v14 = vor.u32 %v8314_v17, %v7525_v9  ;;  %v8304_v60 = vld [vmem:[#allocation9 + $0x2c] sm:$0xf0]  ;;  %v8302_v2 = vld [vmem:[#allocation9 + $0x24] sm:$0xf] }
 0x86e   :  { %v3911_v15 = vsel %vm3908_vm15, %v3910_v20, %v3906_v19  ;;  %v7544_v63 = vor.u32 %v8318_v56, %v7541_v59  ;;  %4463 = vmatpush.bf16.msra.mxu2 %v7548_v0  ;;  %v7533_v19 = vld [vmem:[#allocation9 + $0x98] sm:$0xf0]  ;;  %v3920_v20 = vld [vmem:[#allocation3 + $0x180] sm:$0xff]  ;;  %v7500_v56 = vor.u32 %v8309_v51, %v7499_v50  ;;  %v7476_v0 = vor.u32 %v8304_v60, %v7475_v44  ;;  %v7483_v4 = vld [vmem:[#allocation9 + $0x28] sm:$0xf] }
 0x86f   :  { %v7501_v59 = vld [vmem:[#allocation9 + $0x58] sm:$0xf0]  ;;  %v7477_v3 = vld [vmem:[#allocation9 + $0x30] sm:$0xf0]  ;;  %v8305_v6 = vld [vmem:[#allocation9 + $0x34] sm:$0xf0] }
 0x870   :  { %4450 = vmatpush.bf16.msra.mxu1 %v7544_v63  ;;  %4438 = vmatpush.bf16.msra.mxu0 %v7524_v8  ;;  %v7504_v63 = vor.u32 %v8307_v57, %v7501_v59  ;;  %v7480_v5 = vor.u32 %v8302_v2, %v7477_v3  ;;  %v8303_v17 = vld [vmem:[#allocation9 + $0x2c] sm:$0xf]  ;;  %v7485_v8 = vld [vmem:[#allocation9 + $0x38] sm:$0xf0]  ;;  %v7484_v11 = vor.u32 %v8305_v6, %v7483_v4  ;;  %v3922_v43 = vld [vmem:[#allocation3 + $0x190] sm:$0xff] }
 0x871   :  { %v8299_v34 = vld [vmem:[#allocation9 + $0xc] sm:$0xf] }
 0x872   :  { %4464 = vmatpush.bf16.msra.mxu2 %v7532_v16  ;;  %v7459_v16 = vld [vmem:[#allocation9] sm:$0xf] }
 0x873   :  { %v8610_v21 = vpop.eup %8609 }
 0x874   :  { %v9182_v24 = vmul.f32 %v8610_v21, %v3911_v15  ;;  %v3921_v21 = vld [vmem:[#allocation3 + $0x188] sm:$0xff]  ;;  %v7536_v15 = vor.u32 %v8315_v18, %v7533_v19  ;;  %4451 = vmatpush.bf16.msra.mxu1 %v7528_v14  ;;  %v7488_v14 = vor.u32 %v8303_v17, %v7485_v8  ;;  %v8300_v18 = vld [vmem:[#allocation9 + $0xc] sm:$0xf0]  ;;  %v8298_v19 = vld [vmem:[#allocation9 + $0x4] sm:$0xf] }
 0x876   :  { %v3924_v12 = vpack.c.bf16 %v9182_v24, %v9182_v24  ;;  %4477 = vmatpush.bf16.msra.mxu3 %v7536_v15  ;;  %4465 = vmatpush.bf16.msra.mxu2 %v7516_v58 }
 0x878   :  { %4125 = vmatmul.bf16.vlgmr.msrb.gmra.mxu0 %v3924_v12  ;;  %4138 = vmatmul.bf16.vlgmr.msrb.gmra.mxu1 %v3924_v12 }
 0x879   :  { %4151 = vmatmul.bf16.vlgmr.msrb.gmra.mxu2 %v3924_v12  ;;  %4164 = vmatmul.bf16.vlgmr.msrb.gmra.mxu3 %v3924_v12  ;;  %v7507_v12 = vld [vmem:[#allocation9 + $0x60] sm:$0xf] }
 0x87a   :  { %v7508_v30 = vor.u32 %v8312_v22, %v7507_v12  ;;  %4452 = vmatpush.bf16.msra.mxu1 %v7512_v35  ;;  %4478 = vmatpush.bf16.msra.mxu3 %v7520_v41  ;;  %v7460_v12 = vor.u32 %v8300_v18, %v7459_v16  ;;  %v7461_v22 = vld [vmem:[#allocation9 + $0x10] sm:$0xf0]  ;;  %v7469_v35 = vld [vmem:[#allocation9 + $0x18] sm:$0xf0] }
 0x87b   :  { %4466 = vmatpush.bf16.msra.mxu2 %v7500_v56  ;;  %v7464_v31 = vor.u32 %v8298_v19, %v7461_v22  ;;  %v7472_v37 = vor.u32 %v8299_v34, %v7469_v35  ;;  %v8360_v34 = vld [vmem:[#allocation9 + $0xec] sm:$0xf0]  ;;  %v8358_v35 = vld [vmem:[#allocation9 + $0xe4] sm:$0xf] }
 0x87c   :  { %4439 = vmatpush.bf16.msra.mxu0 %v7508_v30  ;;  %v8301_v30 = vld [vmem:[#allocation9 + $0x14] sm:$0xf0] }
 0x87d   :  { %v7468_v32 = vor.u32 %v8301_v30, %v7467_v28 }
 0x87e   :  { %4453 = vmatpush.bf16.msra.mxu1 %v7496_v55  ;;  %4479 = vmatpush.bf16.msra.mxu3 %v7504_v63 }
 0x87f   :  { %4467 = vmatpush.bf16.msra.mxu2 %v7484_v11 }
 0x880   :  { %4440 = vmatpush.bf16.msra.mxu0 %v7492_v61 }
 0x882   :  { %4454 = vmatpush.bf16.msra.mxu1 %v7480_v5  ;;  %4480 = vmatpush.bf16.msra.mxu3 %v7488_v14 }
 0x883   :  { %4468 = vmatpush.bf16.msra.mxu2 %v7468_v32  ;;  %v7702_v32 = vld [vmem:[#allocation9 + $0xe0] sm:$0xf] }
 0x884   :  { %4441 = vmatpush.bf16.msra.mxu0 %v7476_v0 }
 0x886   :  { %4455 = vmatpush.bf16.msra.mxu1 %v7464_v31  ;;  %4481 = vmatpush.bf16.msra.mxu3 %v7472_v37  ;;  %v7710_v37 = vld [vmem:[#allocation9 + $0xe8] sm:$0xf] }
 0x888   :  { %4442 = vmatpush.bf16.msra.mxu0 %v7460_v12 }
 0x8f5   :  { %v4126_v38 = vpop.f32.mrf.mxu0  ;;  %v4139_v39 = vpop.f32.mrf.mxu1 }
 0x8f6   :  { %v4169_v25 = vadd.f32 %v4126_v38, %v3920_v20  ;;  %v4170_v42 = vadd.f32 %v4139_v39, %v3921_v21 }
 0x8f8   :  { %v7454_v52 = vmul.f32 -1.442695, %v4169_v25  ;;  %v7455_v53 = vmul.f32 -1.442695, %v4170_v42 }
 0x8fa   :  { %8611 = vpow2.f32 %v7454_v52 }
 0x8fb   :  { %8613 = vpow2.f32 %v7455_v53 }
 0x8fc   :  { %v4152_v9 = vpop.f32.mrf.mxu2  ;;  %v4165_v10 = vpop.f32.mrf.mxu3 }
 0x8fd   :  { %v4172_v20 = vadd.f32 %v4165_v10, %v3923_v62  ;;  %v4128_v21 = vpop.f32.mrf.mxu0  ;;  %v4141_v15 = vpop.f32.mrf.mxu1  ;;  %v4171_v48 = vadd.f32 %v4152_v9, %v3922_v43 }
 0x8ff   :  { %v7456_v58 = vmul.f32 -1.442695, %v4172_v20 }
 0x900   :  { %v8612_v36 = vpop.eup %8611 }
 0x901   :  { %v8614_v38 = vpop.eup %8613  ;;  %v4176_v39 = vadd.f32 1.0, %v8612_v36  ;;  %8615 = vpow2.f32 %v7456_v58  ;;  %v7703_v58 = vor.u32 %v8360_v34, %v7702_v32  ;;  %v7704_v36 = vld [vmem:[#allocation9 + $0xf0] sm:$0xf0]  ;;  %v7638_v32 = vld [vmem:[#allocation9 + $0x60] sm:$0xf] }
 0x902   :  { %v4195_v41 = vadd.f32 1.0, %v8614_v38  ;;  %v8361_v38 = vld [vmem:[#allocation9 + $0xf4] sm:$0xf0]  ;;  %v8344_v34 = vld [vmem:[#allocation9 + $0x6c] sm:$0xf0] }
 0x903   :  { %8617 = vrcp.f32 %v4176_v39  ;;  %v4188_v55 = vand.u32 2147483648, %v4176_v39  ;;  %v4186_v59 = vand.u32 2147483647, %v4176_v39  ;;  %vm4182_vm2 = vweird.f32 %v4176_v39  ;;  %4753 = vmatpush.bf16.msrb.mxu0 %v7703_v58 }
 0x904   :  { %8619 = vrcp.f32 %v4195_v41  ;;  %v4154_v25 = vpop.f32.mrf.mxu2  ;;  %v4167_v42 = vpop.f32.mrf.mxu3  ;;  %v4207_v56 = vand.u32 2147483648, %v4195_v41  ;;  %v4205_v60 = vand.u32 2147483647, %v4195_v41  ;;  %vm4201_vm3 = vweird.f32 %v4195_v41 }
 0x905   :  { %v4189_v2 = vor.u32 1.1754944e-38, %v4188_v55  ;;  %vm4187_vm6 = vcmp.eq.f32.partialorder %v4186_v59, 8.507059e+37  ;;  %v8359_v25 = vld [vmem:[#allocation9 + $0xec] sm:$0xf]  ;;  %v7712_v42 = vld [vmem:[#allocation9 + $0xf8] sm:$0xf0]  ;;  %v7639_v58 = vor.u32 %v8344_v34, %v7638_v32 }
 0x906   :  { %v4208_v5 = vor.u32 1.1754944e-38, %v4207_v56  ;;  %vm4206_vm7 = vcmp.eq.f32.partialorder %v4205_v60, 8.507059e+37  ;;  %v7715_v43 = vor.u32 %v8359_v25, %v7712_v42  ;;  %v8355_v55 = vld [vmem:[#allocation9 + $0xcc] sm:$0xf]  ;;  %v7696_v56 = vld [vmem:[#allocation9 + $0xd8] sm:$0xf0] }
 0x907   :  { %v8616_v45 = vpop.eup %8615  ;;  %v7670_v59 = vld [vmem:[#allocation9 + $0xa0] sm:$0xf]  ;;  %v8350_v60 = vld [vmem:[#allocation9 + $0xa4] sm:$0xf]  ;;  %v8343_v25 = vld [vmem:[#allocation9 + $0x6c] sm:$0xf] }
 0x908   :  { %v4215_v46 = vadd.f32 1.0, %v8616_v45  ;;  %v7686_v45 = vld [vmem:[#allocation9 + $0xc0] sm:$0xf]  ;;  %4792 = vmatpush.bf16.msrb.mxu3 %v7715_v43  ;;  %v7648_v42 = vld [vmem:[#allocation9 + $0x78] sm:$0xf0] }
 0x909   :  { %v8618_v61 = vpop.eup %8617 }
 0x90a   :  { %v8620_v50 = vpop.eup %8619  ;;  %v4178_v51 = vmul.f32 %v8618_v61, %v4176_v39  ;;  %8621 = vrcp.f32 %v4215_v46  ;;  %vm4183_vm0 = vweird.f32 %v8618_v61  ;;  %v4227_v21 = vand.u32 2147483648, %v4215_v46 }
 0x90b   :  { %v4197_v52 = vmul.f32 %v8620_v50, %v4195_v41  ;;  %8623 = vtanh.f32 %v4171_v48  ;;  %vm4202_vm1 = vweird.f32 %v8620_v50  ;;  %vm4184_vm4 = vmor %vm4182_vm2, %vm4183_vm0  ;;  %vm4221_vm9 = vweird.f32 %v4215_v46 }
 0x90c   :  { %v4179_v53 = vsub.f32 1.0, %v4178_v51  ;;  %vm4203_vm5 = vmor %vm4201_vm3, %vm4202_vm1  ;;  %v4225_v15 = vand.u32 2147483647, %v4215_v46  ;;  %v4228_v22 = vor.u32 1.1754944e-38, %v4227_v21  ;;  %v7707_v39 = vor.u32 %v8358_v35, %v7704_v36  ;;  %v7694_v51 = vld [vmem:[#allocation9 + $0xc8] sm:$0xf] }
 0x90d   :  { %v4198_v62 = vsub.f32 1.0, %v4197_v52  ;;  %v7711_v41 = vor.u32 %v8361_v38, %v7710_v37  ;;  %v8357_v52 = vld [vmem:[#allocation9 + $0xd4] sm:$0xf0]  ;;  %v8342_v35 = vld [vmem:[#allocation9 + $0x64] sm:$0xf] }
 0x90e   :  { %v4180_v57 = vmul.f32 %v8618_v61, %v4179_v53  ;;  %vm4226_vm11 = vcmp.eq.f32.partialorder %v4225_v15, 8.507059e+37  ;;  %4766 = vmatpush.bf16.msrb.mxu1 %v7707_v39  ;;  %v7640_v36 = vld [vmem:[#allocation9 + $0x70] sm:$0xf0]  ;;  %v7646_v37 = vld [vmem:[#allocation9 + $0x68] sm:$0xf] }
 0x90f   :  { %v4199_v44 = vmul.f32 %v8620_v50, %v4198_v62  ;;  %4779 = vmatpush.bf16.msrb.mxu2 %v7711_v41  ;;  %v7695_v62 = vor.u32 %v8357_v52, %v7694_v51  ;;  %v8345_v38 = vld [vmem:[#allocation9 + $0x74] sm:$0xf0]  ;;  %v7643_v39 = vor.u32 %v8342_v35, %v7640_v36  ;;  %v8340_v51 = vld [vmem:[#allocation9 + $0x4c] sm:$0xf0]  ;;  %v8338_v52 = vld [vmem:[#allocation9 + $0x44] sm:$0xf] }
 0x910   :  { %v8622_v63 = vpop.eup %8621  ;;  %v4181_v0 = vadd.f32 %v8618_v61, %v4180_v57  ;;  %v7699_v57 = vor.u32 %v8355_v55, %v7696_v56  ;;  %v7647_v41 = vor.u32 %v8345_v38, %v7646_v37  ;;  %v7630_v55 = vld [vmem:[#allocation9 + $0x48] sm:$0xf]  ;;  %v8341_v56 = vld [vmem:[#allocation9 + $0x54] sm:$0xf0]  ;;  %v7592_v35 = vld [vmem:[#allocation9 + $0x10] sm:$0xf0] }
 0x911   :  { %v4200_v3 = vadd.f32 %v8620_v50, %v4199_v44  ;;  %v4217_v4 = vmul.f32 %v8622_v63, %v4215_v46  ;;  %v8624_v17 = vpop.eup %8623  ;;  %vm4222_vm8 = vweird.f32 %v8622_v63  ;;  %v8356_v46 = vld [vmem:[#allocation9 + $0xcc] sm:$0xf0]  ;;  %v8333_v36 = vld [vmem:[#allocation9 + $0x14] sm:$0xf0] }
 0x912   :  { %v4185_v6 = vsel %vm4184_vm4, %v8618_v61, %v4181_v0  ;;  %vm4223_vm10 = vmor %vm4221_vm9, %vm4222_vm8  ;;  %v8354_v61 = vld [vmem:[#allocation9 + $0xc4] sm:$0xf]  ;;  %v7687_v48 = vor.u32 %v8356_v46, %v7686_v45  ;;  %v8352_v44 = vld [vmem:[#allocation9 + $0xac] sm:$0xf0]  ;;  %4793 = vmatpush.bf16.msrb.mxu3 %v7699_v57  ;;  %v7651_v46 = vor.u32 %v8343_v25, %v7648_v42 }
 0x913   :  { %v4190_v8 = vsel %vm4187_vm6, %v4189_v2, %v4185_v6  ;;  %v4204_v9 = vsel %vm4203_vm5, %v8620_v50, %v4200_v3  ;;  %v4218_v10 = vsub.f32 1.0, %v4217_v4  ;;  %v7688_v50 = vld [vmem:[#allocation9 + $0xd0] sm:$0xf0]  ;;  %4780 = vmatpush.bf16.msrb.mxu2 %v7695_v62  ;;  %v7678_v2 = vld [vmem:[#allocation9 + $0xa8] sm:$0xf] }
 0x914   :  { %v4209_v11 = vsel %vm4206_vm7, %v4208_v5, %v4204_v9  ;;  %v4232_v14 = vmul.f32 %v8624_v17, %v4190_v8  ;;  %v7691_v53 = vor.u32 %v8354_v61, %v7688_v50  ;;  %4754 = vmatpush.bf16.msrb.mxu0 %v7687_v48  ;;  %v7672_v0 = vld [vmem:[#allocation9 + $0xb0] sm:$0xf0]  ;;  %v8353_v3 = vld [vmem:[#allocation9 + $0xb4] sm:$0xf0]  ;;  %v8351_v6 = vld [vmem:[#allocation9 + $0xac] sm:$0xf] }
 0x915   :  { %v4231_v16 = vmul.f32 %v4209_v11, %v9179_v13  ;;  %v4219_v18 = vmul.f32 %v8622_v63, %v4218_v10  ;;  %v7675_v4 = vor.u32 %v8350_v60, %v7672_v0  ;;  %v7679_v5 = vor.u32 %v8353_v3, %v7678_v2  ;;  %v7680_v17 = vld [vmem:[#allocation9 + $0xb8] sm:$0xf0]  ;;  %v7654_v9 = vld [vmem:[#allocation9 + $0x80] sm:$0xf]  ;;  %v8348_v10 = vld [vmem:[#allocation9 + $0x8c] sm:$0xf0] }
 0x916   :  { %4767 = vmatpush.bf16.msrb.mxu1 %v7691_v53  ;;  %v7683_v8 = vor.u32 %v8351_v6, %v7680_v17  ;;  %v8346_v11 = vld [vmem:[#allocation9 + $0x84] sm:$0xf]  ;;  %v7622_v50 = vld [vmem:[#allocation9 + $0x40] sm:$0xf]  ;;  %v7624_v62 = vld [vmem:[#allocation9 + $0x50] sm:$0xf0] }
 0x917   :  { %v9187_v19 = vadd.f32 %v4232_v14, %v4231_v16  ;;  %v4220_v20 = vadd.f32 %v8622_v63, %v4219_v18  ;;  %4781 = vmatpush.bf16.msrb.mxu2 %v7679_v5  ;;  %v7655_v14 = vor.u32 %v8348_v10, %v7654_v9  ;;  %v7656_v16 = vld [vmem:[#allocation9 + $0x90] sm:$0xf0]  ;;  %v7662_v18 = vld [vmem:[#allocation9 + $0x88] sm:$0xf]  ;;  %v7623_v53 = vor.u32 %v8340_v51, %v7622_v50  ;;  %v8339_v0 = vld [vmem:[#allocation9 + $0x4c] sm:$0xf] }
 0x918   :  { %4794 = vmatpush.bf16.msrb.mxu3 %v7683_v8  ;;  %v7659_v21 = vor.u32 %v8346_v11, %v7656_v16  ;;  %v7627_v60 = vor.u32 %v8338_v52, %v7624_v62  ;;  %v7632_v2 = vld [vmem:[#allocation9 + $0x58] sm:$0xf0]  ;;  %v7606_v3 = vld [vmem:[#allocation9 + $0x20] sm:$0xf]  ;;  %v8334_v17 = vld [vmem:[#allocation9 + $0x24] sm:$0xf] }
 0x919   :  { %8625 = vtanh.f32 %v9187_v19  ;;  %v4224_v12 = vsel %vm4223_vm10, %v8622_v63, %v4220_v20  ;;  %v7671_v63 = vor.u32 %v8352_v44, %v7670_v59  ;;  %v8349_v20 = vld [vmem:[#allocation9 + $0x94] sm:$0xf0]  ;;  %v4241_v44 = vld [vmem:[#allocation3 + $0x1b8] sm:$0xff]  ;;  %v7635_v5 = vor.u32 %v8339_v0, %v7632_v2  ;;  %v7608_v8 = vld [vmem:[#allocation9 + $0x30] sm:$0xf0] }
 0x91a   :  { %v4229_v30 = vsel %vm4226_vm11, %v4228_v22, %v4224_v12  ;;  %4768 = vmatpush.bf16.msrb.mxu1 %v7675_v4  ;;  %v7663_v15 = vor.u32 %v8349_v20, %v7662_v18  ;;  %v8347_v12 = vld [vmem:[#allocation9 + $0x8c] sm:$0xf]  ;;  %v7664_v22 = vld [vmem:[#allocation9 + $0x98] sm:$0xf0]  ;;  %v8336_v4 = vld [vmem:[#allocation9 + $0x2c] sm:$0xf0]  ;;  %v7611_v10 = vor.u32 %v8334_v17, %v7608_v8 }
 0x91b   :  { %4755 = vmatpush.bf16.msrb.mxu0 %v7671_v63  ;;  %v7631_v63 = vor.u32 %v8341_v56, %v7630_v55  ;;  %v7607_v6 = vor.u32 %v8336_v4, %v7606_v3  ;;  %v7614_v9 = vld [vmem:[#allocation9 + $0x28] sm:$0xf]  ;;  %v8337_v11 = vld [vmem:[#allocation9 + $0x34] sm:$0xf0]  ;;  %v7616_v16 = vld [vmem:[#allocation9 + $0x38] sm:$0xf0] }
 0x91c   :  { %4782 = vmatpush.bf16.msrb.mxu2 %v7663_v15  ;;  %v4240_v51 = vld [vmem:[#allocation3 + $0x1b0] sm:$0xff] }
 0x91e   :  { %4769 = vmatpush.bf16.msrb.mxu1 %v7659_v21  ;;  %v7615_v21 = vor.u32 %v8337_v11, %v7614_v9 }
 0x91f   :  { %v8626_v28 = vpop.eup %8625  ;;  %4756 = vmatpush.bf16.msrb.mxu0 %v7655_v14  ;;  %v8335_v14 = vld [vmem:[#allocation9 + $0x2c] sm:$0xf] }
 0x920   :  { %v9190_v31 = vmul.f32 %v8626_v28, %v4229_v30  ;;  %v4238_v28 = vld [vmem:[#allocation3 + $0x1a0] sm:$0xff]  ;;  %v4239_v30 = vld [vmem:[#allocation3 + $0x1a8] sm:$0xff]  ;;  %4783 = vmatpush.bf16.msrb.mxu2 %v7647_v41  ;;  %v7619_v15 = vor.u32 %v8335_v14, %v7616_v16 }
 0x921   :  { %v7600_v41 = vld [vmem:[#allocation9 + $0x18] sm:$0xf0] }
 0x922   :  { %v4242_v13 = vpack.c.bf16 %v9190_v31, %v9190_v31  ;;  %4770 = vmatpush.bf16.msrb.mxu1 %v7643_v39  ;;  %v8331_v39 = vld [vmem:[#allocation9 + $0xc] sm:$0xf] }
 0x923   :  { %4757 = vmatpush.bf16.msrb.mxu0 %v7639_v58  ;;  %v7598_v58 = vld [vmem:[#allocation9 + $0x8] sm:$0xf] }
 0x924   :  { %4443 = vmatmul.bf16.vlgmr.msra.gmra.mxu0 %v4242_v13  ;;  %4456 = vmatmul.bf16.vlgmr.msra.gmra.mxu1 %v4242_v13  ;;  %v7599_v38 = vor.u32 %v8333_v36, %v7598_v58 }
 0x925   :  { %4469 = vmatmul.bf16.vlgmr.msra.gmra.mxu2 %v4242_v13  ;;  %4482 = vmatmul.bf16.vlgmr.msra.gmra.mxu3 %v4242_v13  ;;  %v7667_v13 = vor.u32 %v8347_v12, %v7664_v22  ;;  %v7590_v12 = vld [vmem:[#allocation9] sm:$0xf]  ;;  %v8332_v22 = vld [vmem:[#allocation9 + $0xc] sm:$0xf0] }
 0x926   :  { %4771 = vmatpush.bf16.msrb.mxu1 %v7627_v60  ;;  %4784 = vmatpush.bf16.msrb.mxu2 %v7631_v63  ;;  %v7591_v34 = vor.u32 %v8332_v22, %v7590_v12 }
 0x927   :  { %4795 = vmatpush.bf16.msrb.mxu3 %v7667_v13  ;;  %4758 = vmatpush.bf16.msrb.mxu0 %v7623_v53 }
 0x92a   :  { %4772 = vmatpush.bf16.msrb.mxu1 %v7611_v10  ;;  %4785 = vmatpush.bf16.msrb.mxu2 %v7615_v21 }
 0x92b   :  { %4796 = vmatpush.bf16.msrb.mxu3 %v7651_v46  ;;  %4759 = vmatpush.bf16.msrb.mxu0 %v7607_v6 }
 0x92e   :  { %4786 = vmatpush.bf16.msrb.mxu2 %v7599_v38 }
 0x92f   :  { %4797 = vmatpush.bf16.msrb.mxu3 %v7635_v5  ;;  %4760 = vmatpush.bf16.msrb.mxu0 %v7591_v34 }
 0x933   :  { %4798 = vmatpush.bf16.msrb.mxu3 %v7619_v15 }
 0x9a1   :  { %v4444_v43 = vpop.f32.mrf.mxu0  ;;  %v4457_v45 = vpop.f32.mrf.mxu1 }
 0x9a2   :  { %v4487_v61 = vadd.f32 %v4444_v43, %v4238_v28  ;;  %v4488_v48 = vadd.f32 %v4457_v45, %v4239_v30  ;;  %v8330_v28 = vld [vmem:[#allocation9 + $0x4] sm:$0xf]  ;;  %v7603_v43 = vor.u32 %v8331_v39, %v7600_v41  ;;  %v7833_v39 = vld [vmem:[#allocation9 + $0xe0] sm:$0xf]  ;;  %v8392_v41 = vld [vmem:[#allocation9 + $0xec] sm:$0xf0] }
 0x9a3   :  { %v7595_v37 = vor.u32 %v8330_v28, %v7592_v35 }
 0x9a4   :  { %v7585_v57 = vmul.f32 -1.442695, %v4487_v61  ;;  %v7586_v59 = vmul.f32 -1.442695, %v4488_v48  ;;  %4799 = vmatpush.bf16.msrb.mxu3 %v7603_v43  ;;  %v8388_v43 = vld [vmem:[#allocation9 + $0xcc] sm:$0xf0] }
 0x9a5   :  { %4773 = vmatpush.bf16.msrb.mxu1 %v7595_v37 }
 0x9a6   :  { %8627 = vpow2.f32 %v7585_v57 }
 0x9a7   :  { %8629 = vpow2.f32 %v7586_v59 }
 0x9a8   :  { %v4470_v18 = vpop.f32.mrf.mxu2  ;;  %v4483_v20 = vpop.f32.mrf.mxu3 }
 0x9a9   :  { %v4490_v30 = vadd.f32 %v4483_v20, %v4241_v44  ;;  %v4446_v13 = vpop.f32.mrf.mxu0  ;;  %v4459_v32 = vpop.f32.mrf.mxu1  ;;  %v4489_v55 = vadd.f32 %v4470_v18, %v4240_v51  ;;  %v8380_v51 = vld [vmem:[#allocation9 + $0x8c] sm:$0xf0] }
 0x9ab   :  { %v7587_v25 = vmul.f32 -1.442695, %v4490_v30 }
 0x9ac   :  { %v8628_v42 = vpop.eup %8627 }
 0x9ad   :  { %v8630_v45 = vpop.eup %8629  ;;  %v4494_v46 = vadd.f32 1.0, %v8628_v42  ;;  %8631 = vpow2.f32 %v7587_v25  ;;  %v7834_v25 = vor.u32 %v8392_v41, %v7833_v39  ;;  %v7817_v42 = vld [vmem:[#allocation9 + $0xc0] sm:$0xf]  ;;  %v7787_v39 = vld [vmem:[#allocation9 + $0x90] sm:$0xf0] }
 0x9ae   :  { %v4513_v61 = vadd.f32 1.0, %v8630_v45  ;;  %v7818_v45 = vor.u32 %v8388_v43, %v7817_v42  ;;  %v7793_v41 = vld [vmem:[#allocation9 + $0x88] sm:$0xf]  ;;  %v8381_v42 = vld [vmem:[#allocation9 + $0x94] sm:$0xf0] }
 0x9af   :  { %8633 = vrcp.f32 %v4494_v46  ;;  %v4506_v63 = vand.u32 2147483648, %v4494_v46  ;;  %v4504_v3 = vand.u32 2147483647, %v4494_v46  ;;  %vm4500_vm14 = vweird.f32 %v4494_v46  ;;  %5071 = vmatpush.bf16.msra.mxu0 %v7834_v25  ;;  %v8379_v43 = vld [vmem:[#allocation9 + $0x8c] sm:$0xf] }
 0x9b0   :  { %8635 = vrcp.f32 %v4513_v61  ;;  %v4472_v48 = vpop.f32.mrf.mxu2  ;;  %v4485_v50 = vpop.f32.mrf.mxu3  ;;  %v4525_v0 = vand.u32 2147483648, %v4513_v61  ;;  %v4523_v5 = vand.u32 2147483647, %v4513_v61  ;;  %vm4519_vm15 = vweird.f32 %v4513_v61 }
 0x9b1   :  { %v4507_v8 = vor.u32 1.1754944e-38, %v4506_v63  ;;  %vm4505_vm2 = vcmp.eq.f32.partialorder %v4504_v3, 8.507059e+37  ;;  %v7785_v50 = vld [vmem:[#allocation9 + $0x80] sm:$0xf] }
 0x9b2   :  { %v4526_v11 = vor.u32 1.1754944e-38, %v4525_v0  ;;  %vm4524_vm3 = vcmp.eq.f32.partialorder %v4523_v5, 8.507059e+37  ;;  %v7769_v0 = vld [vmem:[#allocation9 + $0x60] sm:$0xf]  ;;  %v7819_v5 = vld [vmem:[#allocation9 + $0xd0] sm:$0xf0] }
 0x9b3   :  { %v8632_v52 = vpop.eup %8631  ;;  %5072 = vmatpush.bf16.msra.mxu0 %v7818_v45  ;;  %v7795_v45 = vld [vmem:[#allocation9 + $0x98] sm:$0xf0] }
 0x9b4   :  { %v4533_v53 = vadd.f32 1.0, %v8632_v52  ;;  %v7786_v52 = vor.u32 %v8380_v51, %v7785_v50  ;;  %v4557_v50 = vld [vmem:[#allocation3 + $0x1c8] sm:$0xff]  ;;  %v7721_v51 = vld [vmem:[#allocation9] sm:$0xf] }
 0x9b5   :  { %v8634_v62 = vpop.eup %8633 }
 0x9b6   :  { %v8636_v56 = vpop.eup %8635  ;;  %v4496_v57 = vmul.f32 %v8634_v62, %v4494_v46  ;;  %8637 = vrcp.f32 %v4533_v53  ;;  %vm4501_vm12 = vweird.f32 %v8634_v62  ;;  %v4545_v32 = vand.u32 2147483648, %v4533_v53  ;;  %v7801_v46 = vld [vmem:[#allocation9 + $0xa0] sm:$0xf] }
 0x9b7   :  { %v4515_v59 = vmul.f32 %v8636_v56, %v4513_v61  ;;  %8639 = vtanh.f32 %v4489_v55  ;;  %vm4520_vm13 = vweird.f32 %v8636_v56  ;;  %vm4502_vm0 = vmor %vm4500_vm14, %vm4501_vm12  ;;  %vm4539_vm5 = vweird.f32 %v4533_v53  ;;  %v8384_v61 = vld [vmem:[#allocation9 + $0xac] sm:$0xf0]  ;;  %v7841_v55 = vld [vmem:[#allocation9 + $0xe8] sm:$0xf] }
 0x9b8   :  { %v4497_v44 = vsub.f32 1.0, %v4496_v57  ;;  %vm4521_vm1 = vmor %vm4519_vm15, %vm4520_vm13  ;;  %v4543_v34 = vand.u32 2147483647, %v4533_v53  ;;  %v4546_v58 = vor.u32 1.1754944e-38, %v4545_v32  ;;  %v7802_v48 = vor.u32 %v8384_v61, %v7801_v46  ;;  %v8393_v57 = vld [vmem:[#allocation9 + $0xf4] sm:$0xf0] }
 0x9b9   :  { %v4516_v60 = vsub.f32 1.0, %v4515_v59  ;;  %v8391_v59 = vld [vmem:[#allocation9 + $0xec] sm:$0xf]  ;;  %v7811_v32 = vld [vmem:[#allocation9 + $0xb8] sm:$0xf0]  ;;  %v4556_v46 = vld [vmem:[#allocation3 + $0x1c0] sm:$0xff]  ;;  %v7794_v61 = vor.u32 %v8381_v42, %v7793_v41 }
 0x9ba   :  { %v4498_v2 = vmul.f32 %v8634_v62, %v4497_v44  ;;  %vm4544_vm7 = vcmp.eq.f32.partialorder %v4543_v34, 8.507059e+37  ;;  %5073 = vmatpush.bf16.msra.mxu0 %v7802_v48  ;;  %v7843_v44 = vld [vmem:[#allocation9 + $0xf8] sm:$0xf0]  ;;  %v7798_v48 = vor.u32 %v8379_v43, %v7795_v45  ;;  %v8362_v42 = vld [vmem:[#allocation9 + $0x4] sm:$0xf] }
 0x9bb   :  { %v4517_v4 = vmul.f32 %v8636_v56, %v4516_v60  ;;  %v7842_v60 = vor.u32 %v8393_v57, %v7841_v55  ;;  %v7846_v63 = vor.u32 %v8391_v59, %v7843_v44  ;;  %v7771_v55 = vld [vmem:[#allocation9 + $0x70] sm:$0xf0]  ;;  %v8377_v59 = vld [vmem:[#allocation9 + $0x74] sm:$0xf0]  ;;  %v8375_v44 = vld [vmem:[#allocation9 + $0x6c] sm:$0xf] }
 0x9bc   :  { %v8638_v6 = vpop.eup %8637  ;;  %v4499_v17 = vadd.f32 %v8634_v62, %v4498_v2  ;;  %v8376_v2 = vld [vmem:[#allocation9 + $0x6c] sm:$0xf0]  ;;  %v7723_v43 = vld [vmem:[#allocation9 + $0x10] sm:$0xf0] }
 0x9bd   :  { %v4518_v9 = vadd.f32 %v8636_v56, %v4517_v4  ;;  %v4535_v10 = vmul.f32 %v8638_v6, %v4533_v53  ;;  %v8640_v16 = vpop.eup %8639  ;;  %vm4540_vm4 = vweird.f32 %v8638_v6  ;;  %v8390_v53 = vld [vmem:[#allocation9 + $0xe4] sm:$0xf]  ;;  %5097 = vmatpush.bf16.msra.mxu2 %v7842_v60  ;;  %5110 = vmatpush.bf16.msra.mxu3 %v7846_v63  ;;  %v7770_v3 = vor.u32 %v8376_v2, %v7769_v0  ;;  %v7779_v60 = vld [vmem:[#allocation9 + $0x78] sm:$0xf0] }
 0x9be   :  { %v4503_v14 = vsel %vm4502_vm0, %v8634_v62, %v4499_v17  ;;  %vm4541_vm6 = vmor %vm4539_vm5, %vm4540_vm4  ;;  %v7835_v62 = vld [vmem:[#allocation9 + $0xf0] sm:$0xf0]  ;;  %5074 = vmatpush.bf16.msra.mxu0 %v7786_v52  ;;  %v8386_v4 = vld [vmem:[#allocation9 + $0xc4] sm:$0xf] }
 0x9bf   :  { %v4508_v18 = vsel %vm4505_vm2, %v4507_v8, %v4503_v14  ;;  %v4522_v20 = vsel %vm4521_vm1, %v8636_v56, %v4518_v9  ;;  %v4536_v21 = vsub.f32 1.0, %v4535_v10  ;;  %v7838_v56 = vor.u32 %v8390_v53, %v7835_v62  ;;  %v8389_v8 = vld [vmem:[#allocation9 + $0xd4] sm:$0xf0]  ;;  %v8387_v9 = vld [vmem:[#allocation9 + $0xcc] sm:$0xf] }
 0x9c0   :  { %v4527_v15 = vsel %vm4524_vm3, %v4526_v11, %v4522_v20  ;;  %v4550_v12 = vmul.f32 %v8640_v16, %v4508_v18  ;;  %v7822_v17 = vor.u32 %v8386_v4, %v7819_v5  ;;  %v7827_v10 = vld [vmem:[#allocation9 + $0xd8] sm:$0xf0]  ;;  %v7753_v16 = vld [vmem:[#allocation9 + $0x40] sm:$0xf]  ;;  %v8372_v18 = vld [vmem:[#allocation9 + $0x4c] sm:$0xf0] }
 0x9c1   :  { %v4549_v22 = vmul.f32 %v4527_v15, %v9187_v19  ;;  %v4537_v28 = vmul.f32 %v8638_v6, %v4536_v21  ;;  %5084 = vmatpush.bf16.msra.mxu1 %v7838_v56  ;;  %v7830_v14 = vor.u32 %v8387_v9, %v7827_v10  ;;  %v7754_v20 = vor.u32 %v8372_v18, %v7753_v16  ;;  %v8382_v21 = vld [vmem:[#allocation9 + $0xa4] sm:$0xf]  ;;  %v7803_v15 = vld [vmem:[#allocation9 + $0xb0] sm:$0xf0]  ;;  %v8364_v52 = vld [vmem:[#allocation9 + $0xc] sm:$0xf0] }
 0x9c2   :  { %5075 = vmatpush.bf16.msra.mxu0 %v7770_v3  ;;  %v7722_v53 = vor.u32 %v8364_v52, %v7721_v51  ;;  %v8374_v62 = vld [vmem:[#allocation9 + $0x64] sm:$0xf]  ;;  %v7777_v56 = vld [vmem:[#allocation9 + $0x68] sm:$0xf]  ;;  %v7782_v3 = vor.u32 %v8375_v44, %v7779_v60  ;;  %v8401_v4 = vld [vmem:[#allocation11 + $0x38] sm:$0xff]  ;;  %v7726_v52 = vor.u32 %v8362_v42, %v7723_v43 }
 0x9c3   :  { %v9195_v30 = vadd.f32 %v4550_v12, %v4549_v22  ;;  %v4538_v13 = vadd.f32 %v8638_v6, %v4537_v28  ;;  %5111 = vmatpush.bf16.msra.mxu3 %v7830_v14  ;;  %v7809_v12 = vld [vmem:[#allocation9 + $0xa8] sm:$0xf]  ;;  %v7806_v22 = vor.u32 %v8382_v21, %v7803_v15  ;;  %v8385_v28 = vld [vmem:[#allocation9 + $0xb4] sm:$0xf0]  ;;  %v7774_v57 = vor.u32 %v8374_v62, %v7771_v55  ;;  %v8371_v21 = vld [vmem:[#allocation9 + $0x4c] sm:$0xf] }
 0x9c4   :  { %v7810_v34 = vor.u32 %v8385_v28, %v7809_v12  ;;  %v7778_v2 = vor.u32 %v8377_v59, %v7777_v56  ;;  %v7761_v9 = vld [vmem:[#allocation9 + $0x48] sm:$0xf]  ;;  %v8373_v18 = vld [vmem:[#allocation9 + $0x54] sm:$0xf0]  ;;  %v7763_v15 = vld [vmem:[#allocation9 + $0x58] sm:$0xf0] }
 0x9c5   :  { %8641 = vtanh.f32 %v9195_v30  ;;  %v4542_v35 = vsel %vm4541_vm6, %v8638_v6, %v4538_v13  ;;  %v7825_v6 = vld [vmem:[#allocation9 + $0xc8] sm:$0xf]  ;;  %5085 = vmatpush.bf16.msra.mxu1 %v7822_v17  ;;  %v8383_v13 = vld [vmem:[#allocation9 + $0xac] sm:$0xf]  ;;  %v8370_v17 = vld [vmem:[#allocation9 + $0x44] sm:$0xf] }
 0x9c6   :  { %v4547_v37 = vsel %vm4544_vm7, %v4546_v58, %v4542_v35  ;;  %v7826_v11 = vor.u32 %v8389_v8, %v7825_v6  ;;  %5076 = vmatpush.bf16.msra.mxu0 %v7754_v20  ;;  %v7814_v35 = vor.u32 %v8383_v13, %v7811_v32  ;;  %v7737_v58 = vld [vmem:[#allocation9 + $0x20] sm:$0xf]  ;;  %v7755_v8 = vld [vmem:[#allocation9 + $0x50] sm:$0xf0]  ;;  %v4559_v14 = vld [vmem:[#allocation3 + $0x1d8] sm:$0xff]  ;;  %v7762_v20 = vor.u32 %v8373_v18, %v7761_v9 }
 0x9c7   :  { %v7758_v16 = vor.u32 %v8370_v17, %v7755_v8  ;;  %v8400_v12 = vld [vmem:[#allocation11 + $0x30] sm:$0xff]  ;;  %v8366_v28 = vld [vmem:[#allocation9 + $0x24] sm:$0xf]  ;;  %v7745_v32 = vld [vmem:[#allocation9 + $0x28] sm:$0xf] }
 0x9c8   :  { %5098 = vmatpush.bf16.msra.mxu2 %v7826_v11  ;;  %5112 = vmatpush.bf16.msra.mxu3 %v7814_v35  ;;  %v7739_v13 = vld [vmem:[#allocation9 + $0x30] sm:$0xf0]  ;;  %v8369_v35 = vld [vmem:[#allocation9 + $0x34] sm:$0xf0]  ;;  %v8363_v51 = vld [vmem:[#allocation9 + $0xc] sm:$0xf] }
 0x9c9   :  { %5086 = vmatpush.bf16.msra.mxu1 %v7806_v22  ;;  %v7766_v22 = vor.u32 %v8371_v21, %v7763_v15  ;;  %v8398_v59 = vld [vmem:[#allocation11 + $0x20] sm:$0xff]  ;;  %v8396_v17 = vld [vmem:[#allocation11 + $0x10] sm:$0xff]  ;;  %v8395_v18 = vld [vmem:[#allocation11 + $0x8] sm:$0xff] }
 0x9cb   :  { %v8642_v36 = vpop.eup %8641 }
 0x9cc   :  { %v9198_v38 = vmul.f32 %v8642_v36, %v4547_v37  ;;  %v8368_v36 = vld [vmem:[#allocation9 + $0x2c] sm:$0xf0]  ;;  %5099 = vmatpush.bf16.msra.mxu2 %v7810_v34  ;;  %5113 = vmatpush.bf16.msra.mxu3 %v7798_v48  ;;  %v7742_v34 = vor.u32 %v8366_v28, %v7739_v13  ;;  %v7729_v48 = vld [vmem:[#allocation9 + $0x8] sm:$0xf] }
 0x9cd   :  { %v7738_v37 = vor.u32 %v8368_v36, %v7737_v58  ;;  %v8367_v58 = vld [vmem:[#allocation9 + $0x2c] sm:$0xf]  ;;  %v7747_v36 = vld [vmem:[#allocation9 + $0x38] sm:$0xf0] }
 0x9ce   :  { %v4560_v19 = vpack.c.bf16 %v9198_v38, %v9198_v38  ;;  %v7750_v41 = vor.u32 %v8367_v58, %v7747_v36 }
 0x9cf   :  { %5077 = vmatpush.bf16.msra.mxu0 %v7738_v37 }
 0x9d0   :  { %4761 = vmatmul.bf16.vlgmr.msrb.gmra.mxu0 %v4560_v19  ;;  %4774 = vmatmul.bf16.vlgmr.msrb.gmra.mxu1 %v4560_v19 }
 0x9d1   :  { %4787 = vmatmul.bf16.vlgmr.msrb.gmra.mxu2 %v4560_v19  ;;  %4800 = vmatmul.bf16.vlgmr.msrb.gmra.mxu3 %v4560_v19  ;;  %v8378_v19 = vld [vmem:[#allocation9 + $0x84] sm:$0xf] }
 0x9d2   :  { %v7790_v25 = vor.u32 %v8378_v19, %v7787_v39  ;;  %5100 = vmatpush.bf16.msra.mxu2 %v7794_v61  ;;  %5114 = vmatpush.bf16.msra.mxu3 %v7782_v3  ;;  %v7746_v39 = vor.u32 %v8369_v35, %v7745_v32  ;;  %v8397_v3 = vld [vmem:[#allocation11 + $0x18] sm:$0xff]  ;;  %v8394_v35 = vld [vmem:[#allocation11] sm:$0xff] }
 0x9d3   :  { %5078 = vmatpush.bf16.msra.mxu0 %v7722_v53  ;;  %v7731_v53 = vld [vmem:[#allocation9 + $0x18] sm:$0xf0] }
 0x9d4   :  { %5087 = vmatpush.bf16.msra.mxu1 %v7790_v25  ;;  %v8399_v25 = vld [vmem:[#allocation11 + $0x28] sm:$0xff] }
 0x9d6   :  { %5101 = vmatpush.bf16.msra.mxu2 %v7778_v2  ;;  %5115 = vmatpush.bf16.msra.mxu3 %v7766_v22 }
 0x9d7   :  { %5285 = vmatpush.bf16.msrb.mxu0 %v8401_v4  ;;  %v4558_v4 = vld [vmem:[#allocation3 + $0x1d0] sm:$0xff] }
 0x9d8   :  { %5088 = vmatpush.bf16.msra.mxu1 %v7774_v57  ;;  %v7734_v57 = vor.u32 %v8363_v51, %v7731_v53 }
 0x9da   :  { %5102 = vmatpush.bf16.msra.mxu2 %v7762_v20  ;;  %5116 = vmatpush.bf16.msra.mxu3 %v7750_v41 }
 0x9db   :  { %5286 = vmatpush.bf16.msrb.mxu0 %v8400_v12 }
 0x9dc   :  { %5089 = vmatpush.bf16.msra.mxu1 %v7758_v16 }
 0x9de   :  { %5103 = vmatpush.bf16.msra.mxu2 %v7746_v39  ;;  %5117 = vmatpush.bf16.msra.mxu3 %v7734_v57 }
 0x9df   :  { %5287 = vmatpush.bf16.msrb.mxu0 %v8399_v25 }
 0x9e0   :  { %5090 = vmatpush.bf16.msra.mxu1 %v7742_v34 }
 0x9e3   :  { %5288 = vmatpush.bf16.msrb.mxu0 %v8398_v59 }
 0x9e4   :  { %5091 = vmatpush.bf16.msra.mxu1 %v7726_v52 }
 0x9e7   :  { %5289 = vmatpush.bf16.msrb.mxu0 %v8397_v3 }
 0x9eb   :  { %5290 = vmatpush.bf16.msrb.mxu0 %v8396_v17 }
 0x9ef   :  { %5291 = vmatpush.bf16.msrb.mxu0 %v8395_v18  ;;  %v4876_v18 = vld [vmem:[#allocation3 + $0x1f0] sm:$0xff] }
 0x9f3   :  { %5292 = vmatpush.bf16.msrb.mxu0 %v8394_v35 }
 0xa4d   :  { %v4762_v63 = vpop.f32.mrf.mxu0  ;;  %v4775_v0 = vpop.f32.mrf.mxu1 }
 0xa4e   :  { %v4805_v5 = vadd.f32 %v4762_v63, %v4556_v46  ;;  %v4806_v6 = vadd.f32 %v4775_v0, %v4557_v50  ;;  %v8365_v50 = vld [vmem:[#allocation9 + $0x14] sm:$0xf0] }
 0xa4f   :  { %v7730_v55 = vor.u32 %v8365_v50, %v7729_v48 }
 0xa50   :  { %v7716_v10 = vmul.f32 -1.442695, %v4805_v5  ;;  %v7717_v11 = vmul.f32 -1.442695, %v4806_v6 }
 0xa51   :  { %5104 = vmatpush.bf16.msra.mxu2 %v7730_v55 }
 0xa52   :  { %8643 = vpow2.f32 %v7716_v10 }
 0xa53   :  { %8645 = vpow2.f32 %v7717_v11 }
 0xa54   :  { %v4788_v37 = vpop.f32.mrf.mxu2  ;;  %v4801_v19 = vpop.f32.mrf.mxu3 }
 0xa55   :  { %v4808_v45 = vadd.f32 %v4801_v19, %v4559_v14  ;;  %v4764_v46 = vpop.f32.mrf.mxu0  ;;  %v4777_v61 = vpop.f32.mrf.mxu1  ;;  %v4807_v9 = vadd.f32 %v4788_v37, %v4558_v4 }
 0xa57   :  { %v7718_v62 = vmul.f32 -1.442695, %v4808_v45 }
 0xa58   :  { %v8644_v56 = vpop.eup %8643 }
 0xa59   :  { %v8646_v44 = vpop.eup %8645  ;;  %v4812_v60 = vadd.f32 1.0, %v8644_v56  ;;  %8647 = vpow2.f32 %v7718_v62 }
 0xa5a   :  { %v4831_v63 = vadd.f32 1.0, %v8646_v44  ;;  %v5209_v44 = vpack.c.bf16 %v9078_v49, %v9050_v1  ;;  %v5214_v1 = vpack.c.bf16 %v9182_v24, %v9174_v23  ;;  %v5215_v49 = vpack.c.bf16 %v9198_v38, %v9190_v31 }
 0xa5b   :  { %8649 = vrcp.f32 %v4812_v60  ;;  %v4824_v21 = vand.u32 2147483648, %v4812_v60  ;;  %v4822_v22 = vand.u32 2147483647, %v4812_v60  ;;  %vm4818_vm10 = vweird.f32 %v4812_v60 }
 0xa5c   :  { %8651 = vrcp.f32 %v4831_v63  ;;  %v4790_v0 = vpop.f32.mrf.mxu2  ;;  %v4803_v2 = vpop.f32.mrf.mxu3  ;;  %v4843_v15 = vand.u32 2147483648, %v4831_v63  ;;  %v4841_v13 = vand.u32 2147483647, %v4831_v63  ;;  %vm4837_vm11 = vweird.f32 %v4831_v63 }
 0xa5d   :  { %v4825_v58 = vor.u32 1.1754944e-38, %v4824_v21  ;;  %vm4823_vm14 = vcmp.eq.f32.partialorder %v4822_v22, 8.507059e+37  ;;  %v5212_v0 = vpack.c.bf16 %v9150_v26, %v9142_v54  ;;  %v5213_v2 = vpack.c.bf16 %v9166_v40, %v9158_v33 }
 0xa5e   :  { %v4844_v19 = vor.u32 1.1754944e-38, %v4843_v15  ;;  %vm4842_vm15 = vcmp.eq.f32.partialorder %v4841_v13, 8.507059e+37 }
 0xa5f   :  { %v8648_v5 = vpop.eup %8647 }
 0xa60   :  { %v4851_v6 = vadd.f32 1.0, %v8648_v5  ;;  %v4877_v5 = vld [vmem:[#allocation3 + $0x1f8] sm:$0xff] }
 0xa61   :  { %v8650_v8 = vpop.eup %8649 }
 0xa62   :  { %v8652_v10 = vpop.eup %8651  ;;  %v4814_v11 = vmul.f32 %v8650_v8, %v4812_v60  ;;  %8653 = vrcp.f32 %v4851_v6  ;;  %vm4819_vm8 = vweird.f32 %v8650_v8  ;;  %v4863_v52 = vand.u32 2147483648, %v4851_v6 }
 0xa63   :  { %v4833_v14 = vmul.f32 %v8652_v10, %v4831_v63  ;;  %8655 = vtanh.f32 %v4807_v9  ;;  %vm4838_vm9 = vweird.f32 %v8652_v10  ;;  %vm4820_vm12 = vmor %vm4818_vm10, %vm4819_vm8  ;;  %vm4857_vm1 = vweird.f32 %v4851_v6 }
 0xa64   :  { %v4815_v16 = vsub.f32 1.0, %v4814_v11  ;;  %vm4839_vm13 = vmor %vm4837_vm11, %vm4838_vm9  ;;  %v4861_v53 = vand.u32 2147483647, %v4851_v6  ;;  %v4864_v55 = vor.u32 1.1754944e-38, %v4863_v52  ;;  %v5210_v60 = vpack.c.bf16 %v9118_v47, %v9110_v29  ;;  %v4874_v29 = vld [vmem:[#allocation3 + $0x1e0] sm:$0xff]  ;;  %v4875_v47 = vld [vmem:[#allocation3 + $0x1e8] sm:$0xff] }
 0xa65   :  { %v4834_v20 = vsub.f32 1.0, %v4833_v14  ;;  %v5211_v63 = vpack.c.bf16 %v9134_v7, %v9126_v27 }
 0xa66   :  { %v4816_v12 = vmul.f32 %v8650_v8, %v4815_v16  ;;  %vm4862_vm3 = vcmp.eq.f32.partialorder %v4861_v53, 8.507059e+37 }
 0xa67   :  { %v4835_v28 = vmul.f32 %v8652_v10, %v4834_v20 }
 0xa68   :  { %v8654_v32 = vpop.eup %8653  ;;  %v4817_v34 = vadd.f32 %v8650_v8, %v4816_v12 }
 0xa69   :  { %v4836_v36 = vadd.f32 %v8652_v10, %v4835_v28  ;;  %v4853_v37 = vmul.f32 %v8654_v32, %v4851_v6  ;;  %v8656_v41 = vpop.eup %8655  ;;  %vm4858_vm0 = vweird.f32 %v8654_v32 }
 0xa6a   :  { %v4821_v39 = vsel %vm4820_vm12, %v8650_v8, %v4817_v34  ;;  %vm4859_vm2 = vmor %vm4857_vm1, %vm4858_vm0 }
 0xa6b   :  { %v4826_v25 = vsel %vm4823_vm14, %v4825_v58, %v4821_v39  ;;  %v4840_v42 = vsel %vm4839_vm13, %v8652_v10, %v4836_v36  ;;  %v4854_v43 = vsub.f32 1.0, %v4853_v37  ;;  %v9227_v10 = vld [vmem:[%s9429_s5] ss:$0 sm:$0xff]  ;;  %s8952_s5 = smov [#allocation13]  }
 0xa6c   :  { %v4845_v45 = vsel %vm4842_vm15, %v4844_v19, %v4840_v42  ;;  %v4868_v46 = vmul.f32 %v8656_v41, %v4826_v25  ;;  %s5720_s11 = sshll.u32 %s8952_s5, 4  ;;  %s5721_s11 = int_to_ptr.vmem [resolvable:$true] %s5720_s11 }
 0xa6d   :  { %v4867_v61 = vmul.f32 %v4845_v45, %v9195_v30  ;;  %v4855_v48 = vmul.f32 %v8654_v32, %v4854_v43 }
 0xa6f   :  { %v9203_v50 = vadd.f32 %v4868_v46, %v4867_v61  ;;  %v4856_v51 = vadd.f32 %v8654_v32, %v4855_v48 }
 0xa71   :  { %8657 = vtanh.f32 %v9203_v50  ;;  %v4860_v62 = vsel %vm4859_vm2, %v8654_v32, %v4856_v51 }
 0xa72   :  { %v4865_v57 = vsel %vm4862_vm3, %v4864_v55, %v4860_v62 }
 0xa77   :  { %v8658_v56 = vpop.eup %8657 }
 0xa78   :  { %v9206_v59 = vmul.f32 %v8658_v56, %v4865_v57 }
 0xa7a   :  { %v4878_v30 = vpack.c.bf16 %v9206_v59, %v9206_v59 }
 0xa7c   :  { %5079 = vmatmul.bf16.vlgmr.msra.gmra.mxu0 %v4878_v30  ;;  %5092 = vmatmul.bf16.vlgmr.msra.gmra.mxu1 %v4878_v30 }
 0xa7d   :  { %5105 = vmatmul.bf16.vlgmr.msra.gmra.mxu2 %v4878_v30  ;;  %5118 = vmatmul.bf16.vlgmr.msra.gmra.mxu3 %v4878_v30 }
 0xa8c   :  { %5293 = vmatmul.bf16.vlgmr.msrb.gmra.mxu0 %v5209_v44 }
 0xa9c   :  { %5298 = vmatmul.bf16.gmra.mxu0 %v5210_v60 }
 0xaac   :  { %5303 = vmatmul.bf16.gmra.mxu0 %v5211_v63 }
 0xabc   :  { %5308 = vmatmul.bf16.gmra.mxu0 %v5212_v0 }
 0xacc   :  { %5313 = vmatmul.bf16.gmra.mxu0 %v5213_v2 }
 0xadc   :  { %5318 = vmatmul.bf16.gmra.mxu0 %v5214_v1 }
 0xaec   :  { %5323 = vmatmul.bf16.gmra.mxu0 %v5215_v49 }
 0xaf9   :  { %v5080_v27 = vpop.f32.mrf.mxu0  ;;  %v5093_v7 = vpop.f32.mrf.mxu1 }
 0xafa   :  { %v5123_v3 = vadd.f32 %v5080_v27, %v4874_v29  ;;  %v5124_v4 = vadd.f32 %v5093_v7, %v4875_v47 }
 0xafc   :  { %v7847_v54 = vmul.f32 -1.442695, %v5123_v3  ;;  %v7848_v26 = vmul.f32 -1.442695, %v5124_v4 }
 0xafe   :  { %8659 = vpow2.f32 %v7847_v54 }
 0xaff   :  { %8661 = vpow2.f32 %v7848_v26 }
 0xb00   :  { %v5106_v33 = vpop.f32.mrf.mxu2  ;;  %v5119_v40 = vpop.f32.mrf.mxu3 }
 0xb01   :  { %v5126_v6 = vadd.f32 %v5119_v40, %v4877_v5  ;;  %v5082_v23 = vpop.f32.mrf.mxu0  ;;  %v5095_v24 = vpop.f32.mrf.mxu1  ;;  %v5125_v22 = vadd.f32 %v5106_v33, %v4876_v18 }
 0xb03   :  { %v7849_v17 = vmul.f32 -1.442695, %v5126_v6 }
 0xb04   :  { %v8660_v8 = vpop.eup %8659 }
 0xb05   :  { %v8662_v31 = vpop.eup %8661  ;;  %v5130_v38 = vadd.f32 1.0, %v8660_v8  ;;  %8663 = vpow2.f32 %v7849_v17 }
 0xb06   :  { %v5149_v9 = vadd.f32 1.0, %v8662_v31 }
 0xb07   :  { %8665 = vrcp.f32 %v5130_v38  ;;  %v5140_v58 = vand.u32 2147483647, %v5130_v38  ;;  %v5142_v36 = vand.u32 2147483648, %v5130_v38  ;;  %vm5136_vm6 = vweird.f32 %v5130_v38 }
 0xb08   :  { %8667 = vrcp.f32 %v5149_v9  ;;  %v5108_v11 = vpop.f32.mrf.mxu2  ;;  %v5121_v14 = vpop.f32.mrf.mxu3  ;;  %v5161_v19 = vand.u32 2147483648, %v5149_v9  ;;  %v5159_v42 = vand.u32 2147483647, %v5149_v9  ;;  %vm5155_vm7 = vweird.f32 %v5149_v9 }
 0xb09   :  { %v5294_v16 = vpop.f32.mrf.mxu0  ;;  %v5143_v46 = vor.u32 1.1754944e-38, %v5142_v36  ;;  %vm5141_vm10 = vcmp.eq.f32.partialorder %v5140_v58, 8.507059e+37 }
 0xb0a   :  { %v9230_v20 = vadd.f32 %v9227_v10, %v5294_v16  ;;  %v5162_v51 = vor.u32 1.1754944e-38, %v5161_v19  ;;  %vm5160_vm11 = vcmp.eq.f32.partialorder %v5159_v42, 8.507059e+37 }
 0xb0b   :  { %v8664_v21 = vpop.eup %8663 }
 0xb0c   :  { %v5169_v15 = vadd.f32 1.0, %v8664_v21  ;;  %5334 = vmax.xlane.f32.xlu0 %v9230_v20 }
 0xb0d   :  { %v8666_v12 = vpop.eup %8665 }
 0xb0e   :  { %v8668_v28 = vpop.eup %8667  ;;  %v5132_v13 = vmul.f32 %v8666_v12, %v5130_v38  ;;  %8669 = vrcp.f32 %v5169_v15  ;;  %vm5137_vm4 = vweird.f32 %v8666_v12  ;;  %v5181_v49 = vand.u32 2147483648, %v5169_v15 }
 0xb0f   :  { %v5151_v32 = vmul.f32 %v8668_v28, %v5149_v9  ;;  %8671 = vtanh.f32 %v5125_v22  ;;  %vm5156_vm5 = vweird.f32 %v8668_v28  ;;  %vm5138_vm8 = vmor %vm5136_vm6, %vm5137_vm4  ;;  %vm5175_vm13 = vweird.f32 %v5169_v15 }
 0xb10   :  { %v5133_v34 = vsub.f32 1.0, %v5132_v13  ;;  %vm5157_vm9 = vmor %vm5155_vm7, %vm5156_vm5  ;;  %v5179_v29 = vand.u32 2147483647, %v5169_v15  ;;  %v5182_v7 = vor.u32 1.1754944e-38, %v5181_v49 }
 0xb11   :  { %v5152_v35 = vsub.f32 1.0, %v5151_v32  ;;  %v5296_v37 = vpop.f32.mrf.mxu0 }
 0xb12   :  { %v5134_v39 = vmul.f32 %v8666_v12, %v5133_v34  ;;  %v9234_v41 = vadd.f32 %v9227_v10, %v5296_v37  ;;  %vm5180_vm15 = vcmp.eq.f32.partialorder %v5179_v29, 8.507059e+37 }
 0xb13   :  { %v5153_v25 = vmul.f32 %v8668_v28, %v5152_v35 }
 0xb14   :  { %v8670_v43 = vpop.eup %8669  ;;  %v5135_v45 = vadd.f32 %v8666_v12, %v5134_v39  ;;  %5336 = vmax.xlane.f32.xlu0 %v9234_v41 }
 0xb15   :  { %v5154_v61 = vadd.f32 %v8668_v28, %v5153_v25  ;;  %v5171_v48 = vmul.f32 %v8670_v43, %v5169_v15  ;;  %v8672_v53 = vpop.eup %8671  ;;  %vm5176_vm12 = vweird.f32 %v8670_v43 }
 0xb16   :  { %v5139_v52 = vsel %vm5138_vm8, %v8666_v12, %v5135_v45  ;;  %vm5177_vm14 = vmor %vm5175_vm13, %vm5176_vm12 }
 0xb17   :  { %v5144_v62 = vsel %vm5141_vm10, %v5143_v46, %v5139_v52  ;;  %v5158_v55 = vsel %vm5157_vm9, %v8668_v28, %v5154_v61  ;;  %v5172_v56 = vsub.f32 1.0, %v5171_v48 }
 0xb18   :  { %v5163_v57 = vsel %vm5160_vm11, %v5162_v51, %v5158_v55  ;;  %v5186_v30 = vmul.f32 %v8672_v53, %v5144_v62 }
 0xb19   :  { %v5185_v44 = vmul.f32 %v5163_v57, %v9203_v50  ;;  %v5299_v60 = vpop.f32.mrf.mxu0  ;;  %v5173_v63 = vmul.f32 %v8670_v43, %v5172_v56 }
 0xb1a   :  { %v9239_v0 = vadd.f32 %v9227_v10, %v5299_v60 }
 0xb1b   :  { %v5187_v2 = vadd.f32 %v5186_v30, %v5185_v44  ;;  %v5174_v1 = vadd.f32 %v8670_v43, %v5173_v63 }
 0xb1c   :  { %5338 = vmax.xlane.f32.xlu1 %v9239_v0 }
 0xb1d   :  { %8673 = vtanh.f32 %v5187_v2  ;;  %5192 = vst [vmem:[#allocation15] sm:$0xff] %v5187_v2  ;;  %v5178_v47 = vsel %vm5177_vm14, %v8670_v43, %v5174_v1 }
 0xb1e   :  { %v5183_v4 = vsel %vm5180_vm15, %v5182_v7, %v5178_v47 }
 0xb21   :  { %v5301_v27 = vpop.f32.mrf.mxu0 }
 0xb22   :  { %v5302_v50 = vadd.f32 %v9227_v10, %v5301_v27 }
 0xb23   :  { %v8674_v3 = vpop.eup %8673 }
 0xb24   :  { %5340 = vmax.xlane.f32.xlu1 %v5302_v50  ;;  %v5189_v54 = vmul.f32 %v8674_v3, %v5183_v4 }
 0xb26   :  { %v5216_v26 = vpack.c.bf16 %v5189_v54, %v9206_v59  ;;  %5191 = vst [vmem:[#allocation13] sm:$0xff] %v5189_v54 }
 0xb27   :  { %5725 = dma.vmem_to_hbm [thread:$0]  %s5721_s11, 128, %s5723_s14, [#allocation14]  }
 0xb28   :  { %5328 = vmatmul.bf16.gmra.mxu0 %v5216_v26  ;;  %5736 = dma.vmem_to_hbm [thread:$0]  %s5732_s15, 128, %s5734_s18, [#allocation14]  }
 0xb29   :  { %v5304_v5 = vpop.f32.mrf.mxu0 }
 0xb2a   :  { %v5305_v33 = vadd.f32 %v9227_v10, %v5304_v5 }
 0xb2c   :  { %5342 = vmax.xlane.f32.xlu2 %v5305_v33 }
 0xb31   :  { %v5306_v40 = vpop.f32.mrf.mxu0 }
 0xb32   :  { %v9246_v6 = vadd.f32 %v9227_v10, %v5306_v40 }
 0xb34   :  { %5344 = vmax.xlane.f32.xlu2 %v9246_v6 }
 0xb39   :  { %v5309_v23 = vpop.f32.mrf.mxu0 }
 0xb3a   :  { %v5310_v24 = vadd.f32 %v9227_v10, %v5309_v23 }
 0xb3c   :  { %5346 = vmax.xlane.f32.xlu0 %v5310_v24 }
 0xb41   :  { %v5311_v17 = vpop.f32.mrf.mxu0 }
 0xb42   :  { %v9251_v8 = vadd.f32 %v9227_v10, %v5311_v17 }
 0xb44   :  { %5348 = vmax.xlane.f32.xlu1 %v9251_v8 }
 0xb49   :  { %v5314_v59 = vpop.f32.mrf.mxu0 }
 0xb4a   :  { %v9255_v31 = vadd.f32 %v9227_v10, %v5314_v59 }
 0xb4c   :  { %5350 = vmax.xlane.f32.xlu2 %v9255_v31 }
 0xb51   :  { %v5316_v38 = vpop.f32.mrf.mxu0 }
 0xb52   :  { %v9259_v9 = vadd.f32 %v9227_v10, %v5316_v38 }
 0xb54   :  { %5352 = vmax.xlane.f32.xlu0 %v9259_v9 }
 0xb59   :  { %v5319_v11 = vpop.f32.mrf.mxu0 }
 0xb5a   :  { %v9263_v14 = vadd.f32 %v9227_v10, %v5319_v11 }
 0xb5c   :  { %5354 = vmax.xlane.f32.xlu1 %v9263_v14 }
 0xb61   :  { %v5321_v16 = vpop.f32.mrf.mxu0 }
 0xb62   :  { %v9267_v18 = vadd.f32 %v9227_v10, %v5321_v16 }
 0xb64   :  { %5356 = vmax.xlane.f32.xlu2 %v9267_v18 }
 0xb69   :  { %v5324_v21 = vpop.f32.mrf.mxu0 }
 0xb6a   :  { %v9271_v15 = vadd.f32 %v9227_v10, %v5324_v21 }
 0xb6c   :  { %5358 = vmax.xlane.f32.xlu0 %v9271_v15 }
 0xb71   :  { %v5326_v12 = vpop.f32.mrf.mxu0 }
 0xb72   :  { %v9275_v22 = vadd.f32 %v9227_v10, %v5326_v12 }
 0xb74   :  { %5360 = vmax.xlane.f32.xlu1 %v9275_v22 }
 0xb7f   :  { %v5335_v28 = vpop.xlane.xlu0 %5334 }
 0xb80   :  { %v5366_v13 = vsub.f32 %v9230_v20, %v5335_v28 }
 0xb82   :  { %v5382_v32 = vmul.f32 1.442695, %v5366_v13 }
 0xb84   :  { %8675 = vpow2.f32 %v5382_v32 }
 0xb87   :  { %v5337_v19 = vpop.xlane.xlu0 %5336 }
 0xb88   :  { %v5367_v39 = vsub.f32 %v9234_v41, %v5337_v19 }
 0xb8a   :  { %v9279_v34 = vpop.eup %8675  ;;  %v5384_v20 = vmul.f32 1.442695, %v5367_v39 }
 0xb8b   :  { %5414 = vadd.xlane.f32.xlu1 %v9279_v34 }
 0xb8f   :  { %v5339_v35 = vpop.xlane.xlu1 %5338 }
 0xb90   :  { %v5368_v46 = vsub.f32 %v9239_v0, %v5339_v35 }
 0xb92   :  { %v5386_v48 = vmul.f32 1.442695, %v5368_v46 }
 0xb97   :  { %v5341_v58 = vpop.xlane.xlu1 %5340 }
 0xb98   :  { %v5369_v36 = vsub.f32 %v5302_v50, %v5341_v58 }
 0xb9a   :  { %v5388_v37 = vmul.f32 1.442695, %v5369_v36 }
 0xb9c   :  { %8677 = vpow2.f32 %v5388_v37 }
 0xb9d   :  { %8679 = vpow2.f32 %v5384_v20 }
 0xb9e   :  { %8681 = vpow2.f32 %v5386_v48 }
 0xb9f   :  { %v5343_v42 = vpop.xlane.xlu2 %5342 }
 0xba0   :  { %v5370_v61 = vsub.f32 %v5305_v33, %v5343_v42 }
 0xba2   :  { %v9283_v25 = vpop.eup %8677  ;;  %v5390_v51 = vmul.f32 1.442695, %v5370_v61 }
 0xba3   :  { %5420 = vadd.xlane.f32.xlu1 %v9283_v25  ;;  %v9294_v62 = vpop.eup %8679 }
 0xba4   :  { %8683 = vpow2.f32 %v5390_v51  ;;  %v9299_v60 = vpop.eup %8681 }
 0xba5   :  { %v5329_v43 = vpop.f32.mrf.mxu0 }
 0xba6   :  { %v9287_v45 = vadd.f32 %v9227_v10, %v5329_v43 }
 0xba7   :  { %v5345_v41 = vpop.xlane.xlu2 %5344 }
 0xba8   :  { %5362 = vmax.xlane.f32.xlu2 %v9287_v45  ;;  %v5371_v57 = vsub.f32 %v9246_v6, %v5345_v41 }
 0xbaa   :  { %v5392_v44 = vmul.f32 1.442695, %v5371_v57  ;;  %v9301_v63 = vpop.eup %8683 }
 0xbad   :  { %v5331_v52 = vpop.f32.mrf.mxu0 }
 0xbae   :  { %v9292_v53 = vadd.f32 %v9227_v10, %v5331_v52 }
 0xbaf   :  { %v5347_v55 = vpop.xlane.xlu0 %5346 }
 0xbb0   :  { %v5372_v56 = vsub.f32 %v5310_v24, %v5347_v55  ;;  %5364 = vmax.xlane.f32.xlu0 %v9292_v53  ;;  %5416 = vadd.xlane.f32.xlu2 %v9294_v62 }
 0xbb2   :  { %v5394_v30 = vmul.f32 1.442695, %v5372_v56 }
 0xbb4   :  { %8685 = vpow2.f32 %v5394_v30 }
 0xbb5   :  { %8687 = vpow2.f32 %v5392_v44 }
 0xbb7   :  { %v5349_v10 = vpop.xlane.xlu1 %5348 }
 0xbb8   :  { %v5373_v0 = vsub.f32 %v9251_v8, %v5349_v10  ;;  %5418 = vadd.xlane.f32.xlu0 %v9299_v60  ;;  %5422 = vadd.xlane.f32.xlu2 %v9301_v63 }
 0xbba   :  { %v9306_v2 = vpop.eup %8685  ;;  %v5396_v1 = vmul.f32 1.442695, %v5373_v0 }
 0xbbb   :  { %5426 = vadd.xlane.f32.xlu1 %v9306_v2  ;;  %v9309_v49 = vpop.eup %8687 }
 0xbbc   :  { %8689 = vpow2.f32 %v5396_v1 }
 0xbbf   :  { %v5351_v29 = vpop.xlane.xlu2 %5350 }
 0xbc0   :  { %v5374_v47 = vsub.f32 %v9255_v31, %v5351_v29  ;;  %5424 = vadd.xlane.f32.xlu0 %v9309_v49 }
 0xbc2   :  { %v9313_v27 = vpop.eup %8689  ;;  %v5398_v7 = vmul.f32 1.442695, %v5374_v47 }
 0xbc3   :  { %5428 = vadd.xlane.f32.xlu2 %v9313_v27 }
 0xbc4   :  { %8691 = vpow2.f32 %v5398_v7 }
 0xbc7   :  { %v5353_v50 = vpop.xlane.xlu0 %5352 }
 0xbc8   :  { %v5375_v3 = vsub.f32 %v9259_v9, %v5353_v50 }
 0xbca   :  { %v9317_v4 = vpop.eup %8691  ;;  %v5400_v54 = vmul.f32 1.442695, %v5375_v3 }
 0xbcb   :  { %5430 = vadd.xlane.f32.xlu0 %v9317_v4 }
 0xbcc   :  { %8693 = vpow2.f32 %v5400_v54 }
 0xbcf   :  { %v5355_v26 = vpop.xlane.xlu1 %5354 }
 0xbd0   :  { %v5376_v5 = vsub.f32 %v9263_v14, %v5355_v26 }
 0xbd2   :  { %v9321_v33 = vpop.eup %8693  ;;  %v5402_v40 = vmul.f32 1.442695, %v5376_v5 }
 0xbd3   :  { %5432 = vadd.xlane.f32.xlu1 %v9321_v33 }
 0xbd4   :  { %8695 = vpow2.f32 %v5402_v40 }
 0xbd7   :  { %v5357_v6 = vpop.xlane.xlu2 %5356 }
 0xbd8   :  { %v5377_v23 = vsub.f32 %v9267_v18, %v5357_v6 }
 0xbda   :  { %v9325_v24 = vpop.eup %8695  ;;  %v5404_v17 = vmul.f32 1.442695, %v5377_v23 }
 0xbdb   :  { %5434 = vadd.xlane.f32.xlu2 %v9325_v24 }
 0xbdc   :  { %8697 = vpow2.f32 %v5404_v17 }
 0xbdf   :  { %v5359_v8 = vpop.xlane.xlu0 %5358 }
 0xbe0   :  { %v5378_v59 = vsub.f32 %v9271_v15, %v5359_v8 }
 0xbe2   :  { %v9329_v31 = vpop.eup %8697  ;;  %v5406_v38 = vmul.f32 1.442695, %v5378_v59 }
 0xbe3   :  { %5436 = vadd.xlane.f32.xlu0 %v9329_v31 }
 0xbe4   :  { %8699 = vpow2.f32 %v5406_v38 }
 0xbe7   :  { %v5361_v9 = vpop.xlane.xlu1 %5360 }
 0xbe8   :  { %v5379_v11 = vsub.f32 %v9275_v22, %v5361_v9 }
 0xbea   :  { %v9333_v14 = vpop.eup %8699  ;;  %v5408_v16 = vmul.f32 1.442695, %v5379_v11 }
 0xbeb   :  { %5438 = vadd.xlane.f32.xlu1 %v9333_v14 }
 0xbec   :  { %8701 = vpow2.f32 %v5408_v16 }
 0xbf2   :  { %v9336_v18 = vpop.eup %8701 }
 0xbf3   :  { %5440 = vadd.xlane.f32.xlu2 %v9336_v18 }
 0xbfe   :  { %v5415_v21 = vpop.xlane.xlu1 %5414 }
 0xbff   :  { %8703 = vrcp.f32 %v5415_v21  ;;  %v5457_v13 = vand.u32 2147483648, %v5415_v21  ;;  %v5455_v35 = vand.u32 2147483647, %v5415_v21  ;;  %vm5451_vm1 = vweird.f32 %v5415_v21 }
 0xc01   :  { %v5458_v58 = vor.u32 1.1754944e-38, %v5457_v13  ;;  %vm5456_vm3 = vcmp.eq.f32.partialorder %v5455_v35, 8.507059e+37 }
 0xc05   :  { %v8704_v15 = vpop.eup %8703 }
 0xc06   :  { %v5447_v12 = vmul.f32 %v8704_v15, %v5415_v21  ;;  %vm5452_vm0 = vweird.f32 %v8704_v15 }
 0xc07   :  { %vm5453_vm2 = vmor %vm5451_vm1, %vm5452_vm0 }
 0xc08   :  { %v5448_v28 = vsub.f32 1.0, %v5447_v12 }
 0xc0a   :  { %v5449_v32 = vmul.f32 %v8704_v15, %v5448_v28 }
 0xc0c   :  { %v5450_v22 = vadd.f32 %v8704_v15, %v5449_v32 }
 0xc0e   :  { %v5454_v36 = vsel %vm5453_vm2, %v8704_v15, %v5450_v22 }
 0xc0f   :  { %v5459_v37 = vsel %vm5456_vm3, %v5458_v58, %v5454_v36 }
 0xc10   :  { %v5460_v19 = vmul.f32 %v9279_v34, %v5459_v37 }
 0xc12   :  { %5686 = vst [vmem:[#allocation12] sm:$0xff] %v5460_v19 }
 0xc16   :  { %v5421_v39 = vpop.xlane.xlu1 %5420 }
 0xc17   :  { %8705 = vrcp.f32 %v5421_v39  ;;  %v5502_v51 = vand.u32 2147483648, %v5421_v39  ;;  %v5500_v41 = vand.u32 2147483647, %v5421_v39  ;;  %vm5496_vm5 = vweird.f32 %v5421_v39 }
 0xc19   :  { %v5503_v30 = vor.u32 1.1754944e-38, %v5502_v51  ;;  %vm5501_vm7 = vcmp.eq.f32.partialorder %v5500_v41, 8.507059e+37 }
 0xc1b   :  { %v5363_v42 = vpop.xlane.xlu2 %5362 }
 0xc1c   :  { %v5380_v20 = vsub.f32 %v9287_v45, %v5363_v42 }
 0xc1d   :  { %v8706_v43 = vpop.eup %8705 }
 0xc1e   :  { %v5492_v46 = vmul.f32 %v8706_v43, %v5421_v39  ;;  %v5410_v61 = vmul.f32 1.442695, %v5380_v20  ;;  %vm5497_vm4 = vweird.f32 %v8706_v43 }
 0xc1f   :  { %vm5498_vm6 = vmor %vm5496_vm5, %vm5497_vm4 }
 0xc20   :  { %v5493_v48 = vsub.f32 1.0, %v5492_v46  ;;  %8707 = vpow2.f32 %v5410_v61 }
 0xc22   :  { %v5494_v52 = vmul.f32 %v8706_v43, %v5493_v48 }
 0xc23   :  { %v5365_v55 = vpop.xlane.xlu0 %5364  ;;  %v5417_v56 = vpop.xlane.xlu2 %5416 }
 0xc24   :  { %v5495_v57 = vadd.f32 %v8706_v43, %v5494_v52  ;;  %v5381_v34 = vsub.f32 %v9292_v53, %v5365_v55  ;;  %8709 = vrcp.f32 %v5417_v56  ;;  %v5472_v54 = vand.u32 2147483648, %v5417_v56 }
 0xc25   :  { %v5470_v40 = vand.u32 2147483647, %v5417_v56  ;;  %vm5466_vm9 = vweird.f32 %v5417_v56 }
 0xc26   :  { %v9342_v44 = vpop.eup %8707  ;;  %v5499_v45 = vsel %vm5498_vm6, %v8706_v43, %v5495_v57  ;;  %v5412_v10 = vmul.f32 1.442695, %v5381_v34  ;;  %v5473_v23 = vor.u32 1.1754944e-38, %v5472_v54 }
 0xc27   :  { %v5504_v0 = vsel %vm5501_vm7, %v5503_v30, %v5499_v45  ;;  %5442 = vadd.xlane.f32.xlu0 %v9342_v44  ;;  %vm5471_vm11 = vcmp.eq.f32.partialorder %v5470_v40, 8.507059e+37 }
 0xc28   :  { %v5505_v1 = vmul.f32 %v9283_v25, %v5504_v0  ;;  %8711 = vpow2.f32 %v5412_v10 }
 0xc2a   :  { %v8710_v29 = vpop.eup %8709  ;;  %5689 = vst [vmem:[#allocation12 + $0x18] sm:$0xff] %v5505_v1 }
 0xc2b   :  { %v5462_v47 = vmul.f32 %v8710_v29, %v5417_v56  ;;  %v5419_v7 = vpop.xlane.xlu0 %5418  ;;  %v9346_v50 = vpop.xlane.xlu2 %5422  ;;  %vm5467_vm8 = vweird.f32 %v8710_v29 }
 0xc2c   :  { %8713 = vrcp.f32 %v5419_v7  ;;  %vm5468_vm10 = vmor %vm5466_vm9, %vm5467_vm8  ;;  %vm5481_vm12 = vweird.f32 %v5419_v7  ;;  %v5485_v11 = vand.u32 2147483647, %v5419_v7  ;;  %v5487_v28 = vand.u32 2147483648, %v5419_v7 }
 0xc2d   :  { %v5463_v53 = vsub.f32 1.0, %v5462_v47  ;;  %8715 = vrcp.f32 %v9346_v50  ;;  %v5515_v13 = vand.u32 2147483647, %v9346_v50  ;;  %vm5511_vm13 = vweird.f32 %v9346_v50 }
 0xc2e   :  { %v9349_v3 = vpop.eup %8711  ;;  %v9351_v26 = vpop.xlane.xlu1 %5426  ;;  %v5517_v35 = vand.u32 2147483648, %v9346_v50  ;;  %vm5486_vm0 = vcmp.eq.f32.partialorder %v5485_v11, 8.507059e+37  ;;  %v5488_v20 = vor.u32 1.1754944e-38, %v5487_v28 }
 0xc2f   :  { %v5464_v5 = vmul.f32 %v8710_v29, %v5463_v53  ;;  %8717 = vrcp.f32 %v9351_v26  ;;  %5444 = vadd.xlane.f32.xlu1 %v9349_v3  ;;  %v5545_v36 = vand.u32 2147483647, %v9351_v26  ;;  %v5547_v39 = vand.u32 2147483648, %v9351_v26 }
 0xc30   :  { %vm9375_vm1 = vcmp.eq.f32.partialorder %v5515_v13, 8.507059e+37  ;;  %vm5541_vm3 = vweird.f32 %v9351_v26  ;;  %v5518_v52 = vor.u32 1.1754944e-38, %v5517_v35 }
 0xc31   :  { %v5465_v25 = vadd.f32 %v8710_v29, %v5464_v5  ;;  %vm9387_vm6 = vcmp.eq.f32.partialorder %v5545_v36, 8.507059e+37  ;;  %v5548_v30 = vor.u32 1.1754944e-38, %v5547_v39 }
 0xc32   :  { %v8714_v6 = vpop.eup %8713 }
 0xc33   :  { %v8716_v17 = vpop.eup %8715  ;;  %v5469_v8 = vsel %vm5468_vm10, %v8710_v29, %v5465_v25  ;;  %v5477_v59 = vmul.f32 %v8714_v6, %v5419_v7  ;;  %v9355_v38 = vpop.xlane.xlu0 %5424  ;;  %vm5482_vm14 = vweird.f32 %v8714_v6 }
 0xc34   :  { %v5474_v9 = vsel %vm5471_vm11, %v5473_v23, %v5469_v8  ;;  %v5507_v16 = vmul.f32 %v8716_v17, %v9346_v50  ;;  %8719 = vrcp.f32 %v9355_v38  ;;  %vm5512_vm15 = vweird.f32 %v8716_v17  ;;  %vm5483_vm2 = vmor %vm5481_vm12, %vm5482_vm14 }
 0xc35   :  { %v9359_v21 = vpop.eup %8717  ;;  %v5475_v15 = vmul.f32 %v9294_v62, %v5474_v9  ;;  %v5478_v12 = vsub.f32 1.0, %v5477_v59  ;;  %vm5513_vm5 = vmor %vm5511_vm13, %vm5512_vm15  ;;  %v5530_v29 = vand.u32 2147483647, %v9355_v38  ;;  %v5532_v50 = vand.u32 2147483648, %v9355_v38 }
 0xc36   :  { %v5508_v32 = vsub.f32 1.0, %v5507_v16  ;;  %v5537_v22 = vmul.f32 %v9359_v21, %v9351_v26  ;;  %v9367_v58 = vpop.xlane.xlu2 %5428  ;;  %vm5542_vm4 = vweird.f32 %v9359_v21  ;;  %vm5526_vm9 = vweird.f32 %v9355_v38 }
 0xc37   :  { %5687 = vst [vmem:[#allocation12 + $0x8] sm:$0xff] %v5475_v15  ;;  %v5479_v62 = vmul.f32 %v8714_v6, %v5478_v12  ;;  %8721 = vrcp.f32 %v9367_v58  ;;  %vm5543_vm7 = vmor %vm5541_vm3, %vm5542_vm4  ;;  %v5562_v25 = vand.u32 2147483648, %v9367_v58  ;;  %vm5531_vm12 = vcmp.eq.f32.partialorder %v5530_v29, 8.507059e+37 }
 0xc38   :  { %v5509_v37 = vmul.f32 %v8716_v17, %v5508_v32  ;;  %v5538_v19 = vsub.f32 1.0, %v5537_v22  ;;  %vm5556_vm13 = vweird.f32 %v9367_v58 }
 0xc39   :  { %v5480_v42 = vadd.f32 %v8714_v6, %v5479_v62 }
 0xc3a   :  { %v8720_v46 = vpop.eup %8719  ;;  %v5510_v61 = vadd.f32 %v8716_v17, %v5509_v37  ;;  %v5539_v48 = vmul.f32 %v9359_v21, %v5538_v19 }
 0xc3b   :  { %v5484_v51 = vsel %vm5483_vm2, %v8714_v6, %v5480_v42  ;;  %v5522_v55 = vmul.f32 %v8720_v46, %v9355_v38  ;;  %vm5527_vm8 = vweird.f32 %v8720_v46  ;;  %v5533_v6 = vor.u32 1.1754944e-38, %v5532_v50 }
 0xc3c   :  { %v5489_v56 = vsel %vm5486_vm0, %v5488_v20, %v5484_v51  ;;  %v5514_v57 = vsel %vm5513_vm5, %v8716_v17, %v5510_v61  ;;  %v5540_v34 = vadd.f32 %v9359_v21, %v5539_v48  ;;  %vm5528_vm10 = vmor %vm5526_vm9, %vm5527_vm8  ;;  %v5560_v17 = vand.u32 2147483647, %v9367_v58 }
 0xc3d   :  { %v8722_v45 = vpop.eup %8721  ;;  %v5490_v10 = vmul.f32 %v9299_v60, %v5489_v56  ;;  %v5519_v0 = vsel %vm9375_vm1, %v5518_v52, %v5514_v57  ;;  %v5523_v1 = vsub.f32 1.0, %v5522_v55  ;;  %v5563_v38 = vor.u32 1.1754944e-38, %v5562_v25 }
 0xc3e   :  { %v5520_v47 = vmul.f32 %v9301_v63, %v5519_v0  ;;  %v5544_v7 = vsel %vm5543_vm7, %v9359_v21, %v5540_v34  ;;  %v5552_v60 = vmul.f32 %v8722_v45, %v9367_v58  ;;  %v5431_v53 = vpop.xlane.xlu0 %5430  ;;  %vm5557_vm11 = vweird.f32 %v8722_v45 }
 0xc3f   :  { %5688 = vst [vmem:[#allocation12 + $0x10] sm:$0xff] %v5490_v10  ;;  %v5549_v54 = vsel %vm9387_vm6, %v5548_v30, %v5544_v7  ;;  %v5524_v26 = vmul.f32 %v8720_v46, %v5523_v1  ;;  %8723 = vrcp.f32 %v5431_v53  ;;  %vm5558_vm14 = vmor %vm5556_vm13, %vm5557_vm11  ;;  %vm5561_vm15 = vcmp.eq.f32.partialorder %v5560_v17, 8.507059e+37 }
 0xc40   :  { %5690 = vst [vmem:[#allocation12 + $0x20] sm:$0xff] %v5520_v47  ;;  %v5550_v63 = vmul.f32 %v9306_v2, %v5549_v54  ;;  %v5553_v5 = vsub.f32 1.0, %v5552_v60  ;;  %v5577_v32 = vand.u32 2147483648, %v5431_v53  ;;  %v5575_v22 = vand.u32 2147483647, %v5431_v53 }
 0xc41   :  { %v5525_v40 = vadd.f32 %v8720_v46, %v5524_v26  ;;  %vm5571_vm1 = vweird.f32 %v5431_v53 }
 0xc42   :  { %5692 = vst [vmem:[#allocation12 + $0x30] sm:$0xff] %v5550_v63  ;;  %v5554_v23 = vmul.f32 %v8722_v45, %v5553_v5  ;;  %v5578_v62 = vor.u32 1.1754944e-38, %v5577_v32  ;;  %vm5576_vm3 = vcmp.eq.f32.partialorder %v5575_v22, 8.507059e+37 }
 0xc43   :  { %v5529_v8 = vsel %vm5528_vm10, %v8720_v46, %v5525_v40 }
 0xc44   :  { %v5534_v59 = vsel %vm5531_vm12, %v5533_v6, %v5529_v8  ;;  %v5555_v9 = vadd.f32 %v8722_v45, %v5554_v23 }
 0xc45   :  { %v8724_v2 = vpop.eup %8723  ;;  %v5535_v11 = vmul.f32 %v9309_v49, %v5534_v59 }
 0xc46   :  { %v5559_v16 = vsel %vm5558_vm14, %v8722_v45, %v5555_v9  ;;  %v5567_v21 = vmul.f32 %v8724_v2, %v5431_v53  ;;  %v5433_v15 = vpop.xlane.xlu1 %5432  ;;  %vm5572_vm0 = vweird.f32 %v8724_v2 }
 0xc47   :  { %5691 = vst [vmem:[#allocation12 + $0x28] sm:$0xff] %v5535_v11  ;;  %v5564_v12 = vsel %vm5561_vm15, %v5563_v38, %v5559_v16  ;;  %8725 = vrcp.f32 %v5433_v15  ;;  %vm5573_vm2 = vmor %vm5571_vm1, %vm5572_vm0  ;;  %v5592_v20 = vand.u32 2147483648, %v5433_v15  ;;  %v5590_v46 = vand.u32 2147483647, %v5433_v15 }
 0xc48   :  { %v5565_v28 = vmul.f32 %v9313_v27, %v5564_v12  ;;  %v5568_v13 = vsub.f32 1.0, %v5567_v21  ;;  %vm5586_vm5 = vweird.f32 %v5433_v15 }
 0xc49   :  { %v5593_v51 = vor.u32 1.1754944e-38, %v5592_v20  ;;  %vm5591_vm7 = vcmp.eq.f32.partialorder %v5590_v46, 8.507059e+37 }
 0xc4a   :  { %5693 = vst [vmem:[#allocation12 + $0x38] sm:$0xff] %v5565_v28  ;;  %v5569_v35 = vmul.f32 %v8724_v2, %v5568_v13 }
 0xc4c   :  { %v5570_v58 = vadd.f32 %v8724_v2, %v5569_v35 }
 0xc4d   :  { %v8726_v49 = vpop.eup %8725 }
 0xc4e   :  { %v5574_v36 = vsel %vm5573_vm2, %v8724_v2, %v5570_v58  ;;  %v5582_v37 = vmul.f32 %v8726_v49, %v5433_v15  ;;  %v5435_v19 = vpop.xlane.xlu2 %5434  ;;  %vm5587_vm4 = vweird.f32 %v8726_v49 }
 0xc4f   :  { %v5579_v39 = vsel %vm5576_vm3, %v5578_v62, %v5574_v36  ;;  %8727 = vrcp.f32 %v5435_v19  ;;  %vm5588_vm6 = vmor %vm5586_vm5, %vm5587_vm4  ;;  %v5607_v34 = vand.u32 2147483648, %v5435_v19  ;;  %v5605_v45 = vand.u32 2147483647, %v5435_v19 }
 0xc50   :  { %v5580_v42 = vmul.f32 %v9317_v4, %v5579_v39  ;;  %v5583_v27 = vsub.f32 1.0, %v5582_v37  ;;  %vm5601_vm9 = vweird.f32 %v5435_v19 }
 0xc51   :  { %v5608_v1 = vor.u32 1.1754944e-38, %v5607_v34  ;;  %vm5606_vm11 = vcmp.eq.f32.partialorder %v5605_v45, 8.507059e+37 }
 0xc52   :  { %5694 = vst [vmem:[#allocation12 + $0x40] sm:$0xff] %v5580_v42  ;;  %v5584_v43 = vmul.f32 %v8726_v49, %v5583_v27 }
 0xc54   :  { %v5585_v61 = vadd.f32 %v8726_v49, %v5584_v43 }
 0xc55   :  { %v8728_v48 = vpop.eup %8727 }
 0xc56   :  { %v5589_v52 = vsel %vm5588_vm6, %v8726_v49, %v5585_v61  ;;  %v5597_v41 = vmul.f32 %v8728_v48, %v5435_v19  ;;  %v5437_v55 = vpop.xlane.xlu0 %5436  ;;  %vm5602_vm8 = vweird.f32 %v8728_v48 }
 0xc57   :  { %v5594_v56 = vsel %vm5591_vm7, %v5593_v51, %v5589_v52  ;;  %8729 = vrcp.f32 %v5437_v55  ;;  %vm5603_vm10 = vmor %vm5601_vm9, %vm5602_vm8  ;;  %v5622_v53 = vand.u32 2147483648, %v5437_v55  ;;  %v5620_v26 = vand.u32 2147483647, %v5437_v55 }
 0xc58   :  { %v5595_v57 = vmul.f32 %v9321_v33, %v5594_v56  ;;  %v5598_v4 = vsub.f32 1.0, %v5597_v41  ;;  %vm5616_vm13 = vweird.f32 %v5437_v55 }
 0xc59   :  { %v5623_v40 = vor.u32 1.1754944e-38, %v5622_v53  ;;  %vm5621_vm15 = vcmp.eq.f32.partialorder %v5620_v26, 8.507059e+37 }
 0xc5a   :  { %5695 = vst [vmem:[#allocation12 + $0x48] sm:$0xff] %v5595_v57  ;;  %v5599_v30 = vmul.f32 %v8728_v48, %v5598_v4 }
 0xc5c   :  { %v5600_v10 = vadd.f32 %v8728_v48, %v5599_v30 }
 0xc5d   :  { %v8730_v0 = vpop.eup %8729 }
 0xc5e   :  { %v5604_v29 = vsel %vm5603_vm10, %v8728_v48, %v5600_v10  ;;  %v5612_v47 = vmul.f32 %v8730_v0, %v5437_v55  ;;  %v5439_v7 = vpop.xlane.xlu1 %5438  ;;  %vm5617_vm12 = vweird.f32 %v8730_v0 }
 0xc5f   :  { %v5609_v50 = vsel %vm5606_vm11, %v5608_v1, %v5604_v29  ;;  %8731 = vrcp.f32 %v5439_v7  ;;  %vm5618_vm14 = vmor %vm5616_vm13, %vm5617_vm12  ;;  %v5637_v59 = vand.u32 2147483648, %v5439_v7  ;;  %v5635_v2 = vand.u32 2147483647, %v5439_v7 }
 0xc60   :  { %v5610_v60 = vmul.f32 %v9325_v24, %v5609_v50  ;;  %v5613_v33 = vsub.f32 1.0, %v5612_v47  ;;  %vm5631_vm1 = vweird.f32 %v5439_v7 }
 0xc61   :  { %v5638_v16 = vor.u32 1.1754944e-38, %v5637_v59  ;;  %vm5636_vm3 = vcmp.eq.f32.partialorder %v5635_v2, 8.507059e+37 }
 0xc62   :  { %5696 = vst [vmem:[#allocation12 + $0x50] sm:$0xff] %v5610_v60  ;;  %v5614_v54 = vmul.f32 %v8730_v0, %v5613_v33 }
 0xc64   :  { %v5615_v63 = vadd.f32 %v8730_v0, %v5614_v54 }
 0xc65   :  { %v8732_v5 = vpop.eup %8731 }
 0xc66   :  { %v5619_v25 = vsel %vm5618_vm14, %v8730_v0, %v5615_v63  ;;  %v5627_v6 = vmul.f32 %v8732_v5, %v5439_v7  ;;  %v5441_v23 = vpop.xlane.xlu2 %5440  ;;  %vm5632_vm0 = vweird.f32 %v8732_v5 }
 0xc67   :  { %v5624_v17 = vsel %vm5621_vm15, %v5623_v40, %v5619_v25  ;;  %8733 = vrcp.f32 %v5441_v23  ;;  %vm5633_vm2 = vmor %vm5631_vm1, %vm5632_vm0  ;;  %v5652_v32 = vand.u32 2147483648, %v5441_v23  ;;  %v5650_v35 = vand.u32 2147483647, %v5441_v23 }
 0xc68   :  { %v5625_v8 = vmul.f32 %v9329_v31, %v5624_v17  ;;  %v5628_v24 = vsub.f32 1.0, %v5627_v6  ;;  %vm5646_vm5 = vweird.f32 %v5441_v23 }
 0xc69   :  { %v5653_v58 = vor.u32 1.1754944e-38, %v5652_v32  ;;  %vm5651_vm7 = vcmp.eq.f32.partialorder %v5650_v35, 8.507059e+37 }
 0xc6a   :  { %5697 = vst [vmem:[#allocation12 + $0x58] sm:$0xff] %v5625_v8  ;;  %v5629_v9 = vmul.f32 %v8732_v5, %v5628_v24 }
 0xc6c   :  { %v5630_v11 = vadd.f32 %v8732_v5, %v5629_v9 }
 0xc6d   :  { %v8734_v38 = vpop.eup %8733 }
 0xc6e   :  { %v5634_v21 = vsel %vm5633_vm2, %v8732_v5, %v5630_v11  ;;  %v5642_v15 = vmul.f32 %v8734_v38, %v5441_v23  ;;  %vm5647_vm4 = vweird.f32 %v8734_v38 }
 0xc6f   :  { %v5639_v12 = vsel %vm5636_vm3, %v5638_v16, %v5634_v21  ;;  %vm5648_vm6 = vmor %vm5646_vm5, %vm5647_vm4 }
 0xc70   :  { %v5640_v28 = vmul.f32 %v9333_v14, %v5639_v12  ;;  %v5643_v13 = vsub.f32 1.0, %v5642_v15 }
 0xc72   :  { %5698 = vst [vmem:[#allocation12 + $0x60] sm:$0xff] %v5640_v28  ;;  %v5644_v31 = vmul.f32 %v8734_v38, %v5643_v13 }
 0xc74   :  { %v5645_v22 = vadd.f32 %v8734_v38, %v5644_v31 }
 0xc76   :  { %v5649_v49 = vsel %vm5648_vm6, %v8734_v38, %v5645_v22 }
 0xc77   :  { %v5654_v62 = vsel %vm5651_vm7, %v5653_v58, %v5649_v49 }
 0xc78   :  { %v5655_v36 = vmul.f32 %v9336_v18, %v5654_v62 }
 0xc7a   :  { %5699 = vst [vmem:[#allocation12 + $0x68] sm:$0xff] %v5655_v36 }
 0xc9a   :  { %v5443_v37 = vpop.xlane.xlu0 %5442 }
 0xc9b   :  { %8735 = vrcp.f32 %v5443_v37  ;;  %v5667_v27 = vand.u32 2147483648, %v5443_v37  ;;  %v5665_v43 = vand.u32 2147483647, %v5443_v37  ;;  %vm5661_vm9 = vweird.f32 %v5443_v37 }
 0xc9d   :  { %v5668_v48 = vor.u32 1.1754944e-38, %v5667_v27  ;;  %vm5666_vm11 = vcmp.eq.f32.partialorder %v5665_v43, 8.507059e+37 }
 0xca1   :  { %v8736_v19 = vpop.eup %8735 }
 0xca2   :  { %v5657_v14 = vmul.f32 %v8736_v19, %v5443_v37  ;;  %v5445_v39 = vpop.xlane.xlu1 %5444  ;;  %vm5662_vm8 = vweird.f32 %v8736_v19 }
 0xca3   :  { %8737 = vrcp.f32 %v5445_v39  ;;  %vm5663_vm10 = vmor %vm5661_vm9, %vm5662_vm8  ;;  %v5682_v56 = vand.u32 2147483648, %v5445_v39  ;;  %v5680_v4 = vand.u32 2147483647, %v5445_v39  ;;  %vm5676_vm13 = vweird.f32 %v5445_v39 }
 0xca4   :  { %v5658_v42 = vsub.f32 1.0, %v5657_v14 }
 0xca5   :  { %v5683_v30 = vor.u32 1.1754944e-38, %v5682_v56  ;;  %vm5681_vm15 = vcmp.eq.f32.partialorder %v5680_v4, 8.507059e+37 }
 0xca6   :  { %v5659_v20 = vmul.f32 %v8736_v19, %v5658_v42 }
 0xca8   :  { %v5660_v46 = vadd.f32 %v8736_v19, %v5659_v20 }
 0xca9   :  { %v8738_v61 = vpop.eup %8737 }
 0xcaa   :  { %v5664_v51 = vsel %vm5663_vm10, %v8736_v19, %v5660_v46  ;;  %v5672_v18 = vmul.f32 %v8738_v61, %v5445_v39  ;;  %vm5677_vm12 = vweird.f32 %v8738_v61 }
 0xcab   :  { %v5669_v52 = vsel %vm5666_vm11, %v5668_v48, %v5664_v51  ;;  %vm5678_vm14 = vmor %vm5676_vm13, %vm5677_vm12 }
 0xcac   :  { %v5670_v41 = vmul.f32 %v9342_v44, %v5669_v52  ;;  %v5673_v55 = vsub.f32 1.0, %v5672_v18 }
 0xcae   :  { %5700 = vst [vmem:[#allocation12 + $0x70] sm:$0xff] %v5670_v41  ;;  %v5674_v57 = vmul.f32 %v8738_v61, %v5673_v55 }
 0xcb0   :  { %v5675_v34 = vadd.f32 %v8738_v61, %v5674_v57 }
 0xcb2   :  { %v5679_v45 = vsel %vm5678_vm14, %v8738_v61, %v5675_v34 }
 0xcb3   :  { %v5684_v10 = vsel %vm5681_vm15, %v5683_v30, %v5679_v45 }
 0xcb4   :  { %v5685_v44 = vmul.f32 %v9349_v3, %v5684_v10 }
 0xcb6   :  { %5701 = vst [vmem:[#allocation12 + $0x78] sm:$0xff] %v5685_v44 }
 0xcb7   :  { %5714 = dma.vmem_to_hbm [thread:$0]  %s5707_s1, 2048, %s5709_s21, [#allocation5], %s8955_s22, %s8955_s22, %s8956_s3  }
 0xcb8   :  { %8937 = dma.done.wait [#allocation5], 2048  }
 0xcb9   :  { %8938 = vsyncadd [#allocation5], 4294965248 }
 0xcba   :  { %8939 = dma.done.wait [#allocation14], 256  }
 0xcbb   :  { %8940 = vsyncadd [#allocation14], 4294967040 }
 0xcbc   :  { %5749 = vsyncpa [#allocation4], 1 }
 0xcbd   :  { %5750 = vsyncpa [#allocation7], 1 }
 0xcbe   :  { %5751 = vsyncpa [#allocation10], 1 }
 0xcbf   :  { %5752 = vsyncpa [#allocation5], 1 }
 0xcc0   :  { %5753 = vsyncpa [#allocation14], 1 }

</bundles_post_ra>
